<compile_context>
chip_gen: v5e
topology: v5e:2x2
jax: 0.10.0
libtpu: 0.0.40
codegen_flags: <defaults>
</compile_context>

<pallas_src>
import functools

import jax
import jax.numpy as jnp
from jax import lax
from jax.experimental import pallas as pl
from jax.experimental.pallas import tpu as pltpu

NEG = -1e9          # finite "minus infinity" for padded CRF classes (avoids NaNs)


# ----------------------------------------------------------------------------------
# Fused kernel: BiLSTM (pack_padded semantics via mask) + FC head + CRF forward
# (gold score, log-partition, Viterbi max pass with backpointers).
# ----------------------------------------------------------------------------------
def nernet_crf_kernel(x_ref, m_ref, tags_ref,
                      wx_f_ref, wh_f_ref, b_f_ref,
                      wx_b_ref, wh_b_ref, b_b_ref,
                      wfc_ref, bfc_ref,
                      start_ref, end_ref, trans_ref, trans_t_ref,
                      llh_ref, vscore_ref, hist_ref,
                      xproj_f, xproj_b, hcat_scr, emis_scr, hist_scr,
                      hf_st, cf_st, hb_st, cb_st):
    T, Bt, E = x_ref.shape
    H, G = wh_f_ref.shape                      # G = 4*H, gate order [i|f|g|o]
    Cp = trans_ref.shape[0]
    mxu_dt = x_ref.dtype                       # bf16 or f32 MXU operands
    fc_dt = wfc_ref.dtype
    unroll_lstm = max(1, min(8, T))            # partial unroll (LLO visibility,
    unroll_crf = max(1, min(8, T - 1)) if T > 1 else 1   # no vreg/compile blowup)

    # ---- (1) hoisted input projections: one big MXU matmul per direction ---------
    x2 = x_ref[...].reshape(T * Bt, E)
    xproj_f[...] = (jnp.dot(x2, wx_f_ref[...], preferred_element_type=jnp.float32)
                    + b_f_ref[...]).reshape(T, Bt, G).astype(xproj_f.dtype)
    xproj_b[...] = (jnp.dot(x2, wx_b_ref[...], preferred_element_type=jnp.float32)
                    + b_b_ref[...]).reshape(T, Bt, G).astype(xproj_b.dtype)

    # ---- (2) interleaved fwd/bwd LSTM recurrence (serial critical path) -----------
    hf_st[...] = jnp.zeros((Bt, H), jnp.float32)
    cf_st[...] = jnp.zeros((Bt, H), jnp.float32)
    hb_st[...] = jnp.zeros((Bt, H), jnp.float32)
    cb_st[...] = jnp.zeros((Bt, H), jnp.float32)

    def lstm_step(s, carry):
        tf = s                       # forward direction processes t = s
        tb = T - 1 - s               # backward direction processes t = T-1-s
        mf = m_ref[tf]               # (Bt, 1)
        mb = m_ref[tb]

        # both recurrent matmuls issued back-to-back: MXU push/pop of one direction
        # overlaps the EUP sigmoid/tanh chain of the other.
        gf = xproj_f[tf].astype(jnp.float32) + jnp.dot(
            hf_st[...].astype(mxu_dt), wh_f_ref[...],
            preferred_element_type=jnp.float32)                        # (Bt, 4H)
        gb = xproj_b[tb].astype(jnp.float32) + jnp.dot(
            hb_st[...].astype(mxu_dt), wh_b_ref[...],
            preferred_element_type=jnp.float32)

        i_f = jax.nn.sigmoid(gf[:, 0 * H:1 * H])
        f_f = jax.nn.sigmoid(gf[:, 1 * H:2 * H])
        g_f = jnp.tanh(gf[:, 2 * H:3 * H])
        o_f = jax.nn.sigmoid(gf[:, 3 * H:4 * H])
        c_f = f_f * cf_st[...] + i_f * g_f
        h_f = o_f * jnp.tanh(c_f)

        i_b = jax.nn.sigmoid(gb[:, 0 * H:1 * H])
        f_b = jax.nn.sigmoid(gb[:, 1 * H:2 * H])
        g_b = jnp.tanh(gb[:, 2 * H:3 * H])
        o_b = jax.nn.sigmoid(gb[:, 3 * H:4 * H])
        c_b = f_b * cb_st[...] + i_b * g_b
        h_b = o_b * jnp.tanh(c_b)
        # packed semantics (reverse): zero state across pads so each sequence's
        # reverse pass starts fresh at its true last token; outputs 0 at pads.
        h_b = mb * h_b
        c_b = mb * c_b

        hcat_scr[tf, :, pl.ds(0, H)] = h_f * mf       # pad_packed pads outputs with 0
        hcat_scr[tb, :, pl.ds(H, H)] = h_b
        hf_st[...] = h_f
        cf_st[...] = c_f
        hb_st[...] = h_b
        cb_st[...] = c_b
        return carry

    lax.fori_loop(0, T, lstm_step, 0, unroll=unroll_lstm)

    # ---- (3) fused FC head: ONE (T*Bt,2H)@(2H,Cp) matmul --------------------------
    h2 = hcat_scr[...].reshape(T * Bt, 2 * H).astype(fc_dt)
    emis = (jnp.dot(h2, wfc_ref[...], preferred_element_type=jnp.float32)
            + bfc_ref[...]).reshape(T, Bt, Cp)
    emis_scr[...] = emis                               # emissions never hit HBM

    # ---- (4a) CRF gold-path score: fully hoisted out of the serial loop -----------
    start = start_ref[...]                             # (1, Cp)
    end = end_ref[...]                                 # (1, Cp)
    m_all = m_ref[...]                                 # (T, Bt, 1)
    cls3 = lax.broadcasted_iota(jnp.int32, (T, Bt, Cp), 2)
    oh_all = (tags_ref[...] == cls3).astype(jnp.float32)          # (T, Bt, Cp)

    emit_sc = jnp.sum(oh_all * emis, axis=2, keepdims=True)       # (T, Bt, 1)
    num = jnp.sum(oh_all[0] * start, axis=1, keepdims=True) + emit_sc[0]
    if T > 1:
        tr_rows = jnp.dot(oh_all[:-1].reshape((T - 1) * Bt, Cp), trans_ref[...],
                          preferred_element_type=jnp.float32).reshape(T - 1, Bt, Cp)
        trans_sc = jnp.sum(tr_rows * oh_all[1:], axis=2, keepdims=True)
        num = num + jnp.sum(m_all[1:] * (trans_sc + emit_sc[1:]), axis=0)
        # last valid position indicator: mask is monotone, so m[t] - m[t+1] == 1
        # exactly at t = len-1 (and m[T-1] itself if the sequence fills T).
        last_oh = (jnp.sum(oh_all[:-1] * (m_all[:-1] - m_all[1:]), axis=0)
                   + oh_all[-1] * m_all[-1])
    else:
        last_oh = oh_all[0] * m_all[0]
    num = num + jnp.sum(last_oh * end, axis=1, keepdims=True)     # (Bt, 1)

    # ---- (4b) CRF alpha / Viterbi recursion (only remaining serial part) ----------
    alpha0 = start + emis[0]                                      # (Bt, Cp)
    hist_scr[0] = jnp.zeros((Bt, Cp), jnp.int32)
    trans_b = trans_t_ref[...][None, :, :]      # hoisted: trans_t[j,k] broadcast
    idx3 = lax.broadcasted_iota(jnp.int32, (Bt, Cp, Cp), 2)       # hoisted iota

    def crf_step(t, carry):
        alpha, v = carry
        et = emis_scr[t]                                          # (Bt, Cp)
        mt = m_ref[t]                                             # (Bt, 1)

        # scores[b, j, k] = alpha[b, k] + trans[k, j]; reduce previous tag k on lanes.
        sc = alpha[:, None, :] + trans_b                          # (Bt, Cp, Cp)
        mmax = jnp.max(sc, axis=2, keepdims=True)
        alpha_new = (jnp.log(jnp.sum(jnp.exp(sc - mmax), axis=2))
                     + mmax[:, :, 0] + et)

        vs = v[:, None, :] + trans_b
        vmax = jnp.max(vs, axis=2, keepdims=True)
        varg = jnp.min(jnp.where(vs >= vmax, idx3, Cp), axis=2).astype(jnp.int32)
        v_new = vmax[:, :, 0] + et

        alpha = jnp.where(mt > 0, alpha_new, alpha)
        v = jnp.where(mt > 0, v_new, v)
        hist_scr[t] = varg
        return alpha, v

    alpha, v = lax.fori_loop(1, T, crf_step, (alpha0, alpha0), unroll=unroll_crf)

    alpha = alpha + end
    amax = jnp.max(alpha, axis=1, keepdims=True)
    den = jnp.log(jnp.sum(jnp.exp(alpha - amax), axis=1, keepdims=True)) + amax
    llh_ref[...] = num - den
    vscore_ref[...] = v + end
    # single bulk writeback of backpointers (int8 at production tiles, see wrapper)
    hist_ref[...] = hist_scr[...].astype(hist_ref.dtype)


# ----------------------------------------------------------------------------------
# pallas_call wrapper: batch-tiled grid, megacore-parallel over the batch axis.
# ----------------------------------------------------------------------------------
def _const_spec(shape, single_buffer):
    if single_buffer:
        # weights are revisited every grid step -> no pipelining benefit; single
        # buffer halves their VMEM footprint (matters against v7x's 64 MiB).
        return pl.BlockSpec(shape, lambda b: (0,) * len(shape),
                            pipeline_mode=pl.Buffered(1))
    return pl.BlockSpec(shape, lambda b: (0,) * len(shape))


def _batched_spec(shape):
    return pl.BlockSpec(shape, lambda b: (0, b, 0))


def _padded_bytes(shape, dtype):
    """Rough VMEM footprint of one buffer: minor dims padded to (8, 128)."""
    itemsize = jnp.dtype(dtype).itemsize
    if len(shape) >= 2:
        lead = 1
        for d in shape[:-2]:
            lead *= int(d)
        sub = -(-int(shape[-2]) // 8) * 8
        lane = -(-int(shape[-1]) // 128) * 128
        n = lead * sub * lane
    else:
        n = -(-int(shape[0]) // 128) * 128 if shape else 1
    return n * itemsize


def nernet_fused_pallas(x_tbe, m_tb1, tags_tb1, p, b_tile=None):
    T, B, E = x_tbe.shape
    H, G = p["wh_f"].shape
    Cp = p["crf_trans"].shape[0]
    assert Cp <= 127                         # backpointers fit int8
    x_dt = x_tbe.dtype

    if b_tile is None:
        # largest sublane-legal tile that still leaves >= 2 grid steps (v7x has two
        # TensorCores; the "parallel" batch axis then keeps both busy).  Big tiles
        # fill the MXU M dim of the recurrent matmul and amortize the ~0.35us
        # per-grid-step overhead on v5e/v6e.
        b_tile = B
        for cand in (512, 256, 128, 64, 32, 16, 8):
            if B % cand == 0 and B // cand >= 2:
                b_tile = cand
                break
    assert B % b_tile == 0
    Bt, nb = b_tile, B // b_tile

    wfc = jnp.concatenate([p["wfc_f"], p["wfc_b"]], axis=0)       # fused FC (2H, Cp)
    trans_t = jnp.transpose(p["crf_trans"])

    # int8 backpointers (4x less HBM writeback + output-pipeline VMEM) when the tile
    # is int8-sublane friendly; int32 at tiny/toy tiles.
    hist_dt = jnp.int8 if Bt % 32 == 0 else jnp.int32
    single_buffer_weights = nb > 1

    scratch_sds = [
        ((T, Bt, G), x_dt),            # hoisted x-projection fwd (bf16 when use_bf16)
        ((T, Bt, G), x_dt),            # hoisted x-projection bwd
        ((T, Bt, 2 * H), jnp.float32),  # [hf | hb] hidden states
        ((T, Bt, Cp), jnp.float32),    # emissions (VMEM-resident, never hit HBM)
        ((T, Bt, Cp), jnp.int32),      # backpointer staging
        ((Bt, H), jnp.float32), ((Bt, H), jnp.float32),
        ((Bt, H), jnp.float32), ((Bt, H), jnp.float32),
    ]
    batched_in_sds = [((T, Bt, E), x_dt), ((T, Bt, 1), jnp.float32),
                      ((T, Bt, 1), jnp.int32)]
    weight_sds = [((E, G), x_dt), ((H, G), x_dt), ((1, G), jnp.float32),
                  ((E, G), x_dt), ((H, G), x_dt), ((1, G), jnp.float32),
                  ((2 * H, Cp), x_dt), ((1, Cp), jnp.float32),
                  ((1, Cp), jnp.float32), ((1, Cp), jnp.float32),
                  ((Cp, Cp), jnp.float32), ((Cp, Cp), jnp.float32)]
    out_sds = [((Bt, 1), jnp.float32), ((Bt, Cp), jnp.float32), ((T, Bt, Cp), hist_dt)]

    wbuf = 1 if single_buffer_weights else 2
    vmem_need = (sum(_padded_bytes(s, d) for s, d in scratch_sds)
                 + 2 * sum(_padded_bytes(s, d) for s, d in batched_in_sds)
                 + wbuf * sum(_padded_bytes(s, d) for s, d in weight_sds)
                 + 2 * sum(_padded_bytes(s, d) for s, d in out_sds))
    vmem_limit = int(min(100 * 1024 * 1024,
                         max(32 * 1024 * 1024, int(vmem_need * 1.25))))

    grid_spec = pltpu.PrefetchScalarGridSpec(
        num_scalar_prefetch=0,
        grid=(nb,),
        in_specs=[
            _batched_spec((T, Bt, E)),          # x
            _batched_spec((T, Bt, 1)),          # mask
            _batched_spec((T, Bt, 1)),          # tags
            _const_spec((E, G), single_buffer_weights),     # fwd LSTM
            _const_spec((H, G), single_buffer_weights),
            _const_spec((1, G), single_buffer_weights),
            _const_spec((E, G), single_buffer_weights),     # bwd LSTM
            _const_spec((H, G), single_buffer_weights),
            _const_spec((1, G), single_buffer_weights),
            _const_spec((2 * H, Cp), single_buffer_weights),  # fused FC
            _const_spec((1, Cp), single_buffer_weights),
            _const_spec((1, Cp), single_buffer_weights),      # CRF start
            _const_spec((1, Cp), single_buffer_weights),      # CRF end
            _const_spec((Cp, Cp), single_buffer_weights),     # trans
            _const_spec((Cp, Cp), single_buffer_weights),     # trans^T
        ],
        out_specs=(
            pl.BlockSpec((Bt, 1), lambda b: (b, 0)),
            pl.BlockSpec((Bt, Cp), lambda b: (b, 0)),
            pl.BlockSpec((T, Bt, Cp), lambda b: (0, b, 0)),
        ),
        scratch_shapes=[pltpu.VMEM(s, d) for s, d in scratch_sds],
    )
    return pl.pallas_call(
        nernet_crf_kernel,
        out_shape=(jax.ShapeDtypeStruct((B, 1), jnp.float32),
                   jax.ShapeDtypeStruct((B, Cp), jnp.float32),
                   jax.ShapeDtypeStruct((T, B, Cp), hist_dt)),
        grid_spec=grid_spec,
        compiler_params=pltpu.CompilerParams(
            dimension_semantics=("parallel",),       # megacore batch split on v7x
            vmem_limit_bytes=vmem_limit),
    )(x_tbe, m_tb1, tags_tb1,
      p["wx_f"], p["wh_f"], p["b_f"],
      p["wx_b"], p["wh_b"], p["b_b"],
      wfc, p["bfc"],
      p["crf_start"], p["crf_end"], p["crf_trans"], trans_t)


# ----------------------------------------------------------------------------------
# Plain-JAX glue: Viterbi backtrace over kernel-produced backpointers.
# ----------------------------------------------------------------------------------
def viterbi_backtrace(vscore, hist, lens, mask_bt):
    T = hist.shape[0]
    last_tag = jnp.argmax(vscore, axis=1).astype(jnp.int32)   # tag at position len-1

    def step(cur, t):
        h_t = hist[jnp.minimum(t + 1, T - 1)].astype(jnp.int32)    # (B, Cp)
        nxt = jnp.take_along_axis(h_t, cur[:, None], axis=1)[:, 0]
        new_cur = jnp.where(t < lens - 1, nxt, cur)
        return new_cur, new_cur

    ts = jnp.arange(T - 1, -1, -1)
    _, outs = lax.scan(step, last_tag, ts)
    dec = outs[::-1].T                                        # (B, T)
    return jnp.where(mask_bt, dec, 0)


# ----------------------------------------------------------------------------------
# Full forward = NERNetCRF.forward : returns (decode, loss)
# ----------------------------------------------------------------------------------
def nernet_crf_forward(p, tok, lens, tags, *, use_bf16=True, b_tile=None):
    B, T = tok.shape
    emb = p["embedding"][tok]                                 # (B,T,E) gather glue
    x_tbe = jnp.transpose(emb, (1, 0, 2))                     # time-major
    mask_bt = jnp.arange(T)[None, :] < lens[:, None]
    m_tb1 = mask_bt.T.astype(jnp.float32)[:, :, None]
    tags_tb1 = tags.T[:, :, None].astype(jnp.int32)

    if use_bf16:                                              # bf16 MXU operands only
        mm = {k: p[k].astype(jnp.bfloat16)
              for k in ("wx_f", "wh_f", "wx_b", "wh_b", "wfc_f", "wfc_b")}
        p = {**p, **mm}
        x_tbe = x_tbe.astype(jnp.bfloat16)

    llh, vscore, hist = nernet_fused_pallas(x_tbe, m_tb1, tags_tb1, p, b_tile=b_tile)
    loss = -jnp.sum(llh)                                      # crf reduction='sum'
    decoded = viterbi_backtrace(vscore, hist, lens, mask_bt)
    return decoded, loss


# ----------------------------------------------------------------------------------
# Deterministic parameter init (matches module shapes; forget-gate biases set to 1).
# Gates packed [i|f|g|o]; CRF/FC class axis padded to Cp (multiple of 8).
# ----------------------------------------------------------------------------------
def init_params(key, V, E, H, C):
    Cp = max(8, -(-C // 8) * 8)
    ks = jax.random.split(key, 8)
    emb = jax.random.normal(ks[0], (V, E), jnp.float32)
    emb = emb.at[0].set(0.0)                                  # padding_idx=0

    def lstm_dir(k):
        bound = 1.0 / (H ** 0.5)
        k1, k2, k3, k4 = jax.random.split(k, 4)
        w_ih = jax.random.uniform(k1, (4 * H, E), jnp.float32, -bound, bound)
        w_hh = jax.random.uniform(k2, (4 * H, H), jnp.float32, -bound, bound)
        b_ih = jax.random.uniform(k3, (4 * H,), jnp.float32, -bound, bound)
        b_hh = jax.random.uniform(k4, (4 * H,), jnp.float32, -bound, bound)
        b_ih = b_ih.at[H:2 * H].set(1.0)                      # forget-gate bias
        b_hh = b_hh.at[H:2 * H].set(1.0)
        return w_ih.T, w_hh.T, (b_ih + b_hh)[None, :]         # (E,4H), (H,4H), (1,4H)

    wx_f, wh_f, b_f = lstm_dir(ks[1])
    wx_b, wh_b, b_b = lstm_dir(ks[2])

    fc_bound = 1.0 / ((2 * H) ** 0.5)
    w_fc = jax.random.uniform(ks[3], (C, 2 * H), jnp.float32, -fc_bound, fc_bound)
    b_fc = jax.random.uniform(ks[4], (C,), jnp.float32, -fc_bound, fc_bound)
    wfc_f = jnp.zeros((H, Cp), jnp.float32).at[:, :C].set(w_fc[:, :H].T)
    wfc_b = jnp.zeros((H, Cp), jnp.float32).at[:, :C].set(w_fc[:, H:].T)
    bfc = jnp.full((1, Cp), NEG, jnp.float32).at[:, :C].set(b_fc)

    crf_start = jnp.zeros((1, Cp), jnp.float32).at[:, :C].set(
        jax.random.uniform(ks[5], (C,), jnp.float32, -0.1, 0.1))
    crf_end = jnp.zeros((1, Cp), jnp.float32).at[:, :C].set(
        jax.random.uniform(ks[6], (C,), jnp.float32, -0.1, 0.1))
    crf_trans = jnp.zeros((Cp, Cp), jnp.float32).at[:C, :C].set(
        jax.random.uniform(ks[7], (C, C), jnp.float32, -0.1, 0.1))

    return dict(embedding=emb,
                wx_f=wx_f, wh_f=wh_f, b_f=b_f,
                wx_b=wx_b, wh_b=wh_b, b_b=b_b,
                wfc_f=wfc_f, wfc_b=wfc_b, bfc=bfc,
                crf_start=crf_start, crf_end=crf_end, crf_trans=crf_trans)


# ----------------------------------------------------------------------------------
# Pure-JAX reference (same semantics, unpadded class axis) for consistency checks.
# ----------------------------------------------------------------------------------
def ref_forward(p, tok, lens, tags, C):
    B, T = tok.shape
    emb = p["embedding"][tok]
    x = jnp.transpose(emb, (1, 0, 2))
    mask_bt = jnp.arange(T)[None, :] < lens[:, None]
    m = mask_bt.T.astype(jnp.float32)                         # (T,B)
    H = p["wh_f"].shape[0]

    def run_dir(wx, wh, b, reverse):
        h = jnp.zeros((B, H)); c = jnp.zeros((B, H)); outs = [None] * T
        order = range(T - 1, -1, -1) if reverse else range(T)
        for t in order:
            mt = m[t][:, None]
            g = x[t] @ wx + h @ wh + b
            i = jax.nn.sigmoid(g[:, :H]); f = jax.nn.sigmoid(g[:, H:2 * H])
            gg = jnp.tanh(g[:, 2 * H:3 * H]); o = jax.nn.sigmoid(g[:, 3 * H:])
            cn = f * c + i * gg; hn = o * jnp.tanh(cn)
            if reverse:
                c = mt * cn; h = mt * hn; outs[t] = h
            else:
                c = cn; h = hn; outs[t] = hn * mt
        return jnp.stack(outs)

    hf = run_dir(p["wx_f"], p["wh_f"], p["b_f"], False)
    hb = run_dir(p["wx_b"], p["wh_b"], p["b_b"], True)
    emis = (jnp.einsum("tbh,hc->tbc", hf, p["wfc_f"][:, :C])
            + jnp.einsum("tbh,hc->tbc", hb, p["wfc_b"][:, :C])
            + p["bfc"][:, :C])

    start = p["crf_start"][0, :C]; end = p["crf_end"][0, :C]
    trans = p["crf_trans"][:C, :C]
    tags_tb = tags.T
    ar = jnp.arange(B)
    num = start[tags_tb[0]] + emis[0, ar, tags_tb[0]]
    for t in range(1, T):
        num = num + m[t] * (trans[tags_tb[t - 1], tags_tb[t]] + emis[t, ar, tags_tb[t]])
    seq_ends = m.sum(0).astype(jnp.int32) - 1
    num = num + end[tags_tb[seq_ends, ar]]

    alpha = start[None] + emis[0]
    v = start[None] + emis[0]
    hist = [jnp.zeros((B, C), jnp.int32)]
    for t in range(1, T):
        sc = alpha[:, :, None] + trans[None] + emis[t][:, None, :]
        alpha = jnp.where(m[t][:, None] > 0,
                          jax.scipy.special.logsumexp(sc, axis=1), alpha)
        vs = v[:, :, None] + trans[None] + emis[t][:, None, :]
        hist.append(jnp.argmax(vs, axis=1).astype(jnp.int32))
        v = jnp.where(m[t][:, None] > 0, vs.max(axis=1), v)
    den = jax.scipy.special.logsumexp(alpha + end[None], axis=1)
    loss = -jnp.sum(num - den)
    decoded = viterbi_backtrace(v + end[None], jnp.stack(hist), lens, mask_bt)
    return decoded, loss


if __name__ == "__main__":
    V, E, H, C = 50, 32, 32, 5
    B, T = 2, 8

    root = jax.random.PRNGKey(0)
    k_par, k_tok, k_tag = jax.random.split(root, 3)
    params = init_params(k_par, V, E, H, C)

    lens = jnp.array([T, 5], dtype=jnp.int32)
    mask_bt = jnp.arange(T)[None, :] < lens[:, None]
    tok = jax.random.randint(k_tok, (B, T), 1, V, dtype=jnp.int32)
    tok = jnp.where(mask_bt, tok, 0)                          # pad id = 0
    tags = jax.random.randint(k_tag, (B, T), 0, C, dtype=jnp.int32)
    tags = jnp.where(mask_bt, tags, 0)

    # f32 path: strict check against the pure-JAX reference
    fwd_f32 = jax.jit(functools.partial(nernet_crf_forward, use_bf16=False))
    decoded, loss = fwd_f32(params, tok, lens, tags)
    jax.block_until_ready((decoded, loss))

    ref_fn = jax.jit(functools.partial(ref_forward, C=C))
    dec_ref, loss_ref = ref_fn(params, tok, lens, tags)
    jax.block_until_ready((dec_ref, loss_ref))

    assert bool(jnp.isfinite(loss)), "loss not finite"
    assert abs(float(loss) - float(loss_ref)) < 5e-3 * max(1.0, abs(float(loss_ref))), \
        (float(loss), float(loss_ref))
    assert bool(jnp.all(decoded == dec_ref)), (decoded, dec_ref)

    # default path: bf16 MXU operands (v5e/v6e/v7x recommendation); looser check
    fwd_def = jax.jit(nernet_crf_forward)
    dec16, loss16 = fwd_def(params, tok, lens, tags)
    jax.block_until_ready((dec16, loss16))
    assert bool(jnp.isfinite(loss16)), "bf16 loss not finite"
    assert abs(float(loss16) - float(loss_ref)) < 5e-2 * max(1.0, abs(float(loss_ref))), \
        (float(loss16), float(loss_ref))

    print("KERNEL_OK")
</pallas_src>

<mosaic_0001>
module attributes {stable_mosaic.version = 11 : i64} {
  func.func @nernet_crf_kernel(%arg0: i32, %arg1: memref<8x2x32xf32, #tpu.memory_space<vmem>>, %arg2: memref<8x2x1xf32, #tpu.memory_space<vmem>>, %arg3: memref<8x2x1xi32, #tpu.memory_space<vmem>>, %arg4: memref<32x128xf32, #tpu.memory_space<vmem>>, %arg5: memref<32x128xf32, #tpu.memory_space<vmem>>, %arg6: memref<1x128xf32, #tpu.memory_space<vmem>>, %arg7: memref<32x128xf32, #tpu.memory_space<vmem>>, %arg8: memref<32x128xf32, #tpu.memory_space<vmem>>, %arg9: memref<1x128xf32, #tpu.memory_space<vmem>>, %arg10: memref<64x8xf32, #tpu.memory_space<vmem>>, %arg11: memref<1x8xf32, #tpu.memory_space<vmem>>, %arg12: memref<1x8xf32, #tpu.memory_space<vmem>>, %arg13: memref<1x8xf32, #tpu.memory_space<vmem>>, %arg14: memref<8x8xf32, #tpu.memory_space<vmem>>, %arg15: memref<8x8xf32, #tpu.memory_space<vmem>>, %arg16: memref<2x1xf32, #tpu.memory_space<vmem>>, %arg17: memref<2x8xf32, #tpu.memory_space<vmem>>, %arg18: memref<8x2x8xi32, #tpu.memory_space<vmem>>, %arg19: memref<8x2x128xf32, #tpu.memory_space<vmem>>, %arg20: memref<8x2x128xf32, #tpu.memory_space<vmem>>, %arg21: memref<8x2x64xf32, #tpu.memory_space<vmem>>, %arg22: memref<8x2x8xf32, #tpu.memory_space<vmem>>, %arg23: memref<8x2x8xi32, #tpu.memory_space<vmem>>, %arg24: memref<2x32xf32, #tpu.memory_space<vmem>>, %arg25: memref<2x32xf32, #tpu.memory_space<vmem>>, %arg26: memref<2x32xf32, #tpu.memory_space<vmem>>, %arg27: memref<2x32xf32, #tpu.memory_space<vmem>>) attributes {dimension_semantics = [#tpu.dimension_semantics<parallel>], iteration_bounds = array<i64: 1>, scalar_prefetch = 0 : i64, scratch_operands = 9 : i64, tpu.core_type = #tpu.core_type<tc>, window_params = [{transform_indices = @transform_0, window_bounds = array<i64: 8, 2, 32>}, {transform_indices = @transform_1, window_bounds = array<i64: 8, 2, 1>}, {transform_indices = @transform_2, window_bounds = array<i64: 8, 2, 1>}, {pipeline_mode = #tpu.pipeline_mode<synchronous>, transform_indices = @transform_3, window_bounds = array<i64: 32, 128>}, {pipeline_mode = #tpu.pipeline_mode<synchronous>, transform_indices = @transform_4, window_bounds = array<i64: 32, 128>}, {pipeline_mode = #tpu.pipeline_mode<synchronous>, transform_indices = @transform_5, window_bounds = array<i64: 1, 128>}, {pipeline_mode = #tpu.pipeline_mode<synchronous>, transform_indices = @transform_6, window_bounds = array<i64: 32, 128>}, {pipeline_mode = #tpu.pipeline_mode<synchronous>, transform_indices = @transform_7, window_bounds = array<i64: 32, 128>}, {pipeline_mode = #tpu.pipeline_mode<synchronous>, transform_indices = @transform_8, window_bounds = array<i64: 1, 128>}, {pipeline_mode = #tpu.pipeline_mode<synchronous>, transform_indices = @transform_9, window_bounds = array<i64: 64, 8>}, {pipeline_mode = #tpu.pipeline_mode<synchronous>, transform_indices = @transform_10, window_bounds = array<i64: 1, 8>}, {pipeline_mode = #tpu.pipeline_mode<synchronous>, transform_indices = @transform_11, window_bounds = array<i64: 1, 8>}, {pipeline_mode = #tpu.pipeline_mode<synchronous>, transform_indices = @transform_12, window_bounds = array<i64: 1, 8>}, {pipeline_mode = #tpu.pipeline_mode<synchronous>, transform_indices = @transform_13, window_bounds = array<i64: 8, 8>}, {pipeline_mode = #tpu.pipeline_mode<synchronous>, transform_indices = @transform_14, window_bounds = array<i64: 8, 8>}, {transform_indices = @transform_15, window_bounds = array<i64: 2, 1>}, {transform_indices = @transform_16, window_bounds = array<i64: 2, 8>}, {transform_indices = @transform_17, window_bounds = array<i64: 8, 2, 8>}]} {
    %c0 = arith.constant 0 : index
    %c0_0 = arith.constant 0 : index
    %c0_1 = arith.constant 0 : index
    %0 = vector.load %arg1[%c0, %c0_0, %c0_1] : memref<8x2x32xf32, #tpu.memory_space<vmem>>, vector<8x2x32xf32>
    %1 = vector.shape_cast %0 : vector<8x2x32xf32> to vector<16x32xf32>
    %c0_2 = arith.constant 0 : index
    %c0_3 = arith.constant 0 : index
    %2 = vector.load %arg4[%c0_2, %c0_3] : memref<32x128xf32, #tpu.memory_space<vmem>>, vector<32x128xf32>
    %cst = arith.constant dense<0.000000e+00> : vector<16x128xf32>
    %3 = tpu.matmul %1, %2, %cst {dimension_numbers = #tpu.dot_dimension_numbers<[1], [0], [0], [1], [0, 0, 1, 1], [], []>} : vector<16x32xf32>, vector<32x128xf32>, vector<16x128xf32> -> vector<16x128xf32>
    %c0_4 = arith.constant 0 : index
    %c0_5 = arith.constant 0 : index
    %4 = vector.load %arg6[%c0_4, %c0_5] : memref<1x128xf32, #tpu.memory_space<vmem>>, vector<1x128xf32>
    %5 = vector.broadcast %4 : vector<1x128xf32> to vector<16x128xf32>
    %6 = arith.addf %3, %5 : vector<16x128xf32>
    %7 = vector.shape_cast %6 : vector<16x128xf32> to vector<8x2x128xf32>
    %c0_6 = arith.constant 0 : index
    %c0_7 = arith.constant 0 : index
    %c0_8 = arith.constant 0 : index
    %8 = vector.load %arg19[%c0_6, %c0_7, %c0_8] : memref<8x2x128xf32, #tpu.memory_space<vmem>>, vector<8x2x128xf32>
    tpu.vector_store %arg19[%c0_6, %c0_7, %c0_8], %7 {strides = array<i32>} : memref<8x2x128xf32, #tpu.memory_space<vmem>>, vector<8x2x128xf32>,
    %c0_9 = arith.constant 0 : index
    %c0_10 = arith.constant 0 : index
    %9 = vector.load %arg7[%c0_9, %c0_10] : memref<32x128xf32, #tpu.memory_space<vmem>>, vector<32x128xf32>
    %cst_11 = arith.constant dense<0.000000e+00> : vector<16x128xf32>
    %10 = tpu.matmul %1, %9, %cst_11 {dimension_numbers = #tpu.dot_dimension_numbers<[1], [0], [0], [1], [0, 0, 1, 1], [], []>} : vector<16x32xf32>, vector<32x128xf32>, vector<16x128xf32> -> vector<16x128xf32>
    %c0_12 = arith.constant 0 : index
    %c0_13 = arith.constant 0 : index
    %11 = vector.load %arg9[%c0_12, %c0_13] : memref<1x128xf32, #tpu.memory_space<vmem>>, vector<1x128xf32>
    %12 = vector.broadcast %11 : vector<1x128xf32> to vector<16x128xf32>
    %13 = arith.addf %10, %12 : vector<16x128xf32>
    %14 = vector.shape_cast %13 : vector<16x128xf32> to vector<8x2x128xf32>
    %c0_14 = arith.constant 0 : index
    %c0_15 = arith.constant 0 : index
    %c0_16 = arith.constant 0 : index
    %15 = vector.load %arg20[%c0_14, %c0_15, %c0_16] : memref<8x2x128xf32, #tpu.memory_space<vmem>>, vector<8x2x128xf32>
    tpu.vector_store %arg20[%c0_14, %c0_15, %c0_16], %14 {strides = array<i32>} : memref<8x2x128xf32, #tpu.memory_space<vmem>>, vector<8x2x128xf32>,
    %cst_17 = arith.constant 0.000000e+00 : f32
    %16 = vector.broadcast %cst_17 : f32 to vector<2x32xf32>
    %c0_18 = arith.constant 0 : index
    %c0_19 = arith.constant 0 : index
    %17 = vector.load %arg24[%c0_18, %c0_19] : memref<2x32xf32, #tpu.memory_space<vmem>>, vector<2x32xf32>
    tpu.vector_store %arg24[%c0_18, %c0_19], %16 {strides = array<i32>} : memref<2x32xf32, #tpu.memory_space<vmem>>, vector<2x32xf32>,
    %cst_20 = arith.constant 0.000000e+00 : f32
    %18 = vector.broadcast %cst_20 : f32 to vector<2x32xf32>
    %c0_21 = arith.constant 0 : index
    %c0_22 = arith.constant 0 : index
    %19 = vector.load %arg25[%c0_21, %c0_22] : memref<2x32xf32, #tpu.memory_space<vmem>>, vector<2x32xf32>
    tpu.vector_store %arg25[%c0_21, %c0_22], %18 {strides = array<i32>} : memref<2x32xf32, #tpu.memory_space<vmem>>, vector<2x32xf32>,
    %cst_23 = arith.constant 0.000000e+00 : f32
    %20 = vector.broadcast %cst_23 : f32 to vector<2x32xf32>
    %c0_24 = arith.constant 0 : index
    %c0_25 = arith.constant 0 : index
    %21 = vector.load %arg26[%c0_24, %c0_25] : memref<2x32xf32, #tpu.memory_space<vmem>>, vector<2x32xf32>
    tpu.vector_store %arg26[%c0_24, %c0_25], %20 {strides = array<i32>} : memref<2x32xf32, #tpu.memory_space<vmem>>, vector<2x32xf32>,
    %cst_26 = arith.constant 0.000000e+00 : f32
    %22 = vector.broadcast %cst_26 : f32 to vector<2x32xf32>
    %c0_27 = arith.constant 0 : index
    %c0_28 = arith.constant 0 : index
    %23 = vector.load %arg27[%c0_27, %c0_28] : memref<2x32xf32, #tpu.memory_space<vmem>>, vector<2x32xf32>
    tpu.vector_store %arg27[%c0_27, %c0_28], %22 {strides = array<i32>} : memref<2x32xf32, #tpu.memory_space<vmem>>, vector<2x32xf32>,
    %c0_i32 = arith.constant 0 : i32
    %c7_i32 = arith.constant 7 : i32
    %24 = arith.subi %c7_i32, %c0_i32 : i32
    %25 = arith.index_cast %c0_i32 : i32 to index
    %c0_29 = arith.constant 0 : index
    %c0_30 = arith.constant 0 : index
    %26 = vector.load %arg2[%25, %c0_29, %c0_30] : memref<8x2x1xf32, #tpu.memory_space<vmem>>, vector<1x2x1xf32>
    %27 = vector.shape_cast %26 : vector<1x2x1xf32> to vector<2x1xf32>
    %28 = arith.index_cast %24 : i32 to index
    %c0_31 = arith.constant 0 : index
    %c0_32 = arith.constant 0 : index
    %29 = vector.load %arg2[%28, %c0_31, %c0_32] : memref<8x2x1xf32, #tpu.memory_space<vmem>>, vector<1x2x1xf32>
    %30 = vector.shape_cast %29 : vector<1x2x1xf32> to vector<2x1xf32>
    %31 = arith.index_cast %c0_i32 : i32 to index
    %c0_33 = arith.constant 0 : index
    %c0_34 = arith.constant 0 : index
    %32 = vector.load %arg19[%31, %c0_33, %c0_34] : memref<8x2x128xf32, #tpu.memory_space<vmem>>, vector<1x2x128xf32>
    %33 = vector.shape_cast %32 : vector<1x2x128xf32> to vector<2x128xf32>
    %c0_35 = arith.constant 0 : index
    %c0_36 = arith.constant 0 : index
    %34 = vector.load %arg24[%c0_35, %c0_36] : memref<2x32xf32, #tpu.memory_space<vmem>>, vector<2x32xf32>
    %c0_37 = arith.constant 0 : index
    %c0_38 = arith.constant 0 : index
    %35 = vector.load %arg5[%c0_37, %c0_38] : memref<32x128xf32, #tpu.memory_space<vmem>>, vector<32x128xf32>
    %cst_39 = arith.constant dense<0.000000e+00> : vector<2x128xf32>
    %36 = tpu.matmul %34, %35, %cst_39 {dimension_numbers = #tpu.dot_dimension_numbers<[1], [0], [0], [1], [0, 0, 1, 1], [], []>} : vector<2x32xf32>, vector<32x128xf32>, vector<2x128xf32> -> vector<2x128xf32>
    %37 = arith.addf %33, %36 : vector<2x128xf32>
    %38 = arith.index_cast %24 : i32 to index
    %c0_40 = arith.constant 0 : index
    %c0_41 = arith.constant 0 : index
    %39 = vector.load %arg20[%38, %c0_40, %c0_41] : memref<8x2x128xf32, #tpu.memory_space<vmem>>, vector<1x2x128xf32>
    %40 = vector.shape_cast %39 : vector<1x2x128xf32> to vector<2x128xf32>
    %c0_42 = arith.constant 0 : index
    %c0_43 = arith.constant 0 : index
    %41 = vector.load %arg26[%c0_42, %c0_43] : memref<2x32xf32, #tpu.memory_space<vmem>>, vector<2x32xf32>
    %c0_44 = arith.constant 0 : index
    %c0_45 = arith.constant 0 : index
    %42 = vector.load %arg8[%c0_44, %c0_45] : memref<32x128xf32, #tpu.memory_space<vmem>>, vector<32x128xf32>
    %cst_46 = arith.constant dense<0.000000e+00> : vector<2x128xf32>
    %43 = tpu.matmul %41, %42, %cst_46 {dimension_numbers = #tpu.dot_dimension_numbers<[1], [0], [0], [1], [0, 0, 1, 1], [], []>} : vector<2x32xf32>, vector<32x128xf32>, vector<2x128xf32> -> vector<2x128xf32>
    %44 = arith.addf %40, %43 : vector<2x128xf32>
    %45 = vector.extract_strided_slice %37 {offsets = [0, 0], sizes = [2, 32], strides = [1, 1]} : vector<2x128xf32> to vector<2x32xf32>
    %46 = arith.negf %45 : vector<2x32xf32>
    %47 = math.exp %46 : vector<2x32xf32>
    %cst_47 = arith.constant 1.000000e+00 : f32
    %48 = vector.broadcast %cst_47 : f32 to vector<2x32xf32>
    %49 = arith.addf %48, %47 : vector<2x32xf32>
    %50 = arith.divf %48, %49 : vector<2x32xf32>
    %51 = vector.extract_strided_slice %37 {offsets = [0, 32], sizes = [2, 32], strides = [1, 1]} : vector<2x128xf32> to vector<2x32xf32>
    %52 = arith.negf %51 : vector<2x32xf32>
    %53 = math.exp %52 : vector<2x32xf32>
    %cst_48 = arith.constant 1.000000e+00 : f32
    %54 = vector.broadcast %cst_48 : f32 to vector<2x32xf32>
    %55 = arith.addf %54, %53 : vector<2x32xf32>
    %56 = arith.divf %54, %55 : vector<2x32xf32>
    %57 = vector.extract_strided_slice %37 {offsets = [0, 64], sizes = [2, 32], strides = [1, 1]} : vector<2x128xf32> to vector<2x32xf32>
    %58 = math.tanh %57 : vector<2x32xf32>
    %59 = vector.extract_strided_slice %37 {offsets = [0, 96], sizes = [2, 32], strides = [1, 1]} : vector<2x128xf32> to vector<2x32xf32>
    %60 = arith.negf %59 : vector<2x32xf32>
    %61 = math.exp %60 : vector<2x32xf32>
    %cst_49 = arith.constant 1.000000e+00 : f32
    %62 = vector.broadcast %cst_49 : f32 to vector<2x32xf32>
    %63 = arith.addf %62, %61 : vector<2x32xf32>
    %64 = arith.divf %62, %63 : vector<2x32xf32>
    %c0_50 = arith.constant 0 : index
    %c0_51 = arith.constant 0 : index
    %65 = vector.load %arg25[%c0_50, %c0_51] : memref<2x32xf32, #tpu.memory_space<vmem>>, vector<2x32xf32>
    %66 = arith.mulf %56, %65 : vector<2x32xf32>
    %67 = arith.mulf %50, %58 : vector<2x32xf32>
    %68 = arith.addf %66, %67 : vector<2x32xf32>
    %69 = math.tanh %68 : vector<2x32xf32>
    %70 = arith.mulf %64, %69 : vector<2x32xf32>
    %71 = vector.extract_strided_slice %44 {offsets = [0, 0], sizes = [2, 32], strides = [1, 1]} : vector<2x128xf32> to vector<2x32xf32>
    %72 = arith.negf %71 : vector<2x32xf32>
    %73 = math.exp %72 : vector<2x32xf32>
    %cst_52 = arith.constant 1.000000e+00 : f32
    %74 = vector.broadcast %cst_52 : f32 to vector<2x32xf32>
    %75 = arith.addf %74, %73 : vector<2x32xf32>
    %76 = arith.divf %74, %75 : vector<2x32xf32>
    %77 = vector.extract_strided_slice %44 {offsets = [0, 32], sizes = [2, 32], strides = [1, 1]} : vector<2x128xf32> to vector<2x32xf32>
    %78 = arith.negf %77 : vector<2x32xf32>
    %79 = math.exp %78 : vector<2x32xf32>
    %cst_53 = arith.constant 1.000000e+00 : f32
    %80 = vector.broadcast %cst_53 : f32 to vector<2x32xf32>
    %81 = arith.addf %80, %79 : vector<2x32xf32>
    %82 = arith.divf %80, %81 : vector<2x32xf32>
    %83 = vector.extract_strided_slice %44 {offsets = [0, 64], sizes = [2, 32], strides = [1, 1]} : vector<2x128xf32> to vector<2x32xf32>
    %84 = math.tanh %83 : vector<2x32xf32>
    %85 = vector.extract_strided_slice %44 {offsets = [0, 96], sizes = [2, 32], strides = [1, 1]} : vector<2x128xf32> to vector<2x32xf32>
    %86 = arith.negf %85 : vector<2x32xf32>
    %87 = math.exp %86 : vector<2x32xf32>
    %cst_54 = arith.constant 1.000000e+00 : f32
    %88 = vector.broadcast %cst_54 : f32 to vector<2x32xf32>
    %89 = arith.addf %88, %87 : vector<2x32xf32>
    %90 = arith.divf %88, %89 : vector<2x32xf32>
    %c0_55 = arith.constant 0 : index
    %c0_56 = arith.constant 0 : index
    %91 = vector.load %arg27[%c0_55, %c0_56] : memref<2x32xf32, #tpu.memory_space<vmem>>, vector<2x32xf32>
    %92 = arith.mulf %82, %91 : vector<2x32xf32>
    %93 = arith.mulf %76, %84 : vector<2x32xf32>
    %94 = arith.addf %92, %93 : vector<2x32xf32>
    %95 = math.tanh %94 : vector<2x32xf32>
    %96 = arith.mulf %90, %95 : vector<2x32xf32>
    %97 = vector.broadcast %30 : vector<2x1xf32> to vector<2x32xf32>
    %98 = arith.mulf %97, %96 : vector<2x32xf32>
    %99 = vector.broadcast %30 : vector<2x1xf32> to vector<2x32xf32>
    %100 = arith.mulf %99, %94 : vector<2x32xf32>
    %101 = vector.broadcast %27 : vector<2x1xf32> to vector<2x32xf32>
    %102 = arith.mulf %70, %101 : vector<2x32xf32>
    %103 = arith.index_cast %c0_i32 : i32 to index
    %c0_57 = arith.constant 0 : index
    %c0_58 = arith.constant 0 : index
    %104 = vector.load %arg21[%103, %c0_57, %c0_58] : memref<8x2x64xf32, #tpu.memory_space<vmem>>, vector<1x2x32xf32>
    %105 = vector.shape_cast %104 : vector<1x2x32xf32> to vector<2x32xf32>
    %106 = vector.shape_cast %102 : vector<2x32xf32> to vector<1x2x32xf32>
    tpu.vector_store %arg21[%103, %c0_57, %c0_58], %106 {strides = array<i32>} : memref<8x2x64xf32, #tpu.memory_space<vmem>>, vector<1x2x32xf32>,
    %107 = arith.index_cast %24 : i32 to index
    %c0_59 = arith.constant 0 : index
    %c32 = arith.constant 32 : index
    %108 = vector.load %arg21[%107, %c0_59, %c32] : memref<8x2x64xf32, #tpu.memory_space<vmem>>, vector<1x2x32xf32>
    %109 = vector.shape_cast %108 : vector<1x2x32xf32> to vector<2x32xf32>
    %110 = vector.shape_cast %98 : vector<2x32xf32> to vector<1x2x32xf32>
    tpu.vector_store %arg21[%107, %c0_59, %c32], %110 {strides = array<i32>} : memref<8x2x64xf32, #tpu.memory_space<vmem>>, vector<1x2x32xf32>,
    %c0_60 = arith.constant 0 : index
    %c0_61 = arith.constant 0 : index
    %111 = vector.load %arg24[%c0_60, %c0_61] : memref<2x32xf32, #tpu.memory_space<vmem>>, vector<2x32xf32>
    tpu.vector_store %arg24[%c0_60, %c0_61], %70 {strides = array<i32>} : memref<2x32xf32, #tpu.memory_space<vmem>>, vector<2x32xf32>,
    %c0_62 = arith.constant 0 : index
    %c0_63 = arith.constant 0 : index
    %112 = vector.load %arg25[%c0_62, %c0_63] : memref<2x32xf32, #tpu.memory_space<vmem>>, vector<2x32xf32>
    tpu.vector_store %arg25[%c0_62, %c0_63], %68 {strides = array<i32>} : memref<2x32xf32, #tpu.memory_space<vmem>>, vector<2x32xf32>,
    %c0_64 = arith.constant 0 : index
    %c0_65 = arith.constant 0 : index
    %113 = vector.load %arg26[%c0_64, %c0_65] : memref<2x32xf32, #tpu.memory_space<vmem>>, vector<2x32xf32>
    tpu.vector_store %arg26[%c0_64, %c0_65], %98 {strides = array<i32>} : memref<2x32xf32, #tpu.memory_space<vmem>>, vector<2x32xf32>,
    %c0_66 = arith.constant 0 : index
    %c0_67 = arith.constant 0 : index
    %114 = vector.load %arg27[%c0_66, %c0_67] : memref<2x32xf32, #tpu.memory_space<vmem>>, vector<2x32xf32>
    tpu.vector_store %arg27[%c0_66, %c0_67], %100 {strides = array<i32>} : memref<2x32xf32, #tpu.memory_space<vmem>>, vector<2x32xf32>,
    %c1_i32 = arith.constant 1 : i32
    %c7_i32_68 = arith.constant 7 : i32
    %115 = arith.subi %c7_i32_68, %c1_i32 : i32
    %116 = arith.index_cast %c1_i32 : i32 to index
    %c0_69 = arith.constant 0 : index
    %c0_70 = arith.constant 0 : index
    %117 = vector.load %arg2[%116, %c0_69, %c0_70] : memref<8x2x1xf32, #tpu.memory_space<vmem>>, vector<1x2x1xf32>
    %118 = vector.shape_cast %117 : vector<1x2x1xf32> to vector<2x1xf32>
    %119 = arith.index_cast %115 : i32 to index
    %c0_71 = arith.constant 0 : index
    %c0_72 = arith.constant 0 : index
    %120 = vector.load %arg2[%119, %c0_71, %c0_72] : memref<8x2x1xf32, #tpu.memory_space<vmem>>, vector<1x2x1xf32>
    %121 = vector.shape_cast %120 : vector<1x2x1xf32> to vector<2x1xf32>
    %122 = arith.index_cast %c1_i32 : i32 to index
    %c0_73 = arith.constant 0 : index
    %c0_74 = arith.constant 0 : index
    %123 = vector.load %arg19[%122, %c0_73, %c0_74] : memref<8x2x128xf32, #tpu.memory_space<vmem>>, vector<1x2x128xf32>
    %124 = vector.shape_cast %123 : vector<1x2x128xf32> to vector<2x128xf32>
    %c0_75 = arith.constant 0 : index
    %c0_76 = arith.constant 0 : index
    %125 = vector.load %arg24[%c0_75, %c0_76] : memref<2x32xf32, #tpu.memory_space<vmem>>, vector<2x32xf32>
    %c0_77 = arith.constant 0 : index
    %c0_78 = arith.constant 0 : index
    %126 = vector.load %arg5[%c0_77, %c0_78] : memref<32x128xf32, #tpu.memory_space<vmem>>, vector<32x128xf32>
    %cst_79 = arith.constant dense<0.000000e+00> : vector<2x128xf32>
    %127 = tpu.matmul %125, %126, %cst_79 {dimension_numbers = #tpu.dot_dimension_numbers<[1], [0], [0], [1], [0, 0, 1, 1], [], []>} : vector<2x32xf32>, vector<32x128xf32>, vector<2x128xf32> -> vector<2x128xf32>
    %128 = arith.addf %124, %127 : vector<2x128xf32>
    %129 = arith.index_cast %115 : i32 to index
    %c0_80 = arith.constant 0 : index
    %c0_81 = arith.constant 0 : index
    %130 = vector.load %arg20[%129, %c0_80, %c0_81] : memref<8x2x128xf32, #tpu.memory_space<vmem>>, vector<1x2x128xf32>
    %131 = vector.shape_cast %130 : vector<1x2x128xf32> to vector<2x128xf32>
    %c0_82 = arith.constant 0 : index
    %c0_83 = arith.constant 0 : index
    %132 = vector.load %arg26[%c0_82, %c0_83] : memref<2x32xf32, #tpu.memory_space<vmem>>, vector<2x32xf32>
    %c0_84 = arith.constant 0 : index
    %c0_85 = arith.constant 0 : index
    %133 = vector.load %arg8[%c0_84, %c0_85] : memref<32x128xf32, #tpu.memory_space<vmem>>, vector<32x128xf32>
    %cst_86 = arith.constant dense<0.000000e+00> : vector<2x128xf32>
    %134 = tpu.matmul %132, %133, %cst_86 {dimension_numbers = #tpu.dot_dimension_numbers<[1], [0], [0], [1], [0, 0, 1, 1], [], []>} : vector<2x32xf32>, vector<32x128xf32>, vector<2x128xf32> -> vector<2x128xf32>
    %135 = arith.addf %131, %134 : vector<2x128xf32>
    %136 = vector.extract_strided_slice %128 {offsets = [0, 0], sizes = [2, 32], strides = [1, 1]} : vector<2x128xf32> to vector<2x32xf32>
    %137 = arith.negf %136 : vector<2x32xf32>
    %138 = math.exp %137 : vector<2x32xf32>
    %cst_87 = arith.constant 1.000000e+00 : f32
    %139 = vector.broadcast %cst_87 : f32 to vector<2x32xf32>
    %140 = arith.addf %139, %138 : vector<2x32xf32>
    %141 = arith.divf %139, %140 : vector<2x32xf32>
    %142 = vector.extract_strided_slice %128 {offsets = [0, 32], sizes = [2, 32], strides = [1, 1]} : vector<2x128xf32> to vector<2x32xf32>
    %143 = arith.negf %142 : vector<2x32xf32>
    %144 = math.exp %143 : vector<2x32xf32>
    %cst_88 = arith.constant 1.000000e+00 : f32
    %145 = vector.broadcast %cst_88 : f32 to vector<2x32xf32>
    %146 = arith.addf %145, %144 : vector<2x32xf32>
    %147 = arith.divf %145, %146 : vector<2x32xf32>
    %148 = vector.extract_strided_slice %128 {offsets = [0, 64], sizes = [2, 32], strides = [1, 1]} : vector<2x128xf32> to vector<2x32xf32>
    %149 = math.tanh %148 : vector<2x32xf32>
    %150 = vector.extract_strided_slice %128 {offsets = [0, 96], sizes = [2, 32], strides = [1, 1]} : vector<2x128xf32> to vector<2x32xf32>
    %151 = arith.negf %150 : vector<2x32xf32>
    %152 = math.exp %151 : vector<2x32xf32>
    %cst_89 = arith.constant 1.000000e+00 : f32
    %153 = vector.broadcast %cst_89 : f32 to vector<2x32xf32>
    %154 = arith.addf %153, %152 : vector<2x32xf32>
    %155 = arith.divf %153, %154 : vector<2x32xf32>
    %c0_90 = arith.constant 0 : index
    %c0_91 = arith.constant 0 : index
    %156 = vector.load %arg25[%c0_90, %c0_91] : memref<2x32xf32, #tpu.memory_space<vmem>>, vector<2x32xf32>
    %157 = arith.mulf %147, %156 : vector<2x32xf32>
    %158 = arith.mulf %141, %149 : vector<2x32xf32>
    %159 = arith.addf %157, %158 : vector<2x32xf32>
    %160 = math.tanh %159 : vector<2x32xf32>
    %161 = arith.mulf %155, %160 : vector<2x32xf32>
    %162 = vector.extract_strided_slice %135 {offsets = [0, 0], sizes = [2, 32], strides = [1, 1]} : vector<2x128xf32> to vector<2x32xf32>
    %163 = arith.negf %162 : vector<2x32xf32>
    %164 = math.exp %163 : vector<2x32xf32>
    %cst_92 = arith.constant 1.000000e+00 : f32
    %165 = vector.broadcast %cst_92 : f32 to vector<2x32xf32>
    %166 = arith.addf %165, %164 : vector<2x32xf32>
    %167 = arith.divf %165, %166 : vector<2x32xf32>
    %168 = vector.extract_strided_slice %135 {offsets = [0, 32], sizes = [2, 32], strides = [1, 1]} : vector<2x128xf32> to vector<2x32xf32>
    %169 = arith.negf %168 : vector<2x32xf32>
    %170 = math.exp %169 : vector<2x32xf32>
    %cst_93 = arith.constant 1.000000e+00 : f32
    %171 = vector.broadcast %cst_93 : f32 to vector<2x32xf32>
    %172 = arith.addf %171, %170 : vector<2x32xf32>
    %173 = arith.divf %171, %172 : vector<2x32xf32>
    %174 = vector.extract_strided_slice %135 {offsets = [0, 64], sizes = [2, 32], strides = [1, 1]} : vector<2x128xf32> to vector<2x32xf32>
    %175 = math.tanh %174 : vector<2x32xf32>
    %176 = vector.extract_strided_slice %135 {offsets = [0, 96], sizes = [2, 32], strides = [1, 1]} : vector<2x128xf32> to vector<2x32xf32>
    %177 = arith.negf %176 : vector<2x32xf32>
    %178 = math.exp %177 : vector<2x32xf32>
    %cst_94 = arith.constant 1.000000e+00 : f32
    %179 = vector.broadcast %cst_94 : f32 to vector<2x32xf32>
    %180 = arith.addf %179, %178 : vector<2x32xf32>
    %181 = arith.divf %179, %180 : vector<2x32xf32>
    %c0_95 = arith.constant 0 : index
    %c0_96 = arith.constant 0 : index
    %182 = vector.load %arg27[%c0_95, %c0_96] : memref<2x32xf32, #tpu.memory_space<vmem>>, vector<2x32xf32>
    %183 = arith.mulf %173, %182 : vector<2x32xf32>
    %184 = arith.mulf %167, %175 : vector<2x32xf32>
    %185 = arith.addf %183, %184 : vector<2x32xf32>
    %186 = math.tanh %185 : vector<2x32xf32>
    %187 = arith.mulf %181, %186 : vector<2x32xf32>
    %188 = vector.broadcast %121 : vector<2x1xf32> to vector<2x32xf32>
    %189 = arith.mulf %188, %187 : vector<2x32xf32>
    %190 = vector.broadcast %121 : vector<2x1xf32> to vector<2x32xf32>
    %191 = arith.mulf %190, %185 : vector<2x32xf32>
    %192 = vector.broadcast %118 : vector<2x1xf32> to vector<2x32xf32>
    %193 = arith.mulf %161, %192 : vector<2x32xf32>
    %194 = arith.index_cast %c1_i32 : i32 to index
    %c0_97 = arith.constant 0 : index
    %c0_98 = arith.constant 0 : index
    %195 = vector.load %arg21[%194, %c0_97, %c0_98] : memref<8x2x64xf32, #tpu.memory_space<vmem>>, vector<1x2x32xf32>
    %196 = vector.shape_cast %195 : vector<1x2x32xf32> to vector<2x32xf32>
    %197 = vector.shape_cast %193 : vector<2x32xf32> to vector<1x2x32xf32>
    tpu.vector_store %arg21[%194, %c0_97, %c0_98], %197 {strides = array<i32>} : memref<8x2x64xf32, #tpu.memory_space<vmem>>, vector<1x2x32xf32>,
    %198 = arith.index_cast %115 : i32 to index
    %c0_99 = arith.constant 0 : index
    %c32_100 = arith.constant 32 : index
    %199 = vector.load %arg21[%198, %c0_99, %c32_100] : memref<8x2x64xf32, #tpu.memory_space<vmem>>, vector<1x2x32xf32>
    %200 = vector.shape_cast %199 : vector<1x2x32xf32> to vector<2x32xf32>
    %201 = vector.shape_cast %189 : vector<2x32xf32> to vector<1x2x32xf32>
    tpu.vector_store %arg21[%198, %c0_99, %c32_100], %201 {strides = array<i32>} : memref<8x2x64xf32, #tpu.memory_space<vmem>>, vector<1x2x32xf32>,
    %c0_101 = arith.constant 0 : index
    %c0_102 = arith.constant 0 : index
    %202 = vector.load %arg24[%c0_101, %c0_102] : memref<2x32xf32, #tpu.memory_space<vmem>>, vector<2x32xf32>
    tpu.vector_store %arg24[%c0_101, %c0_102], %161 {strides = array<i32>} : memref<2x32xf32, #tpu.memory_space<vmem>>, vector<2x32xf32>,
    %c0_103 = arith.constant 0 : index
    %c0_104 = arith.constant 0 : index
    %203 = vector.load %arg25[%c0_103, %c0_104] : memref<2x32xf32, #tpu.memory_space<vmem>>, vector<2x32xf32>
    tpu.vector_store %arg25[%c0_103, %c0_104], %159 {strides = array<i32>} : memref<2x32xf32, #tpu.memory_space<vmem>>, vector<2x32xf32>,
    %c0_105 = arith.constant 0 : index
    %c0_106 = arith.constant 0 : index
    %204 = vector.load %arg26[%c0_105, %c0_106] : memref<2x32xf32, #tpu.memory_space<vmem>>, vector<2x32xf32>
    tpu.vector_store %arg26[%c0_105, %c0_106], %189 {strides = array<i32>} : memref<2x32xf32, #tpu.memory_space<vmem>>, vector<2x32xf32>,
    %c0_107 = arith.constant 0 : index
    %c0_108 = arith.constant 0 : index
    %205 = vector.load %arg27[%c0_107, %c0_108] : memref<2x32xf32, #tpu.memory_space<vmem>>, vector<2x32xf32>
    tpu.vector_store %arg27[%c0_107, %c0_108], %191 {strides = array<i32>} : memref<2x32xf32, #tpu.memory_space<vmem>>, vector<2x32xf32>,
    %c2_i32 = arith.constant 2 : i32
    %c7_i32_109 = arith.constant 7 : i32
    %206 = arith.subi %c7_i32_109, %c2_i32 : i32
    %207 = arith.index_cast %c2_i32 : i32 to index
    %c0_110 = arith.constant 0 : index
    %c0_111 = arith.constant 0 : index
    %208 = vector.load %arg2[%207, %c0_110, %c0_111] : memref<8x2x1xf32, #tpu.memory_space<vmem>>, vector<1x2x1xf32>
    %209 = vector.shape_cast %208 : vector<1x2x1xf32> to vector<2x1xf32>
    %210 = arith.index_cast %206 : i32 to index
    %c0_112 = arith.constant 0 : index
    %c0_113 = arith.constant 0 : index
    %211 = vector.load %arg2[%210, %c0_112, %c0_113] : memref<8x2x1xf32, #tpu.memory_space<vmem>>, vector<1x2x1xf32>
    %212 = vector.shape_cast %211 : vector<1x2x1xf32> to vector<2x1xf32>
    %213 = arith.index_cast %c2_i32 : i32 to index
    %c0_114 = arith.constant 0 : index
    %c0_115 = arith.constant 0 : index
    %214 = vector.load %arg19[%213, %c0_114, %c0_115] : memref<8x2x128xf32, #tpu.memory_space<vmem>>, vector<1x2x128xf32>
    %215 = vector.shape_cast %214 : vector<1x2x128xf32> to vector<2x128xf32>
    %c0_116 = arith.constant 0 : index
    %c0_117 = arith.constant 0 : index
    %216 = vector.load %arg24[%c0_116, %c0_117] : memref<2x32xf32, #tpu.memory_space<vmem>>, vector<2x32xf32>
    %c0_118 = arith.constant 0 : index
    %c0_119 = arith.constant 0 : index
    %217 = vector.load %arg5[%c0_118, %c0_119] : memref<32x128xf32, #tpu.memory_space<vmem>>, vector<32x128xf32>
    %cst_120 = arith.constant dense<0.000000e+00> : vector<2x128xf32>
    %218 = tpu.matmul %216, %217, %cst_120 {dimension_numbers = #tpu.dot_dimension_numbers<[1], [0], [0], [1], [0, 0, 1, 1], [], []>} : vector<2x32xf32>, vector<32x128xf32>, vector<2x128xf32> -> vector<2x128xf32>
    %219 = arith.addf %215, %218 : vector<2x128xf32>
    %220 = arith.index_cast %206 : i32 to index
    %c0_121 = arith.constant 0 : index
    %c0_122 = arith.constant 0 : index
    %221 = vector.load %arg20[%220, %c0_121, %c0_122] : memref<8x2x128xf32, #tpu.memory_space<vmem>>, vector<1x2x128xf32>
    %222 = vector.shape_cast %221 : vector<1x2x128xf32> to vector<2x128xf32>
    %c0_123 = arith.constant 0 : index
    %c0_124 = arith.constant 0 : index
    %223 = vector.load %arg26[%c0_123, %c0_124] : memref<2x32xf32, #tpu.memory_space<vmem>>, vector<2x32xf32>
    %c0_125 = arith.constant 0 : index
    %c0_126 = arith.constant 0 : index
    %224 = vector.load %arg8[%c0_125, %c0_126] : memref<32x128xf32, #tpu.memory_space<vmem>>, vector<32x128xf32>
    %cst_127 = arith.constant dense<0.000000e+00> : vector<2x128xf32>
    %225 = tpu.matmul %223, %224, %cst_127 {dimension_numbers = #tpu.dot_dimension_numbers<[1], [0], [0], [1], [0, 0, 1, 1], [], []>} : vector<2x32xf32>, vector<32x128xf32>, vector<2x128xf32> -> vector<2x128xf32>
    %226 = arith.addf %222, %225 : vector<2x128xf32>
    %227 = vector.extract_strided_slice %219 {offsets = [0, 0], sizes = [2, 32], strides = [1, 1]} : vector<2x128xf32> to vector<2x32xf32>
    %228 = arith.negf %227 : vector<2x32xf32>
    %229 = math.exp %228 : vector<2x32xf32>
    %cst_128 = arith.constant 1.000000e+00 : f32
    %230 = vector.broadcast %cst_128 : f32 to vector<2x32xf32>
    %231 = arith.addf %230, %229 : vector<2x32xf32>
    %232 = arith.divf %230, %231 : vector<2x32xf32>
    %233 = vector.extract_strided_slice %219 {offsets = [0, 32], sizes = [2, 32], strides = [1, 1]} : vector<2x128xf32> to vector<2x32xf32>
    %234 = arith.negf %233 : vector<2x32xf32>
    %235 = math.exp %234 : vector<2x32xf32>
    %cst_129 = arith.constant 1.000000e+00 : f32
    %236 = vector.broadcast %cst_129 : f32 to vector<2x32xf32>
    %237 = arith.addf %236, %235 : vector<2x32xf32>
    %238 = arith.divf %236, %237 : vector<2x32xf32>
    %239 = vector.extract_strided_slice %219 {offsets = [0, 64], sizes = [2, 32], strides = [1, 1]} : vector<2x128xf32> to vector<2x32xf32>
    %240 = math.tanh %239 : vector<2x32xf32>
    %241 = vector.extract_strided_slice %219 {offsets = [0, 96], sizes = [2, 32], strides = [1, 1]} : vector<2x128xf32> to vector<2x32xf32>
    %242 = arith.negf %241 : vector<2x32xf32>
    %243 = math.exp %242 : vector<2x32xf32>
    %cst_130 = arith.constant 1.000000e+00 : f32
    %244 = vector.broadcast %cst_130 : f32 to vector<2x32xf32>
    %245 = arith.addf %244, %243 : vector<2x32xf32>
    %246 = arith.divf %244, %245 : vector<2x32xf32>
    %c0_131 = arith.constant 0 : index
    %c0_132 = arith.constant 0 : index
    %247 = vector.load %arg25[%c0_131, %c0_132] : memref<2x32xf32, #tpu.memory_space<vmem>>, vector<2x32xf32>
    %248 = arith.mulf %238, %247 : vector<2x32xf32>
    %249 = arith.mulf %232, %240 : vector<2x32xf32>
    %250 = arith.addf %248, %249 : vector<2x32xf32>
    %251 = math.tanh %250 : vector<2x32xf32>
    %252 = arith.mulf %246, %251 : vector<2x32xf32>
    %253 = vector.extract_strided_slice %226 {offsets = [0, 0], sizes = [2, 32], strides = [1, 1]} : vector<2x128xf32> to vector<2x32xf32>
    %254 = arith.negf %253 : vector<2x32xf32>
    %255 = math.exp %254 : vector<2x32xf32>
    %cst_133 = arith.constant 1.000000e+00 : f32
    %256 = vector.broadcast %cst_133 : f32 to vector<2x32xf32>
    %257 = arith.addf %256, %255 : vector<2x32xf32>
    %258 = arith.divf %256, %257 : vector<2x32xf32>
    %259 = vector.extract_strided_slice %226 {offsets = [0, 32], sizes = [2, 32], strides = [1, 1]} : vector<2x128xf32> to vector<2x32xf32>
    %260 = arith.negf %259 : vector<2x32xf32>
    %261 = math.exp %260 : vector<2x32xf32>
    %cst_134 = arith.constant 1.000000e+00 : f32
    %262 = vector.broadcast %cst_134 : f32 to vector<2x32xf32>
    %263 = arith.addf %262, %261 : vector<2x32xf32>
    %264 = arith.divf %262, %263 : vector<2x32xf32>
    %265 = vector.extract_strided_slice %226 {offsets = [0, 64], sizes = [2, 32], strides = [1, 1]} : vector<2x128xf32> to vector<2x32xf32>
    %266 = math.tanh %265 : vector<2x32xf32>
    %267 = vector.extract_strided_slice %226 {offsets = [0, 96], sizes = [2, 32], strides = [1, 1]} : vector<2x128xf32> to vector<2x32xf32>
    %268 = arith.negf %267 : vector<2x32xf32>
    %269 = math.exp %268 : vector<2x32xf32>
    %cst_135 = arith.constant 1.000000e+00 : f32
    %270 = vector.broadcast %cst_135 : f32 to vector<2x32xf32>
    %271 = arith.addf %270, %269 : vector<2x32xf32>
    %272 = arith.divf %270, %271 : vector<2x32xf32>
    %c0_136 = arith.constant 0 : index
    %c0_137 = arith.constant 0 : index
    %273 = vector.load %arg27[%c0_136, %c0_137] : memref<2x32xf32, #tpu.memory_space<vmem>>, vector<2x32xf32>
    %274 = arith.mulf %264, %273 : vector<2x32xf32>
    %275 = arith.mulf %258, %266 : vector<2x32xf32>
    %276 = arith.addf %274, %275 : vector<2x32xf32>
    %277 = math.tanh %276 : vector<2x32xf32>
    %278 = arith.mulf %272, %277 : vector<2x32xf32>
    %279 = vector.broadcast %212 : vector<2x1xf32> to vector<2x32xf32>
    %280 = arith.mulf %279, %278 : vector<2x32xf32>
    %281 = vector.broadcast %212 : vector<2x1xf32> to vector<2x32xf32>
    %282 = arith.mulf %281, %276 : vector<2x32xf32>
    %283 = vector.broadcast %209 : vector<2x1xf32> to vector<2x32xf32>
    %284 = arith.mulf %252, %283 : vector<2x32xf32>
    %285 = arith.index_cast %c2_i32 : i32 to index
    %c0_138 = arith.constant 0 : index
    %c0_139 = arith.constant 0 : index
    %286 = vector.load %arg21[%285, %c0_138, %c0_139] : memref<8x2x64xf32, #tpu.memory_space<vmem>>, vector<1x2x32xf32>
    %287 = vector.shape_cast %286 : vector<1x2x32xf32> to vector<2x32xf32>
    %288 = vector.shape_cast %284 : vector<2x32xf32> to vector<1x2x32xf32>
    tpu.vector_store %arg21[%285, %c0_138, %c0_139], %288 {strides = array<i32>} : memref<8x2x64xf32, #tpu.memory_space<vmem>>, vector<1x2x32xf32>,
    %289 = arith.index_cast %206 : i32 to index
    %c0_140 = arith.constant 0 : index
    %c32_141 = arith.constant 32 : index
    %290 = vector.load %arg21[%289, %c0_140, %c32_141] : memref<8x2x64xf32, #tpu.memory_space<vmem>>, vector<1x2x32xf32>
    %291 = vector.shape_cast %290 : vector<1x2x32xf32> to vector<2x32xf32>
    %292 = vector.shape_cast %280 : vector<2x32xf32> to vector<1x2x32xf32>
    tpu.vector_store %arg21[%289, %c0_140, %c32_141], %292 {strides = array<i32>} : memref<8x2x64xf32, #tpu.memory_space<vmem>>, vector<1x2x32xf32>,
    %c0_142 = arith.constant 0 : index
    %c0_143 = arith.constant 0 : index
    %293 = vector.load %arg24[%c0_142, %c0_143] : memref<2x32xf32, #tpu.memory_space<vmem>>, vector<2x32xf32>
    tpu.vector_store %arg24[%c0_142, %c0_143], %252 {strides = array<i32>} : memref<2x32xf32, #tpu.memory_space<vmem>>, vector<2x32xf32>,
    %c0_144 = arith.constant 0 : index
    %c0_145 = arith.constant 0 : index
    %294 = vector.load %arg25[%c0_144, %c0_145] : memref<2x32xf32, #tpu.memory_space<vmem>>, vector<2x32xf32>
    tpu.vector_store %arg25[%c0_144, %c0_145], %250 {strides = array<i32>} : memref<2x32xf32, #tpu.memory_space<vmem>>, vector<2x32xf32>,
    %c0_146 = arith.constant 0 : index
    %c0_147 = arith.constant 0 : index
    %295 = vector.load %arg26[%c0_146, %c0_147] : memref<2x32xf32, #tpu.memory_space<vmem>>, vector<2x32xf32>
    tpu.vector_store %arg26[%c0_146, %c0_147], %280 {strides = array<i32>} : memref<2x32xf32, #tpu.memory_space<vmem>>, vector<2x32xf32>,
    %c0_148 = arith.constant 0 : index
    %c0_149 = arith.constant 0 : index
    %296 = vector.load %arg27[%c0_148, %c0_149] : memref<2x32xf32, #tpu.memory_space<vmem>>, vector<2x32xf32>
    tpu.vector_store %arg27[%c0_148, %c0_149], %282 {strides = array<i32>} : memref<2x32xf32, #tpu.memory_space<vmem>>, vector<2x32xf32>,
    %c3_i32 = arith.constant 3 : i32
    %c7_i32_150 = arith.constant 7 : i32
    %297 = arith.subi %c7_i32_150, %c3_i32 : i32
    %298 = arith.index_cast %c3_i32 : i32 to index
    %c0_151 = arith.constant 0 : index
    %c0_152 = arith.constant 0 : index
    %299 = vector.load %arg2[%298, %c0_151, %c0_152] : memref<8x2x1xf32, #tpu.memory_space<vmem>>, vector<1x2x1xf32>
    %300 = vector.shape_cast %299 : vector<1x2x1xf32> to vector<2x1xf32>
    %301 = arith.index_cast %297 : i32 to index
    %c0_153 = arith.constant 0 : index
    %c0_154 = arith.constant 0 : index
    %302 = vector.load %arg2[%301, %c0_153, %c0_154] : memref<8x2x1xf32, #tpu.memory_space<vmem>>, vector<1x2x1xf32>
    %303 = vector.shape_cast %302 : vector<1x2x1xf32> to vector<2x1xf32>
    %304 = arith.index_cast %c3_i32 : i32 to index
    %c0_155 = arith.constant 0 : index
    %c0_156 = arith.constant 0 : index
    %305 = vector.load %arg19[%304, %c0_155, %c0_156] : memref<8x2x128xf32, #tpu.memory_space<vmem>>, vector<1x2x128xf32>
    %306 = vector.shape_cast %305 : vector<1x2x128xf32> to vector<2x128xf32>
    %c0_157 = arith.constant 0 : index
    %c0_158 = arith.constant 0 : index
    %307 = vector.load %arg24[%c0_157, %c0_158] : memref<2x32xf32, #tpu.memory_space<vmem>>, vector<2x32xf32>
    %c0_159 = arith.constant 0 : index
    %c0_160 = arith.constant 0 : index
    %308 = vector.load %arg5[%c0_159, %c0_160] : memref<32x128xf32, #tpu.memory_space<vmem>>, vector<32x128xf32>
    %cst_161 = arith.constant dense<0.000000e+00> : vector<2x128xf32>
    %309 = tpu.matmul %307, %308, %cst_161 {dimension_numbers = #tpu.dot_dimension_numbers<[1], [0], [0], [1], [0, 0, 1, 1], [], []>} : vector<2x32xf32>, vector<32x128xf32>, vector<2x128xf32> -> vector<2x128xf32>
    %310 = arith.addf %306, %309 : vector<2x128xf32>
    %311 = arith.index_cast %297 : i32 to index
    %c0_162 = arith.constant 0 : index
    %c0_163 = arith.constant 0 : index
    %312 = vector.load %arg20[%311, %c0_162, %c0_163] : memref<8x2x128xf32, #tpu.memory_space<vmem>>, vector<1x2x128xf32>
    %313 = vector.shape_cast %312 : vector<1x2x128xf32> to vector<2x128xf32>
    %c0_164 = arith.constant 0 : index
    %c0_165 = arith.constant 0 : index
    %314 = vector.load %arg26[%c0_164, %c0_165] : memref<2x32xf32, #tpu.memory_space<vmem>>, vector<2x32xf32>
    %c0_166 = arith.constant 0 : index
    %c0_167 = arith.constant 0 : index
    %315 = vector.load %arg8[%c0_166, %c0_167] : memref<32x128xf32, #tpu.memory_space<vmem>>, vector<32x128xf32>
    %cst_168 = arith.constant dense<0.000000e+00> : vector<2x128xf32>
    %316 = tpu.matmul %314, %315, %cst_168 {dimension_numbers = #tpu.dot_dimension_numbers<[1], [0], [0], [1], [0, 0, 1, 1], [], []>} : vector<2x32xf32>, vector<32x128xf32>, vector<2x128xf32> -> vector<2x128xf32>
    %317 = arith.addf %313, %316 : vector<2x128xf32>
    %318 = vector.extract_strided_slice %310 {offsets = [0, 0], sizes = [2, 32], strides = [1, 1]} : vector<2x128xf32> to vector<2x32xf32>
    %319 = arith.negf %318 : vector<2x32xf32>
    %320 = math.exp %319 : vector<2x32xf32>
    %cst_169 = arith.constant 1.000000e+00 : f32
    %321 = vector.broadcast %cst_169 : f32 to vector<2x32xf32>
    %322 = arith.addf %321, %320 : vector<2x32xf32>
    %323 = arith.divf %321, %322 : vector<2x32xf32>
    %324 = vector.extract_strided_slice %310 {offsets = [0, 32], sizes = [2, 32], strides = [1, 1]} : vector<2x128xf32> to vector<2x32xf32>
    %325 = arith.negf %324 : vector<2x32xf32>
    %326 = math.exp %325 : vector<2x32xf32>
    %cst_170 = arith.constant 1.000000e+00 : f32
    %327 = vector.broadcast %cst_170 : f32 to vector<2x32xf32>
    %328 = arith.addf %327, %326 : vector<2x32xf32>
    %329 = arith.divf %327, %328 : vector<2x32xf32>
    %330 = vector.extract_strided_slice %310 {offsets = [0, 64], sizes = [2, 32], strides = [1, 1]} : vector<2x128xf32> to vector<2x32xf32>
    %331 = math.tanh %330 : vector<2x32xf32>
    %332 = vector.extract_strided_slice %310 {offsets = [0, 96], sizes = [2, 32], strides = [1, 1]} : vector<2x128xf32> to vector<2x32xf32>
    %333 = arith.negf %332 : vector<2x32xf32>
    %334 = math.exp %333 : vector<2x32xf32>
    %cst_171 = arith.constant 1.000000e+00 : f32
    %335 = vector.broadcast %cst_171 : f32 to vector<2x32xf32>
    %336 = arith.addf %335, %334 : vector<2x32xf32>
    %337 = arith.divf %335, %336 : vector<2x32xf32>
    %c0_172 = arith.constant 0 : index
    %c0_173 = arith.constant 0 : index
    %338 = vector.load %arg25[%c0_172, %c0_173] : memref<2x32xf32, #tpu.memory_space<vmem>>, vector<2x32xf32>
    %339 = arith.mulf %329, %338 : vector<2x32xf32>
    %340 = arith.mulf %323, %331 : vector<2x32xf32>
    %341 = arith.addf %339, %340 : vector<2x32xf32>
    %342 = math.tanh %341 : vector<2x32xf32>
    %343 = arith.mulf %337, %342 : vector<2x32xf32>
    %344 = vector.extract_strided_slice %317 {offsets = [0, 0], sizes = [2, 32], strides = [1, 1]} : vector<2x128xf32> to vector<2x32xf32>
    %345 = arith.negf %344 : vector<2x32xf32>
    %346 = math.exp %345 : vector<2x32xf32>
    %cst_174 = arith.constant 1.000000e+00 : f32
    %347 = vector.broadcast %cst_174 : f32 to vector<2x32xf32>
    %348 = arith.addf %347, %346 : vector<2x32xf32>
    %349 = arith.divf %347, %348 : vector<2x32xf32>
    %350 = vector.extract_strided_slice %317 {offsets = [0, 32], sizes = [2, 32], strides = [1, 1]} : vector<2x128xf32> to vector<2x32xf32>
    %351 = arith.negf %350 : vector<2x32xf32>
    %352 = math.exp %351 : vector<2x32xf32>
    %cst_175 = arith.constant 1.000000e+00 : f32
    %353 = vector.broadcast %cst_175 : f32 to vector<2x32xf32>
    %354 = arith.addf %353, %352 : vector<2x32xf32>
    %355 = arith.divf %353, %354 : vector<2x32xf32>
    %356 = vector.extract_strided_slice %317 {offsets = [0, 64], sizes = [2, 32], strides = [1, 1]} : vector<2x128xf32> to vector<2x32xf32>
    %357 = math.tanh %356 : vector<2x32xf32>
    %358 = vector.extract_strided_slice %317 {offsets = [0, 96], sizes = [2, 32], strides = [1, 1]} : vector<2x128xf32> to vector<2x32xf32>
    %359 = arith.negf %358 : vector<2x32xf32>
    %360 = math.exp %359 : vector<2x32xf32>
    %cst_176 = arith.constant 1.000000e+00 : f32
    %361 = vector.broadcast %cst_176 : f32 to vector<2x32xf32>
    %362 = arith.addf %361, %360 : vector<2x32xf32>
    %363 = arith.divf %361, %362 : vector<2x32xf32>
    %c0_177 = arith.constant 0 : index
    %c0_178 = arith.constant 0 : index
    %364 = vector.load %arg27[%c0_177, %c0_178] : memref<2x32xf32, #tpu.memory_space<vmem>>, vector<2x32xf32>
    %365 = arith.mulf %355, %364 : vector<2x32xf32>
    %366 = arith.mulf %349, %357 : vector<2x32xf32>
    %367 = arith.addf %365, %366 : vector<2x32xf32>
    %368 = math.tanh %367 : vector<2x32xf32>
    %369 = arith.mulf %363, %368 : vector<2x32xf32>
    %370 = vector.broadcast %303 : vector<2x1xf32> to vector<2x32xf32>
    %371 = arith.mulf %370, %369 : vector<2x32xf32>
    %372 = vector.broadcast %303 : vector<2x1xf32> to vector<2x32xf32>
    %373 = arith.mulf %372, %367 : vector<2x32xf32>
    %374 = vector.broadcast %300 : vector<2x1xf32> to vector<2x32xf32>
    %375 = arith.mulf %343, %374 : vector<2x32xf32>
    %376 = arith.index_cast %c3_i32 : i32 to index
    %c0_179 = arith.constant 0 : index
    %c0_180 = arith.constant 0 : index
    %377 = vector.load %arg21[%376, %c0_179, %c0_180] : memref<8x2x64xf32, #tpu.memory_space<vmem>>, vector<1x2x32xf32>
    %378 = vector.shape_cast %377 : vector<1x2x32xf32> to vector<2x32xf32>
    %379 = vector.shape_cast %375 : vector<2x32xf32> to vector<1x2x32xf32>
    tpu.vector_store %arg21[%376, %c0_179, %c0_180], %379 {strides = array<i32>} : memref<8x2x64xf32, #tpu.memory_space<vmem>>, vector<1x2x32xf32>,
    %380 = arith.index_cast %297 : i32 to index
    %c0_181 = arith.constant 0 : index
    %c32_182 = arith.constant 32 : index
    %381 = vector.load %arg21[%380, %c0_181, %c32_182] : memref<8x2x64xf32, #tpu.memory_space<vmem>>, vector<1x2x32xf32>
    %382 = vector.shape_cast %381 : vector<1x2x32xf32> to vector<2x32xf32>
    %383 = vector.shape_cast %371 : vector<2x32xf32> to vector<1x2x32xf32>
    tpu.vector_store %arg21[%380, %c0_181, %c32_182], %383 {strides = array<i32>} : memref<8x2x64xf32, #tpu.memory_space<vmem>>, vector<1x2x32xf32>,
    %c0_183 = arith.constant 0 : index
    %c0_184 = arith.constant 0 : index
    %384 = vector.load %arg24[%c0_183, %c0_184] : memref<2x32xf32, #tpu.memory_space<vmem>>, vector<2x32xf32>
    tpu.vector_store %arg24[%c0_183, %c0_184], %343 {strides = array<i32>} : memref<2x32xf32, #tpu.memory_space<vmem>>, vector<2x32xf32>,
    %c0_185 = arith.constant 0 : index
    %c0_186 = arith.constant 0 : index
    %385 = vector.load %arg25[%c0_185, %c0_186] : memref<2x32xf32, #tpu.memory_space<vmem>>, vector<2x32xf32>
    tpu.vector_store %arg25[%c0_185, %c0_186], %341 {strides = array<i32>} : memref<2x32xf32, #tpu.memory_space<vmem>>, vector<2x32xf32>,
    %c0_187 = arith.constant 0 : index
    %c0_188 = arith.constant 0 : index
    %386 = vector.load %arg26[%c0_187, %c0_188] : memref<2x32xf32, #tpu.memory_space<vmem>>, vector<2x32xf32>
    tpu.vector_store %arg26[%c0_187, %c0_188], %371 {strides = array<i32>} : memref<2x32xf32, #tpu.memory_space<vmem>>, vector<2x32xf32>,
    %c0_189 = arith.constant 0 : index
    %c0_190 = arith.constant 0 : index
    %387 = vector.load %arg27[%c0_189, %c0_190] : memref<2x32xf32, #tpu.memory_space<vmem>>, vector<2x32xf32>
    tpu.vector_store %arg27[%c0_189, %c0_190], %373 {strides = array<i32>} : memref<2x32xf32, #tpu.memory_space<vmem>>, vector<2x32xf32>,
    %c4_i32 = arith.constant 4 : i32
    %c7_i32_191 = arith.constant 7 : i32
    %388 = arith.subi %c7_i32_191, %c4_i32 : i32
    %389 = arith.index_cast %c4_i32 : i32 to index
    %c0_192 = arith.constant 0 : index
    %c0_193 = arith.constant 0 : index
    %390 = vector.load %arg2[%389, %c0_192, %c0_193] : memref<8x2x1xf32, #tpu.memory_space<vmem>>, vector<1x2x1xf32>
    %391 = vector.shape_cast %390 : vector<1x2x1xf32> to vector<2x1xf32>
    %392 = arith.index_cast %388 : i32 to index
    %c0_194 = arith.constant 0 : index
    %c0_195 = arith.constant 0 : index
    %393 = vector.load %arg2[%392, %c0_194, %c0_195] : memref<8x2x1xf32, #tpu.memory_space<vmem>>, vector<1x2x1xf32>
    %394 = vector.shape_cast %393 : vector<1x2x1xf32> to vector<2x1xf32>
    %395 = arith.index_cast %c4_i32 : i32 to index
    %c0_196 = arith.constant 0 : index
    %c0_197 = arith.constant 0 : index
    %396 = vector.load %arg19[%395, %c0_196, %c0_197] : memref<8x2x128xf32, #tpu.memory_space<vmem>>, vector<1x2x128xf32>
    %397 = vector.shape_cast %396 : vector<1x2x128xf32> to vector<2x128xf32>
    %c0_198 = arith.constant 0 : index
    %c0_199 = arith.constant 0 : index
    %398 = vector.load %arg24[%c0_198, %c0_199] : memref<2x32xf32, #tpu.memory_space<vmem>>, vector<2x32xf32>
    %c0_200 = arith.constant 0 : index
    %c0_201 = arith.constant 0 : index
    %399 = vector.load %arg5[%c0_200, %c0_201] : memref<32x128xf32, #tpu.memory_space<vmem>>, vector<32x128xf32>
    %cst_202 = arith.constant dense<0.000000e+00> : vector<2x128xf32>
    %400 = tpu.matmul %398, %399, %cst_202 {dimension_numbers = #tpu.dot_dimension_numbers<[1], [0], [0], [1], [0, 0, 1, 1], [], []>} : vector<2x32xf32>, vector<32x128xf32>, vector<2x128xf32> -> vector<2x128xf32>
    %401 = arith.addf %397, %400 : vector<2x128xf32>
    %402 = arith.index_cast %388 : i32 to index
    %c0_203 = arith.constant 0 : index
    %c0_204 = arith.constant 0 : index
    %403 = vector.load %arg20[%402, %c0_203, %c0_204] : memref<8x2x128xf32, #tpu.memory_space<vmem>>, vector<1x2x128xf32>
    %404 = vector.shape_cast %403 : vector<1x2x128xf32> to vector<2x128xf32>
    %c0_205 = arith.constant 0 : index
    %c0_206 = arith.constant 0 : index
    %405 = vector.load %arg26[%c0_205, %c0_206] : memref<2x32xf32, #tpu.memory_space<vmem>>, vector<2x32xf32>
    %c0_207 = arith.constant 0 : index
    %c0_208 = arith.constant 0 : index
    %406 = vector.load %arg8[%c0_207, %c0_208] : memref<32x128xf32, #tpu.memory_space<vmem>>, vector<32x128xf32>
    %cst_209 = arith.constant dense<0.000000e+00> : vector<2x128xf32>
    %407 = tpu.matmul %405, %406, %cst_209 {dimension_numbers = #tpu.dot_dimension_numbers<[1], [0], [0], [1], [0, 0, 1, 1], [], []>} : vector<2x32xf32>, vector<32x128xf32>, vector<2x128xf32> -> vector<2x128xf32>
    %408 = arith.addf %404, %407 : vector<2x128xf32>
    %409 = vector.extract_strided_slice %401 {offsets = [0, 0], sizes = [2, 32], strides = [1, 1]} : vector<2x128xf32> to vector<2x32xf32>
    %410 = arith.negf %409 : vector<2x32xf32>
    %411 = math.exp %410 : vector<2x32xf32>
    %cst_210 = arith.constant 1.000000e+00 : f32
    %412 = vector.broadcast %cst_210 : f32 to vector<2x32xf32>
    %413 = arith.addf %412, %411 : vector<2x32xf32>
    %414 = arith.divf %412, %413 : vector<2x32xf32>
    %415 = vector.extract_strided_slice %401 {offsets = [0, 32], sizes = [2, 32], strides = [1, 1]} : vector<2x128xf32> to vector<2x32xf32>
    %416 = arith.negf %415 : vector<2x32xf32>
    %417 = math.exp %416 : vector<2x32xf32>
    %cst_211 = arith.constant 1.000000e+00 : f32
    %418 = vector.broadcast %cst_211 : f32 to vector<2x32xf32>
    %419 = arith.addf %418, %417 : vector<2x32xf32>
    %420 = arith.divf %418, %419 : vector<2x32xf32>
    %421 = vector.extract_strided_slice %401 {offsets = [0, 64], sizes = [2, 32], strides = [1, 1]} : vector<2x128xf32> to vector<2x32xf32>
    %422 = math.tanh %421 : vector<2x32xf32>
    %423 = vector.extract_strided_slice %401 {offsets = [0, 96], sizes = [2, 32], strides = [1, 1]} : vector<2x128xf32> to vector<2x32xf32>
    %424 = arith.negf %423 : vector<2x32xf32>
    %425 = math.exp %424 : vector<2x32xf32>
    %cst_212 = arith.constant 1.000000e+00 : f32
    %426 = vector.broadcast %cst_212 : f32 to vector<2x32xf32>
    %427 = arith.addf %426, %425 : vector<2x32xf32>
    %428 = arith.divf %426, %427 : vector<2x32xf32>
    %c0_213 = arith.constant 0 : index
    %c0_214 = arith.constant 0 : index
    %429 = vector.load %arg25[%c0_213, %c0_214] : memref<2x32xf32, #tpu.memory_space<vmem>>, vector<2x32xf32>
    %430 = arith.mulf %420, %429 : vector<2x32xf32>
    %431 = arith.mulf %414, %422 : vector<2x32xf32>
    %432 = arith.addf %430, %431 : vector<2x32xf32>
    %433 = math.tanh %432 : vector<2x32xf32>
    %434 = arith.mulf %428, %433 : vector<2x32xf32>
    %435 = vector.extract_strided_slice %408 {offsets = [0, 0], sizes = [2, 32], strides = [1, 1]} : vector<2x128xf32> to vector<2x32xf32>
    %436 = arith.negf %435 : vector<2x32xf32>
    %437 = math.exp %436 : vector<2x32xf32>
    %cst_215 = arith.constant 1.000000e+00 : f32
    %438 = vector.broadcast %cst_215 : f32 to vector<2x32xf32>
    %439 = arith.addf %438, %437 : vector<2x32xf32>
    %440 = arith.divf %438, %439 : vector<2x32xf32>
    %441 = vector.extract_strided_slice %408 {offsets = [0, 32], sizes = [2, 32], strides = [1, 1]} : vector<2x128xf32> to vector<2x32xf32>
    %442 = arith.negf %441 : vector<2x32xf32>
    %443 = math.exp %442 : vector<2x32xf32>
    %cst_216 = arith.constant 1.000000e+00 : f32
    %444 = vector.broadcast %cst_216 : f32 to vector<2x32xf32>
    %445 = arith.addf %444, %443 : vector<2x32xf32>
    %446 = arith.divf %444, %445 : vector<2x32xf32>
    %447 = vector.extract_strided_slice %408 {offsets = [0, 64], sizes = [2, 32], strides = [1, 1]} : vector<2x128xf32> to vector<2x32xf32>
    %448 = math.tanh %447 : vector<2x32xf32>
    %449 = vector.extract_strided_slice %408 {offsets = [0, 96], sizes = [2, 32], strides = [1, 1]} : vector<2x128xf32> to vector<2x32xf32>
    %450 = arith.negf %449 : vector<2x32xf32>
    %451 = math.exp %450 : vector<2x32xf32>
    %cst_217 = arith.constant 1.000000e+00 : f32
    %452 = vector.broadcast %cst_217 : f32 to vector<2x32xf32>
    %453 = arith.addf %452, %451 : vector<2x32xf32>
    %454 = arith.divf %452, %453 : vector<2x32xf32>
    %c0_218 = arith.constant 0 : index
    %c0_219 = arith.constant 0 : index
    %455 = vector.load %arg27[%c0_218, %c0_219] : memref<2x32xf32, #tpu.memory_space<vmem>>, vector<2x32xf32>
    %456 = arith.mulf %446, %455 : vector<2x32xf32>
    %457 = arith.mulf %440, %448 : vector<2x32xf32>
    %458 = arith.addf %456, %457 : vector<2x32xf32>
    %459 = math.tanh %458 : vector<2x32xf32>
    %460 = arith.mulf %454, %459 : vector<2x32xf32>
    %461 = vector.broadcast %394 : vector<2x1xf32> to vector<2x32xf32>
    %462 = arith.mulf %461, %460 : vector<2x32xf32>
    %463 = vector.broadcast %394 : vector<2x1xf32> to vector<2x32xf32>
    %464 = arith.mulf %463, %458 : vector<2x32xf32>
    %465 = vector.broadcast %391 : vector<2x1xf32> to vector<2x32xf32>
    %466 = arith.mulf %434, %465 : vector<2x32xf32>
    %467 = arith.index_cast %c4_i32 : i32 to index
    %c0_220 = arith.constant 0 : index
    %c0_221 = arith.constant 0 : index
    %468 = vector.load %arg21[%467, %c0_220, %c0_221] : memref<8x2x64xf32, #tpu.memory_space<vmem>>, vector<1x2x32xf32>
    %469 = vector.shape_cast %468 : vector<1x2x32xf32> to vector<2x32xf32>
    %470 = vector.shape_cast %466 : vector<2x32xf32> to vector<1x2x32xf32>
    tpu.vector_store %arg21[%467, %c0_220, %c0_221], %470 {strides = array<i32>} : memref<8x2x64xf32, #tpu.memory_space<vmem>>, vector<1x2x32xf32>,
    %471 = arith.index_cast %388 : i32 to index
    %c0_222 = arith.constant 0 : index
    %c32_223 = arith.constant 32 : index
    %472 = vector.load %arg21[%471, %c0_222, %c32_223] : memref<8x2x64xf32, #tpu.memory_space<vmem>>, vector<1x2x32xf32>
    %473 = vector.shape_cast %472 : vector<1x2x32xf32> to vector<2x32xf32>
    %474 = vector.shape_cast %462 : vector<2x32xf32> to vector<1x2x32xf32>
    tpu.vector_store %arg21[%471, %c0_222, %c32_223], %474 {strides = array<i32>} : memref<8x2x64xf32, #tpu.memory_space<vmem>>, vector<1x2x32xf32>,
    %c0_224 = arith.constant 0 : index
    %c0_225 = arith.constant 0 : index
    %475 = vector.load %arg24[%c0_224, %c0_225] : memref<2x32xf32, #tpu.memory_space<vmem>>, vector<2x32xf32>
    tpu.vector_store %arg24[%c0_224, %c0_225], %434 {strides = array<i32>} : memref<2x32xf32, #tpu.memory_space<vmem>>, vector<2x32xf32>,
    %c0_226 = arith.constant 0 : index
    %c0_227 = arith.constant 0 : index
    %476 = vector.load %arg25[%c0_226, %c0_227] : memref<2x32xf32, #tpu.memory_space<vmem>>, vector<2x32xf32>
    tpu.vector_store %arg25[%c0_226, %c0_227], %432 {strides = array<i32>} : memref<2x32xf32, #tpu.memory_space<vmem>>, vector<2x32xf32>,
    %c0_228 = arith.constant 0 : index
    %c0_229 = arith.constant 0 : index
    %477 = vector.load %arg26[%c0_228, %c0_229] : memref<2x32xf32, #tpu.memory_space<vmem>>, vector<2x32xf32>
    tpu.vector_store %arg26[%c0_228, %c0_229], %462 {strides = array<i32>} : memref<2x32xf32, #tpu.memory_space<vmem>>, vector<2x32xf32>,
    %c0_230 = arith.constant 0 : index
    %c0_231 = arith.constant 0 : index
    %478 = vector.load %arg27[%c0_230, %c0_231] : memref<2x32xf32, #tpu.memory_space<vmem>>, vector<2x32xf32>
    tpu.vector_store %arg27[%c0_230, %c0_231], %464 {strides = array<i32>} : memref<2x32xf32, #tpu.memory_space<vmem>>, vector<2x32xf32>,
    %c5_i32 = arith.constant 5 : i32
    %c7_i32_232 = arith.constant 7 : i32
    %479 = arith.subi %c7_i32_232, %c5_i32 : i32
    %480 = arith.index_cast %c5_i32 : i32 to index
    %c0_233 = arith.constant 0 : index
    %c0_234 = arith.constant 0 : index
    %481 = vector.load %arg2[%480, %c0_233, %c0_234] : memref<8x2x1xf32, #tpu.memory_space<vmem>>, vector<1x2x1xf32>
    %482 = vector.shape_cast %481 : vector<1x2x1xf32> to vector<2x1xf32>
    %483 = arith.index_cast %479 : i32 to index
    %c0_235 = arith.constant 0 : index
    %c0_236 = arith.constant 0 : index
    %484 = vector.load %arg2[%483, %c0_235, %c0_236] : memref<8x2x1xf32, #tpu.memory_space<vmem>>, vector<1x2x1xf32>
    %485 = vector.shape_cast %484 : vector<1x2x1xf32> to vector<2x1xf32>
    %486 = arith.index_cast %c5_i32 : i32 to index
    %c0_237 = arith.constant 0 : index
    %c0_238 = arith.constant 0 : index
    %487 = vector.load %arg19[%486, %c0_237, %c0_238] : memref<8x2x128xf32, #tpu.memory_space<vmem>>, vector<1x2x128xf32>
    %488 = vector.shape_cast %487 : vector<1x2x128xf32> to vector<2x128xf32>
    %c0_239 = arith.constant 0 : index
    %c0_240 = arith.constant 0 : index
    %489 = vector.load %arg24[%c0_239, %c0_240] : memref<2x32xf32, #tpu.memory_space<vmem>>, vector<2x32xf32>
    %c0_241 = arith.constant 0 : index
    %c0_242 = arith.constant 0 : index
    %490 = vector.load %arg5[%c0_241, %c0_242] : memref<32x128xf32, #tpu.memory_space<vmem>>, vector<32x128xf32>
    %cst_243 = arith.constant dense<0.000000e+00> : vector<2x128xf32>
    %491 = tpu.matmul %489, %490, %cst_243 {dimension_numbers = #tpu.dot_dimension_numbers<[1], [0], [0], [1], [0, 0, 1, 1], [], []>} : vector<2x32xf32>, vector<32x128xf32>, vector<2x128xf32> -> vector<2x128xf32>
    %492 = arith.addf %488, %491 : vector<2x128xf32>
    %493 = arith.index_cast %479 : i32 to index
    %c0_244 = arith.constant 0 : index
    %c0_245 = arith.constant 0 : index
    %494 = vector.load %arg20[%493, %c0_244, %c0_245] : memref<8x2x128xf32, #tpu.memory_space<vmem>>, vector<1x2x128xf32>
    %495 = vector.shape_cast %494 : vector<1x2x128xf32> to vector<2x128xf32>
    %c0_246 = arith.constant 0 : index
    %c0_247 = arith.constant 0 : index
    %496 = vector.load %arg26[%c0_246, %c0_247] : memref<2x32xf32, #tpu.memory_space<vmem>>, vector<2x32xf32>
    %c0_248 = arith.constant 0 : index
    %c0_249 = arith.constant 0 : index
    %497 = vector.load %arg8[%c0_248, %c0_249] : memref<32x128xf32, #tpu.memory_space<vmem>>, vector<32x128xf32>
    %cst_250 = arith.constant dense<0.000000e+00> : vector<2x128xf32>
    %498 = tpu.matmul %496, %497, %cst_250 {dimension_numbers = #tpu.dot_dimension_numbers<[1], [0], [0], [1], [0, 0, 1, 1], [], []>} : vector<2x32xf32>, vector<32x128xf32>, vector<2x128xf32> -> vector<2x128xf32>
    %499 = arith.addf %495, %498 : vector<2x128xf32>
    %500 = vector.extract_strided_slice %492 {offsets = [0, 0], sizes = [2, 32], strides = [1, 1]} : vector<2x128xf32> to vector<2x32xf32>
    %501 = arith.negf %500 : vector<2x32xf32>
    %502 = math.exp %501 : vector<2x32xf32>
    %cst_251 = arith.constant 1.000000e+00 : f32
    %503 = vector.broadcast %cst_251 : f32 to vector<2x32xf32>
    %504 = arith.addf %503, %502 : vector<2x32xf32>
    %505 = arith.divf %503, %504 : vector<2x32xf32>
    %506 = vector.extract_strided_slice %492 {offsets = [0, 32], sizes = [2, 32], strides = [1, 1]} : vector<2x128xf32> to vector<2x32xf32>
    %507 = arith.negf %506 : vector<2x32xf32>
    %508 = math.exp %507 : vector<2x32xf32>
    %cst_252 = arith.constant 1.000000e+00 : f32
    %509 = vector.broadcast %cst_252 : f32 to vector<2x32xf32>
    %510 = arith.addf %509, %508 : vector<2x32xf32>
    %511 = arith.divf %509, %510 : vector<2x32xf32>
    %512 = vector.extract_strided_slice %492 {offsets = [0, 64], sizes = [2, 32], strides = [1, 1]} : vector<2x128xf32> to vector<2x32xf32>
    %513 = math.tanh %512 : vector<2x32xf32>
    %514 = vector.extract_strided_slice %492 {offsets = [0, 96], sizes = [2, 32], strides = [1, 1]} : vector<2x128xf32> to vector<2x32xf32>
    %515 = arith.negf %514 : vector<2x32xf32>
    %516 = math.exp %515 : vector<2x32xf32>
    %cst_253 = arith.constant 1.000000e+00 : f32
    %517 = vector.broadcast %cst_253 : f32 to vector<2x32xf32>
    %518 = arith.addf %517, %516 : vector<2x32xf32>
    %519 = arith.divf %517, %518 : vector<2x32xf32>
    %c0_254 = arith.constant 0 : index
    %c0_255 = arith.constant 0 : index
    %520 = vector.load %arg25[%c0_254, %c0_255] : memref<2x32xf32, #tpu.memory_space<vmem>>, vector<2x32xf32>
    %521 = arith.mulf %511, %520 : vector<2x32xf32>
    %522 = arith.mulf %505, %513 : vector<2x32xf32>
    %523 = arith.addf %521, %522 : vector<2x32xf32>
    %524 = math.tanh %523 : vector<2x32xf32>
    %525 = arith.mulf %519, %524 : vector<2x32xf32>
    %526 = vector.extract_strided_slice %499 {offsets = [0, 0], sizes = [2, 32], strides = [1, 1]} : vector<2x128xf32> to vector<2x32xf32>
    %527 = arith.negf %526 : vector<2x32xf32>
    %528 = math.exp %527 : vector<2x32xf32>
    %cst_256 = arith.constant 1.000000e+00 : f32
    %529 = vector.broadcast %cst_256 : f32 to vector<2x32xf32>
    %530 = arith.addf %529, %528 : vector<2x32xf32>
    %531 = arith.divf %529, %530 : vector<2x32xf32>
    %532 = vector.extract_strided_slice %499 {offsets = [0, 32], sizes = [2, 32], strides = [1, 1]} : vector<2x128xf32> to vector<2x32xf32>
    %533 = arith.negf %532 : vector<2x32xf32>
    %534 = math.exp %533 : vector<2x32xf32>
    %cst_257 = arith.constant 1.000000e+00 : f32
    %535 = vector.broadcast %cst_257 : f32 to vector<2x32xf32>
    %536 = arith.addf %535, %534 : vector<2x32xf32>
    %537 = arith.divf %535, %536 : vector<2x32xf32>
    %538 = vector.extract_strided_slice %499 {offsets = [0, 64], sizes = [2, 32], strides = [1, 1]} : vector<2x128xf32> to vector<2x32xf32>
    %539 = math.tanh %538 : vector<2x32xf32>
    %540 = vector.extract_strided_slice %499 {offsets = [0, 96], sizes = [2, 32], strides = [1, 1]} : vector<2x128xf32> to vector<2x32xf32>
    %541 = arith.negf %540 : vector<2x32xf32>
    %542 = math.exp %541 : vector<2x32xf32>
    %cst_258 = arith.constant 1.000000e+00 : f32
    %543 = vector.broadcast %cst_258 : f32 to vector<2x32xf32>
    %544 = arith.addf %543, %542 : vector<2x32xf32>
    %545 = arith.divf %543, %544 : vector<2x32xf32>
    %c0_259 = arith.constant 0 : index
    %c0_260 = arith.constant 0 : index
    %546 = vector.load %arg27[%c0_259, %c0_260] : memref<2x32xf32, #tpu.memory_space<vmem>>, vector<2x32xf32>
    %547 = arith.mulf %537, %546 : vector<2x32xf32>
    %548 = arith.mulf %531, %539 : vector<2x32xf32>
    %549 = arith.addf %547, %548 : vector<2x32xf32>
    %550 = math.tanh %549 : vector<2x32xf32>
    %551 = arith.mulf %545, %550 : vector<2x32xf32>
    %552 = vector.broadcast %485 : vector<2x1xf32> to vector<2x32xf32>
    %553 = arith.mulf %552, %551 : vector<2x32xf32>
    %554 = vector.broadcast %485 : vector<2x1xf32> to vector<2x32xf32>
    %555 = arith.mulf %554, %549 : vector<2x32xf32>
    %556 = vector.broadcast %482 : vector<2x1xf32> to vector<2x32xf32>
    %557 = arith.mulf %525, %556 : vector<2x32xf32>
    %558 = arith.index_cast %c5_i32 : i32 to index
    %c0_261 = arith.constant 0 : index
    %c0_262 = arith.constant 0 : index
    %559 = vector.load %arg21[%558, %c0_261, %c0_262] : memref<8x2x64xf32, #tpu.memory_space<vmem>>, vector<1x2x32xf32>
    %560 = vector.shape_cast %559 : vector<1x2x32xf32> to vector<2x32xf32>
    %561 = vector.shape_cast %557 : vector<2x32xf32> to vector<1x2x32xf32>
    tpu.vector_store %arg21[%558, %c0_261, %c0_262], %561 {strides = array<i32>} : memref<8x2x64xf32, #tpu.memory_space<vmem>>, vector<1x2x32xf32>,
    %562 = arith.index_cast %479 : i32 to index
    %c0_263 = arith.constant 0 : index
    %c32_264 = arith.constant 32 : index
    %563 = vector.load %arg21[%562, %c0_263, %c32_264] : memref<8x2x64xf32, #tpu.memory_space<vmem>>, vector<1x2x32xf32>
    %564 = vector.shape_cast %563 : vector<1x2x32xf32> to vector<2x32xf32>
    %565 = vector.shape_cast %553 : vector<2x32xf32> to vector<1x2x32xf32>
    tpu.vector_store %arg21[%562, %c0_263, %c32_264], %565 {strides = array<i32>} : memref<8x2x64xf32, #tpu.memory_space<vmem>>, vector<1x2x32xf32>,
    %c0_265 = arith.constant 0 : index
    %c0_266 = arith.constant 0 : index
    %566 = vector.load %arg24[%c0_265, %c0_266] : memref<2x32xf32, #tpu.memory_space<vmem>>, vector<2x32xf32>
    tpu.vector_store %arg24[%c0_265, %c0_266], %525 {strides = array<i32>} : memref<2x32xf32, #tpu.memory_space<vmem>>, vector<2x32xf32>,
    %c0_267 = arith.constant 0 : index
    %c0_268 = arith.constant 0 : index
    %567 = vector.load %arg25[%c0_267, %c0_268] : memref<2x32xf32, #tpu.memory_space<vmem>>, vector<2x32xf32>
    tpu.vector_store %arg25[%c0_267, %c0_268], %523 {strides = array<i32>} : memref<2x32xf32, #tpu.memory_space<vmem>>, vector<2x32xf32>,
    %c0_269 = arith.constant 0 : index
    %c0_270 = arith.constant 0 : index
    %568 = vector.load %arg26[%c0_269, %c0_270] : memref<2x32xf32, #tpu.memory_space<vmem>>, vector<2x32xf32>
    tpu.vector_store %arg26[%c0_269, %c0_270], %553 {strides = array<i32>} : memref<2x32xf32, #tpu.memory_space<vmem>>, vector<2x32xf32>,
    %c0_271 = arith.constant 0 : index
    %c0_272 = arith.constant 0 : index
    %569 = vector.load %arg27[%c0_271, %c0_272] : memref<2x32xf32, #tpu.memory_space<vmem>>, vector<2x32xf32>
    tpu.vector_store %arg27[%c0_271, %c0_272], %555 {strides = array<i32>} : memref<2x32xf32, #tpu.memory_space<vmem>>, vector<2x32xf32>,
    %c6_i32 = arith.constant 6 : i32
    %c7_i32_273 = arith.constant 7 : i32
    %570 = arith.subi %c7_i32_273, %c6_i32 : i32
    %571 = arith.index_cast %c6_i32 : i32 to index
    %c0_274 = arith.constant 0 : index
    %c0_275 = arith.constant 0 : index
    %572 = vector.load %arg2[%571, %c0_274, %c0_275] : memref<8x2x1xf32, #tpu.memory_space<vmem>>, vector<1x2x1xf32>
    %573 = vector.shape_cast %572 : vector<1x2x1xf32> to vector<2x1xf32>
    %574 = arith.index_cast %570 : i32 to index
    %c0_276 = arith.constant 0 : index
    %c0_277 = arith.constant 0 : index
    %575 = vector.load %arg2[%574, %c0_276, %c0_277] : memref<8x2x1xf32, #tpu.memory_space<vmem>>, vector<1x2x1xf32>
    %576 = vector.shape_cast %575 : vector<1x2x1xf32> to vector<2x1xf32>
    %577 = arith.index_cast %c6_i32 : i32 to index
    %c0_278 = arith.constant 0 : index
    %c0_279 = arith.constant 0 : index
    %578 = vector.load %arg19[%577, %c0_278, %c0_279] : memref<8x2x128xf32, #tpu.memory_space<vmem>>, vector<1x2x128xf32>
    %579 = vector.shape_cast %578 : vector<1x2x128xf32> to vector<2x128xf32>
    %c0_280 = arith.constant 0 : index
    %c0_281 = arith.constant 0 : index
    %580 = vector.load %arg24[%c0_280, %c0_281] : memref<2x32xf32, #tpu.memory_space<vmem>>, vector<2x32xf32>
    %c0_282 = arith.constant 0 : index
    %c0_283 = arith.constant 0 : index
    %581 = vector.load %arg5[%c0_282, %c0_283] : memref<32x128xf32, #tpu.memory_space<vmem>>, vector<32x128xf32>
    %cst_284 = arith.constant dense<0.000000e+00> : vector<2x128xf32>
    %582 = tpu.matmul %580, %581, %cst_284 {dimension_numbers = #tpu.dot_dimension_numbers<[1], [0], [0], [1], [0, 0, 1, 1], [], []>} : vector<2x32xf32>, vector<32x128xf32>, vector<2x128xf32> -> vector<2x128xf32>
    %583 = arith.addf %579, %582 : vector<2x128xf32>
    %584 = arith.index_cast %570 : i32 to index
    %c0_285 = arith.constant 0 : index
    %c0_286 = arith.constant 0 : index
    %585 = vector.load %arg20[%584, %c0_285, %c0_286] : memref<8x2x128xf32, #tpu.memory_space<vmem>>, vector<1x2x128xf32>
    %586 = vector.shape_cast %585 : vector<1x2x128xf32> to vector<2x128xf32>
    %c0_287 = arith.constant 0 : index
    %c0_288 = arith.constant 0 : index
    %587 = vector.load %arg26[%c0_287, %c0_288] : memref<2x32xf32, #tpu.memory_space<vmem>>, vector<2x32xf32>
    %c0_289 = arith.constant 0 : index
    %c0_290 = arith.constant 0 : index
    %588 = vector.load %arg8[%c0_289, %c0_290] : memref<32x128xf32, #tpu.memory_space<vmem>>, vector<32x128xf32>
    %cst_291 = arith.constant dense<0.000000e+00> : vector<2x128xf32>
    %589 = tpu.matmul %587, %588, %cst_291 {dimension_numbers = #tpu.dot_dimension_numbers<[1], [0], [0], [1], [0, 0, 1, 1], [], []>} : vector<2x32xf32>, vector<32x128xf32>, vector<2x128xf32> -> vector<2x128xf32>
    %590 = arith.addf %586, %589 : vector<2x128xf32>
    %591 = vector.extract_strided_slice %583 {offsets = [0, 0], sizes = [2, 32], strides = [1, 1]} : vector<2x128xf32> to vector<2x32xf32>
    %592 = arith.negf %591 : vector<2x32xf32>
    %593 = math.exp %592 : vector<2x32xf32>
    %cst_292 = arith.constant 1.000000e+00 : f32
    %594 = vector.broadcast %cst_292 : f32 to vector<2x32xf32>
    %595 = arith.addf %594, %593 : vector<2x32xf32>
    %596 = arith.divf %594, %595 : vector<2x32xf32>
    %597 = vector.extract_strided_slice %583 {offsets = [0, 32], sizes = [2, 32], strides = [1, 1]} : vector<2x128xf32> to vector<2x32xf32>
    %598 = arith.negf %597 : vector<2x32xf32>
    %599 = math.exp %598 : vector<2x32xf32>
    %cst_293 = arith.constant 1.000000e+00 : f32
    %600 = vector.broadcast %cst_293 : f32 to vector<2x32xf32>
    %601 = arith.addf %600, %599 : vector<2x32xf32>
    %602 = arith.divf %600, %601 : vector<2x32xf32>
    %603 = vector.extract_strided_slice %583 {offsets = [0, 64], sizes = [2, 32], strides = [1, 1]} : vector<2x128xf32> to vector<2x32xf32>
    %604 = math.tanh %603 : vector<2x32xf32>
    %605 = vector.extract_strided_slice %583 {offsets = [0, 96], sizes = [2, 32], strides = [1, 1]} : vector<2x128xf32> to vector<2x32xf32>
    %606 = arith.negf %605 : vector<2x32xf32>
    %607 = math.exp %606 : vector<2x32xf32>
    %cst_294 = arith.constant 1.000000e+00 : f32
    %608 = vector.broadcast %cst_294 : f32 to vector<2x32xf32>
    %609 = arith.addf %608, %607 : vector<2x32xf32>
    %610 = arith.divf %608, %609 : vector<2x32xf32>
    %c0_295 = arith.constant 0 : index
    %c0_296 = arith.constant 0 : index
    %611 = vector.load %arg25[%c0_295, %c0_296] : memref<2x32xf32, #tpu.memory_space<vmem>>, vector<2x32xf32>
    %612 = arith.mulf %602, %611 : vector<2x32xf32>
    %613 = arith.mulf %596, %604 : vector<2x32xf32>
    %614 = arith.addf %612, %613 : vector<2x32xf32>
    %615 = math.tanh %614 : vector<2x32xf32>
    %616 = arith.mulf %610, %615 : vector<2x32xf32>
    %617 = vector.extract_strided_slice %590 {offsets = [0, 0], sizes = [2, 32], strides = [1, 1]} : vector<2x128xf32> to vector<2x32xf32>
    %618 = arith.negf %617 : vector<2x32xf32>
    %619 = math.exp %618 : vector<2x32xf32>
    %cst_297 = arith.constant 1.000000e+00 : f32
    %620 = vector.broadcast %cst_297 : f32 to vector<2x32xf32>
    %621 = arith.addf %620, %619 : vector<2x32xf32>
    %622 = arith.divf %620, %621 : vector<2x32xf32>
    %623 = vector.extract_strided_slice %590 {offsets = [0, 32], sizes = [2, 32], strides = [1, 1]} : vector<2x128xf32> to vector<2x32xf32>
    %624 = arith.negf %623 : vector<2x32xf32>
    %625 = math.exp %624 : vector<2x32xf32>
    %cst_298 = arith.constant 1.000000e+00 : f32
    %626 = vector.broadcast %cst_298 : f32 to vector<2x32xf32>
    %627 = arith.addf %626, %625 : vector<2x32xf32>
    %628 = arith.divf %626, %627 : vector<2x32xf32>
    %629 = vector.extract_strided_slice %590 {offsets = [0, 64], sizes = [2, 32], strides = [1, 1]} : vector<2x128xf32> to vector<2x32xf32>
    %630 = math.tanh %629 : vector<2x32xf32>
    %631 = vector.extract_strided_slice %590 {offsets = [0, 96], sizes = [2, 32], strides = [1, 1]} : vector<2x128xf32> to vector<2x32xf32>
    %632 = arith.negf %631 : vector<2x32xf32>
    %633 = math.exp %632 : vector<2x32xf32>
    %cst_299 = arith.constant 1.000000e+00 : f32
    %634 = vector.broadcast %cst_299 : f32 to vector<2x32xf32>
    %635 = arith.addf %634, %633 : vector<2x32xf32>
    %636 = arith.divf %634, %635 : vector<2x32xf32>
    %c0_300 = arith.constant 0 : index
    %c0_301 = arith.constant 0 : index
    %637 = vector.load %arg27[%c0_300, %c0_301] : memref<2x32xf32, #tpu.memory_space<vmem>>, vector<2x32xf32>
    %638 = arith.mulf %628, %637 : vector<2x32xf32>
    %639 = arith.mulf %622, %630 : vector<2x32xf32>
    %640 = arith.addf %638, %639 : vector<2x32xf32>
    %641 = math.tanh %640 : vector<2x32xf32>
    %642 = arith.mulf %636, %641 : vector<2x32xf32>
    %643 = vector.broadcast %576 : vector<2x1xf32> to vector<2x32xf32>
    %644 = arith.mulf %643, %642 : vector<2x32xf32>
    %645 = vector.broadcast %576 : vector<2x1xf32> to vector<2x32xf32>
    %646 = arith.mulf %645, %640 : vector<2x32xf32>
    %647 = vector.broadcast %573 : vector<2x1xf32> to vector<2x32xf32>
    %648 = arith.mulf %616, %647 : vector<2x32xf32>
    %649 = arith.index_cast %c6_i32 : i32 to index
    %c0_302 = arith.constant 0 : index
    %c0_303 = arith.constant 0 : index
    %650 = vector.load %arg21[%649, %c0_302, %c0_303] : memref<8x2x64xf32, #tpu.memory_space<vmem>>, vector<1x2x32xf32>
    %651 = vector.shape_cast %650 : vector<1x2x32xf32> to vector<2x32xf32>
    %652 = vector.shape_cast %648 : vector<2x32xf32> to vector<1x2x32xf32>
    tpu.vector_store %arg21[%649, %c0_302, %c0_303], %652 {strides = array<i32>} : memref<8x2x64xf32, #tpu.memory_space<vmem>>, vector<1x2x32xf32>,
    %653 = arith.index_cast %570 : i32 to index
    %c0_304 = arith.constant 0 : index
    %c32_305 = arith.constant 32 : index
    %654 = vector.load %arg21[%653, %c0_304, %c32_305] : memref<8x2x64xf32, #tpu.memory_space<vmem>>, vector<1x2x32xf32>
    %655 = vector.shape_cast %654 : vector<1x2x32xf32> to vector<2x32xf32>
    %656 = vector.shape_cast %644 : vector<2x32xf32> to vector<1x2x32xf32>
    tpu.vector_store %arg21[%653, %c0_304, %c32_305], %656 {strides = array<i32>} : memref<8x2x64xf32, #tpu.memory_space<vmem>>, vector<1x2x32xf32>,
    %c0_306 = arith.constant 0 : index
    %c0_307 = arith.constant 0 : index
    %657 = vector.load %arg24[%c0_306, %c0_307] : memref<2x32xf32, #tpu.memory_space<vmem>>, vector<2x32xf32>
    tpu.vector_store %arg24[%c0_306, %c0_307], %616 {strides = array<i32>} : memref<2x32xf32, #tpu.memory_space<vmem>>, vector<2x32xf32>,
    %c0_308 = arith.constant 0 : index
    %c0_309 = arith.constant 0 : index
    %658 = vector.load %arg25[%c0_308, %c0_309] : memref<2x32xf32, #tpu.memory_space<vmem>>, vector<2x32xf32>
    tpu.vector_store %arg25[%c0_308, %c0_309], %614 {strides = array<i32>} : memref<2x32xf32, #tpu.memory_space<vmem>>, vector<2x32xf32>,
    %c0_310 = arith.constant 0 : index
    %c0_311 = arith.constant 0 : index
    %659 = vector.load %arg26[%c0_310, %c0_311] : memref<2x32xf32, #tpu.memory_space<vmem>>, vector<2x32xf32>
    tpu.vector_store %arg26[%c0_310, %c0_311], %644 {strides = array<i32>} : memref<2x32xf32, #tpu.memory_space<vmem>>, vector<2x32xf32>,
    %c0_312 = arith.constant 0 : index
    %c0_313 = arith.constant 0 : index
    %660 = vector.load %arg27[%c0_312, %c0_313] : memref<2x32xf32, #tpu.memory_space<vmem>>, vector<2x32xf32>
    tpu.vector_store %arg27[%c0_312, %c0_313], %646 {strides = array<i32>} : memref<2x32xf32, #tpu.memory_space<vmem>>, vector<2x32xf32>,
    %c7_i32_314 = arith.constant 7 : i32
    %c7_i32_315 = arith.constant 7 : i32
    %661 = arith.subi %c7_i32_315, %c7_i32_314 : i32
    %662 = arith.index_cast %c7_i32_314 : i32 to index
    %c0_316 = arith.constant 0 : index
    %c0_317 = arith.constant 0 : index
    %663 = vector.load %arg2[%662, %c0_316, %c0_317] : memref<8x2x1xf32, #tpu.memory_space<vmem>>, vector<1x2x1xf32>
    %664 = vector.shape_cast %663 : vector<1x2x1xf32> to vector<2x1xf32>
    %665 = arith.index_cast %661 : i32 to index
    %c0_318 = arith.constant 0 : index
    %c0_319 = arith.constant 0 : index
    %666 = vector.load %arg2[%665, %c0_318, %c0_319] : memref<8x2x1xf32, #tpu.memory_space<vmem>>, vector<1x2x1xf32>
    %667 = vector.shape_cast %666 : vector<1x2x1xf32> to vector<2x1xf32>
    %668 = arith.index_cast %c7_i32_314 : i32 to index
    %c0_320 = arith.constant 0 : index
    %c0_321 = arith.constant 0 : index
    %669 = vector.load %arg19[%668, %c0_320, %c0_321] : memref<8x2x128xf32, #tpu.memory_space<vmem>>, vector<1x2x128xf32>
    %670 = vector.shape_cast %669 : vector<1x2x128xf32> to vector<2x128xf32>
    %c0_322 = arith.constant 0 : index
    %c0_323 = arith.constant 0 : index
    %671 = vector.load %arg24[%c0_322, %c0_323] : memref<2x32xf32, #tpu.memory_space<vmem>>, vector<2x32xf32>
    %c0_324 = arith.constant 0 : index
    %c0_325 = arith.constant 0 : index
    %672 = vector.load %arg5[%c0_324, %c0_325] : memref<32x128xf32, #tpu.memory_space<vmem>>, vector<32x128xf32>
    %cst_326 = arith.constant dense<0.000000e+00> : vector<2x128xf32>
    %673 = tpu.matmul %671, %672, %cst_326 {dimension_numbers = #tpu.dot_dimension_numbers<[1], [0], [0], [1], [0, 0, 1, 1], [], []>} : vector<2x32xf32>, vector<32x128xf32>, vector<2x128xf32> -> vector<2x128xf32>
    %674 = arith.addf %670, %673 : vector<2x128xf32>
    %675 = arith.index_cast %661 : i32 to index
    %c0_327 = arith.constant 0 : index
    %c0_328 = arith.constant 0 : index
    %676 = vector.load %arg20[%675, %c0_327, %c0_328] : memref<8x2x128xf32, #tpu.memory_space<vmem>>, vector<1x2x128xf32>
    %677 = vector.shape_cast %676 : vector<1x2x128xf32> to vector<2x128xf32>
    %c0_329 = arith.constant 0 : index
    %c0_330 = arith.constant 0 : index
    %678 = vector.load %arg26[%c0_329, %c0_330] : memref<2x32xf32, #tpu.memory_space<vmem>>, vector<2x32xf32>
    %c0_331 = arith.constant 0 : index
    %c0_332 = arith.constant 0 : index
    %679 = vector.load %arg8[%c0_331, %c0_332] : memref<32x128xf32, #tpu.memory_space<vmem>>, vector<32x128xf32>
    %cst_333 = arith.constant dense<0.000000e+00> : vector<2x128xf32>
    %680 = tpu.matmul %678, %679, %cst_333 {dimension_numbers = #tpu.dot_dimension_numbers<[1], [0], [0], [1], [0, 0, 1, 1], [], []>} : vector<2x32xf32>, vector<32x128xf32>, vector<2x128xf32> -> vector<2x128xf32>
    %681 = arith.addf %677, %680 : vector<2x128xf32>
    %682 = vector.extract_strided_slice %674 {offsets = [0, 0], sizes = [2, 32], strides = [1, 1]} : vector<2x128xf32> to vector<2x32xf32>
    %683 = arith.negf %682 : vector<2x32xf32>
    %684 = math.exp %683 : vector<2x32xf32>
    %cst_334 = arith.constant 1.000000e+00 : f32
    %685 = vector.broadcast %cst_334 : f32 to vector<2x32xf32>
    %686 = arith.addf %685, %684 : vector<2x32xf32>
    %687 = arith.divf %685, %686 : vector<2x32xf32>
    %688 = vector.extract_strided_slice %674 {offsets = [0, 32], sizes = [2, 32], strides = [1, 1]} : vector<2x128xf32> to vector<2x32xf32>
    %689 = arith.negf %688 : vector<2x32xf32>
    %690 = math.exp %689 : vector<2x32xf32>
    %cst_335 = arith.constant 1.000000e+00 : f32
    %691 = vector.broadcast %cst_335 : f32 to vector<2x32xf32>
    %692 = arith.addf %691, %690 : vector<2x32xf32>
    %693 = arith.divf %691, %692 : vector<2x32xf32>
    %694 = vector.extract_strided_slice %674 {offsets = [0, 64], sizes = [2, 32], strides = [1, 1]} : vector<2x128xf32> to vector<2x32xf32>
    %695 = math.tanh %694 : vector<2x32xf32>
    %696 = vector.extract_strided_slice %674 {offsets = [0, 96], sizes = [2, 32], strides = [1, 1]} : vector<2x128xf32> to vector<2x32xf32>
    %697 = arith.negf %696 : vector<2x32xf32>
    %698 = math.exp %697 : vector<2x32xf32>
    %cst_336 = arith.constant 1.000000e+00 : f32
    %699 = vector.broadcast %cst_336 : f32 to vector<2x32xf32>
    %700 = arith.addf %699, %698 : vector<2x32xf32>
    %701 = arith.divf %699, %700 : vector<2x32xf32>
    %c0_337 = arith.constant 0 : index
    %c0_338 = arith.constant 0 : index
    %702 = vector.load %arg25[%c0_337, %c0_338] : memref<2x32xf32, #tpu.memory_space<vmem>>, vector<2x32xf32>
    %703 = arith.mulf %693, %702 : vector<2x32xf32>
    %704 = arith.mulf %687, %695 : vector<2x32xf32>
    %705 = arith.addf %703, %704 : vector<2x32xf32>
    %706 = math.tanh %705 : vector<2x32xf32>
    %707 = arith.mulf %701, %706 : vector<2x32xf32>
    %708 = vector.extract_strided_slice %681 {offsets = [0, 0], sizes = [2, 32], strides = [1, 1]} : vector<2x128xf32> to vector<2x32xf32>
    %709 = arith.negf %708 : vector<2x32xf32>
    %710 = math.exp %709 : vector<2x32xf32>
    %cst_339 = arith.constant 1.000000e+00 : f32
    %711 = vector.broadcast %cst_339 : f32 to vector<2x32xf32>
    %712 = arith.addf %711, %710 : vector<2x32xf32>
    %713 = arith.divf %711, %712 : vector<2x32xf32>
    %714 = vector.extract_strided_slice %681 {offsets = [0, 32], sizes = [2, 32], strides = [1, 1]} : vector<2x128xf32> to vector<2x32xf32>
    %715 = arith.negf %714 : vector<2x32xf32>
    %716 = math.exp %715 : vector<2x32xf32>
    %cst_340 = arith.constant 1.000000e+00 : f32
    %717 = vector.broadcast %cst_340 : f32 to vector<2x32xf32>
    %718 = arith.addf %717, %716 : vector<2x32xf32>
    %719 = arith.divf %717, %718 : vector<2x32xf32>
    %720 = vector.extract_strided_slice %681 {offsets = [0, 64], sizes = [2, 32], strides = [1, 1]} : vector<2x128xf32> to vector<2x32xf32>
    %721 = math.tanh %720 : vector<2x32xf32>
    %722 = vector.extract_strided_slice %681 {offsets = [0, 96], sizes = [2, 32], strides = [1, 1]} : vector<2x128xf32> to vector<2x32xf32>
    %723 = arith.negf %722 : vector<2x32xf32>
    %724 = math.exp %723 : vector<2x32xf32>
    %cst_341 = arith.constant 1.000000e+00 : f32
    %725 = vector.broadcast %cst_341 : f32 to vector<2x32xf32>
    %726 = arith.addf %725, %724 : vector<2x32xf32>
    %727 = arith.divf %725, %726 : vector<2x32xf32>
    %c0_342 = arith.constant 0 : index
    %c0_343 = arith.constant 0 : index
    %728 = vector.load %arg27[%c0_342, %c0_343] : memref<2x32xf32, #tpu.memory_space<vmem>>, vector<2x32xf32>
    %729 = arith.mulf %719, %728 : vector<2x32xf32>
    %730 = arith.mulf %713, %721 : vector<2x32xf32>
    %731 = arith.addf %729, %730 : vector<2x32xf32>
    %732 = math.tanh %731 : vector<2x32xf32>
    %733 = arith.mulf %727, %732 : vector<2x32xf32>
    %734 = vector.broadcast %667 : vector<2x1xf32> to vector<2x32xf32>
    %735 = arith.mulf %734, %733 : vector<2x32xf32>
    %736 = vector.broadcast %667 : vector<2x1xf32> to vector<2x32xf32>
    %737 = arith.mulf %736, %731 : vector<2x32xf32>
    %738 = vector.broadcast %664 : vector<2x1xf32> to vector<2x32xf32>
    %739 = arith.mulf %707, %738 : vector<2x32xf32>
    %740 = arith.index_cast %c7_i32_314 : i32 to index
    %c0_344 = arith.constant 0 : index
    %c0_345 = arith.constant 0 : index
    %741 = vector.load %arg21[%740, %c0_344, %c0_345] : memref<8x2x64xf32, #tpu.memory_space<vmem>>, vector<1x2x32xf32>
    %742 = vector.shape_cast %741 : vector<1x2x32xf32> to vector<2x32xf32>
    %743 = vector.shape_cast %739 : vector<2x32xf32> to vector<1x2x32xf32>
    tpu.vector_store %arg21[%740, %c0_344, %c0_345], %743 {strides = array<i32>} : memref<8x2x64xf32, #tpu.memory_space<vmem>>, vector<1x2x32xf32>,
    %744 = arith.index_cast %661 : i32 to index
    %c0_346 = arith.constant 0 : index
    %c32_347 = arith.constant 32 : index
    %745 = vector.load %arg21[%744, %c0_346, %c32_347] : memref<8x2x64xf32, #tpu.memory_space<vmem>>, vector<1x2x32xf32>
    %746 = vector.shape_cast %745 : vector<1x2x32xf32> to vector<2x32xf32>
    %747 = vector.shape_cast %735 : vector<2x32xf32> to vector<1x2x32xf32>
    tpu.vector_store %arg21[%744, %c0_346, %c32_347], %747 {strides = array<i32>} : memref<8x2x64xf32, #tpu.memory_space<vmem>>, vector<1x2x32xf32>,
    %c0_348 = arith.constant 0 : index
    %c0_349 = arith.constant 0 : index
    %748 = vector.load %arg24[%c0_348, %c0_349] : memref<2x32xf32, #tpu.memory_space<vmem>>, vector<2x32xf32>
    tpu.vector_store %arg24[%c0_348, %c0_349], %707 {strides = array<i32>} : memref<2x32xf32, #tpu.memory_space<vmem>>, vector<2x32xf32>,
    %c0_350 = arith.constant 0 : index
    %c0_351 = arith.constant 0 : index
    %749 = vector.load %arg25[%c0_350, %c0_351] : memref<2x32xf32, #tpu.memory_space<vmem>>, vector<2x32xf32>
    tpu.vector_store %arg25[%c0_350, %c0_351], %705 {strides = array<i32>} : memref<2x32xf32, #tpu.memory_space<vmem>>, vector<2x32xf32>,
    %c0_352 = arith.constant 0 : index
    %c0_353 = arith.constant 0 : index
    %750 = vector.load %arg26[%c0_352, %c0_353] : memref<2x32xf32, #tpu.memory_space<vmem>>, vector<2x32xf32>
    tpu.vector_store %arg26[%c0_352, %c0_353], %735 {strides = array<i32>} : memref<2x32xf32, #tpu.memory_space<vmem>>, vector<2x32xf32>,
    %c0_354 = arith.constant 0 : index
    %c0_355 = arith.constant 0 : index
    %751 = vector.load %arg27[%c0_354, %c0_355] : memref<2x32xf32, #tpu.memory_space<vmem>>, vector<2x32xf32>
    tpu.vector_store %arg27[%c0_354, %c0_355], %737 {strides = array<i32>} : memref<2x32xf32, #tpu.memory_space<vmem>>, vector<2x32xf32>,
    %c8_i32 = arith.constant 8 : i32
    %c0_356 = arith.constant 0 : index
    %c0_357 = arith.constant 0 : index
    %c0_358 = arith.constant 0 : index
    %752 = vector.load %arg21[%c0_356, %c0_357, %c0_358] : memref<8x2x64xf32, #tpu.memory_space<vmem>>, vector<8x2x64xf32>
    %753 = vector.shape_cast %752 : vector<8x2x64xf32> to vector<16x64xf32>
    %c0_359 = arith.constant 0 : index
    %c0_360 = arith.constant 0 : index
    %754 = vector.load %arg10[%c0_359, %c0_360] : memref<64x8xf32, #tpu.memory_space<vmem>>, vector<64x8xf32>
    %cst_361 = arith.constant dense<0.000000e+00> : vector<16x8xf32>
    %755 = tpu.matmul %753, %754, %cst_361 {dimension_numbers = #tpu.dot_dimension_numbers<[1], [0], [0], [1], [0, 0, 1, 1], [], []>} : vector<16x64xf32>, vector<64x8xf32>, vector<16x8xf32> -> vector<16x8xf32>
    %c0_362 = arith.constant 0 : index
    %c0_363 = arith.constant 0 : index
    %756 = vector.load %arg11[%c0_362, %c0_363] : memref<1x8xf32, #tpu.memory_space<vmem>>, vector<1x8xf32>
    %757 = vector.broadcast %756 : vector<1x8xf32> to vector<16x8xf32>
    %758 = arith.addf %755, %757 : vector<16x8xf32>
    %759 = vector.shape_cast %758 : vector<16x8xf32> to vector<8x2x8xf32>
    %c0_364 = arith.constant 0 : index
    %c0_365 = arith.constant 0 : index
    %c0_366 = arith.constant 0 : index
    %760 = vector.load %arg22[%c0_364, %c0_365, %c0_366] : memref<8x2x8xf32, #tpu.memory_space<vmem>>, vector<8x2x8xf32>
    tpu.vector_store %arg22[%c0_364, %c0_365, %c0_366], %759 {strides = array<i32>} : memref<8x2x8xf32, #tpu.memory_space<vmem>>, vector<8x2x8xf32>,
    %c0_367 = arith.constant 0 : index
    %c0_368 = arith.constant 0 : index
    %761 = vector.load %arg12[%c0_367, %c0_368] : memref<1x8xf32, #tpu.memory_space<vmem>>, vector<1x8xf32>
    %c0_369 = arith.constant 0 : index
    %c0_370 = arith.constant 0 : index
    %762 = vector.load %arg13[%c0_369, %c0_370] : memref<1x8xf32, #tpu.memory_space<vmem>>, vector<1x8xf32>
    %c0_371 = arith.constant 0 : index
    %c0_372 = arith.constant 0 : index
    %c0_373 = arith.constant 0 : index
    %763 = vector.load %arg2[%c0_371, %c0_372, %c0_373] : memref<8x2x1xf32, #tpu.memory_space<vmem>>, vector<8x2x1xf32>
    %764 = tpu.iota {dimensions = array<i32: 2>} : vector<8x2x8xi32>
    %c0_374 = arith.constant 0 : index
    %c0_375 = arith.constant 0 : index
    %c0_376 = arith.constant 0 : index
    %765 = vector.load %arg3[%c0_374, %c0_375, %c0_376] : memref<8x2x1xi32, #tpu.memory_space<vmem>>, vector<8x2x1xi32>
    %766 = vector.broadcast %765 : vector<8x2x1xi32> to vector<8x2x8xi32>
    %767 = arith.cmpi eq, %766, %764 : vector<8x2x8xi32>
    %768 = arith.extui %767 : vector<8x2x8xi1> to vector<8x2x8xi32>
    %769 = arith.sitofp %768 : vector<8x2x8xi32> to vector<8x2x8xf32>
    %770 = arith.mulf %769, %759 : vector<8x2x8xf32>
    %cst_377 = arith.constant dense<0.000000e+00> : vector<8x2xf32>
    %771 = vector.multi_reduction <add>, %770, %cst_377 [2] : vector<8x2x8xf32> to vector<8x2xf32>
    %772 = vector.shape_cast %771 : vector<8x2xf32> to vector<8x2x1xf32>
    %773 = vector.extract_strided_slice %769 {offsets = [0, 0, 0], sizes = [1, 2, 8], strides = [1, 1, 1]} : vector<8x2x8xf32> to vector<1x2x8xf32>
    %774 = vector.shape_cast %773 : vector<1x2x8xf32> to vector<2x8xf32>
    %775 = vector.broadcast %761 : vector<1x8xf32> to vector<2x8xf32>
    %776 = arith.mulf %774, %775 : vector<2x8xf32>
    %cst_378 = arith.constant dense<0.000000e+00> : vector<2xf32>
    %777 = vector.multi_reduction <add>, %776, %cst_378 [1] : vector<2x8xf32> to vector<2xf32>
    %778 = vector.shape_cast %777 : vector<2xf32> to vector<2x1xf32>
    %779 = vector.extract_strided_slice %772 {offsets = [0, 0, 0], sizes = [1, 2, 1], strides = [1, 1, 1]} : vector<8x2x1xf32> to vector<1x2x1xf32>
    %780 = vector.shape_cast %779 : vector<1x2x1xf32> to vector<2x1xf32>
    %781 = arith.addf %778, %780 : vector<2x1xf32>
    %782 = vector.extract_strided_slice %769 {offsets = [0, 0, 0], sizes = [7, 2, 8], strides = [1, 1, 1]} : vector<8x2x8xf32> to vector<7x2x8xf32>
    %783 = vector.shape_cast %782 : vector<7x2x8xf32> to vector<14x8xf32>
    %c0_379 = arith.constant 0 : index
    %c0_380 = arith.constant 0 : index
    %784 = vector.load %arg14[%c0_379, %c0_380] : memref<8x8xf32, #tpu.memory_space<vmem>>, vector<8x8xf32>
    %cst_381 = arith.constant dense<0.000000e+00> : vector<14x8xf32>
    %785 = tpu.matmul %783, %784, %cst_381 {dimension_numbers = #tpu.dot_dimension_numbers<[1], [0], [0], [1], [0, 0, 1, 1], [], []>} : vector<14x8xf32>, vector<8x8xf32>, vector<14x8xf32> -> vector<14x8xf32>
    %786 = vector.shape_cast %785 : vector<14x8xf32> to vector<7x2x8xf32>
    %787 = vector.extract_strided_slice %769 {offsets = [1, 0, 0], sizes = [7, 2, 8], strides = [1, 1, 1]} : vector<8x2x8xf32> to vector<7x2x8xf32>
    %788 = arith.mulf %786, %787 : vector<7x2x8xf32>
    %cst_382 = arith.constant dense<0.000000e+00> : vector<7x2xf32>
    %789 = vector.multi_reduction <add>, %788, %cst_382 [2] : vector<7x2x8xf32> to vector<7x2xf32>
    %790 = vector.shape_cast %789 : vector<7x2xf32> to vector<7x2x1xf32>
    %791 = vector.extract_strided_slice %763 {offsets = [1, 0, 0], sizes = [7, 2, 1], strides = [1, 1, 1]} : vector<8x2x1xf32> to vector<7x2x1xf32>
    %792 = vector.extract_strided_slice %772 {offsets = [1, 0, 0], sizes = [7, 2, 1], strides = [1, 1, 1]} : vector<8x2x1xf32> to vector<7x2x1xf32>
    %793 = arith.addf %790, %792 : vector<7x2x1xf32>
    %794 = arith.mulf %791, %793 : vector<7x2x1xf32>
    %cst_383 = arith.constant dense<0.000000e+00> : vector<2x1xf32>
    %795 = vector.multi_reduction <add>, %794, %cst_383 [0] : vector<7x2x1xf32> to vector<2x1xf32>
    %796 = arith.addf %781, %795 : vector<2x1xf32>
    %797 = vector.extract_strided_slice %769 {offsets = [0, 0, 0], sizes = [7, 2, 8], strides = [1, 1, 1]} : vector<8x2x8xf32> to vector<7x2x8xf32>
    %798 = vector.extract_strided_slice %763 {offsets = [0, 0, 0], sizes = [7, 2, 1], strides = [1, 1, 1]} : vector<8x2x1xf32> to vector<7x2x1xf32>
    %799 = vector.extract_strided_slice %763 {offsets = [1, 0, 0], sizes = [7, 2, 1], strides = [1, 1, 1]} : vector<8x2x1xf32> to vector<7x2x1xf32>
    %800 = arith.subf %798, %799 : vector<7x2x1xf32>
    %801 = vector.broadcast %800 : vector<7x2x1xf32> to vector<7x2x8xf32>
    %802 = arith.mulf %797, %801 : vector<7x2x8xf32>
    %cst_384 = arith.constant dense<0.000000e+00> : vector<2x8xf32>
    %803 = vector.multi_reduction <add>, %802, %cst_384 [0] : vector<7x2x8xf32> to vector<2x8xf32>
    %804 = vector.extract_strided_slice %769 {offsets = [7, 0, 0], sizes = [1, 2, 8], strides = [1, 1, 1]} : vector<8x2x8xf32> to vector<1x2x8xf32>
    %805 = vector.shape_cast %804 : vector<1x2x8xf32> to vector<2x8xf32>
    %806 = vector.extract_strided_slice %763 {offsets = [7, 0, 0], sizes = [1, 2, 1], strides = [1, 1, 1]} : vector<8x2x1xf32> to vector<1x2x1xf32>
    %807 = vector.shape_cast %806 : vector<1x2x1xf32> to vector<2x1xf32>
    %808 = vector.broadcast %807 : vector<2x1xf32> to vector<2x8xf32>
    %809 = arith.mulf %805, %808 : vector<2x8xf32>
    %810 = arith.addf %803, %809 : vector<2x8xf32>
    %811 = vector.broadcast %762 : vector<1x8xf32> to vector<2x8xf32>
    %812 = arith.mulf %810, %811 : vector<2x8xf32>
    %cst_385 = arith.constant dense<0.000000e+00> : vector<2xf32>
    %813 = vector.multi_reduction <add>, %812, %cst_385 [1] : vector<2x8xf32> to vector<2xf32>
    %814 = vector.shape_cast %813 : vector<2xf32> to vector<2x1xf32>
    %815 = arith.addf %796, %814 : vector<2x1xf32>
    %816 = vector.extract_strided_slice %759 {offsets = [0, 0, 0], sizes = [1, 2, 8], strides = [1, 1, 1]} : vector<8x2x8xf32> to vector<1x2x8xf32>
    %817 = vector.shape_cast %816 : vector<1x2x8xf32> to vector<2x8xf32>
    %818 = vector.broadcast %761 : vector<1x8xf32> to vector<2x8xf32>
    %819 = arith.addf %818, %817 : vector<2x8xf32>
    %c0_i32_386 = arith.constant 0 : i32
    %820 = vector.broadcast %c0_i32_386 : i32 to vector<2x8xi32>
    %c0_387 = arith.constant 0 : index
    %c0_388 = arith.constant 0 : index
    %c0_389 = arith.constant 0 : index
    %821 = vector.load %arg23[%c0_387, %c0_388, %c0_389] : memref<8x2x8xi32, #tpu.memory_space<vmem>>, vector<1x2x8xi32>
    %822 = vector.shape_cast %821 : vector<1x2x8xi32> to vector<2x8xi32>
    %823 = vector.shape_cast %820 : vector<2x8xi32> to vector<1x2x8xi32>
    tpu.vector_store %arg23[%c0_387, %c0_388, %c0_389], %823 {strides = array<i32>} : memref<8x2x8xi32, #tpu.memory_space<vmem>>, vector<1x2x8xi32>,
    %c0_390 = arith.constant 0 : index
    %c0_391 = arith.constant 0 : index
    %824 = vector.load %arg15[%c0_390, %c0_391] : memref<8x8xf32, #tpu.memory_space<vmem>>, vector<8x8xf32>
    %825 = vector.shape_cast %824 : vector<8x8xf32> to vector<1x8x8xf32>
    %826 = tpu.iota {dimensions = array<i32: 2>} : vector<2x8x8xi32>
    %c1_i32_392 = arith.constant 1 : i32
    %827 = arith.index_cast %c1_i32_392 : i32 to index
    %c0_393 = arith.constant 0 : index
    %c0_394 = arith.constant 0 : index
    %828 = vector.load %arg22[%827, %c0_393, %c0_394] : memref<8x2x8xf32, #tpu.memory_space<vmem>>, vector<1x2x8xf32>
    %829 = vector.shape_cast %828 : vector<1x2x8xf32> to vector<2x8xf32>
    %830 = arith.index_cast %c1_i32_392 : i32 to index
    %c0_395 = arith.constant 0 : index
    %c0_396 = arith.constant 0 : index
    %831 = vector.load %arg2[%830, %c0_395, %c0_396] : memref<8x2x1xf32, #tpu.memory_space<vmem>>, vector<1x2x1xf32>
    %832 = vector.shape_cast %831 : vector<1x2x1xf32> to vector<2x1xf32>
    %833 = vector.shape_cast %819 : vector<2x8xf32> to vector<2x1x8xf32>
    %834 = vector.broadcast %833 : vector<2x1x8xf32> to vector<2x8x8xf32>
    %835 = vector.broadcast %825 : vector<1x8x8xf32> to vector<2x8x8xf32>
    %836 = arith.addf %834, %835 : vector<2x8x8xf32>
    %cst_397 = arith.constant dense<0xFF800000> : vector<2x8xf32>
    %837 = vector.multi_reduction <maximumf>, %836, %cst_397 [2] : vector<2x8x8xf32> to vector<2x8xf32>
    %838 = vector.shape_cast %837 : vector<2x8xf32> to vector<2x8x1xf32>
    %839 = vector.broadcast %838 : vector<2x8x1xf32> to vector<2x8x8xf32>
    %840 = arith.subf %836, %839 : vector<2x8x8xf32>
    %841 = math.exp %840 : vector<2x8x8xf32>
    %cst_398 = arith.constant dense<0.000000e+00> : vector<2x8xf32>
    %842 = vector.multi_reduction <add>, %841, %cst_398 [2] : vector<2x8x8xf32> to vector<2x8xf32>
    %843 = math.log %842 : vector<2x8xf32>
    %844 = vector.shape_cast %838 : vector<2x8x1xf32> to vector<2x8xf32>
    %845 = arith.addf %843, %844 : vector<2x8xf32>
    %846 = arith.addf %845, %829 : vector<2x8xf32>
    %847 = vector.shape_cast %819 : vector<2x8xf32> to vector<2x1x8xf32>
    %848 = vector.broadcast %847 : vector<2x1x8xf32> to vector<2x8x8xf32>
    %849 = vector.broadcast %825 : vector<1x8x8xf32> to vector<2x8x8xf32>
    %850 = arith.addf %848, %849 : vector<2x8x8xf32>
    %cst_399 = arith.constant dense<0xFF800000> : vector<2x8xf32>
    %851 = vector.multi_reduction <maximumf>, %850, %cst_399 [2] : vector<2x8x8xf32> to vector<2x8xf32>
    %852 = vector.shape_cast %851 : vector<2x8xf32> to vector<2x8x1xf32>
    %853 = vector.broadcast %852 : vector<2x8x1xf32> to vector<2x8x8xf32>
    %854 = arith.cmpf oge, %850, %853 : vector<2x8x8xf32>
    %c8_i32_400 = arith.constant 8 : i32
    %855 = vector.broadcast %c8_i32_400 : i32 to vector<2x8x8xi32>
    %856 = arith.select %854, %826, %855 : vector<2x8x8xi1>, vector<2x8x8xi32>
    %cst_401 = arith.constant dense<2147483647> : vector<2x8xi32>
    %857 = vector.multi_reduction <minsi>, %856, %cst_401 [2] : vector<2x8x8xi32> to vector<2x8xi32>
    %858 = vector.shape_cast %852 : vector<2x8x1xf32> to vector<2x8xf32>
    %859 = arith.addf %858, %829 : vector<2x8xf32>
    %cst_402 = arith.constant 0.000000e+00 : f32
    %860 = vector.broadcast %cst_402 : f32 to vector<2x1xf32>
    %861 = arith.cmpf ogt, %832, %860 : vector<2x1xf32>
    %862 = vector.shape_cast %861 : vector<2x1xi1> to vector<2x1xi1>
    %863 = vector.broadcast %862 : vector<2x1xi1> to vector<2x8xi1>
    %864 = arith.select %863, %846, %819 : vector<2x8xi1>, vector<2x8xf32>
    %cst_403 = arith.constant 0.000000e+00 : f32
    %865 = vector.broadcast %cst_403 : f32 to vector<2x1xf32>
    %866 = arith.cmpf ogt, %832, %865 : vector<2x1xf32>
    %867 = vector.shape_cast %866 : vector<2x1xi1> to vector<2x1xi1>
    %868 = vector.broadcast %867 : vector<2x1xi1> to vector<2x8xi1>
    %869 = arith.select %868, %859, %819 : vector<2x8xi1>, vector<2x8xf32>
    %870 = arith.index_cast %c1_i32_392 : i32 to index
    %c0_404 = arith.constant 0 : index
    %c0_405 = arith.constant 0 : index
    %871 = vector.load %arg23[%870, %c0_404, %c0_405] : memref<8x2x8xi32, #tpu.memory_space<vmem>>, vector<1x2x8xi32>
    %872 = vector.shape_cast %871 : vector<1x2x8xi32> to vector<2x8xi32>
    %873 = vector.shape_cast %857 : vector<2x8xi32> to vector<1x2x8xi32>
    tpu.vector_store %arg23[%870, %c0_404, %c0_405], %873 {strides = array<i32>} : memref<8x2x8xi32, #tpu.memory_space<vmem>>, vector<1x2x8xi32>,
    %c2_i32_406 = arith.constant 2 : i32
    %874 = arith.index_cast %c2_i32_406 : i32 to index
    %c0_407 = arith.constant 0 : index
    %c0_408 = arith.constant 0 : index
    %875 = vector.load %arg22[%874, %c0_407, %c0_408] : memref<8x2x8xf32, #tpu.memory_space<vmem>>, vector<1x2x8xf32>
    %876 = vector.shape_cast %875 : vector<1x2x8xf32> to vector<2x8xf32>
    %877 = arith.index_cast %c2_i32_406 : i32 to index
    %c0_409 = arith.constant 0 : index
    %c0_410 = arith.constant 0 : index
    %878 = vector.load %arg2[%877, %c0_409, %c0_410] : memref<8x2x1xf32, #tpu.memory_space<vmem>>, vector<1x2x1xf32>
    %879 = vector.shape_cast %878 : vector<1x2x1xf32> to vector<2x1xf32>
    %880 = vector.shape_cast %864 : vector<2x8xf32> to vector<2x1x8xf32>
    %881 = vector.broadcast %880 : vector<2x1x8xf32> to vector<2x8x8xf32>
    %882 = vector.broadcast %825 : vector<1x8x8xf32> to vector<2x8x8xf32>
    %883 = arith.addf %881, %882 : vector<2x8x8xf32>
    %cst_411 = arith.constant dense<0xFF800000> : vector<2x8xf32>
    %884 = vector.multi_reduction <maximumf>, %883, %cst_411 [2] : vector<2x8x8xf32> to vector<2x8xf32>
    %885 = vector.shape_cast %884 : vector<2x8xf32> to vector<2x8x1xf32>
    %886 = vector.broadcast %885 : vector<2x8x1xf32> to vector<2x8x8xf32>
    %887 = arith.subf %883, %886 : vector<2x8x8xf32>
    %888 = math.exp %887 : vector<2x8x8xf32>
    %cst_412 = arith.constant dense<0.000000e+00> : vector<2x8xf32>
    %889 = vector.multi_reduction <add>, %888, %cst_412 [2] : vector<2x8x8xf32> to vector<2x8xf32>
    %890 = math.log %889 : vector<2x8xf32>
    %891 = vector.shape_cast %885 : vector<2x8x1xf32> to vector<2x8xf32>
    %892 = arith.addf %890, %891 : vector<2x8xf32>
    %893 = arith.addf %892, %876 : vector<2x8xf32>
    %894 = vector.shape_cast %869 : vector<2x8xf32> to vector<2x1x8xf32>
    %895 = vector.broadcast %894 : vector<2x1x8xf32> to vector<2x8x8xf32>
    %896 = vector.broadcast %825 : vector<1x8x8xf32> to vector<2x8x8xf32>
    %897 = arith.addf %895, %896 : vector<2x8x8xf32>
    %cst_413 = arith.constant dense<0xFF800000> : vector<2x8xf32>
    %898 = vector.multi_reduction <maximumf>, %897, %cst_413 [2] : vector<2x8x8xf32> to vector<2x8xf32>
    %899 = vector.shape_cast %898 : vector<2x8xf32> to vector<2x8x1xf32>
    %900 = vector.broadcast %899 : vector<2x8x1xf32> to vector<2x8x8xf32>
    %901 = arith.cmpf oge, %897, %900 : vector<2x8x8xf32>
    %c8_i32_414 = arith.constant 8 : i32
    %902 = vector.broadcast %c8_i32_414 : i32 to vector<2x8x8xi32>
    %903 = arith.select %901, %826, %902 : vector<2x8x8xi1>, vector<2x8x8xi32>
    %cst_415 = arith.constant dense<2147483647> : vector<2x8xi32>
    %904 = vector.multi_reduction <minsi>, %903, %cst_415 [2] : vector<2x8x8xi32> to vector<2x8xi32>
    %905 = vector.shape_cast %899 : vector<2x8x1xf32> to vector<2x8xf32>
    %906 = arith.addf %905, %876 : vector<2x8xf32>
    %cst_416 = arith.constant 0.000000e+00 : f32
    %907 = vector.broadcast %cst_416 : f32 to vector<2x1xf32>
    %908 = arith.cmpf ogt, %879, %907 : vector<2x1xf32>
    %909 = vector.shape_cast %908 : vector<2x1xi1> to vector<2x1xi1>
    %910 = vector.broadcast %909 : vector<2x1xi1> to vector<2x8xi1>
    %911 = arith.select %910, %893, %864 : vector<2x8xi1>, vector<2x8xf32>
    %cst_417 = arith.constant 0.000000e+00 : f32
    %912 = vector.broadcast %cst_417 : f32 to vector<2x1xf32>
    %913 = arith.cmpf ogt, %879, %912 : vector<2x1xf32>
    %914 = vector.shape_cast %913 : vector<2x1xi1> to vector<2x1xi1>
    %915 = vector.broadcast %914 : vector<2x1xi1> to vector<2x8xi1>
    %916 = arith.select %915, %906, %869 : vector<2x8xi1>, vector<2x8xf32>
    %917 = arith.index_cast %c2_i32_406 : i32 to index
    %c0_418 = arith.constant 0 : index
    %c0_419 = arith.constant 0 : index
    %918 = vector.load %arg23[%917, %c0_418, %c0_419] : memref<8x2x8xi32, #tpu.memory_space<vmem>>, vector<1x2x8xi32>
    %919 = vector.shape_cast %918 : vector<1x2x8xi32> to vector<2x8xi32>
    %920 = vector.shape_cast %904 : vector<2x8xi32> to vector<1x2x8xi32>
    tpu.vector_store %arg23[%917, %c0_418, %c0_419], %920 {strides = array<i32>} : memref<8x2x8xi32, #tpu.memory_space<vmem>>, vector<1x2x8xi32>,
    %c3_i32_420 = arith.constant 3 : i32
    %921 = arith.index_cast %c3_i32_420 : i32 to index
    %c0_421 = arith.constant 0 : index
    %c0_422 = arith.constant 0 : index
    %922 = vector.load %arg22[%921, %c0_421, %c0_422] : memref<8x2x8xf32, #tpu.memory_space<vmem>>, vector<1x2x8xf32>
    %923 = vector.shape_cast %922 : vector<1x2x8xf32> to vector<2x8xf32>
    %924 = arith.index_cast %c3_i32_420 : i32 to index
    %c0_423 = arith.constant 0 : index
    %c0_424 = arith.constant 0 : index
    %925 = vector.load %arg2[%924, %c0_423, %c0_424] : memref<8x2x1xf32, #tpu.memory_space<vmem>>, vector<1x2x1xf32>
    %926 = vector.shape_cast %925 : vector<1x2x1xf32> to vector<2x1xf32>
    %927 = vector.shape_cast %911 : vector<2x8xf32> to vector<2x1x8xf32>
    %928 = vector.broadcast %927 : vector<2x1x8xf32> to vector<2x8x8xf32>
    %929 = vector.broadcast %825 : vector<1x8x8xf32> to vector<2x8x8xf32>
    %930 = arith.addf %928, %929 : vector<2x8x8xf32>
    %cst_425 = arith.constant dense<0xFF800000> : vector<2x8xf32>
    %931 = vector.multi_reduction <maximumf>, %930, %cst_425 [2] : vector<2x8x8xf32> to vector<2x8xf32>
    %932 = vector.shape_cast %931 : vector<2x8xf32> to vector<2x8x1xf32>
    %933 = vector.broadcast %932 : vector<2x8x1xf32> to vector<2x8x8xf32>
    %934 = arith.subf %930, %933 : vector<2x8x8xf32>
    %935 = math.exp %934 : vector<2x8x8xf32>
    %cst_426 = arith.constant dense<0.000000e+00> : vector<2x8xf32>
    %936 = vector.multi_reduction <add>, %935, %cst_426 [2] : vector<2x8x8xf32> to vector<2x8xf32>
    %937 = math.log %936 : vector<2x8xf32>
    %938 = vector.shape_cast %932 : vector<2x8x1xf32> to vector<2x8xf32>
    %939 = arith.addf %937, %938 : vector<2x8xf32>
    %940 = arith.addf %939, %923 : vector<2x8xf32>
    %941 = vector.shape_cast %916 : vector<2x8xf32> to vector<2x1x8xf32>
    %942 = vector.broadcast %941 : vector<2x1x8xf32> to vector<2x8x8xf32>
    %943 = vector.broadcast %825 : vector<1x8x8xf32> to vector<2x8x8xf32>
    %944 = arith.addf %942, %943 : vector<2x8x8xf32>
    %cst_427 = arith.constant dense<0xFF800000> : vector<2x8xf32>
    %945 = vector.multi_reduction <maximumf>, %944, %cst_427 [2] : vector<2x8x8xf32> to vector<2x8xf32>
    %946 = vector.shape_cast %945 : vector<2x8xf32> to vector<2x8x1xf32>
    %947 = vector.broadcast %946 : vector<2x8x1xf32> to vector<2x8x8xf32>
    %948 = arith.cmpf oge, %944, %947 : vector<2x8x8xf32>
    %c8_i32_428 = arith.constant 8 : i32
    %949 = vector.broadcast %c8_i32_428 : i32 to vector<2x8x8xi32>
    %950 = arith.select %948, %826, %949 : vector<2x8x8xi1>, vector<2x8x8xi32>
    %cst_429 = arith.constant dense<2147483647> : vector<2x8xi32>
    %951 = vector.multi_reduction <minsi>, %950, %cst_429 [2] : vector<2x8x8xi32> to vector<2x8xi32>
    %952 = vector.shape_cast %946 : vector<2x8x1xf32> to vector<2x8xf32>
    %953 = arith.addf %952, %923 : vector<2x8xf32>
    %cst_430 = arith.constant 0.000000e+00 : f32
    %954 = vector.broadcast %cst_430 : f32 to vector<2x1xf32>
    %955 = arith.cmpf ogt, %926, %954 : vector<2x1xf32>
    %956 = vector.shape_cast %955 : vector<2x1xi1> to vector<2x1xi1>
    %957 = vector.broadcast %956 : vector<2x1xi1> to vector<2x8xi1>
    %958 = arith.select %957, %940, %911 : vector<2x8xi1>, vector<2x8xf32>
    %cst_431 = arith.constant 0.000000e+00 : f32
    %959 = vector.broadcast %cst_431 : f32 to vector<2x1xf32>
    %960 = arith.cmpf ogt, %926, %959 : vector<2x1xf32>
    %961 = vector.shape_cast %960 : vector<2x1xi1> to vector<2x1xi1>
    %962 = vector.broadcast %961 : vector<2x1xi1> to vector<2x8xi1>
    %963 = arith.select %962, %953, %916 : vector<2x8xi1>, vector<2x8xf32>
    %964 = arith.index_cast %c3_i32_420 : i32 to index
    %c0_432 = arith.constant 0 : index
    %c0_433 = arith.constant 0 : index
    %965 = vector.load %arg23[%964, %c0_432, %c0_433] : memref<8x2x8xi32, #tpu.memory_space<vmem>>, vector<1x2x8xi32>
    %966 = vector.shape_cast %965 : vector<1x2x8xi32> to vector<2x8xi32>
    %967 = vector.shape_cast %951 : vector<2x8xi32> to vector<1x2x8xi32>
    tpu.vector_store %arg23[%964, %c0_432, %c0_433], %967 {strides = array<i32>} : memref<8x2x8xi32, #tpu.memory_space<vmem>>, vector<1x2x8xi32>,
    %c4_i32_434 = arith.constant 4 : i32
    %968 = arith.index_cast %c4_i32_434 : i32 to index
    %c0_435 = arith.constant 0 : index
    %c0_436 = arith.constant 0 : index
    %969 = vector.load %arg22[%968, %c0_435, %c0_436] : memref<8x2x8xf32, #tpu.memory_space<vmem>>, vector<1x2x8xf32>
    %970 = vector.shape_cast %969 : vector<1x2x8xf32> to vector<2x8xf32>
    %971 = arith.index_cast %c4_i32_434 : i32 to index
    %c0_437 = arith.constant 0 : index
    %c0_438 = arith.constant 0 : index
    %972 = vector.load %arg2[%971, %c0_437, %c0_438] : memref<8x2x1xf32, #tpu.memory_space<vmem>>, vector<1x2x1xf32>
    %973 = vector.shape_cast %972 : vector<1x2x1xf32> to vector<2x1xf32>
    %974 = vector.shape_cast %958 : vector<2x8xf32> to vector<2x1x8xf32>
    %975 = vector.broadcast %974 : vector<2x1x8xf32> to vector<2x8x8xf32>
    %976 = vector.broadcast %825 : vector<1x8x8xf32> to vector<2x8x8xf32>
    %977 = arith.addf %975, %976 : vector<2x8x8xf32>
    %cst_439 = arith.constant dense<0xFF800000> : vector<2x8xf32>
    %978 = vector.multi_reduction <maximumf>, %977, %cst_439 [2] : vector<2x8x8xf32> to vector<2x8xf32>
    %979 = vector.shape_cast %978 : vector<2x8xf32> to vector<2x8x1xf32>
    %980 = vector.broadcast %979 : vector<2x8x1xf32> to vector<2x8x8xf32>
    %981 = arith.subf %977, %980 : vector<2x8x8xf32>
    %982 = math.exp %981 : vector<2x8x8xf32>
    %cst_440 = arith.constant dense<0.000000e+00> : vector<2x8xf32>
    %983 = vector.multi_reduction <add>, %982, %cst_440 [2] : vector<2x8x8xf32> to vector<2x8xf32>
    %984 = math.log %983 : vector<2x8xf32>
    %985 = vector.shape_cast %979 : vector<2x8x1xf32> to vector<2x8xf32>
    %986 = arith.addf %984, %985 : vector<2x8xf32>
    %987 = arith.addf %986, %970 : vector<2x8xf32>
    %988 = vector.shape_cast %963 : vector<2x8xf32> to vector<2x1x8xf32>
    %989 = vector.broadcast %988 : vector<2x1x8xf32> to vector<2x8x8xf32>
    %990 = vector.broadcast %825 : vector<1x8x8xf32> to vector<2x8x8xf32>
    %991 = arith.addf %989, %990 : vector<2x8x8xf32>
    %cst_441 = arith.constant dense<0xFF800000> : vector<2x8xf32>
    %992 = vector.multi_reduction <maximumf>, %991, %cst_441 [2] : vector<2x8x8xf32> to vector<2x8xf32>
    %993 = vector.shape_cast %992 : vector<2x8xf32> to vector<2x8x1xf32>
    %994 = vector.broadcast %993 : vector<2x8x1xf32> to vector<2x8x8xf32>
    %995 = arith.cmpf oge, %991, %994 : vector<2x8x8xf32>
    %c8_i32_442 = arith.constant 8 : i32
    %996 = vector.broadcast %c8_i32_442 : i32 to vector<2x8x8xi32>
    %997 = arith.select %995, %826, %996 : vector<2x8x8xi1>, vector<2x8x8xi32>
    %cst_443 = arith.constant dense<2147483647> : vector<2x8xi32>
    %998 = vector.multi_reduction <minsi>, %997, %cst_443 [2] : vector<2x8x8xi32> to vector<2x8xi32>
    %999 = vector.shape_cast %993 : vector<2x8x1xf32> to vector<2x8xf32>
    %1000 = arith.addf %999, %970 : vector<2x8xf32>
    %cst_444 = arith.constant 0.000000e+00 : f32
    %1001 = vector.broadcast %cst_444 : f32 to vector<2x1xf32>
    %1002 = arith.cmpf ogt, %973, %1001 : vector<2x1xf32>
    %1003 = vector.shape_cast %1002 : vector<2x1xi1> to vector<2x1xi1>
    %1004 = vector.broadcast %1003 : vector<2x1xi1> to vector<2x8xi1>
    %1005 = arith.select %1004, %987, %958 : vector<2x8xi1>, vector<2x8xf32>
    %cst_445 = arith.constant 0.000000e+00 : f32
    %1006 = vector.broadcast %cst_445 : f32 to vector<2x1xf32>
    %1007 = arith.cmpf ogt, %973, %1006 : vector<2x1xf32>
    %1008 = vector.shape_cast %1007 : vector<2x1xi1> to vector<2x1xi1>
    %1009 = vector.broadcast %1008 : vector<2x1xi1> to vector<2x8xi1>
    %1010 = arith.select %1009, %1000, %963 : vector<2x8xi1>, vector<2x8xf32>
    %1011 = arith.index_cast %c4_i32_434 : i32 to index
    %c0_446 = arith.constant 0 : index
    %c0_447 = arith.constant 0 : index
    %1012 = vector.load %arg23[%1011, %c0_446, %c0_447] : memref<8x2x8xi32, #tpu.memory_space<vmem>>, vector<1x2x8xi32>
    %1013 = vector.shape_cast %1012 : vector<1x2x8xi32> to vector<2x8xi32>
    %1014 = vector.shape_cast %998 : vector<2x8xi32> to vector<1x2x8xi32>
    tpu.vector_store %arg23[%1011, %c0_446, %c0_447], %1014 {strides = array<i32>} : memref<8x2x8xi32, #tpu.memory_space<vmem>>, vector<1x2x8xi32>,
    %c5_i32_448 = arith.constant 5 : i32
    %1015 = arith.index_cast %c5_i32_448 : i32 to index
    %c0_449 = arith.constant 0 : index
    %c0_450 = arith.constant 0 : index
    %1016 = vector.load %arg22[%1015, %c0_449, %c0_450] : memref<8x2x8xf32, #tpu.memory_space<vmem>>, vector<1x2x8xf32>
    %1017 = vector.shape_cast %1016 : vector<1x2x8xf32> to vector<2x8xf32>
    %1018 = arith.index_cast %c5_i32_448 : i32 to index
    %c0_451 = arith.constant 0 : index
    %c0_452 = arith.constant 0 : index
    %1019 = vector.load %arg2[%1018, %c0_451, %c0_452] : memref<8x2x1xf32, #tpu.memory_space<vmem>>, vector<1x2x1xf32>
    %1020 = vector.shape_cast %1019 : vector<1x2x1xf32> to vector<2x1xf32>
    %1021 = vector.shape_cast %1005 : vector<2x8xf32> to vector<2x1x8xf32>
    %1022 = vector.broadcast %1021 : vector<2x1x8xf32> to vector<2x8x8xf32>
    %1023 = vector.broadcast %825 : vector<1x8x8xf32> to vector<2x8x8xf32>
    %1024 = arith.addf %1022, %1023 : vector<2x8x8xf32>
    %cst_453 = arith.constant dense<0xFF800000> : vector<2x8xf32>
    %1025 = vector.multi_reduction <maximumf>, %1024, %cst_453 [2] : vector<2x8x8xf32> to vector<2x8xf32>
    %1026 = vector.shape_cast %1025 : vector<2x8xf32> to vector<2x8x1xf32>
    %1027 = vector.broadcast %1026 : vector<2x8x1xf32> to vector<2x8x8xf32>
    %1028 = arith.subf %1024, %1027 : vector<2x8x8xf32>
    %1029 = math.exp %1028 : vector<2x8x8xf32>
    %cst_454 = arith.constant dense<0.000000e+00> : vector<2x8xf32>
    %1030 = vector.multi_reduction <add>, %1029, %cst_454 [2] : vector<2x8x8xf32> to vector<2x8xf32>
    %1031 = math.log %1030 : vector<2x8xf32>
    %1032 = vector.shape_cast %1026 : vector<2x8x1xf32> to vector<2x8xf32>
    %1033 = arith.addf %1031, %1032 : vector<2x8xf32>
    %1034 = arith.addf %1033, %1017 : vector<2x8xf32>
    %1035 = vector.shape_cast %1010 : vector<2x8xf32> to vector<2x1x8xf32>
    %1036 = vector.broadcast %1035 : vector<2x1x8xf32> to vector<2x8x8xf32>
    %1037 = vector.broadcast %825 : vector<1x8x8xf32> to vector<2x8x8xf32>
    %1038 = arith.addf %1036, %1037 : vector<2x8x8xf32>
    %cst_455 = arith.constant dense<0xFF800000> : vector<2x8xf32>
    %1039 = vector.multi_reduction <maximumf>, %1038, %cst_455 [2] : vector<2x8x8xf32> to vector<2x8xf32>
    %1040 = vector.shape_cast %1039 : vector<2x8xf32> to vector<2x8x1xf32>
    %1041 = vector.broadcast %1040 : vector<2x8x1xf32> to vector<2x8x8xf32>
    %1042 = arith.cmpf oge, %1038, %1041 : vector<2x8x8xf32>
    %c8_i32_456 = arith.constant 8 : i32
    %1043 = vector.broadcast %c8_i32_456 : i32 to vector<2x8x8xi32>
    %1044 = arith.select %1042, %826, %1043 : vector<2x8x8xi1>, vector<2x8x8xi32>
    %cst_457 = arith.constant dense<2147483647> : vector<2x8xi32>
    %1045 = vector.multi_reduction <minsi>, %1044, %cst_457 [2] : vector<2x8x8xi32> to vector<2x8xi32>
    %1046 = vector.shape_cast %1040 : vector<2x8x1xf32> to vector<2x8xf32>
    %1047 = arith.addf %1046, %1017 : vector<2x8xf32>
    %cst_458 = arith.constant 0.000000e+00 : f32
    %1048 = vector.broadcast %cst_458 : f32 to vector<2x1xf32>
    %1049 = arith.cmpf ogt, %1020, %1048 : vector<2x1xf32>
    %1050 = vector.shape_cast %1049 : vector<2x1xi1> to vector<2x1xi1>
    %1051 = vector.broadcast %1050 : vector<2x1xi1> to vector<2x8xi1>
    %1052 = arith.select %1051, %1034, %1005 : vector<2x8xi1>, vector<2x8xf32>
    %cst_459 = arith.constant 0.000000e+00 : f32
    %1053 = vector.broadcast %cst_459 : f32 to vector<2x1xf32>
    %1054 = arith.cmpf ogt, %1020, %1053 : vector<2x1xf32>
    %1055 = vector.shape_cast %1054 : vector<2x1xi1> to vector<2x1xi1>
    %1056 = vector.broadcast %1055 : vector<2x1xi1> to vector<2x8xi1>
    %1057 = arith.select %1056, %1047, %1010 : vector<2x8xi1>, vector<2x8xf32>
    %1058 = arith.index_cast %c5_i32_448 : i32 to index
    %c0_460 = arith.constant 0 : index
    %c0_461 = arith.constant 0 : index
    %1059 = vector.load %arg23[%1058, %c0_460, %c0_461] : memref<8x2x8xi32, #tpu.memory_space<vmem>>, vector<1x2x8xi32>
    %1060 = vector.shape_cast %1059 : vector<1x2x8xi32> to vector<2x8xi32>
    %1061 = vector.shape_cast %1045 : vector<2x8xi32> to vector<1x2x8xi32>
    tpu.vector_store %arg23[%1058, %c0_460, %c0_461], %1061 {strides = array<i32>} : memref<8x2x8xi32, #tpu.memory_space<vmem>>, vector<1x2x8xi32>,
    %c6_i32_462 = arith.constant 6 : i32
    %1062 = arith.index_cast %c6_i32_462 : i32 to index
    %c0_463 = arith.constant 0 : index
    %c0_464 = arith.constant 0 : index
    %1063 = vector.load %arg22[%1062, %c0_463, %c0_464] : memref<8x2x8xf32, #tpu.memory_space<vmem>>, vector<1x2x8xf32>
    %1064 = vector.shape_cast %1063 : vector<1x2x8xf32> to vector<2x8xf32>
    %1065 = arith.index_cast %c6_i32_462 : i32 to index
    %c0_465 = arith.constant 0 : index
    %c0_466 = arith.constant 0 : index
    %1066 = vector.load %arg2[%1065, %c0_465, %c0_466] : memref<8x2x1xf32, #tpu.memory_space<vmem>>, vector<1x2x1xf32>
    %1067 = vector.shape_cast %1066 : vector<1x2x1xf32> to vector<2x1xf32>
    %1068 = vector.shape_cast %1052 : vector<2x8xf32> to vector<2x1x8xf32>
    %1069 = vector.broadcast %1068 : vector<2x1x8xf32> to vector<2x8x8xf32>
    %1070 = vector.broadcast %825 : vector<1x8x8xf32> to vector<2x8x8xf32>
    %1071 = arith.addf %1069, %1070 : vector<2x8x8xf32>
    %cst_467 = arith.constant dense<0xFF800000> : vector<2x8xf32>
    %1072 = vector.multi_reduction <maximumf>, %1071, %cst_467 [2] : vector<2x8x8xf32> to vector<2x8xf32>
    %1073 = vector.shape_cast %1072 : vector<2x8xf32> to vector<2x8x1xf32>
    %1074 = vector.broadcast %1073 : vector<2x8x1xf32> to vector<2x8x8xf32>
    %1075 = arith.subf %1071, %1074 : vector<2x8x8xf32>
    %1076 = math.exp %1075 : vector<2x8x8xf32>
    %cst_468 = arith.constant dense<0.000000e+00> : vector<2x8xf32>
    %1077 = vector.multi_reduction <add>, %1076, %cst_468 [2] : vector<2x8x8xf32> to vector<2x8xf32>
    %1078 = math.log %1077 : vector<2x8xf32>
    %1079 = vector.shape_cast %1073 : vector<2x8x1xf32> to vector<2x8xf32>
    %1080 = arith.addf %1078, %1079 : vector<2x8xf32>
    %1081 = arith.addf %1080, %1064 : vector<2x8xf32>
    %1082 = vector.shape_cast %1057 : vector<2x8xf32> to vector<2x1x8xf32>
    %1083 = vector.broadcast %1082 : vector<2x1x8xf32> to vector<2x8x8xf32>
    %1084 = vector.broadcast %825 : vector<1x8x8xf32> to vector<2x8x8xf32>
    %1085 = arith.addf %1083, %1084 : vector<2x8x8xf32>
    %cst_469 = arith.constant dense<0xFF800000> : vector<2x8xf32>
    %1086 = vector.multi_reduction <maximumf>, %1085, %cst_469 [2] : vector<2x8x8xf32> to vector<2x8xf32>
    %1087 = vector.shape_cast %1086 : vector<2x8xf32> to vector<2x8x1xf32>
    %1088 = vector.broadcast %1087 : vector<2x8x1xf32> to vector<2x8x8xf32>
    %1089 = arith.cmpf oge, %1085, %1088 : vector<2x8x8xf32>
    %c8_i32_470 = arith.constant 8 : i32
    %1090 = vector.broadcast %c8_i32_470 : i32 to vector<2x8x8xi32>
    %1091 = arith.select %1089, %826, %1090 : vector<2x8x8xi1>, vector<2x8x8xi32>
    %cst_471 = arith.constant dense<2147483647> : vector<2x8xi32>
    %1092 = vector.multi_reduction <minsi>, %1091, %cst_471 [2] : vector<2x8x8xi32> to vector<2x8xi32>
    %1093 = vector.shape_cast %1087 : vector<2x8x1xf32> to vector<2x8xf32>
    %1094 = arith.addf %1093, %1064 : vector<2x8xf32>
    %cst_472 = arith.constant 0.000000e+00 : f32
    %1095 = vector.broadcast %cst_472 : f32 to vector<2x1xf32>
    %1096 = arith.cmpf ogt, %1067, %1095 : vector<2x1xf32>
    %1097 = vector.shape_cast %1096 : vector<2x1xi1> to vector<2x1xi1>
    %1098 = vector.broadcast %1097 : vector<2x1xi1> to vector<2x8xi1>
    %1099 = arith.select %1098, %1081, %1052 : vector<2x8xi1>, vector<2x8xf32>
    %cst_473 = arith.constant 0.000000e+00 : f32
    %1100 = vector.broadcast %cst_473 : f32 to vector<2x1xf32>
    %1101 = arith.cmpf ogt, %1067, %1100 : vector<2x1xf32>
    %1102 = vector.shape_cast %1101 : vector<2x1xi1> to vector<2x1xi1>
    %1103 = vector.broadcast %1102 : vector<2x1xi1> to vector<2x8xi1>
    %1104 = arith.select %1103, %1094, %1057 : vector<2x8xi1>, vector<2x8xf32>
    %1105 = arith.index_cast %c6_i32_462 : i32 to index
    %c0_474 = arith.constant 0 : index
    %c0_475 = arith.constant 0 : index
    %1106 = vector.load %arg23[%1105, %c0_474, %c0_475] : memref<8x2x8xi32, #tpu.memory_space<vmem>>, vector<1x2x8xi32>
    %1107 = vector.shape_cast %1106 : vector<1x2x8xi32> to vector<2x8xi32>
    %1108 = vector.shape_cast %1092 : vector<2x8xi32> to vector<1x2x8xi32>
    tpu.vector_store %arg23[%1105, %c0_474, %c0_475], %1108 {strides = array<i32>} : memref<8x2x8xi32, #tpu.memory_space<vmem>>, vector<1x2x8xi32>,
    %c7_i32_476 = arith.constant 7 : i32
    %1109 = arith.index_cast %c7_i32_476 : i32 to index
    %c0_477 = arith.constant 0 : index
    %c0_478 = arith.constant 0 : index
    %1110 = vector.load %arg22[%1109, %c0_477, %c0_478] : memref<8x2x8xf32, #tpu.memory_space<vmem>>, vector<1x2x8xf32>
    %1111 = vector.shape_cast %1110 : vector<1x2x8xf32> to vector<2x8xf32>
    %1112 = arith.index_cast %c7_i32_476 : i32 to index
    %c0_479 = arith.constant 0 : index
    %c0_480 = arith.constant 0 : index
    %1113 = vector.load %arg2[%1112, %c0_479, %c0_480] : memref<8x2x1xf32, #tpu.memory_space<vmem>>, vector<1x2x1xf32>
    %1114 = vector.shape_cast %1113 : vector<1x2x1xf32> to vector<2x1xf32>
    %1115 = vector.shape_cast %1099 : vector<2x8xf32> to vector<2x1x8xf32>
    %1116 = vector.broadcast %1115 : vector<2x1x8xf32> to vector<2x8x8xf32>
    %1117 = vector.broadcast %825 : vector<1x8x8xf32> to vector<2x8x8xf32>
    %1118 = arith.addf %1116, %1117 : vector<2x8x8xf32>
    %cst_481 = arith.constant dense<0xFF800000> : vector<2x8xf32>
    %1119 = vector.multi_reduction <maximumf>, %1118, %cst_481 [2] : vector<2x8x8xf32> to vector<2x8xf32>
    %1120 = vector.shape_cast %1119 : vector<2x8xf32> to vector<2x8x1xf32>
    %1121 = vector.broadcast %1120 : vector<2x8x1xf32> to vector<2x8x8xf32>
    %1122 = arith.subf %1118, %1121 : vector<2x8x8xf32>
    %1123 = math.exp %1122 : vector<2x8x8xf32>
    %cst_482 = arith.constant dense<0.000000e+00> : vector<2x8xf32>
    %1124 = vector.multi_reduction <add>, %1123, %cst_482 [2] : vector<2x8x8xf32> to vector<2x8xf32>
    %1125 = math.log %1124 : vector<2x8xf32>
    %1126 = vector.shape_cast %1120 : vector<2x8x1xf32> to vector<2x8xf32>
    %1127 = arith.addf %1125, %1126 : vector<2x8xf32>
    %1128 = arith.addf %1127, %1111 : vector<2x8xf32>
    %1129 = vector.shape_cast %1104 : vector<2x8xf32> to vector<2x1x8xf32>
    %1130 = vector.broadcast %1129 : vector<2x1x8xf32> to vector<2x8x8xf32>
    %1131 = vector.broadcast %825 : vector<1x8x8xf32> to vector<2x8x8xf32>
    %1132 = arith.addf %1130, %1131 : vector<2x8x8xf32>
    %cst_483 = arith.constant dense<0xFF800000> : vector<2x8xf32>
    %1133 = vector.multi_reduction <maximumf>, %1132, %cst_483 [2] : vector<2x8x8xf32> to vector<2x8xf32>
    %1134 = vector.shape_cast %1133 : vector<2x8xf32> to vector<2x8x1xf32>
    %1135 = vector.broadcast %1134 : vector<2x8x1xf32> to vector<2x8x8xf32>
    %1136 = arith.cmpf oge, %1132, %1135 : vector<2x8x8xf32>
    %c8_i32_484 = arith.constant 8 : i32
    %1137 = vector.broadcast %c8_i32_484 : i32 to vector<2x8x8xi32>
    %1138 = arith.select %1136, %826, %1137 : vector<2x8x8xi1>, vector<2x8x8xi32>
    %cst_485 = arith.constant dense<2147483647> : vector<2x8xi32>
    %1139 = vector.multi_reduction <minsi>, %1138, %cst_485 [2] : vector<2x8x8xi32> to vector<2x8xi32>
    %1140 = vector.shape_cast %1134 : vector<2x8x1xf32> to vector<2x8xf32>
    %1141 = arith.addf %1140, %1111 : vector<2x8xf32>
    %cst_486 = arith.constant 0.000000e+00 : f32
    %1142 = vector.broadcast %cst_486 : f32 to vector<2x1xf32>
    %1143 = arith.cmpf ogt, %1114, %1142 : vector<2x1xf32>
    %1144 = vector.shape_cast %1143 : vector<2x1xi1> to vector<2x1xi1>
    %1145 = vector.broadcast %1144 : vector<2x1xi1> to vector<2x8xi1>
    %1146 = arith.select %1145, %1128, %1099 : vector<2x8xi1>, vector<2x8xf32>
    %cst_487 = arith.constant 0.000000e+00 : f32
    %1147 = vector.broadcast %cst_487 : f32 to vector<2x1xf32>
    %1148 = arith.cmpf ogt, %1114, %1147 : vector<2x1xf32>
    %1149 = vector.shape_cast %1148 : vector<2x1xi1> to vector<2x1xi1>
    %1150 = vector.broadcast %1149 : vector<2x1xi1> to vector<2x8xi1>
    %1151 = arith.select %1150, %1141, %1104 : vector<2x8xi1>, vector<2x8xf32>
    %1152 = arith.index_cast %c7_i32_476 : i32 to index
    %c0_488 = arith.constant 0 : index
    %c0_489 = arith.constant 0 : index
    %1153 = vector.load %arg23[%1152, %c0_488, %c0_489] : memref<8x2x8xi32, #tpu.memory_space<vmem>>, vector<1x2x8xi32>
    %1154 = vector.shape_cast %1153 : vector<1x2x8xi32> to vector<2x8xi32>
    %1155 = vector.shape_cast %1139 : vector<2x8xi32> to vector<1x2x8xi32>
    tpu.vector_store %arg23[%1152, %c0_488, %c0_489], %1155 {strides = array<i32>} : memref<8x2x8xi32, #tpu.memory_space<vmem>>, vector<1x2x8xi32>,
    %c7_i32_490 = arith.constant 7 : i32
    %1156 = vector.broadcast %762 : vector<1x8xf32> to vector<2x8xf32>
    %1157 = arith.addf %1146, %1156 : vector<2x8xf32>
    %cst_491 = arith.constant dense<0xFF800000> : vector<2xf32>
    %1158 = vector.multi_reduction <maximumf>, %1157, %cst_491 [1] : vector<2x8xf32> to vector<2xf32>
    %1159 = vector.shape_cast %1158 : vector<2xf32> to vector<2x1xf32>
    %1160 = vector.broadcast %1159 : vector<2x1xf32> to vector<2x8xf32>
    %1161 = arith.subf %1157, %1160 : vector<2x8xf32>
    %1162 = math.exp %1161 : vector<2x8xf32>
    %cst_492 = arith.constant dense<0.000000e+00> : vector<2xf32>
    %1163 = vector.multi_reduction <add>, %1162, %cst_492 [1] : vector<2x8xf32> to vector<2xf32>
    %1164 = vector.shape_cast %1163 : vector<2xf32> to vector<2x1xf32>
    %1165 = math.log %1164 : vector<2x1xf32>
    %1166 = arith.addf %1165, %1159 : vector<2x1xf32>
    %1167 = arith.subf %815, %1166 : vector<2x1xf32>
    %c0_493 = arith.constant 0 : index
    %c0_494 = arith.constant 0 : index
    %1168 = vector.load %arg16[%c0_493, %c0_494] : memref<2x1xf32, #tpu.memory_space<vmem>>, vector<2x1xf32>
    tpu.vector_store %arg16[%c0_493, %c0_494], %1167 {strides = array<i32>} : memref<2x1xf32, #tpu.memory_space<vmem>>, vector<2x1xf32>,
    %1169 = vector.broadcast %762 : vector<1x8xf32> to vector<2x8xf32>
    %1170 = arith.addf %1151, %1169 : vector<2x8xf32>
    %c0_495 = arith.constant 0 : index
    %c0_496 = arith.constant 0 : index
    %1171 = vector.load %arg17[%c0_495, %c0_496] : memref<2x8xf32, #tpu.memory_space<vmem>>, vector<2x8xf32>
    tpu.vector_store %arg17[%c0_495, %c0_496], %1170 {strides = array<i32>} : memref<2x8xf32, #tpu.memory_space<vmem>>, vector<2x8xf32>,
    %c0_497 = arith.constant 0 : index
    %c0_498 = arith.constant 0 : index
    %c0_499 = arith.constant 0 : index
    %1172 = vector.load %arg23[%c0_497, %c0_498, %c0_499] : memref<8x2x8xi32, #tpu.memory_space<vmem>>, vector<8x2x8xi32>
    %c0_500 = arith.constant 0 : index
    %c0_501 = arith.constant 0 : index
    %c0_502 = arith.constant 0 : index
    %1173 = vector.load %arg18[%c0_500, %c0_501, %c0_502] : memref<8x2x8xi32, #tpu.memory_space<vmem>>, vector<8x2x8xi32>
    tpu.vector_store %arg18[%c0_500, %c0_501, %c0_502], %1172 {strides = array<i32>} : memref<8x2x8xi32, #tpu.memory_space<vmem>>, vector<8x2x8xi32>,
    return
  }
  func.func @transform_0(%arg0: i32) -> (i32, i32, i32) {
    %c0_i32 = arith.constant 0 : i32
    %c0_i32_0 = arith.constant 0 : i32
    %c0_i32_1 = arith.constant 0 : i32
    return %c0_i32, %arg0, %c0_i32_0 : i32, i32, i32
  }
  func.func @transform_1(%arg0: i32) -> (i32, i32, i32) {
    %c0_i32 = arith.constant 0 : i32
    %c0_i32_0 = arith.constant 0 : i32
    %c0_i32_1 = arith.constant 0 : i32
    return %c0_i32, %arg0, %c0_i32_0 : i32, i32, i32
  }
  func.func @transform_2(%arg0: i32) -> (i32, i32, i32) {
    %c0_i32 = arith.constant 0 : i32
    %c0_i32_0 = arith.constant 0 : i32
    %c0_i32_1 = arith.constant 0 : i32
    return %c0_i32, %arg0, %c0_i32_0 : i32, i32, i32
  }
  func.func @transform_3(%arg0: i32) -> (i32, i32) {
    %c0_i32 = arith.constant 0 : i32
    %c0_i32_0 = arith.constant 0 : i32
    %c0_i32_1 = arith.constant 0 : i32
    return %c0_i32, %c0_i32_0 : i32, i32
  }
  func.func @transform_4(%arg0: i32) -> (i32, i32) {
    %c0_i32 = arith.constant 0 : i32
    %c0_i32_0 = arith.constant 0 : i32
    %c0_i32_1 = arith.constant 0 : i32
    return %c0_i32, %c0_i32_0 : i32, i32
  }
  func.func @transform_5(%arg0: i32) -> (i32, i32) {
    %c0_i32 = arith.constant 0 : i32
    %c0_i32_0 = arith.constant 0 : i32
    %c0_i32_1 = arith.constant 0 : i32
    return %c0_i32, %c0_i32_0 : i32, i32
  }
  func.func @transform_6(%arg0: i32) -> (i32, i32) {
    %c0_i32 = arith.constant 0 : i32
    %c0_i32_0 = arith.constant 0 : i32
    %c0_i32_1 = arith.constant 0 : i32
    return %c0_i32, %c0_i32_0 : i32, i32
  }
  func.func @transform_7(%arg0: i32) -> (i32, i32) {
    %c0_i32 = arith.constant 0 : i32
    %c0_i32_0 = arith.constant 0 : i32
    %c0_i32_1 = arith.constant 0 : i32
    return %c0_i32, %c0_i32_0 : i32, i32
  }
  func.func @transform_8(%arg0: i32) -> (i32, i32) {
    %c0_i32 = arith.constant 0 : i32
    %c0_i32_0 = arith.constant 0 : i32
    %c0_i32_1 = arith.constant 0 : i32
    return %c0_i32, %c0_i32_0 : i32, i32
  }
  func.func @transform_9(%arg0: i32) -> (i32, i32) {
    %c0_i32 = arith.constant 0 : i32
    %c0_i32_0 = arith.constant 0 : i32
    %c0_i32_1 = arith.constant 0 : i32
    return %c0_i32, %c0_i32_0 : i32, i32
  }
  func.func @transform_10(%arg0: i32) -> (i32, i32) {
    %c0_i32 = arith.constant 0 : i32
    %c0_i32_0 = arith.constant 0 : i32
    %c0_i32_1 = arith.constant 0 : i32
    return %c0_i32, %c0_i32_0 : i32, i32
  }
  func.func @transform_11(%arg0: i32) -> (i32, i32) {
    %c0_i32 = arith.constant 0 : i32
    %c0_i32_0 = arith.constant 0 : i32
    %c0_i32_1 = arith.constant 0 : i32
    return %c0_i32, %c0_i32_0 : i32, i32
  }
  func.func @transform_12(%arg0: i32) -> (i32, i32) {
    %c0_i32 = arith.constant 0 : i32
    %c0_i32_0 = arith.constant 0 : i32
    %c0_i32_1 = arith.constant 0 : i32
    return %c0_i32, %c0_i32_0 : i32, i32
  }
  func.func @transform_13(%arg0: i32) -> (i32, i32) {
    %c0_i32 = arith.constant 0 : i32
    %c0_i32_0 = arith.constant 0 : i32
    %c0_i32_1 = arith.constant 0 : i32
    return %c0_i32, %c0_i32_0 : i32, i32
  }
  func.func @transform_14(%arg0: i32) -> (i32, i32) {
    %c0_i32 = arith.constant 0 : i32
    %c0_i32_0 = arith.constant 0 : i32
    %c0_i32_1 = arith.constant 0 : i32
    return %c0_i32, %c0_i32_0 : i32, i32
  }
  func.func @transform_15(%arg0: i32) -> (i32, i32) {
    %c0_i32 = arith.constant 0 : i32
    %c0_i32_0 = arith.constant 0 : i32
    return %arg0, %c0_i32 : i32, i32
  }
  func.func @transform_16(%arg0: i32) -> (i32, i32) {
    %c0_i32 = arith.constant 0 : i32
    %c0_i32_0 = arith.constant 0 : i32
    return %arg0, %c0_i32 : i32, i32
  }
  func.func @transform_17(%arg0: i32) -> (i32, i32, i32) {
    %c0_i32 = arith.constant 0 : i32
    %c0_i32_0 = arith.constant 0 : i32
    %c0_i32_1 = arith.constant 0 : i32
    return %c0_i32, %arg0, %c0_i32_0 : i32, i32, i32
  }
}

</mosaic_0001>

<bundles_post_ra>
// kernel: custom-call.4
= control target key start
LH: loop header
LB: loop body
LE: loop exit
PB: predicated region body
PF: predicated region fallthrough
CT: control target
= control target key end

     0   :  { %s6_s0 = inlined_call_operand.vmem [shape: s32[8,2], index: 0, kind: output, shape index: {}]  }

// kernel: nernet_crf_forward.1
= control target key start
LH: loop header
LB: loop body
LE: loop exit
PB: predicated region body
PF: predicated region fallthrough
CT: control target
= control target key end

     0   :  { %vm218_vm0 = vcmask 254976   ;;  %v3477_v2 = vmov 0.0   ;;  %vm94_vm1 = vcmask 261120   ;;  %s3478_s23 = smov 64   ;;  %v5165_v32 = vmov 0   ;;  %s3481_s27 = smov 96   ;;  %s5145_s6 = inlined_call_operand.vmem [shape: f32[32,128], index: 6, kind: input, shape index: {}]   ;;  %s5146_s0 = inlined_call_operand.vmem [shape: f32[8,2,32], index: 0, kind: input, shape index: {}]   ;;  %s5147_s7 = inlined_call_operand.vmem [shape: f32[32,128], index: 7, kind: input, shape index: {}]   ;;  %s5148_s8 = inlined_call_operand.vmem [shape: f32[1,128], index: 8, kind: input, shape index: {}]   ;;  %s5149_s1 = inlined_call_operand.vmem [shape: f32[8,2,1], index: 1, kind: input, shape index: {}]   ;;  %s5150_s3 = inlined_call_operand.vmem [shape: f32[32,128], index: 3, kind: input, shape index: {}]   ;;  %s5151_s4 = inlined_call_operand.vmem [shape: f32[32,128], index: 4, kind: input, shape index: {}]   ;;  %s5152_s5 = inlined_call_operand.vmem [shape: f32[1,128], index: 5, kind: input, shape index: {}]   ;;  %s5153_s9 = inlined_call_operand.vmem [shape: f32[64,8], index: 9, kind: input, shape index: {}]   ;;  %s5154_s10 = inlined_call_operand.vmem [shape: f32[1,8], index: 10, kind: input, shape index: {}]   ;;  %s5155_s11 = inlined_call_operand.vmem [shape: f32[1,8], index: 11, kind: input, shape index: {}]   ;;  %s5156_s14 = inlined_call_operand.vmem [shape: f32[8,8], index: 14, kind: input, shape index: {}]   ;;  %s5157_s2 = inlined_call_operand.vmem [shape: s32[8,2,1], index: 2, kind: input, shape index: {}]   ;;  %s5158_s13 = inlined_call_operand.vmem [shape: f32[8,8], index: 13, kind: input, shape index: {}]   ;;  %s5159_s12 = inlined_call_operand.vmem [shape: f32[1,8], index: 12, kind: input, shape index: {}]   ;;  %s5160_s17 = inlined_call_operand.vmem [shape: s32[8,2,8], index: 17, kind: output, shape index: {2}]   ;;  %s5161_s16 = inlined_call_operand.vmem [shape: f32[2,8], index: 16, kind: output, shape index: {1}]   ;;  %s5162_s15 = inlined_call_operand.vmem [shape: f32[2,1], index: 15, kind: output, shape index: {0}]  }
   0x1   :  { %5170 = sst [smem:[#allocation16_spill]] %s5145_s6  ;;  %221 = vst.msk [vmem:[#allocation9] sm:$0x3] %vm218_vm0, %v3477_v2  ;;  %v3601_v9 = vld [vmem:[%s5147_s7 + $0x18] sm:$0xff]  ;;  %v3608_v10 = vld [vmem:[%s5147_s7 + $0x10] sm:$0xff]  ;;  %v3619_v11 = vld [vmem:[%s5147_s7 + $0x8] sm:$0xff]  ;;  %3257 = vset.pattern.permute.xlu2 %v5165_v32  ;;  %3258 = vset.pattern.permute.xlu0 %v5165_v32 }
   0x2   :  { %5171 = sst [smem:[#allocation17_spill]] %s5146_s0  ;;  %219 = vst.msk [vmem:[#allocation7] sm:$0x3] %vm218_vm0, %v3477_v2  ;;  %v3626_v12 = vld [vmem:[%s5147_s7] sm:$0xff]  ;;  %v3183_v30 = vld [vmem:[%s5149_s1 + $0xe] sm:$0x3]  ;;  %3259 = vset.pattern.permute.xlu1 %v5165_v32 }
   0x3   :  { %s5172_s26 = sld [smem:[#allocation16_spill]]  ;;  %220 = vst.msk [vmem:[#allocation8] sm:$0x3] %vm218_vm0, %v3477_v2  ;;  %v3647_v16 = vld [vmem:[%s5148_s8] ss:$0 sm:$0xff]  ;;  %s3479_s8 = smov 32   ;;  %373 = vperm.xlu2 %3257, %v3183_v30  }
   0x4   :  { %s5173_s19 = sld [smem:[#allocation17_spill]]  ;;  %222 = vst.msk [vmem:[#allocation10] sm:$0x3] %vm218_vm0, %v3477_v2  ;;  %v3189_v56 = vld [vmem:[%s5149_s1 + $0xc] sm:$0x3]  ;;  %v64_v59 = vld [vmem:[%s5150_s3 + $0x18] sm:$0xff] }
   0x5   :  { %v63_v60 = vld [vmem:[%s5150_s3 + $0x10] sm:$0xff]  ;;  %111 = vmatpush.msra.mxu2 %v64_v59  ;;  %v62_v61 = vld [vmem:[%s5150_s3 + $0x8] sm:$0xff] }
   0x7   :  { %112 = vmatpush.msra.mxu2 %v63_v60 }
   0x8   :  { %v258_v15 = vld [vmem:[#allocation9] sm:$0x3] }
   0x9   :  { %v147_v0 = vld [vmem:[%s5172_s26 + $0x18] sm:$0xff]  ;;  %v146_v1 = vld [vmem:[%s5172_s26 + $0x10] sm:$0xff]  ;;  %v145_v3 = vld [vmem:[%s5172_s26 + $0x8] sm:$0xff]  ;;  %113 = vmatpush.msra.mxu2 %v62_v61 }
   0xa   :  { %3248 = vmatpush.msra.mxu3 %v147_v0  ;;  %v57_v4 = vld [vmem:[%s5173_s19 + $0x8] sm:$0x3]  ;;  %v58_v5 = vld [vmem:[%s5173_s19 + $0xa] sm:$0x3]  ;;  %185 = vmatpush.msra.mxu1 %v147_v0  ;;  %v59_v6 = vld [vmem:[%s5173_s19 + $0xc] sm:$0x3] }
   0xb   :  { %v60_v7 = vld [vmem:[%s5173_s19 + $0xe] sm:$0x3]  ;;  %85 = vst [vmem:[#allocation1 + $0x20] ss:$4 sm:$0xff] %v57_v4  ;;  %v144_v8 = vld [vmem:[%s5172_s26] sm:$0xff] }
   0xc   :  { %3249 = vmatpush.msra.mxu3 %v146_v1  ;;  %87 = vst [vmem:[#allocation1 + $0x21] ss:$4 sm:$0xff] %v58_v5  ;;  %186 = vmatpush.msra.mxu1 %v146_v1  ;;  %v349_v26 = vld [vmem:[#allocation10] sm:$0x3]  ;;  %v53_v62 = vld [vmem:[%s5173_s19] sm:$0x3] }
   0xd   :  { %89 = vst [vmem:[#allocation1 + $0x22] ss:$4 sm:$0xff] %v59_v6  ;;  %v54_v63 = vld [vmem:[%s5173_s19 + $0x2] sm:$0x3]  ;;  %v55_v0 = vld [vmem:[%s5173_s19 + $0x4] sm:$0x3] }
   0xe   :  { %3250 = vmatpush.msra.mxu3 %v145_v3  ;;  %91 = vst [vmem:[#allocation1 + $0x23] ss:$4 sm:$0xff] %v60_v7  ;;  %187 = vmatpush.msra.mxu1 %v145_v3  ;;  %v56_v1 = vld [vmem:[%s5173_s19 + $0x6] sm:$0x3]  ;;  %v231_v3 = vld [vmem:[%s5151_s4 + $0x18] sm:$0xff] }
   0xf   :  { %77 = vst [vmem:[#allocation1] ss:$4 sm:$0xff] %v53_v62  ;;  %635 = vmatpush.msra.mxu0 %v231_v3  ;;  %v307_v60 = vld [vmem:[#allocation8] sm:$0x3] }
  0x10   :  { %3251 = vmatpush.msra.mxu3 %v144_v8  ;;  %188 = vmatpush.msra.mxu1 %v144_v8  ;;  %79 = vst [vmem:[#allocation1 + $0x1] ss:$4 sm:$0xff] %v54_v63 }
  0x11   :  { %81 = vst [vmem:[#allocation1 + $0x2] ss:$4 sm:$0xff] %v55_v0 }
  0x12   :  { %278 = vmatpush.msrb.mxu3 %v3601_v9  ;;  %666 = vmatpush.msrb.mxu1 %v3601_v9  ;;  %83 = vst [vmem:[#allocation1 + $0x3] ss:$4 sm:$0xff] %v56_v1 }
  0x14   :  { %279 = vmatpush.msrb.mxu3 %v3608_v10  ;;  %667 = vmatpush.msrb.mxu1 %v3608_v10 }
  0x15   :  { %v3628_v13 = vld.sshfl [vmem:[#allocation1 + $0x20] sm:$0xff pattern:$0x73625140] }
  0x16   :  { %280 = vmatpush.msrb.mxu3 %v3619_v11  ;;  %668 = vmatpush.msrb.mxu1 %v3619_v11  ;;  %160 = vst [vmem:[#allocation1 + $0x20] ss:$4 sm:$0xff] %v57_v4  ;;  %v61_v4 = vld [vmem:[%s5150_s3] sm:$0xff] }
  0x17   :  { %162 = vst [vmem:[#allocation1 + $0x21] ss:$4 sm:$0xff] %v58_v5  ;;  %v230_v5 = vld [vmem:[%s5151_s4 + $0x10] sm:$0xff]  ;;  %114 = vmatpush.msra.mxu2 %v61_v4 }
  0x18   :  { %281 = vmatpush.msrb.mxu3 %v3626_v12  ;;  %669 = vmatpush.msrb.mxu1 %v3626_v12  ;;  %164 = vst [vmem:[#allocation1 + $0x22] ss:$4 sm:$0xff] %v59_v6  ;;  %v229_v6 = vld [vmem:[%s5151_s4 + $0x8] sm:$0xff] }
  0x19   :  { %166 = vst [vmem:[#allocation1 + $0x23] ss:$4 sm:$0xff] %v60_v7  ;;  %636 = vmatpush.msra.mxu0 %v230_v5  ;;  %247 = vmatpush.msrb.mxu2 %v231_v3  ;;  %v228_v7 = vld [vmem:[%s5151_s4] sm:$0xff] }
  0x1a   :  { %v92_v8 = vld.sshfl [vmem:[#allocation1] sm:$0xff pattern:$0x73625140] }
  0x1b   :  { %637 = vmatpush.msra.mxu0 %v229_v6  ;;  %248 = vmatpush.msrb.mxu2 %v230_v5  ;;  %152 = vst [vmem:[#allocation1] ss:$4 sm:$0xff] %v53_v62 }
  0x1c   :  { %3179 = vmatmul.msk.f32.vlgmr.msra.gmra.mxu2 %vm94_vm1, %v92_v8  ;;  %154 = vst [vmem:[#allocation1 + $0x1] ss:$4 sm:$0xff] %v54_v63 }
  0x1d   :  { %638 = vmatpush.msra.mxu0 %v228_v7  ;;  %249 = vmatpush.msrb.mxu2 %v229_v6  ;;  %156 = vst [vmem:[#allocation1 + $0x2] ss:$4 sm:$0xff] %v55_v0 }
  0x1e   :  { %158 = vst [vmem:[#allocation1 + $0x3] ss:$4 sm:$0xff] %v56_v1 }
  0x1f   :  { %1021 = vmatpush.msrb.mxu0 %v231_v3  ;;  %250 = vmatpush.msrb.mxu2 %v228_v7 }
  0x20   :  { %v168_v14 = vld.sshfl [vmem:[#allocation1 + $0x20] sm:$0xff pattern:$0x73625140] }
  0x21   :  { %3182 = vmatmul.msk.f32.vlgmr.msra.gmra.mxu3 %vm94_vm1, %v168_v14  ;;  %1022 = vmatpush.msrb.mxu0 %v230_v5 }
  0x22   :  { %472 = vmatpush.msra.mxu3 %v3601_v9  ;;  %441 = vmatpush.msra.mxu2 %v231_v3 }
  0x23   :  { %1023 = vmatpush.msrb.mxu0 %v229_v6 }
  0x24   :  { %473 = vmatpush.msra.mxu3 %v3608_v10  ;;  %442 = vmatpush.msra.mxu2 %v230_v5 }
  0x25   :  { %1024 = vmatpush.msrb.mxu0 %v228_v7  ;;  %3180 = vmatmul.msk.f32.gmra.mxu2 %vm94_vm1, %v3628_v13 }
  0x26   :  { %474 = vmatpush.msra.mxu3 %v3619_v11  ;;  %443 = vmatpush.msra.mxu2 %v229_v6 }
  0x28   :  { %475 = vmatpush.msra.mxu3 %v3626_v12  ;;  %444 = vmatpush.msra.mxu2 %v228_v7 }
  0x29   :  { %3185 = vmatmul.msk.f32.vlgmr.msrb.gmra.mxu3 %vm94_vm1, %v258_v15 }
  0x2a   :  { %860 = vmatpush.msrb.mxu3 %v3601_v9 }
  0x2c   :  { %861 = vmatpush.msrb.mxu3 %v3608_v10 }
  0x2e   :  { %862 = vmatpush.msrb.mxu3 %v3619_v11 }
  0x30   :  { %863 = vmatpush.msrb.mxu3 %v3626_v12 }
  0x5d   :  { %v374_v47 = vpop.permute.xlu2 %373 }
  0xa4   :  { %v193_v17 = vpop.f32.mrf.mxu3 }
  0xa5   :  { %v194_v18 = vadd.f32 %v3647_v16, %v193_v17 }
  0xa7   :  { %v201_v19 = vrot.slane %v194_v18, 2  ;;  %v202_v20 = vrot.slane %v194_v18, 4  ;;  %v203_v21 = vrot.slane %v194_v18, 6  ;;  %214 = vst [vmem:[#allocation3 + $0x8] sm:$0x3] %v194_v18 }
  0xa8   :  { %v227_v18 = vld [vmem:[#allocation7] sm:$0x3] }
  0xa9   :  { %215 = vst [vmem:[#allocation3 + $0xa] sm:$0x3] %v201_v19  ;;  %3184 = vmatmul.msk.f32.vlgmr.msrb.gmra.mxu2 %vm94_vm1, %v227_v18 }
  0xaa   :  { %216 = vst [vmem:[#allocation3 + $0xc] sm:$0x3] %v202_v20  ;;  %829 = vmatpush.msrb.mxu2 %v231_v3 }
  0xab   :  { %217 = vst [vmem:[#allocation3 + $0xe] sm:$0x3] %v203_v21 }
  0xac   :  { %v283_v22 = vpop.f32.mrf.mxu3  ;;  %830 = vmatpush.msrb.mxu2 %v230_v5 }
  0xae   :  { %831 = vmatpush.msrb.mxu2 %v229_v6 }
  0xb0   :  { %832 = vmatpush.msrb.mxu2 %v228_v7 }
  0xb1   :  { %v451_v14 = vld [vmem:[#allocation3 + $0xc] sm:$0x3] }
  0xb2   :  { %v257_v23 = vld [vmem:[#allocation3 + $0xe] sm:$0x3] }
  0xb3   :  { %v286_v24 = vadd.f32 %v283_v22, %v257_v23 }
  0xb5   :  { %3287 = vtanh.f32 %v286_v24  ;;  %v3187_v27 = vmul.f32 -1.442695, %v286_v24 }
  0xb7   :  { %3289 = vpow2.f32 %v3187_v27 }
  0xbb   :  { %v3288_v25 = vpop.eup %3287 }
  0xbc   :  { %356 = vrot.lane.b32.xlu0 %v3288_v25, %s3478_s23 }
  0xbd   :  { %v3290_v28 = vpop.eup %3289 }
  0xbe   :  { %v332_v29 = vadd.f32 1.0, %v3290_v28 }
  0xc0   :  { %3291 = vrcp.f32 %v332_v29  ;;  %v344_v37 = vand.u32 2147483648, %v332_v29  ;;  %vm338_vm3 = vweird.f32 %v332_v29  ;;  %v342_v38 = vand.u32 2147483647, %v332_v29 }
  0xc2   :  { %v345_v40 = vor.u32 1.1754944e-38, %v344_v37  ;;  %vm343_vm5 = vcmp.eq.f32.partialorder %v342_v38, 8.507059e+37 }
  0xc4   :  { %351 = vrot.lane.b32.xlu0 %v349_v26, %s3479_s8 }
  0xc6   :  { %v3292_v31 = vpop.eup %3291 }
  0xc7   :  { %v334_v33 = vmul.f32 %v3292_v31, %v332_v29  ;;  %vm339_vm2 = vweird.f32 %v3292_v31 }
  0xc8   :  { %vm340_vm4 = vmor %vm338_vm3, %vm339_vm2 }
  0xc9   :  { %v335_v34 = vsub.f32 1.0, %v334_v33 }
  0xcb   :  { %v336_v35 = vmul.f32 %v3292_v31, %v335_v34 }
  0xcd   :  { %v337_v36 = vadd.f32 %v3292_v31, %v336_v35 }
  0xcf   :  { %v341_v39 = vsel %vm340_vm4, %v3292_v31, %v337_v36  ;;  %v3283_v31 = vld [vmem:[%s5152_s5] ss:$0 sm:$0xff]  ;;  %v116_v36 = vpop.f32.mrf.mxu2 }
  0xd0   :  { %v346_v42 = vsel %vm343_vm5, %v345_v40, %v341_v39  ;;  %v117_v37 = vadd.f32 %v3283_v31, %v116_v36 }
  0xd2   :  { %v124_v38 = vrot.slane %v117_v37, 2  ;;  %v125_v39 = vrot.slane %v117_v37, 4  ;;  %v126_v40 = vrot.slane %v117_v37, 6  ;;  %136 = vst [vmem:[#allocation2] sm:$0x3] %v117_v37 }
  0xd4   :  { %137 = vst [vmem:[#allocation2 + $0x2] sm:$0x3] %v124_v38 }
  0xd5   :  { %138 = vst [vmem:[#allocation2 + $0x4] sm:$0x3] %v125_v39 }
  0xd6   :  { %139 = vst [vmem:[#allocation2 + $0x6] sm:$0x3] %v126_v40 }
 0x12e   :  { %v357_v41 = vpop.permute.xlu0 %356 }
 0x12f   :  { %v359_v43 = vmul.f32 %v357_v41, %v346_v42  ;;  %v119_v41 = vpop.f32.mrf.mxu2 }
 0x131   :  { %361 = vrot.lane.b32.xlu1 %v359_v43, %s3479_s8 }
 0x136   :  { %v352_v44 = vpop.permute.xlu0 %351 }
 0x137   :  { %v354_v45 = vmul.f32 %v352_v44, %v346_v42 }
 0x1a3   :  { %v362_v46 = vpop.permute.xlu1 %361 }
 0x1a4   :  { %v364_v48 = vadd.f32 %v362_v46, %v354_v45 }
 0x1a6   :  { %3293 = vtanh.f32 %v364_v48  ;;  %v377_v49 = vmul.f32 %v374_v47, %v364_v48 }
 0x1a8   :  { %411 = vrot.lane.b32.xlu0 %v377_v49, %s3481_s27 }
 0x1ac   :  { %v3294_v50 = vpop.eup %3293 }
 0x1ad   :  { %367 = vrot.lane.b32.xlu1 %v3294_v50, %s3478_s23  ;;  %v226_v50 = vld [vmem:[#allocation2] sm:$0x3] }
 0x21a   :  { %v412_v51 = vpop.permute.xlu0 %411 }
 0x21b   :  { %414 = vst.msk [vmem:[#allocation10] sm:$0x3] %vm218_vm0, %v412_v51  ;;  %v252_v51 = vpop.f32.mrf.mxu2 }
 0x21f   :  { %v368_v52 = vpop.permute.xlu1 %367 }
 0x220   :  { %v370_v53 = vmul.f32 %v368_v52, %v346_v42  ;;  %v120_v42 = vadd.f32 %v3283_v31, %v119_v41  ;;  %v255_v52 = vadd.f32 %v252_v51, %v226_v50 }
 0x222   :  { %v3662_v54 = vmul.f32 %v374_v47, %v370_v53  ;;  %v543_v55 = vld [vmem:[#allocation10] sm:$0x3]  ;;  %v127_v43 = vrot.slane %v120_v42, 2  ;;  %v128_v44 = vrot.slane %v120_v42, 4  ;;  %v129_v45 = vrot.slane %v120_v42, 6 }
 0x223   :  { %140 = vst [vmem:[#allocation2 + $0x8] sm:$0x3] %v120_v42 }
 0x224   :  { %406 = vrot.lane.b32.xlu2 %v3662_v54, %s3479_s8  ;;  %141 = vst [vmem:[#allocation2 + $0xa] sm:$0x3] %v127_v43 }
 0x225   :  { %142 = vst [vmem:[#allocation2 + $0xc] sm:$0x3] %v128_v44 }
 0x226   :  { %143 = vst [vmem:[#allocation2 + $0xe] sm:$0x3] %v129_v45 }
 0x22c   :  { %545 = vrot.lane.b32.xlu2 %v543_v55, %s3479_s8 }
 0x234   :  { %567 = vperm.xlu2 %3257, %v3189_v56  }
 0x23c   :  { %309 = vrot.lane.b32.xlu2 %v307_v60, %s3479_s8 }
 0x27e   :  { %v407_v57 = vpop.permute.xlu2 %406 }
 0x27f   :  { %409 = vst.msk [vmem:[#allocation9] sm:$0x3] %vm218_vm0, %v407_v57 }
 0x286   :  { %v452_v58 = vld [vmem:[#allocation9] sm:$0x3]  ;;  %v546_v46 = vpop.permute.xlu2 %545 }
 0x287   :  { %3191 = vmatmul.msk.f32.vlgmr.msra.gmra.mxu3 %vm94_vm1, %v452_v58  ;;  %v3186_v58 = vmul.f32 -1.442695, %v255_v52 }
 0x28e   :  { %v568_v56 = vpop.permute.xlu2 %567 }
 0x30a   :  { %v477_v15 = vpop.f32.mrf.mxu3 }
 0x30b   :  { %v480_v17 = vadd.f32 %v477_v15, %v451_v14 }
 0x30d   :  { %3295 = vtanh.f32 %v480_v17  ;;  %v3193_v20 = vmul.f32 -1.442695, %v480_v17 }
 0x30f   :  { %3297 = vpow2.f32 %v3193_v20 }
 0x313   :  { %v3296_v19 = vpop.eup %3295 }
 0x314   :  { %550 = vrot.lane.b32.xlu1 %v3296_v19, %s3478_s23 }
 0x315   :  { %v3298_v21 = vpop.eup %3297 }
 0x316   :  { %v526_v22 = vadd.f32 1.0, %v3298_v21  ;;  %v167_v21 = vld.sshfl [vmem:[#allocation1] sm:$0xff pattern:$0x73625140] }
 0x317   :  { %3181 = vmatmul.msk.f32.vlgmr.msra.gmra.mxu1 %vm94_vm1, %v167_v21 }
 0x318   :  { %3299 = vrcp.f32 %v526_v22  ;;  %v538_v27 = vand.u32 2147483648, %v526_v22  ;;  %vm532_vm7 = vweird.f32 %v526_v22  ;;  %v536_v28 = vand.u32 2147483647, %v526_v22  ;;  %1052 = vmatpush.msra.mxu1 %v3601_v9 }
 0x31a   :  { %v539_v30 = vor.u32 1.1754944e-38, %v538_v27  ;;  %vm537_vm9 = vcmp.eq.f32.partialorder %v536_v28, 8.507059e+37  ;;  %1053 = vmatpush.msra.mxu1 %v3608_v10 }
 0x31c   :  { %1054 = vmatpush.msra.mxu1 %v3619_v11  ;;  %v3195_v11 = vld [vmem:[%s5149_s1 + $0xa] sm:$0x3] }
 0x31e   :  { %v3300_v23 = vpop.eup %3299  ;;  %1055 = vmatpush.msra.mxu1 %v3626_v12 }
 0x31f   :  { %v528_v24 = vmul.f32 %v3300_v23, %v526_v22  ;;  %vm533_vm6 = vweird.f32 %v3300_v23 }
 0x320   :  { %vm534_vm8 = vmor %vm532_vm7, %vm533_vm6 }
 0x321   :  { %v529_v25 = vsub.f32 1.0, %v528_v24 }
 0x323   :  { %v530_v13 = vmul.f32 %v3300_v23, %v529_v25 }
 0x325   :  { %v531_v26 = vadd.f32 %v3300_v23, %v530_v13 }
 0x327   :  { %v535_v29 = vsel %vm534_vm8, %v3300_v23, %v531_v26  ;;  %v310_v23 = vpop.permute.xlu2 %309 }
 0x328   :  { %v540_v34 = vsel %vm537_vm9, %v539_v30, %v535_v29 }
 0x329   :  { %v548_v47 = vmul.f32 %v546_v46, %v540_v34 }
 0x386   :  { %v551_v33 = vpop.permute.xlu1 %550 }
 0x387   :  { %v553_v35 = vmul.f32 %v551_v33, %v540_v34 }
 0x389   :  { %555 = vrot.lane.b32.xlu0 %v553_v35, %s3479_s8 }
 0x394   :  { %v190_v12 = vpop.f32.mrf.mxu1 }
 0x395   :  { %v191_v27 = vadd.f32 %v3647_v16, %v190_v12 }
 0x397   :  { %v198_v28 = vrot.slane %v191_v27, 2  ;;  %v199_v29 = vrot.slane %v191_v27, 4  ;;  %v200_v30 = vrot.slane %v191_v27, 6  ;;  %210 = vst [vmem:[#allocation3] sm:$0x3] %v191_v27 }
 0x399   :  { %211 = vst [vmem:[#allocation3 + $0x2] sm:$0x3] %v198_v28 }
 0x39a   :  { %212 = vst [vmem:[#allocation3 + $0x4] sm:$0x3] %v199_v29 }
 0x39b   :  { %213 = vst [vmem:[#allocation3 + $0x6] sm:$0x3] %v200_v30 }
 0x3fb   :  { %v556_v48 = vpop.permute.xlu0 %555 }
 0x3fc   :  { %v558_v49 = vadd.f32 %v556_v48, %v548_v47 }
 0x3fe   :  { %3301 = vtanh.f32 %v558_v49  ;;  %v571_v57 = vmul.f32 %v568_v56, %v558_v49 }
 0x3ff   :  { %3303 = vtanh.f32 %v255_v52 }
 0x400   :  { %3305 = vpow2.f32 %v3186_v58 }
 0x404   :  { %v3302_v53 = vpop.eup %3301 }
 0x405   :  { %561 = vrot.lane.b32.xlu1 %v3302_v53, %s3478_s23  ;;  %v3304_v55 = vpop.eup %3303 }
 0x406   :  { %v3306_v59 = vpop.eup %3305 }
 0x407   :  { %v290_v61 = vadd.f32 1.0, %v3306_v59 }
 0x409   :  { %3307 = vrcp.f32 %v290_v61  ;;  %vm296_vm10 = vweird.f32 %v290_v61  ;;  %v302_v3 = vand.u32 2147483648, %v290_v61  ;;  %v300_v5 = vand.u32 2147483647, %v290_v61 }
 0x40b   :  { %v303_v8 = vor.u32 1.1754944e-38, %v302_v3  ;;  %vm301_vm13 = vcmp.eq.f32.partialorder %v300_v5, 8.507059e+37 }
 0x40d   :  { %314 = vrot.lane.b32.xlu1 %v3304_v55, %s3478_s23  ;;  %v420_v55 = vld [vmem:[#allocation2 + $0x2] sm:$0x3] }
 0x40f   :  { %v3308_v62 = vpop.eup %3307 }
 0x410   :  { %v292_v63 = vmul.f32 %v3308_v62, %v290_v61  ;;  %vm297_vm11 = vweird.f32 %v3308_v62 }
 0x411   :  { %vm298_vm12 = vmor %vm296_vm10, %vm297_vm11 }
 0x412   :  { %v293_v0 = vsub.f32 1.0, %v292_v63 }
 0x414   :  { %v294_v1 = vmul.f32 %v3308_v62, %v293_v0 }
 0x415   :  { %605 = vrot.lane.b32.xlu1 %v571_v57, %s3481_s27 }
 0x416   :  { %v295_v4 = vadd.f32 %v3308_v62, %v294_v1 }
 0x418   :  { %v299_v15 = vsel %vm298_vm12, %v3308_v62, %v295_v4 }
 0x419   :  { %v304_v17 = vsel %vm301_vm13, %v303_v8, %v299_v15 }
 0x41a   :  { %v312_v24 = vmul.f32 %v310_v23, %v304_v17 }
 0x477   :  { %v562_v6 = vpop.permute.xlu1 %561 }
 0x478   :  { %v564_v7 = vmul.f32 %v562_v6, %v540_v34  ;;  %v645_v34 = vld [vmem:[#allocation3 + $0xa] sm:$0x3] }
 0x47a   :  { %v3721_v14 = vmul.f32 %v568_v56, %v564_v7 }
 0x47c   :  { %600 = vrot.lane.b32.xlu0 %v3721_v14, %s3479_s8 }
 0x47f   :  { %v315_v18 = vpop.permute.xlu1 %314 }
 0x480   :  { %v317_v19 = vmul.f32 %v315_v18, %v304_v17 }
 0x484   :  { %319 = vrot.lane.b32.xlu0 %v317_v19, %s3479_s8 }
 0x487   :  { %v606_v20 = vpop.permute.xlu1 %605 }
 0x488   :  { %608 = vst.msk [vmem:[#allocation10] sm:$0x3] %vm218_vm0, %v606_v20 }
 0x48f   :  { %v737_v10 = vld [vmem:[#allocation10] sm:$0x3] }
 0x4ee   :  { %v601_v22 = vpop.permute.xlu0 %600 }
 0x4ef   :  { %603 = vst.msk [vmem:[#allocation9] sm:$0x3] %vm218_vm0, %v601_v22 }
 0x4f6   :  { %v320_v25 = vpop.permute.xlu0 %319  ;;  %v646_v13 = vld [vmem:[#allocation9] sm:$0x3] }
 0x4f7   :  { %v3733_v26 = vadd.f32 %v320_v25, %v312_v24  ;;  %3197 = vmatmul.msk.f32.vlgmr.msrb.gmra.mxu1 %vm94_vm1, %v646_v13 }
 0x4f9   :  { %3309 = vtanh.f32 %v3733_v26 }
 0x4ff   :  { %v3310_v9 = vpop.eup %3309 }
 0x500   :  { %325 = vrot.lane.b32.xlu2 %v3310_v9, %s3478_s23 }
 0x508   :  { %739 = vrot.lane.b32.xlu2 %v737_v10, %s3479_s8 }
 0x510   :  { %761 = vperm.xlu2 %3257, %v3195_v11  }
 0x55a   :  { %v326_v31 = vpop.permute.xlu2 %325 }
 0x55b   :  { %v3743_v33 = vmul.f32 %v326_v31, %v304_v17 }
 0x55d   :  { %397 = vrot.lane.b32.xlu1 %v3743_v33, %s3479_s8 }
 0x562   :  { %v740_v58 = vpop.permute.xlu2 %739 }
 0x56a   :  { %v762_v63 = vpop.permute.xlu2 %761 }
 0x574   :  { %v671_v35 = vpop.f32.mrf.mxu1 }
 0x575   :  { %v674_v36 = vadd.f32 %v671_v35, %v645_v34 }
 0x577   :  { %3311 = vtanh.f32 %v674_v36  ;;  %v3199_v16 = vmul.f32 -1.442695, %v674_v36 }
 0x579   :  { %3313 = vpow2.f32 %v3199_v16  ;;  %v839_v16 = vld [vmem:[#allocation3 + $0x8] sm:$0x3] }
 0x57d   :  { %v3312_v37 = vpop.eup %3311 }
 0x57e   :  { %744 = vrot.lane.b32.xlu0 %v3312_v37, %s3478_s23 }
 0x57f   :  { %v3314_v38 = vpop.eup %3313 }
 0x580   :  { %v720_v40 = vadd.f32 1.0, %v3314_v38 }
 0x582   :  { %3315 = vrcp.f32 %v720_v40  ;;  %v732_v47 = vand.u32 2147483648, %v720_v40  ;;  %vm726_vm15 = vweird.f32 %v720_v40  ;;  %v730_v48 = vand.u32 2147483647, %v720_v40 }
 0x584   :  { %v733_v50 = vor.u32 1.1754944e-38, %v732_v47  ;;  %vm731_vm3 = vcmp.eq.f32.partialorder %v730_v48, 8.507059e+37 }
 0x588   :  { %v3316_v42 = vpop.eup %3315 }
 0x589   :  { %v722_v43 = vmul.f32 %v3316_v42, %v720_v40  ;;  %vm727_vm14 = vweird.f32 %v3316_v42 }
 0x58a   :  { %vm728_vm2 = vmor %vm726_vm15, %vm727_vm14 }
 0x58b   :  { %v723_v44 = vsub.f32 1.0, %v722_v43 }
 0x58d   :  { %v724_v45 = vmul.f32 %v3316_v42, %v723_v44 }
 0x58f   :  { %v725_v46 = vadd.f32 %v3316_v42, %v724_v45  ;;  %v3201_v45 = vld [vmem:[%s5149_s1 + $0x8] sm:$0x3] }
 0x591   :  { %v729_v49 = vsel %vm728_vm2, %v3316_v42, %v725_v46 }
 0x592   :  { %v734_v51 = vsel %vm731_vm3, %v733_v50, %v729_v49 }
 0x593   :  { %v742_v60 = vmul.f32 %v740_v58, %v734_v51 }
 0x5cf   :  { %v398_v39 = vpop.permute.xlu1 %397 }
 0x5d0   :  { %400 = vst.msk [vmem:[#allocation7] sm:$0x3] %vm218_vm0, %v398_v39 }
 0x5d7   :  { %v421_v41 = vld [vmem:[#allocation7] sm:$0x3] }
 0x5d8   :  { %3190 = vmatmul.msk.f32.vlgmr.msra.gmra.mxu2 %vm94_vm1, %v421_v41 }
 0x5f0   :  { %v745_v52 = vpop.permute.xlu0 %744 }
 0x5f1   :  { %v747_v53 = vmul.f32 %v745_v52, %v734_v51 }
 0x5f3   :  { %749 = vrot.lane.b32.xlu0 %v747_v53, %s3479_s8 }
 0x65b   :  { %v446_v56 = vpop.f32.mrf.mxu2 }
 0x65c   :  { %v449_v57 = vadd.f32 %v446_v56, %v420_v55 }
 0x65e   :  { %3317 = vtanh.f32 %v449_v57  ;;  %v3192_v3 = vmul.f32 -1.442695, %v449_v57 }
 0x664   :  { %v3318_v59 = vpop.eup %3317 }
 0x665   :  { %v750_v61 = vpop.permute.xlu0 %749  ;;  %508 = vrot.lane.b32.xlu2 %v3318_v59, %s3478_s23 }
 0x666   :  { %v752_v62 = vadd.f32 %v750_v61, %v742_v60 }
 0x668   :  { %3319 = vtanh.f32 %v752_v62  ;;  %v765_v0 = vmul.f32 %v762_v63, %v752_v62 }
 0x669   :  { %3321 = vpow2.f32 %v3192_v3 }
 0x66d   :  { %799 = vrot.lane.b32.xlu2 %v765_v0, %s3481_s27 }
 0x66e   :  { %v3320_v1 = vpop.eup %3319 }
 0x66f   :  { %755 = vrot.lane.b32.xlu1 %v3320_v1, %s3478_s23  ;;  %v3322_v4 = vpop.eup %3321 }
 0x670   :  { %v484_v5 = vadd.f32 1.0, %v3322_v4  ;;  %v614_v4 = vld [vmem:[#allocation2 + $0x4] sm:$0x3] }
 0x672   :  { %3323 = vrcp.f32 %v484_v5  ;;  %v496_v18 = vand.u32 2147483648, %v484_v5  ;;  %vm490_vm5 = vweird.f32 %v484_v5  ;;  %v494_v19 = vand.u32 2147483647, %v484_v5 }
 0x674   :  { %v497_v21 = vor.u32 1.1754944e-38, %v496_v18  ;;  %vm495_vm7 = vcmp.eq.f32.partialorder %v494_v19, 8.507059e+37 }
 0x677   :  { %402 = vrot.lane.b32.xlu1 %v3733_v26, %s3481_s27 }
 0x678   :  { %v3324_v6 = vpop.eup %3323 }
 0x679   :  { %v486_v7 = vmul.f32 %v3324_v6, %v484_v5  ;;  %vm491_vm4 = vweird.f32 %v3324_v6 }
 0x67a   :  { %vm492_vm6 = vmor %vm490_vm5, %vm491_vm4 }
 0x67b   :  { %v487_v8 = vsub.f32 1.0, %v486_v7 }
 0x67d   :  { %v488_v15 = vmul.f32 %v3324_v6, %v487_v8 }
 0x67f   :  { %v489_v17 = vadd.f32 %v3324_v6, %v488_v15 }
 0x681   :  { %v493_v20 = vsel %vm492_vm6, %v3324_v6, %v489_v17 }
 0x682   :  { %v498_v23 = vsel %vm495_vm7, %v497_v21, %v493_v20 }
 0x6bf   :  { %v509_v22 = vpop.permute.xlu2 %508 }
 0x6c0   :  { %v511_v24 = vmul.f32 %v509_v22, %v498_v23 }
 0x6c2   :  { %513 = vrot.lane.b32.xlu1 %v511_v24, %s3479_s8 }
 0x6c7   :  { %v800_v25 = vpop.permute.xlu2 %799 }
 0x6c8   :  { %802 = vst.msk [vmem:[#allocation10] sm:$0x3] %vm218_vm0, %v800_v25 }
 0x6cf   :  { %v931_v35 = vld [vmem:[#allocation10] sm:$0x3] }
 0x6e1   :  { %v756_v13 = vpop.permute.xlu1 %755 }
 0x6e2   :  { %v758_v26 = vmul.f32 %v756_v13, %v734_v51 }
 0x6e4   :  { %v3758_v9 = vmul.f32 %v762_v63, %v758_v26 }
 0x6e6   :  { %794 = vrot.lane.b32.xlu0 %v3758_v9, %s3479_s8 }
 0x6e9   :  { %v403_v10 = vpop.permute.xlu1 %402 }
 0x6ea   :  { %405 = vst.msk [vmem:[#allocation8] sm:$0x3] %vm218_vm0, %v403_v10 }
 0x6f1   :  { %v501_v11 = vld [vmem:[#allocation8] sm:$0x3] }
 0x6f2   :  { %503 = vrot.lane.b32.xlu0 %v501_v11, %s3479_s8 }
 0x734   :  { %v514_v30 = vpop.permute.xlu1 %513 }
 0x758   :  { %v795_v12 = vpop.permute.xlu0 %794 }
 0x759   :  { %797 = vst.msk [vmem:[#allocation9] sm:$0x3] %vm218_vm0, %v795_v12 }
 0x760   :  { %v840_v27 = vld [vmem:[#allocation9] sm:$0x3] }
 0x761   :  { %3203 = vmatmul.msk.f32.vlgmr.msrb.gmra.mxu3 %vm94_vm1, %v840_v27 }
 0x764   :  { %v504_v28 = vpop.permute.xlu0 %503 }
 0x765   :  { %v506_v29 = vmul.f32 %v504_v28, %v498_v23 }
 0x767   :  { %v516_v31 = vadd.f32 %v514_v30, %v506_v29 }
 0x769   :  { %3325 = vtanh.f32 %v516_v31 }
 0x76f   :  { %v3326_v34 = vpop.eup %3325 }
 0x770   :  { %519 = vrot.lane.b32.xlu0 %v3326_v34, %s3478_s23 }
 0x778   :  { %933 = vrot.lane.b32.xlu0 %v931_v35, %s3479_s8 }
 0x780   :  { %955 = vperm.xlu0 %3258, %v3201_v45  }
 0x7e2   :  { %v520_v36 = vpop.permute.xlu0 %519 }
 0x7e3   :  { %v3768_v37 = vmul.f32 %v520_v36, %v498_v23 }
 0x7e4   :  { %v865_v38 = vpop.f32.mrf.mxu3 }
 0x7e5   :  { %v868_v39 = vadd.f32 %v865_v38, %v839_v16  ;;  %591 = vrot.lane.b32.xlu2 %v3768_v37, %s3479_s8 }
 0x7e7   :  { %3327 = vtanh.f32 %v868_v39  ;;  %v3205_v41 = vmul.f32 -1.442695, %v868_v39 }
 0x7e9   :  { %3329 = vpow2.f32 %v3205_v41  ;;  %v1031_v41 = vld [vmem:[#allocation3 + $0x6] sm:$0x3] }
 0x7ea   :  { %v934_v60 = vpop.permute.xlu0 %933 }
 0x7ed   :  { %v3328_v40 = vpop.eup %3327 }
 0x7ee   :  { %938 = vrot.lane.b32.xlu1 %v3328_v40, %s3478_s23 }
 0x7ef   :  { %v3330_v42 = vpop.eup %3329 }
 0x7f0   :  { %v914_v44 = vadd.f32 1.0, %v3330_v42 }
 0x7f2   :  { %3331 = vrcp.f32 %v914_v44  ;;  %v926_v52 = vand.u32 2147483648, %v914_v44  ;;  %vm920_vm9 = vweird.f32 %v914_v44  ;;  %v924_v53 = vand.u32 2147483647, %v914_v44  ;;  %v956_v7 = vpop.permute.xlu0 %955 }
 0x7f4   :  { %v927_v56 = vor.u32 1.1754944e-38, %v926_v52  ;;  %vm925_vm11 = vcmp.eq.f32.partialorder %v924_v53, 8.507059e+37 }
 0x7f8   :  { %v3332_v47 = vpop.eup %3331 }
 0x7f9   :  { %v916_v48 = vmul.f32 %v3332_v47, %v914_v44  ;;  %vm921_vm8 = vweird.f32 %v3332_v47 }
 0x7fa   :  { %vm922_vm10 = vmor %vm920_vm9, %vm921_vm8 }
 0x7fb   :  { %v917_v49 = vsub.f32 1.0, %v916_v48 }
 0x7fd   :  { %v918_v50 = vmul.f32 %v3332_v47, %v917_v49 }
 0x7ff   :  { %v919_v51 = vadd.f32 %v3332_v47, %v918_v50 }
 0x801   :  { %v923_v55 = vsel %vm922_vm10, %v3332_v47, %v919_v51 }
 0x802   :  { %v928_v57 = vsel %vm925_vm11, %v927_v56, %v923_v55 }
 0x803   :  { %v936_v61 = vmul.f32 %v934_v60, %v928_v57 }
 0x83f   :  { %v592_v43 = vpop.permute.xlu2 %591 }
 0x840   :  { %594 = vst.msk [vmem:[#allocation7] sm:$0x3] %vm218_vm0, %v592_v43 }
 0x847   :  { %v615_v46 = vld [vmem:[#allocation7] sm:$0x3] }
 0x848   :  { %3196 = vmatmul.msk.f32.vlgmr.msra.gmra.mxu0 %vm94_vm1, %v615_v46  ;;  %v3207_v46 = vld [vmem:[%s5149_s1 + $0x6] sm:$0x3] }
 0x860   :  { %v939_v58 = vpop.permute.xlu1 %938 }
 0x861   :  { %v941_v59 = vmul.f32 %v939_v58, %v928_v57 }
 0x863   :  { %943 = vrot.lane.b32.xlu1 %v941_v59, %s3479_s8 }
 0x8c5   :  { %v640_v1 = vpop.f32.mrf.mxu0 }
 0x8c6   :  { %v643_v6 = vadd.f32 %v640_v1, %v614_v4 }
 0x8c8   :  { %v3198_v20 = vmul.f32 -1.442695, %v643_v6 }
 0x8d5   :  { %v944_v62 = vpop.permute.xlu1 %943 }
 0x8d6   :  { %v946_v63 = vadd.f32 %v944_v62, %v936_v61 }
 0x8d8   :  { %3333 = vtanh.f32 %v946_v63  ;;  %v959_v19 = vmul.f32 %v956_v7, %v946_v63 }
 0x8d9   :  { %3335 = vtanh.f32 %v643_v6 }
 0x8da   :  { %3337 = vpow2.f32 %v3198_v20 }
 0x8de   :  { %v3334_v0 = vpop.eup %3333 }
 0x8df   :  { %949 = vrot.lane.b32.xlu2 %v3334_v0, %s3478_s23  ;;  %v3336_v17 = vpop.eup %3335 }
 0x8e0   :  { %v3338_v21 = vpop.eup %3337 }
 0x8e1   :  { %v678_v22 = vadd.f32 1.0, %v3338_v21 }
 0x8e3   :  { %3339 = vrcp.f32 %v678_v22  ;;  %v690_v11 = vand.u32 2147483648, %v678_v22  ;;  %vm684_vm13 = vweird.f32 %v678_v22  ;;  %v688_v12 = vand.u32 2147483647, %v678_v22 }
 0x8e5   :  { %v691_v28 = vor.u32 1.1754944e-38, %v690_v11  ;;  %vm689_vm15 = vcmp.eq.f32.partialorder %v688_v12, 8.507059e+37 }
 0x8e7   :  { %596 = vrot.lane.b32.xlu2 %v516_v31, %s3481_s27 }
 0x8e9   :  { %v3340_v23 = vpop.eup %3339 }
 0x8ea   :  { %v680_v24 = vmul.f32 %v3340_v23, %v678_v22  ;;  %vm685_vm12 = vweird.f32 %v3340_v23 }
 0x8eb   :  { %vm686_vm14 = vmor %vm684_vm13, %vm685_vm12 }
 0x8ec   :  { %v681_v25 = vsub.f32 1.0, %v680_v24 }
 0x8ee   :  { %v682_v13 = vmul.f32 %v3340_v23, %v681_v25 }
 0x8f0   :  { %v683_v10 = vadd.f32 %v3340_v23, %v682_v13 }
 0x8f2   :  { %v687_v27 = vsel %vm686_vm14, %v3340_v23, %v683_v10 }
 0x8f3   :  { %v692_v29 = vsel %vm689_vm15, %v691_v28, %v687_v27 }
 0x939   :  { %v950_v3 = vpop.permute.xlu2 %949 }
 0x93a   :  { %v952_v5 = vmul.f32 %v950_v3, %v928_v57 }
 0x93c   :  { %v3781_v8 = vmul.f32 %v956_v7, %v952_v5 }
 0x93e   :  { %988 = vrot.lane.b32.xlu1 %v3781_v8, %s3479_s8 }
 0x941   :  { %v597_v15 = vpop.permute.xlu2 %596 }
 0x942   :  { %599 = vst.msk [vmem:[#allocation8] sm:$0x3] %vm218_vm0, %v597_v15 }
 0x946   :  { %702 = vrot.lane.b32.xlu1 %v3336_v17, %s3478_s23  ;;  %v808_v17 = vld [vmem:[#allocation2 + $0x6] sm:$0x3] }
 0x949   :  { %v695_v18 = vld [vmem:[#allocation8] sm:$0x3] }
 0x94a   :  { %697 = vrot.lane.b32.xlu2 %v695_v18, %s3479_s8 }
 0x94e   :  { %993 = vrot.lane.b32.xlu1 %v959_v19, %s3481_s27 }
 0x9a4   :  { %v698_v36 = vpop.permute.xlu2 %697 }
 0x9a5   :  { %v700_v16 = vmul.f32 %v698_v36, %v692_v29 }
 0x9b0   :  { %v989_v26 = vpop.permute.xlu1 %988 }
 0x9b1   :  { %991 = vst.msk [vmem:[#allocation9] sm:$0x3] %vm218_vm0, %v989_v26 }
 0x9b8   :  { %v703_v30 = vpop.permute.xlu1 %702  ;;  %v1032_v31 = vld [vmem:[#allocation9] sm:$0x3] }
 0x9b9   :  { %v705_v34 = vmul.f32 %v703_v30, %v692_v29  ;;  %3209 = vmatmul.msk.f32.vlgmr.msra.gmra.mxu1 %vm94_vm1, %v1032_v31 }
 0x9bb   :  { %707 = vrot.lane.b32.xlu0 %v705_v34, %s3479_s8 }
 0x9c0   :  { %v994_v35 = vpop.permute.xlu1 %993 }
 0x9c1   :  { %996 = vst.msk [vmem:[#allocation10] sm:$0x3] %vm218_vm0, %v994_v35 }
 0x9c8   :  { %v1123_v44 = vld [vmem:[#allocation10] sm:$0x3] }
 0xa2d   :  { %v708_v38 = vpop.permute.xlu0 %707 }
 0xa2e   :  { %v710_v39 = vadd.f32 %v708_v38, %v700_v16 }
 0xa30   :  { %3341 = vtanh.f32 %v710_v39 }
 0xa36   :  { %v3342_v40 = vpop.eup %3341  ;;  %v1057_v42 = vpop.f32.mrf.mxu1 }
 0xa37   :  { %v1060_v43 = vadd.f32 %v1057_v42, %v1031_v41  ;;  %713 = vrot.lane.b32.xlu2 %v3342_v40, %s3478_s23  ;;  %v1226_v41 = vld [vmem:[%s5147_s7 + $0x18] sm:$0xff]  ;;  %v1225_v42 = vld [vmem:[%s5147_s7 + $0x10] sm:$0xff] }
 0xa38   :  { %1242 = vmatpush.msra.mxu3 %v1226_v41  ;;  %1432 = vmatpush.msrb.mxu1 %v1226_v41 }
 0xa39   :  { %3343 = vtanh.f32 %v1060_v43  ;;  %v3211_v47 = vmul.f32 -1.442695, %v1060_v43  ;;  %v1224_v43 = vld [vmem:[%s5147_s7 + $0x8] sm:$0xff] }
 0xa3a   :  { %1243 = vmatpush.msra.mxu3 %v1225_v42  ;;  %1433 = vmatpush.msrb.mxu1 %v1225_v42 }
 0xa3b   :  { %3345 = vpow2.f32 %v3211_v47 }
 0xa3c   :  { %1244 = vmatpush.msra.mxu3 %v1224_v43  ;;  %1434 = vmatpush.msrb.mxu1 %v1224_v43 }
 0xa3f   :  { %v3344_v45 = vpop.eup %3343  ;;  %1125 = vrot.lane.b32.xlu2 %v1123_v44, %s3479_s8  ;;  %v1223_v44 = vld [vmem:[%s5147_s7] sm:$0xff] }
 0xa40   :  { %1130 = vrot.lane.b32.xlu0 %v3344_v45, %s3478_s23  ;;  %1245 = vmatpush.msra.mxu3 %v1223_v44 }
 0xa41   :  { %v3346_v48 = vpop.eup %3345  ;;  %1435 = vmatpush.msrb.mxu1 %v1223_v44 }
 0xa42   :  { %v1106_v50 = vadd.f32 1.0, %v3346_v48  ;;  %1621 = vmatpush.msrb.mxu3 %v1226_v41 }
 0xa44   :  { %3347 = vrcp.f32 %v1106_v50  ;;  %v1118_v58 = vand.u32 2147483648, %v1106_v50  ;;  %vm1112_vm3 = vweird.f32 %v1106_v50  ;;  %v1116_v59 = vand.u32 2147483647, %v1106_v50  ;;  %1622 = vmatpush.msrb.mxu3 %v1225_v42 }
 0xa46   :  { %v1119_v61 = vor.u32 1.1754944e-38, %v1118_v58  ;;  %vm1117_vm5 = vcmp.eq.f32.partialorder %v1116_v59, 8.507059e+37  ;;  %1623 = vmatpush.msrb.mxu3 %v1224_v43 }
 0xa47   :  { %1147 = vperm.xlu2 %3257, %v3207_v46  }
 0xa48   :  { %1624 = vmatpush.msrb.mxu3 %v1223_v44 }
 0xa4a   :  { %v3348_v52 = vpop.eup %3347 }
 0xa4b   :  { %v1108_v53 = vmul.f32 %v3348_v52, %v1106_v50  ;;  %vm1113_vm2 = vweird.f32 %v3348_v52  ;;  %v3213_v50 = vld [vmem:[%s5149_s1 + $0x4] sm:$0x3] }
 0xa4c   :  { %vm1114_vm4 = vmor %vm1112_vm3, %vm1113_vm2 }
 0xa4d   :  { %v1109_v55 = vsub.f32 1.0, %v1108_v53 }
 0xa4f   :  { %v1110_v56 = vmul.f32 %v3348_v52, %v1109_v55 }
 0xa51   :  { %v1111_v57 = vadd.f32 %v3348_v52, %v1110_v56 }
 0xa53   :  { %v1115_v60 = vsel %vm1114_vm4, %v3348_v52, %v1111_v57  ;;  %v1221_v57 = vld [vmem:[#allocation3 + $0x4] sm:$0x3] }
 0xa54   :  { %v1120_v62 = vsel %vm1117_vm5, %v1119_v61, %v1115_v60 }
 0xa91   :  { %v714_v49 = vpop.permute.xlu2 %713 }
 0xa92   :  { %v3799_v51 = vmul.f32 %v714_v49, %v692_v29 }
 0xa94   :  { %785 = vrot.lane.b32.xlu1 %v3799_v51, %s3479_s8 }
 0xa99   :  { %v1126_v4 = vpop.permute.xlu2 %1125 }
 0xa9a   :  { %v1128_v5 = vmul.f32 %v1126_v4, %v1120_v62 }
 0xaa1   :  { %v1148_v23 = vpop.permute.xlu2 %1147 }
 0xab2   :  { %v1131_v63 = vpop.permute.xlu0 %1130 }
 0xab3   :  { %v1133_v0 = vmul.f32 %v1131_v63, %v1120_v62 }
 0xab5   :  { %1135 = vrot.lane.b32.xlu0 %v1133_v0, %s3479_s8 }
 0xb06   :  { %v786_v1 = vpop.permute.xlu1 %785 }
 0xb07   :  { %788 = vst.msk [vmem:[#allocation7] sm:$0x3] %vm218_vm0, %v786_v1 }
 0xb0e   :  { %v809_v3 = vld [vmem:[#allocation7] sm:$0x3] }
 0xb0f   :  { %3202 = vmatmul.msk.f32.vlgmr.msrb.gmra.mxu2 %vm94_vm1, %v809_v3 }
 0xb27   :  { %v1136_v6 = vpop.permute.xlu0 %1135 }
 0xb28   :  { %v1138_v7 = vadd.f32 %v1136_v6, %v1128_v5 }
 0xb2a   :  { %3349 = vtanh.f32 %v1138_v7  ;;  %v1151_v26 = vmul.f32 %v1148_v23, %v1138_v7 }
 0xb30   :  { %v3350_v15 = vpop.eup %3349 }
 0xb31   :  { %1141 = vrot.lane.b32.xlu1 %v3350_v15, %s3478_s23 }
 0xb39   :  { %790 = vrot.lane.b32.xlu1 %v710_v39, %s3481_s27 }
 0xb92   :  { %v834_v18 = vpop.f32.mrf.mxu2 }
 0xb93   :  { %v837_v19 = vadd.f32 %v834_v18, %v808_v17 }
 0xb95   :  { %3351 = vtanh.f32 %v837_v19  ;;  %v3204_v10 = vmul.f32 -1.442695, %v837_v19 }
 0xb97   :  { %3353 = vpow2.f32 %v3204_v10 }
 0xb9b   :  { %v3352_v20 = vpop.eup %3351 }
 0xb9c   :  { %896 = vrot.lane.b32.xlu2 %v3352_v20, %s3478_s23 }
 0xb9d   :  { %v3354_v11 = vpop.eup %3353 }
 0xb9e   :  { %v872_v12 = vadd.f32 1.0, %v3354_v11 }
 0xba0   :  { %3355 = vrcp.f32 %v872_v12  ;;  %v884_v34 = vand.u32 2147483648, %v872_v12  ;;  %vm878_vm7 = vweird.f32 %v872_v12  ;;  %v882_v35 = vand.u32 2147483647, %v872_v12 }
 0xba2   :  { %v885_v16 = vor.u32 1.1754944e-38, %v884_v34  ;;  %vm883_vm9 = vcmp.eq.f32.partialorder %v882_v35, 8.507059e+37 }
 0xba3   :  { %v1142_v21 = vpop.permute.xlu1 %1141 }
 0xba4   :  { %v1144_v22 = vmul.f32 %v1142_v21, %v1120_v62 }
 0xba6   :  { %v3809_v24 = vmul.f32 %v1148_v23, %v1144_v22  ;;  %v3356_v27 = vpop.eup %3355 }
 0xba7   :  { %v874_v28 = vmul.f32 %v3356_v27, %v872_v12  ;;  %vm879_vm6 = vweird.f32 %v3356_v27 }
 0xba8   :  { %1178 = vrot.lane.b32.xlu0 %v3809_v24, %s3479_s8  ;;  %vm880_vm8 = vmor %vm878_vm7, %vm879_vm6 }
 0xba9   :  { %v875_v29 = vsub.f32 1.0, %v874_v28 }
 0xbab   :  { %v791_v25 = vpop.permute.xlu1 %790  ;;  %v876_v30 = vmul.f32 %v3356_v27, %v875_v29 }
 0xbac   :  { %793 = vst.msk [vmem:[#allocation8] sm:$0x3] %vm218_vm0, %v791_v25 }
 0xbad   :  { %v877_v31 = vadd.f32 %v3356_v27, %v876_v30 }
 0xbaf   :  { %v881_v36 = vsel %vm880_vm8, %v3356_v27, %v877_v31  ;;  %v1000_v27 = vld [vmem:[#allocation2 + $0x8] sm:$0x3] }
 0xbb0   :  { %v886_v39 = vsel %vm883_vm9, %v885_v16, %v881_v36 }
 0xbb3   :  { %v889_v13 = vld [vmem:[#allocation8] sm:$0x3] }
 0xbb4   :  { %891 = vrot.lane.b32.xlu0 %v889_v13, %s3479_s8 }
 0xbbc   :  { %1183 = vrot.lane.b32.xlu0 %v1151_v26, %s3481_s27 }
 0xbf6   :  { %v897_v38 = vpop.permute.xlu2 %896 }
 0xbf7   :  { %v899_v40 = vmul.f32 %v897_v38, %v886_v39 }
 0xbf9   :  { %901 = vrot.lane.b32.xlu1 %v899_v40, %s3479_s8 }
 0xc1a   :  { %v1179_v45 = vpop.permute.xlu0 %1178 }
 0xc1b   :  { %1181 = vst.msk [vmem:[#allocation9] sm:$0x3] %vm218_vm0, %v1179_v45 }
 0xc22   :  { %v1222_v46 = vld [vmem:[#allocation9] sm:$0x3] }
 0xc23   :  { %3215 = vmatmul.msk.f32.vlgmr.msra.gmra.mxu3 %vm94_vm1, %v1222_v46 }
 0xc26   :  { %v892_v47 = vpop.permute.xlu0 %891 }
 0xc27   :  { %v894_v52 = vmul.f32 %v892_v47, %v886_v39 }
 0xc2e   :  { %v1184_v48 = vpop.permute.xlu0 %1183 }
 0xc2f   :  { %1186 = vst.msk [vmem:[#allocation10] sm:$0x3] %vm218_vm0, %v1184_v48 }
 0xc36   :  { %v1313_v49 = vld [vmem:[#allocation10] sm:$0x3] }
 0xc37   :  { %1315 = vrot.lane.b32.xlu0 %v1313_v49, %s3479_s8 }
 0xc3f   :  { %1337 = vperm.xlu0 %3258, %v3213_v50  }
 0xc6b   :  { %v902_v53 = vpop.permute.xlu1 %901 }
 0xc6c   :  { %v904_v55 = vadd.f32 %v902_v53, %v894_v52 }
 0xc6e   :  { %3357 = vtanh.f32 %v904_v55 }
 0xc74   :  { %v3358_v56 = vpop.eup %3357 }
 0xc75   :  { %907 = vrot.lane.b32.xlu2 %v3358_v56, %s3478_s23 }
 0xca6   :  { %v1247_v58 = vpop.f32.mrf.mxu3 }
 0xca7   :  { %v1250_v59 = vadd.f32 %v1247_v58, %v1221_v57 }
 0xca9   :  { %3359 = vtanh.f32 %v1250_v59  ;;  %v3217_v63 = vmul.f32 -1.442695, %v1250_v59  ;;  %v1316_v13 = vpop.permute.xlu0 %1315 }
 0xcab   :  { %3361 = vpow2.f32 %v3217_v63 }
 0xcaf   :  { %v3360_v60 = vpop.eup %3359 }
 0xcb0   :  { %1320 = vrot.lane.b32.xlu1 %v3360_v60, %s3478_s23 }
 0xcb1   :  { %v3362_v0 = vpop.eup %3361  ;;  %v1338_v35 = vpop.permute.xlu0 %1337 }
 0xcb2   :  { %v1296_v1 = vadd.f32 1.0, %v3362_v0 }
 0xcb4   :  { %3363 = vrcp.f32 %v1296_v1  ;;  %v1308_v15 = vand.u32 2147483648, %v1296_v1  ;;  %vm1302_vm11 = vweird.f32 %v1296_v1  ;;  %v1306_v17 = vand.u32 2147483647, %v1296_v1 }
 0xcb6   :  { %v1309_v19 = vor.u32 1.1754944e-38, %v1308_v15  ;;  %vm1307_vm13 = vcmp.eq.f32.partialorder %v1306_v17, 8.507059e+37 }
 0xcba   :  { %v3364_v3 = vpop.eup %3363 }
 0xcbb   :  { %v1298_v4 = vmul.f32 %v3364_v3, %v1296_v1  ;;  %vm1303_vm10 = vweird.f32 %v3364_v3 }
 0xcbc   :  { %vm1304_vm12 = vmor %vm1302_vm11, %vm1303_vm10 }
 0xcbd   :  { %v1299_v5 = vsub.f32 1.0, %v1298_v4  ;;  %v3219_v4 = vld [vmem:[%s5149_s1 + $0x2] sm:$0x3] }
 0xcbf   :  { %v1300_v6 = vmul.f32 %v3364_v3, %v1299_v5  ;;  %v1411_v5 = vld [vmem:[#allocation3 + $0x2] sm:$0x3] }
 0xcc1   :  { %v1301_v7 = vadd.f32 %v3364_v3, %v1300_v6 }
 0xcc3   :  { %v1305_v18 = vsel %vm1304_vm12, %v3364_v3, %v1301_v7 }
 0xcc4   :  { %v1310_v20 = vsel %vm1307_vm13, %v1309_v19, %v1305_v18 }
 0xcc5   :  { %v1318_v26 = vmul.f32 %v1316_v13, %v1310_v20 }
 0xccf   :  { %v908_v61 = vpop.permute.xlu2 %907 }
 0xcd0   :  { %v3838_v62 = vmul.f32 %v908_v61, %v886_v39 }
 0xcd2   :  { %979 = vrot.lane.b32.xlu2 %v3838_v62, %s3479_s8 }
 0xd22   :  { %v1321_v21 = vpop.permute.xlu1 %1320 }
 0xd23   :  { %v1323_v22 = vmul.f32 %v1321_v21, %v1310_v20 }
 0xd25   :  { %1325 = vrot.lane.b32.xlu1 %v1323_v22, %s3479_s8 }
 0xd2c   :  { %v980_v23 = vpop.permute.xlu2 %979 }
 0xd2d   :  { %982 = vst.msk [vmem:[#allocation7] sm:$0x3] %vm218_vm0, %v980_v23 }
 0xd34   :  { %v1001_v25 = vld [vmem:[#allocation7] sm:$0x3] }
 0xd35   :  { %3208 = vmatmul.msk.f32.vlgmr.msrb.gmra.mxu0 %vm94_vm1, %v1001_v25 }
 0xd97   :  { %v1326_v10 = vpop.permute.xlu1 %1325 }
 0xd98   :  { %v1328_v11 = vadd.f32 %v1326_v10, %v1318_v26 }
 0xd9a   :  { %3365 = vtanh.f32 %v1328_v11  ;;  %v1341_v42 = vmul.f32 %v1338_v35, %v1328_v11 }
 0xda0   :  { %v3366_v12 = vpop.eup %3365 }
 0xda1   :  { %1331 = vrot.lane.b32.xlu2 %v3366_v12, %s3478_s23 }
 0xda9   :  { %984 = vrot.lane.b32.xlu2 %v904_v55, %s3481_s27 }
 0xdb2   :  { %v1026_v28 = vpop.f32.mrf.mxu0 }
 0xdb3   :  { %v1029_v29 = vadd.f32 %v1026_v28, %v1000_v27 }
 0xdb5   :  { %3367 = vtanh.f32 %v1029_v29  ;;  %v3210_v16 = vmul.f32 -1.442695, %v1029_v29 }
 0xdb7   :  { %3369 = vpow2.f32 %v3210_v16  ;;  %v1192_v16 = vld [vmem:[%s5151_s4] sm:$0xff] }
 0xdbb   :  { %v3368_v30 = vpop.eup %3367 }
 0xdbc   :  { %1088 = vrot.lane.b32.xlu0 %v3368_v30, %s3478_s23 }
 0xdbd   :  { %v3370_v39 = vpop.eup %3369 }
 0xdbe   :  { %v1064_v41 = vadd.f32 1.0, %v3370_v39 }
 0xdc0   :  { %3371 = vrcp.f32 %v1064_v41  ;;  %v1076_v48 = vand.u32 2147483648, %v1064_v41  ;;  %vm1070_vm15 = vweird.f32 %v1064_v41  ;;  %v1074_v49 = vand.u32 2147483647, %v1064_v41 }
 0xdc2   :  { %v1077_v52 = vor.u32 1.1754944e-38, %v1076_v48  ;;  %vm1075_vm3 = vcmp.eq.f32.partialorder %v1074_v49, 8.507059e+37 }
 0xdc6   :  { %v3372_v43 = vpop.eup %3371 }
 0xdc7   :  { %v1066_v44 = vmul.f32 %v3372_v43, %v1064_v41  ;;  %vm1071_vm14 = vweird.f32 %v3372_v43 }
 0xdc8   :  { %vm1072_vm2 = vmor %vm1070_vm15, %vm1071_vm14 }
 0xdc9   :  { %v1067_v45 = vsub.f32 1.0, %v1066_v44 }
 0xdcb   :  { %v1068_v46 = vmul.f32 %v3372_v43, %v1067_v45  ;;  %v1190_v45 = vld [vmem:[#allocation2 + $0xa] sm:$0x3] }
 0xdcd   :  { %v1069_v47 = vadd.f32 %v3372_v43, %v1068_v46 }
 0xdcf   :  { %v1073_v50 = vsel %vm1072_vm2, %v3372_v43, %v1069_v47  ;;  %vm394_vm2 = vcmask 517376  }
 0xdd0   :  { %v1078_v55 = vsel %vm1075_vm3, %v1077_v52, %v1073_v50 }
 0xdfb   :  { %v1332_v31 = vpop.permute.xlu2 %1331 }
 0xdfc   :  { %v1334_v34 = vmul.f32 %v1332_v31, %v1310_v20  ;;  %v1195_v31 = vld [vmem:[%s5151_s4 + $0x18] sm:$0xff] }
 0xdfd   :  { %1211 = vmatpush.msra.mxu2 %v1195_v31  ;;  %1401 = vmatpush.msra.mxu0 %v1195_v31 }
 0xdfe   :  { %v3848_v36 = vmul.f32 %v1338_v35, %v1334_v34  ;;  %v1194_v34 = vld [vmem:[%s5151_s4 + $0x10] sm:$0xff]  ;;  %v1193_v35 = vld [vmem:[%s5151_s4 + $0x8] sm:$0xff] }
 0xdff   :  { %1212 = vmatpush.msra.mxu2 %v1194_v34  ;;  %1402 = vmatpush.msra.mxu0 %v1194_v34 }
 0xe00   :  { %1368 = vrot.lane.b32.xlu1 %v3848_v36, %s3479_s8 }
 0xe01   :  { %1213 = vmatpush.msra.mxu2 %v1193_v35  ;;  %1403 = vmatpush.msra.mxu0 %v1193_v35 }
 0xe03   :  { %v985_v38 = vpop.permute.xlu2 %984  ;;  %1214 = vmatpush.msra.mxu2 %v1192_v16  ;;  %1404 = vmatpush.msra.mxu0 %v1192_v16 }
 0xe04   :  { %987 = vst.msk [vmem:[#allocation8] sm:$0x3] %vm218_vm0, %v985_v38 }
 0xe05   :  { %1591 = vmatpush.msrb.mxu2 %v1195_v31 }
 0xe07   :  { %1592 = vmatpush.msrb.mxu2 %v1194_v34 }
 0xe09   :  { %1593 = vmatpush.msrb.mxu2 %v1193_v35 }
 0xe0b   :  { %v1081_v40 = vld [vmem:[#allocation8] sm:$0x3]  ;;  %1594 = vmatpush.msrb.mxu2 %v1192_v16 }
 0xe0c   :  { %1083 = vrot.lane.b32.xlu1 %v1081_v40, %s3479_s8 }
 0xe14   :  { %1373 = vrot.lane.b32.xlu1 %v1341_v42, %s3481_s27 }
 0xe2e   :  { %v1089_v53 = vpop.permute.xlu0 %1088 }
 0xe2f   :  { %v1091_v56 = vmul.f32 %v1089_v53, %v1078_v55 }
 0xe31   :  { %1093 = vrot.lane.b32.xlu2 %v1091_v56, %s3479_s8 }
 0xe72   :  { %v1369_v57 = vpop.permute.xlu1 %1368 }
 0xe73   :  { %1371 = vst.msk [vmem:[#allocation9] sm:$0x3] %vm218_vm0, %v1369_v57 }
 0xe7a   :  { %v1412_v58 = vld [vmem:[#allocation9] sm:$0x3] }
 0xe7b   :  { %3221 = vmatmul.msk.f32.vlgmr.msrb.gmra.mxu1 %vm94_vm1, %v1412_v58 }
 0xe7e   :  { %v1084_v59 = vpop.permute.xlu1 %1083 }
 0xe7f   :  { %v1086_v61 = vmul.f32 %v1084_v59, %v1078_v55 }
 0xe86   :  { %v1374_v60 = vpop.permute.xlu1 %1373 }
 0xe87   :  { %1376 = vst.msk [vmem:[#allocation10] sm:$0x3] %vm218_vm0, %v1374_v60 }
 0xe8b   :  { %v1094_v63 = vpop.permute.xlu2 %1093 }
 0xe8c   :  { %v3859_v0 = vadd.f32 %v1094_v63, %v1086_v61 }
 0xe8e   :  { %3373 = vtanh.f32 %v3859_v0  ;;  %v1503_v1 = vld [vmem:[#allocation10] sm:$0x3] }
 0xe8f   :  { %1505 = vrot.lane.b32.xlu1 %v1503_v1, %s3479_s8 }
 0xe94   :  { %v3374_v3 = vpop.eup %3373 }
 0xe95   :  { %1099 = vrot.lane.b32.xlu0 %v3374_v3, %s3478_s23 }
 0xe97   :  { %1527 = vperm.xlu1 %3259, %v3219_v4  }
 0xef8   :  { %v1437_v6 = vpop.f32.mrf.mxu1 }
 0xef9   :  { %v1440_v7 = vadd.f32 %v1437_v6, %v1411_v5 }
 0xefb   :  { %3375 = vtanh.f32 %v1440_v7  ;;  %v3223_v19 = vmul.f32 -1.442695, %v1440_v7 }
 0xefd   :  { %3377 = vpow2.f32 %v3223_v19 }
 0xf01   :  { %v3376_v15 = vpop.eup %3375  ;;  %v1506_v40 = vpop.permute.xlu1 %1505 }
 0xf02   :  { %1510 = vrot.lane.b32.xlu2 %v3376_v15, %s3478_s23 }
 0xf03   :  { %v3378_v20 = vpop.eup %3377 }
 0xf04   :  { %v1486_v21 = vadd.f32 1.0, %v3378_v20 }
 0xf06   :  { %3379 = vrcp.f32 %v1486_v21  ;;  %v1498_v10 = vand.u32 2147483648, %v1486_v21  ;;  %vm1492_vm5 = vweird.f32 %v1486_v21  ;;  %v1496_v11 = vand.u32 2147483647, %v1486_v21 }
 0xf07   :  { %v1100_v17 = vpop.permute.xlu0 %1099 }
 0xf08   :  { %v3868_v18 = vmul.f32 %v1100_v17, %v1078_v55  ;;  %v1499_v27 = vor.u32 1.1754944e-38, %v1498_v10  ;;  %vm1497_vm7 = vcmp.eq.f32.partialorder %v1496_v11, 8.507059e+37 }
 0xf09   :  { %v1528_v52 = vpop.permute.xlu1 %1527 }
 0xf0a   :  { %1169 = vrot.lane.b32.xlu0 %v3868_v18, %s3479_s8 }
 0xf0c   :  { %v3380_v22 = vpop.eup %3379 }
 0xf0d   :  { %v1488_v23 = vmul.f32 %v3380_v22, %v1486_v21  ;;  %vm1493_vm4 = vweird.f32 %v3380_v22 }
 0xf0e   :  { %vm1494_vm6 = vmor %vm1492_vm5, %vm1493_vm4 }
 0xf0f   :  { %v1489_v25 = vsub.f32 1.0, %v1488_v23 }
 0xf11   :  { %v1490_v13 = vmul.f32 %v3380_v22, %v1489_v25 }
 0xf13   :  { %v1491_v26 = vadd.f32 %v3380_v22, %v1490_v13  ;;  %v223_v13 = vld [vmem:[%s5149_s1] sm:$0x3] }
 0xf15   :  { %v1495_v12 = vsel %vm1494_vm6, %v3380_v22, %v1491_v26  ;;  %v3200_v26 = vld [vmem:[%s5149_s1 + $0x6] sm:$0x3] }
 0xf16   :  { %v1500_v28 = vsel %vm1497_vm7, %v1499_v27, %v1495_v12  ;;  %vm1801_vm7 = vcmask 523264  }
 0xf17   :  { %v1508_v41 = vmul.f32 %v1506_v40, %v1500_v28 }
 0xf5c   :  { %v1511_v29 = vpop.permute.xlu2 %1510 }
 0xf5d   :  { %v1513_v30 = vmul.f32 %v1511_v29, %v1500_v28 }
 0xf5f   :  { %1515 = vrot.lane.b32.xlu2 %v1513_v30, %s3479_s8 }
 0xf7c   :  { %v1170_v38 = vpop.permute.xlu0 %1169 }
 0xf7d   :  { %1172 = vst.msk [vmem:[#allocation7] sm:$0x3] %vm218_vm0, %v1170_v38 }
 0xf84   :  { %v1191_v39 = vld [vmem:[#allocation7] sm:$0x3] }
 0xf85   :  { %3214 = vmatmul.msk.f32.vlgmr.msra.gmra.mxu2 %vm94_vm1, %v1191_v39 }
 0xfb9   :  { %v1516_v42 = vpop.permute.xlu2 %1515 }
 0xfba   :  { %v1518_v43 = vadd.f32 %v1516_v42, %v1508_v41 }
 0xfbc   :  { %3381 = vtanh.f32 %v1518_v43  ;;  %v1531_v57 = vmul.f32 %v1528_v52, %v1518_v43 }
 0xfc2   :  { %v3382_v44 = vpop.eup %3381 }
 0xfc3   :  { %1521 = vrot.lane.b32.xlu0 %v3382_v44, %s3478_s23 }
 0xfcb   :  { %1174 = vrot.lane.b32.xlu0 %v3859_v0, %s3481_s27 }
0x1008   :  { %v1216_v46 = vpop.f32.mrf.mxu2 }
0x1009   :  { %v1219_v47 = vadd.f32 %v1216_v46, %v1190_v45 }
0x100b   :  { %3383 = vtanh.f32 %v1219_v47  ;;  %v3216_v58 = vmul.f32 -1.442695, %v1219_v47 }
0x100d   :  { %3385 = vpow2.f32 %v3216_v58 }
0x1011   :  { %v3384_v48 = vpop.eup %3383 }
0x1012   :  { %1278 = vrot.lane.b32.xlu1 %v3384_v48, %s3478_s23 }
0x1013   :  { %v3386_v59 = vpop.eup %3385 }
0x1014   :  { %v1254_v60 = vadd.f32 1.0, %v3386_v59 }
0x1016   :  { %3387 = vrcp.f32 %v1254_v60  ;;  %v1266_v4 = vand.u32 2147483648, %v1254_v60  ;;  %vm1260_vm9 = vweird.f32 %v1254_v60  ;;  %v1264_v5 = vand.u32 2147483647, %v1254_v60 }
0x1018   :  { %v1267_v7 = vor.u32 1.1754944e-38, %v1266_v4  ;;  %vm1265_vm11 = vcmp.eq.f32.partialorder %v1264_v5, 8.507059e+37  ;;  %v3194_v4 = vld [vmem:[%s5149_s1 + $0x4] sm:$0x3] }
0x101c   :  { %v3388_v61 = vpop.eup %3387 }
0x101d   :  { %v1256_v63 = vmul.f32 %v3388_v61, %v1254_v60  ;;  %vm1261_vm8 = vweird.f32 %v3388_v61 }
0x101e   :  { %vm1262_vm10 = vmor %vm1260_vm9, %vm1261_vm8  ;;  %vm1843_vm8 = vcmask 58368   ;;  %vm1983_vm9 = vcmask 64512  }
0x101f   :  { %v1257_v0 = vsub.f32 1.0, %v1256_v63  ;;  %2158 = vst.msk [vmem:[#allocation6] sm:$0x3] %vm1843_vm8, %v5165_v32 }
0x1021   :  { %v1258_v1 = vmul.f32 %v3388_v61, %v1257_v0 }
0x1023   :  { %v1259_v3 = vadd.f32 %v3388_v61, %v1258_v1 }
0x1025   :  { %v1263_v6 = vsel %vm1262_vm10, %v3388_v61, %v1259_v3 }
0x1026   :  { %v1268_v17 = vsel %vm1265_vm11, %v1267_v7, %v1263_v6 }
0x1035   :  { %v1522_v49 = vpop.permute.xlu0 %1521 }
0x1036   :  { %v1524_v50 = vmul.f32 %v1522_v49, %v1500_v28  ;;  %v1600_v28 = vld [vmem:[#allocation3] sm:$0x3] }
0x1038   :  { %v3891_v53 = vmul.f32 %v1528_v52, %v1524_v50 }
0x103a   :  { %1558 = vrot.lane.b32.xlu2 %v3891_v53, %s3479_s8 }
0x103d   :  { %v1175_v55 = vpop.permute.xlu0 %1174 }
0x103e   :  { %1177 = vst.msk [vmem:[#allocation8] sm:$0x3] %vm218_vm0, %v1175_v55  ;;  %v3188_v55 = vld [vmem:[%s5149_s1 + $0x2] sm:$0x3] }
0x1045   :  { %v1271_v56 = vld [vmem:[#allocation8] sm:$0x3] }
0x1046   :  { %1273 = vrot.lane.b32.xlu2 %v1271_v56, %s3479_s8  ;;  %v1568_v56 = vld [vmem:[%s5149_s1] sm:$0x3] }
0x104e   :  { %1563 = vrot.lane.b32.xlu2 %v1531_v57, %s3481_s27 }
0x1084   :  { %v1279_v15 = vpop.permute.xlu1 %1278 }
0x1085   :  { %v1281_v19 = vmul.f32 %v1279_v15, %v1268_v17  ;;  %v1380_v15 = vld [vmem:[#allocation2 + $0xc] sm:$0x3] }
0x1087   :  { %1283 = vrot.lane.b32.xlu0 %v1281_v19, %s3479_s8 }
0x1094   :  { %v1559_v20 = vpop.permute.xlu2 %1558 }
0x1095   :  { %1561 = vst.msk [vmem:[#allocation9] sm:$0x3] %vm218_vm0, %v1559_v20 }
0x109c   :  { %v1601_v21 = vld [vmem:[#allocation9] sm:$0x3] }
0x109d   :  { %3226 = vmatmul.msk.f32.vlgmr.msrb.gmra.mxu3 %vm94_vm1, %v1601_v21 }
0x10a0   :  { %v1274_v22 = vpop.permute.xlu2 %1273 }
0x10a1   :  { %v1276_v10 = vmul.f32 %v1274_v22, %v1268_v17 }
0x10a8   :  { %v1564_v23 = vpop.permute.xlu2 %1563 }
0x10a9   :  { %1566 = vst.msk [vmem:[#allocation10] sm:$0x3] %vm218_vm0, %v1564_v23 }
0x10b0   :  { %v1692_v25 = vld [vmem:[#allocation10] sm:$0x3] }
0x10b1   :  { %1694 = vrot.lane.b32.xlu2 %v1692_v25, %s3479_s8 }
0x10b9   :  { %380 = vperm.xlu2 %3257, %v223_v13  }
0x10c1   :  { %962 = vperm.xlu2 %3257, %v3200_v26  }
0x10f9   :  { %v1284_v11 = vpop.permute.xlu0 %1283 }
0x10fa   :  { %v3909_v12 = vadd.f32 %v1284_v11, %v1276_v10 }
0x10fc   :  { %3389 = vtanh.f32 %v3909_v12 }
0x1102   :  { %v3390_v27 = vpop.eup %3389 }
0x1103   :  { %1289 = vrot.lane.b32.xlu1 %v3390_v27, %s3478_s23 }
0x110b   :  { %v1695_v59 = vpop.permute.xlu2 %1694 }
0x1113   :  { %v381_v5 = vpop.permute.xlu2 %380 }
0x1114   :  { %v383_v6 = vmul.f32 %v381_v5, %v3743_v33 }
0x111b   :  { %v963_v7 = vpop.permute.xlu2 %962 }
0x1120   :  { %v1626_v29 = vpop.f32.mrf.mxu3 }
0x1121   :  { %v1629_v30 = vadd.f32 %v1626_v29, %v1600_v28 }
0x1123   :  { %3391 = vtanh.f32 %v1629_v30  ;;  %v3228_v34 = vmul.f32 -1.442695, %v1629_v30 }
0x1125   :  { %3393 = vpow2.f32 %v3228_v34 }
0x1129   :  { %v3392_v31 = vpop.eup %3391 }
0x112a   :  { %1699 = vrot.lane.b32.xlu0 %v3392_v31, %s3478_s23 }
0x112b   :  { %v3394_v38 = vpop.eup %3393 }
0x112c   :  { %v1675_v39 = vadd.f32 1.0, %v3394_v38 }
0x112e   :  { %3395 = vrcp.f32 %v1675_v39  ;;  %v1687_v45 = vand.u32 2147483648, %v1675_v39  ;;  %vm1681_vm13 = vweird.f32 %v1675_v39  ;;  %v1685_v46 = vand.u32 2147483647, %v1675_v39 }
0x1130   :  { %v1688_v48 = vor.u32 1.1754944e-38, %v1687_v45  ;;  %vm1686_vm15 = vcmp.eq.f32.partialorder %v1685_v46, 8.507059e+37  ;;  %v1771_v45 = vld [vmem:[%s5153_s9 + $0x38] sm:$0xff] }
0x1131   :  { %1814 = vmatpush.msrb.mxu0 %v1771_v45 }
0x1134   :  { %v3396_v40 = vpop.eup %3395 }
0x1135   :  { %v1677_v41 = vmul.f32 %v3396_v40, %v1675_v39  ;;  %vm1682_vm12 = vweird.f32 %v3396_v40 }
0x1136   :  { %vm1683_vm14 = vmor %vm1681_vm13, %vm1682_vm12 }
0x1137   :  { %v1678_v42 = vsub.f32 1.0, %v1677_v41 }
0x1139   :  { %v1679_v43 = vmul.f32 %v3396_v40, %v1678_v42 }
0x113b   :  { %v1680_v44 = vadd.f32 %v3396_v40, %v1679_v43 }
0x113d   :  { %v1684_v47 = vsel %vm1683_vm14, %v3396_v40, %v1680_v44 }
0x113e   :  { %v1689_v49 = vsel %vm1686_vm15, %v1688_v48, %v1684_v47  ;;  %v1770_v47 = vld [vmem:[%s5153_s9 + $0x30] sm:$0xff]  ;;  %v1769_v48 = vld [vmem:[%s5153_s9 + $0x28] sm:$0xff] }
0x113f   :  { %v1697_v60 = vmul.f32 %v1695_v59, %v1689_v49  ;;  %1815 = vmatpush.msrb.mxu0 %v1770_v47 }
0x1141   :  { %1816 = vmatpush.msrb.mxu0 %v1769_v48 }
0x1175   :  { %v1290_v35 = vpop.permute.xlu1 %1289 }
0x1176   :  { %v3914_v16 = vmul.f32 %v1290_v35, %v1268_v17 }
0x1178   :  { %1359 = vrot.lane.b32.xlu1 %v3914_v16, %s3479_s8 }
0x119c   :  { %v1700_v50 = vpop.permute.xlu0 %1699 }
0x119d   :  { %v1702_v52 = vmul.f32 %v1700_v50, %v1689_v49  ;;  %v1767_v50 = vld [vmem:[%s5153_s9 + $0x18] sm:$0xff] }
0x119f   :  { %1704 = vrot.lane.b32.xlu0 %v1702_v52, %s3479_s8  ;;  %v1766_v52 = vld [vmem:[%s5153_s9 + $0x10] sm:$0xff] }
0x11a7   :  { %574 = vperm.xlu0 %3258, %v3188_v55   ;;  %v1765_v55 = vld [vmem:[%s5153_s9 + $0x8] sm:$0xff] }
0x11af   :  { %1716 = vperm.xlu0 %3258, %v1568_v56   ;;  %v1764_v56 = vld [vmem:[%s5153_s9] sm:$0xff] }
0x11ea   :  { %v1360_v57 = vpop.permute.xlu1 %1359 }
0x11eb   :  { %1362 = vst.msk [vmem:[#allocation7] sm:$0x3] %vm218_vm0, %v1360_v57 }
0x11f2   :  { %v1381_v58 = vld [vmem:[#allocation7] sm:$0x3] }
0x11f3   :  { %3220 = vmatmul.msk.f32.vlgmr.msra.gmra.mxu0 %vm94_vm1, %v1381_v58 }
0x1211   :  { %v1705_v61 = vpop.permute.xlu0 %1704 }
0x1212   :  { %v3927_v63 = vadd.f32 %v1705_v61, %v1697_v60 }
0x1214   :  { %3397 = vtanh.f32 %v3927_v63 }
0x1219   :  { %v575_v0 = vpop.permute.xlu0 %574 }
0x121a   :  { %v3398_v1 = vpop.eup %3397  ;;  %v577_v3 = vmul.f32 %v575_v0, %v3768_v37  ;;  %v965_v37 = vmul.f32 %v963_v7, %v3838_v62  ;;  %v1862_v7 = vlaneseq }
0x121b   :  { %1710 = vrot.lane.b32.xlu1 %v3398_v1, %s3478_s23 }
0x121c   :  { %579 = vrot.lane.b32.xlu2 %v577_v3, %s3479_s8 }
0x1221   :  { %v3946_v22 = vpop.permute.xlu0 %1716 }
0x1223   :  { %768 = vperm.xlu1 %3259, %v3194_v4  }
0x1224   :  { %1164 = vrot.lane.b32.xlu2 %v3809_v24, %s3478_s23 }
0x122b   :  { %385 = vrot.lane.b32.xlu1 %v383_v6, %s3479_s8 }
0x1233   :  { %967 = vrot.lane.b32.xlu1 %v965_v37, %s3479_s8  ;;  %v4002_v37 = vshrl.u32 %v1862_v7, 7 }
0x1235   :  { %3261 = vset.pattern.permute.xlu0 %v4002_v37  ;;  %3260 = vset.pattern.permute.xlu2 %v4002_v37 }
0x123b   :  { %1544 = vrot.lane.b32.xlu1 %v3891_v53, %s3478_s23 }
0x1270   :  { %v1406_v17 = vpop.f32.mrf.mxu0 }
0x1271   :  { %v1409_v19 = vadd.f32 %v1406_v17, %v1380_v15  ;;  %v4009_v15 = vld [vmem:[%s5154_s10] ss:$0 sm:$0xff] }
0x1272   :  { %v3285_v17 = vld [vmem:[%s5155_s11] ss:$0 sm:$0xff] }
0x1273   :  { %3399 = vtanh.f32 %v1409_v19  ;;  %v3222_v27 = vmul.f32 -1.442695, %v1409_v19 }
0x1275   :  { %3401 = vpow2.f32 %v3222_v27 }
0x1276   :  { %v580_v20 = vpop.permute.xlu2 %579 }
0x1277   :  { %583 = vst.msk [vmem:[#allocation4 + $0x2] sm:$0x3] %vm218_vm0, %v580_v20 }
0x1279   :  { %v3400_v24 = vpop.eup %3399 }
0x127a   :  { %1468 = vrot.lane.b32.xlu1 %v3400_v24, %s3478_s23 }
0x127e   :  { %v1165_v26 = vpop.permute.xlu2 %1164 }
0x128d   :  { %v1711_v33 = vpop.permute.xlu1 %1710 }
0x128e   :  { %v1713_v21 = vmul.f32 %v1711_v33, %v1689_v49  ;;  %v1768_v49 = vld [vmem:[%s5153_s9 + $0x20] sm:$0xff] }
0x128f   :  { %1817 = vmatpush.msrb.mxu0 %v1768_v49  ;;  %v3241_v49 = vld [vmem:[%s5149_s1 + $0x2] sm:$0x3] }
0x1290   :  { %v3949_v62 = vmul.f32 %v3946_v22, %v1713_v21  ;;  %vm2250_vm10 = vcmp.gt.f32.partialorder %v3241_v49, 0.0 }
0x1291   :  { %1818 = vmatpush.msrb.mxu0 %v1767_v50  ;;  %v2251_v50 = vsel %vm2250_vm10, 1, %v5165_v32 }
0x1292   :  { %1733 = vrot.lane.b32.xlu2 %v3949_v62, %s3478_s23 }
0x1293   :  { %1819 = vmatpush.msrb.mxu0 %v1766_v52 }
0x1295   :  { %v769_v53 = vpop.permute.xlu1 %768  ;;  %1820 = vmatpush.msrb.mxu0 %v1765_v55 }
0x1296   :  { %v771_v23 = vmul.f32 %v769_v53, %v3799_v51 }
0x1297   :  { %1821 = vmatpush.msrb.mxu0 %v1764_v56 }
0x1298   :  { %773 = vrot.lane.b32.xlu0 %v771_v23, %s3479_s8  ;;  %v4026_v23 = vld [vmem:[%s5156_s14] sm:$0xff] }
0x129d   :  { %v386_v25 = vpop.permute.xlu1 %385 }
0x129e   :  { %388 = vst.msk [vmem:[#allocation4] sm:$0x3] %vm218_vm0, %v386_v25 }
0x12a0   :  { %1354 = vrot.lane.b32.xlu0 %v3848_v36, %s3478_s23  ;;  %v3402_v36 = vpop.eup %3401 }
0x12a1   :  { %v1444_v28 = vadd.f32 1.0, %v3402_v36 }
0x12a3   :  { %3403 = vrcp.f32 %v1444_v28  ;;  %v1456_v38 = vand.u32 2147483648, %v1444_v28  ;;  %vm1450_vm4 = vweird.f32 %v1444_v28 }
0x12a5   :  { %v968_v13 = vpop.permute.xlu1 %967  ;;  %v1457_v40 = vor.u32 1.1754944e-38, %v1456_v38 }
0x12a6   :  { %971 = vst.msk [vmem:[#allocation4 + $0x6] sm:$0x3] %vm218_vm0, %v968_v13 }
0x12a7   :  { %1167 = vst.msk [vmem:[#allocation4 + $0x6] sm:$0x3] %vm394_vm2, %v1165_v26 }
0x12a8   :  { %1364 = vrot.lane.b32.xlu0 %v3909_v12, %s3481_s27  ;;  %v1454_v12 = vand.u32 2147483647, %v1444_v28 }
0x12a9   :  { %v3404_v29 = vpop.eup %3403 }
0x12aa   :  { %v1446_v30 = vmul.f32 %v3404_v29, %v1444_v28  ;;  %vm1451_vm3 = vweird.f32 %v3404_v29  ;;  %vm1455_vm6 = vcmp.eq.f32.partialorder %v1454_v12, 8.507059e+37 }
0x12ab   :  { %vm1452_vm5 = vmor %vm1450_vm4, %vm1451_vm3 }
0x12ac   :  { %v1447_v31 = vsub.f32 1.0, %v1446_v30 }
0x12ad   :  { %v1545_v10 = vpop.permute.xlu1 %1544 }
0x12ae   :  { %v1759_v51 = vld [vmem:[#allocation4 + $0x6] sm:$0x3]  ;;  %1547 = vst.msk [vmem:[#allocation4 + $0x2] sm:$0x3] %vm394_vm2, %v1545_v10  ;;  %v1448_v34 = vmul.f32 %v3404_v29, %v1447_v31 }
0x12af   :  { %1790 = vst [vmem:[#allocation1 + $0x3] ss:$4 sm:$0xff] %v1759_v51 }
0x12b0   :  { %v1449_v35 = vadd.f32 %v3404_v29, %v1448_v34 }
0x12b2   :  { %v1453_v39 = vsel %vm1452_vm5, %v3404_v29, %v1449_v35 }
0x12b3   :  { %v3963_v41 = vsel %vm1455_vm6, %v1457_v40, %v1453_v39 }
0x12b5   :  { %v1757_v11 = vld [vmem:[#allocation4 + $0x2] sm:$0x3] }
0x12b6   :  { %1786 = vst [vmem:[#allocation1 + $0x1] ss:$4 sm:$0xff] %v1757_v11 }
0x12ec   :  { %v1469_v42 = vpop.permute.xlu1 %1468  ;;  %v1734_v43 = vpop.permute.xlu2 %1733 }
0x12ed   :  { %v1471_v44 = vmul.f32 %v1469_v42, %v3963_v41  ;;  %1736 = vst.msk [vmem:[#allocation4] sm:$0x3] %vm394_vm2, %v1734_v43 }
0x12ef   :  { %1473 = vrot.lane.b32.xlu0 %v1471_v44, %s3479_s8 }
0x12f4   :  { %v1756_v46 = vld [vmem:[#allocation4] sm:$0x3] }
0x12f5   :  { %1784 = vst [vmem:[#allocation1] ss:$4 sm:$0xff] %v1756_v46 }
0x130a   :  { %v774_v57 = vpop.permute.xlu0 %773 }
0x130b   :  { %777 = vst.msk [vmem:[#allocation4 + $0x4] sm:$0x3] %vm218_vm0, %v774_v57 }
0x1312   :  { %v1355_v58 = vpop.permute.xlu0 %1354 }
0x1313   :  { %1357 = vst.msk [vmem:[#allocation4 + $0x4] sm:$0x3] %vm394_vm2, %v1355_v58 }
0x131a   :  { %v1758_v59 = vld [vmem:[#allocation4 + $0x4] sm:$0x3]  ;;  %v1365_v60 = vpop.permute.xlu0 %1364 }
0x131b   :  { %1788 = vst [vmem:[#allocation1 + $0x2] ss:$4 sm:$0xff] %v1758_v59 }
0x131c   :  { %1367 = vst.msk [vmem:[#allocation8] sm:$0x3] %vm218_vm0, %v1365_v60 }
0x1322   :  { %v1799_v61 = vld.sshfl [vmem:[#allocation1] sm:$0xff pattern:$0x73625140] }
0x1323   :  { %3229 = vmatmul.msk.f32.vlgmr.msrb.gmra.mxu0 %vm1801_vm7, %v1799_v61  ;;  %v1461_v0 = vld [vmem:[#allocation8] sm:$0x3] }
0x1324   :  { %1463 = vrot.lane.b32.xlu2 %v1461_v0, %s3479_s8 }
0x1361   :  { %v1474_v4 = vpop.permute.xlu0 %1473 }
0x137e   :  { %v1464_v1 = vpop.permute.xlu2 %1463 }
0x137f   :  { %v1466_v3 = vmul.f32 %v1464_v1, %v3963_v41 }
0x1381   :  { %v1476_v5 = vadd.f32 %v1474_v4, %v1466_v3 }
0x1383   :  { %3405 = vtanh.f32 %v1476_v5 }
0x1389   :  { %v3406_v6 = vpop.eup %3405 }
0x138a   :  { %1479 = vrot.lane.b32.xlu1 %v3406_v6, %s3478_s23  ;;  %v1570_v6 = vld [vmem:[#allocation2 + $0xe] sm:$0x3] }
0x13a0   :  { %v1823_v19 = vpop.f32.mrf.mxu0 }
0x13a1   :  { %v4015_v20 = vadd.f32 %v4009_v15, %v1823_v19 }
0x13a3   :  { %v1831_v24 = vrot.slane %v4015_v20, 2  ;;  %v1832_v33 = vrot.slane %v4015_v20, 4  ;;  %v1833_v21 = vrot.slane %v4015_v20, 6  ;;  %v4021_v53 = vadd.f32 %v3285_v17, %v4015_v20 }
0x13a5   :  { %1845 = vst.msk [vmem:[#allocation5 + $0x2] sm:$0x3] %vm1843_vm8, %v1831_v24  ;;  %v2165_v25 = vperm.slane %v4021_v53, 0  ;;  %v2164_v13 = vrot.slane %v4021_v53, 1 }
0x13a6   :  { %1846 = vst.msk [vmem:[#allocation5 + $0x4] sm:$0x3] %vm1843_vm8, %v1832_v33 }
0x13a7   :  { %1847 = vst.msk [vmem:[#allocation5 + $0x6] sm:$0x3] %vm1843_vm8, %v1833_v21  ;;  %v4040_v26 = vadd.f32 %v2165_v25, %v4026_v23  ;;  %v2166_v10 = vperm.slane %v2164_v13, 0 }
0x13a9   :  { %v2171_v51 = vsel %vm1983_vm9, %v4040_v26, -inf  ;;  %v4045_v11 = vadd.f32 %v2166_v10, %v4026_v23 }
0x13aa   :  { %2172 = vmax.xlane.f32.xlu2 %v2171_v51  ;;  %v4092_v51 = vand.u32 127, %v1862_v7 }
0x13ab   :  { %v2174_v27 = vsel %vm1983_vm9, %v4045_v11, -inf }
0x13ac   :  { %2175 = vmax.xlane.f32.xlu0 %v2174_v27  ;;  %v2161_v36 = vld [vmem:[#allocation5 + $0x2] sm:$0x3] }
0x13ad   :  { %v2203_v28 = vperm.slane %v2161_v36, 1  ;;  %v2196_v29 = vperm.slane %v2161_v36, 0  ;;  %v4084_v4 = vld [vmem:[#allocation5 + $0x4] sm:$0x3] }
0x13c0   :  { %2208 = vperm.xlu0 %3261, %v2203_v28  }
0x13c2   :  { %2201 = vperm.xlu2 %3260, %v2196_v29  }
0x13c8   :  { %1554 = vrot.lane.b32.xlu0 %v1476_v5, %s3481_s27  ;;  %v2324_v5 = vperm.slane %v4084_v4, 0 }
0x13c9   :  { %3267 = vset.pattern.permute.xlu0 %v5165_v32 }
0x13ca   :  { %3262 = vset.pattern.permute.xlu2 %v5165_v32 }
0x13fc   :  { %v1480_v30 = vpop.permute.xlu1 %1479 }
0x13fd   :  { %v4053_v31 = vmul.f32 %v1480_v30, %v3963_v41 }
0x13ff   :  { %1549 = vrot.lane.b32.xlu1 %v4053_v31, %s3479_s8 }
0x141d   :  { %v4057_v34 = vpop.xlane.xlu2 %2172 }
0x141e   :  { %v2177_v35 = vsub.f32 %v4040_v26, %v4057_v34 }
0x141f   :  { %v4061_v38 = vpop.xlane.xlu0 %2175 }
0x1420   :  { %v2179_v12 = vmul.f32 1.442695, %v2177_v35  ;;  %v2178_v39 = vsub.f32 %v4045_v11, %v4061_v38 }
0x1422   :  { %3407 = vpow2.f32 %v2179_v12  ;;  %v2181_v40 = vmul.f32 1.442695, %v2178_v39 }
0x1424   :  { %3409 = vpow2.f32 %v2181_v40 }
0x1425   :  { %v4076_v52 = vpop.permute.xlu2 %2201 }
0x1428   :  { %v3408_v42 = vpop.eup %3407 }
0x1429   :  { %v2183_v41 = vsel %vm1983_vm9, %v3408_v42, 0.0 }
0x142a   :  { %v3410_v43 = vpop.eup %3409  ;;  %2184 = vadd.xlane.f32.xlu1 %v2183_v41 }
0x142b   :  { %v2186_v44 = vsel %vm1983_vm9, %v3410_v43, 0.0 }
0x142c   :  { %2187 = vadd.xlane.f32.xlu2 %v2186_v44 }
0x1432   :  { %v4067_v45 = vpop.permute.xlu0 %2208 }
0x143a   :  { %v1555_v46 = vpop.permute.xlu0 %1554 }
0x143b   :  { %1557 = vst.msk [vmem:[#allocation8] sm:$0x3] %vm218_vm0, %v1555_v46 }
0x1444   :  { %2253 = vperm.xlu2 %3262, %v2251_v50  }
0x1471   :  { %v1550_v47 = vpop.permute.xlu1 %1549 }
0x1472   :  { %1552 = vst.msk [vmem:[#allocation7] sm:$0x3] %vm218_vm0, %v1550_v47 }
0x1479   :  { %v1571_v48 = vld [vmem:[#allocation7] sm:$0x3] }
0x147a   :  { %3225 = vmatmul.msk.f32.vlgmr.msrb.gmra.mxu2 %vm94_vm1, %v1571_v48  ;;  %vm2266_vm1 = vcmask 1041409  }
0x149d   :  { %v2185_v55 = vpop.xlane.xlu1 %2184 }
0x149e   :  { %3411 = vlog2.f32 %v2185_v55 }
0x149f   :  { %v2188_v56 = vpop.xlane.xlu2 %2187 }
0x14a0   :  { %3413 = vlog2.f32 %v2188_v56 }
0x14a4   :  { %v3412_v57 = vpop.eup %3411 }
0x14a5   :  { %v2190_v58 = vmul.f32 0.6931472, %v3412_v57 }
0x14a6   :  { %v3414_v59 = vpop.eup %3413 }
0x14a7   :  { %v2193_v60 = vadd.f32 %v2190_v58, %v4057_v34  ;;  %v2192_v61 = vmul.f32 0.6931472, %v3414_v59  ;;  %v4089_v13 = vpop.permute.xlu2 %2253 }
0x14a8   :  { %vm2255_vm11 = vcmp.eq.s32.totalorder %v4089_v13, 1 }
0x14a9   :  { %v2194_v0 = vadd.f32 %v2192_v61, %v4061_v38  ;;  %v2212_v1 = vadd.f32 %v4076_v52, %v2193_v60 }
0x14ab   :  { %2259 = vperm.xlu1 %3259, %v2212_v1   ;;  %v2213_v3 = vadd.f32 %v4067_v45, %v2194_v0  ;;  %v3206_v1 = vld [vmem:[%s5149_s1 + $0x8] sm:$0x3] }
0x14ad   :  { %2262 = vperm.xlu2 %3262, %v2213_v3  }
0x14b3   :  { %3264 = vset.pattern.permute.xlu1 %v4002_v37 }
0x14b5   :  { %3263 = vset.pattern.permute.xlu2 %v4002_v37 }
0x14bd   :  { %2329 = vperm.xlu2 %3263, %v2324_v5  }
0x14c5   :  { %3266 = vset.pattern.permute.xlu2 %v5165_v32 }
0x14fd   :  { %v1596_v17 = vpop.f32.mrf.mxu2 }
0x14fe   :  { %v1599_v19 = vadd.f32 %v1596_v17, %v1570_v6 }
0x1500   :  { %3415 = vtanh.f32 %v1599_v19  ;;  %v3227_v43 = vmul.f32 -1.442695, %v1599_v19 }
0x1502   :  { %3417 = vpow2.f32 %v3227_v43 }
0x1506   :  { %v3416_v25 = vpop.eup %3415 }
0x1507   :  { %1657 = vrot.lane.b32.xlu0 %v3416_v25, %s3478_s23  ;;  %v2263_v10 = vpop.permute.xlu2 %2262 }
0x1508   :  { %v2265_v36 = vperm.slane %v2263_v10, %v4092_v51  ;;  %v3418_v44 = vpop.eup %3417 }
0x1509   :  { %v1633_v46 = vadd.f32 1.0, %v3418_v44 }
0x150b   :  { %3419 = vrcp.f32 %v1633_v46  ;;  %v1645_v56 = vand.u32 2147483648, %v1633_v46  ;;  %vm1639_vm13 = vweird.f32 %v1633_v46  ;;  %v1643_v57 = vand.u32 2147483647, %v1633_v46 }
0x150d   :  { %v1646_v59 = vor.u32 1.1754944e-38, %v1645_v56  ;;  %vm1644_vm15 = vcmp.eq.f32.partialorder %v1643_v57, 8.507059e+37 }
0x1511   :  { %v3420_v47 = vpop.eup %3419 }
0x1512   :  { %v1635_v48 = vmul.f32 %v3420_v47, %v1633_v46  ;;  %vm1640_vm12 = vweird.f32 %v3420_v47 }
0x1513   :  { %vm1641_vm14 = vmor %vm1639_vm13, %vm1640_vm12 }
0x1514   :  { %v1636_v49 = vsub.f32 1.0, %v1635_v48 }
0x1516   :  { %v1637_v50 = vmul.f32 %v3420_v47, %v1636_v49 }
0x1517   :  { %v4116_v3 = vpop.permute.xlu2 %2329 }
0x1518   :  { %v1638_v55 = vadd.f32 %v3420_v47, %v1637_v50 }
0x151a   :  { %v1642_v58 = vsel %vm1641_vm14, %v3420_v47, %v1638_v55 }
0x151b   :  { %v4109_v60 = vsel %vm1644_vm15, %v1646_v59, %v1642_v58 }
0x151d   :  { %v2260_v27 = vpop.permute.xlu1 %2259 }
0x151e   :  { %v2264_v28 = vperm.slane %v2260_v27, %v4092_v51 }
0x1520   :  { %v2267_v29 = vsel %vm2266_vm1, %v2265_v36, %v2264_v28 }
0x1521   :  { %v4101_v30 = vsel %vm2255_vm11, %v2267_v29, %v4021_v53 }
0x1522   :  { %v2293_v35 = vperm.slane %v4101_v30, 0  ;;  %v2292_v7 = vrot.slane %v4101_v30, 1 }
0x1524   :  { %v2297_v12 = vadd.f32 %v2293_v35, %v4026_v23  ;;  %v2294_v39 = vperm.slane %v2292_v7, 0  ;;  %v1650_v35 = vld [vmem:[#allocation8] sm:$0x3]  ;;  %v2331_v7 = vperm.slane %v4084_v4, 1  ;;  %v3242_v4 = vld [vmem:[%s5149_s1 + $0x4] sm:$0x3] }
0x1525   :  { %vm2392_vm3 = vcmp.gt.f32.partialorder %v3242_v4, 0.0 }
0x1526   :  { %v2299_v40 = vsel %vm1983_vm9, %v2297_v12, -inf  ;;  %v2298_v42 = vadd.f32 %v2294_v39, %v4026_v23  ;;  %v2393_v48 = vsel %vm2392_vm3, 1, %v5165_v32 }
0x1527   :  { %2300 = vmax.xlane.f32.xlu1 %v2299_v40 }
0x1528   :  { %v2302_v41 = vsel %vm1983_vm9, %v2298_v42, -inf }
0x1529   :  { %2303 = vmax.xlane.f32.xlu2 %v2302_v41 }
0x1579   :  { %v1658_v61 = vpop.permute.xlu0 %1657 }
0x157a   :  { %v1660_v0 = vmul.f32 %v1658_v61, %v4109_v60  ;;  %v3212_v61 = vld [vmem:[%s5149_s1 + $0xa] sm:$0x3] }
0x157c   :  { %1662 = vrot.lane.b32.xlu2 %v1660_v0, %s3479_s8 }
0x1584   :  { %1154 = vperm.xlu2 %3266, %v3206_v1   ;;  %v3218_v1 = vld [vmem:[%s5149_s1 + $0xc] sm:$0x3] }
0x159a   :  { %v2301_v5 = vpop.xlane.xlu1 %2300 }
0x159b   :  { %v2305_v6 = vsub.f32 %v2297_v12, %v2301_v5  ;;  %v3224_v12 = vld [vmem:[%s5149_s1 + $0xe] sm:$0x3] }
0x159c   :  { %v2304_v17 = vpop.xlane.xlu2 %2303  ;;  %1723 = vperm.xlu2 %3266, %v3224_v12  }
0x159d   :  { %v2307_v19 = vmul.f32 1.442695, %v2305_v6  ;;  %v2306_v25 = vsub.f32 %v2298_v42, %v2304_v17 }
0x159f   :  { %3421 = vpow2.f32 %v2307_v19  ;;  %v2309_v10 = vmul.f32 1.442695, %v2306_v25 }
0x15a1   :  { %3423 = vpow2.f32 %v2309_v10 }
0x15a5   :  { %v3422_v27 = vpop.eup %3421 }
0x15a6   :  { %v2311_v36 = vsel %vm1983_vm9, %v3422_v27, 0.0 }
0x15a7   :  { %v3424_v28 = vpop.eup %3423  ;;  %2312 = vadd.xlane.f32.xlu0 %v2311_v36 }
0x15a8   :  { %v2314_v29 = vsel %vm1983_vm9, %v3424_v28, 0.0 }
0x15a9   :  { %2315 = vadd.xlane.f32.xlu1 %v2314_v29 }
0x15bb   :  { %1652 = vrot.lane.b32.xlu0 %v1650_v35, %s3479_s8 }
0x15c2   :  { %2336 = vperm.xlu1 %3264, %v2331_v7  }
0x15ca   :  { %3265 = vset.pattern.permute.xlu1 %v5165_v32 }
0x15d6   :  { %v1663_v50 = vpop.permute.xlu2 %1662 }
0x161a   :  { %v2313_v39 = vpop.xlane.xlu0 %2312 }
0x161b   :  { %3425 = vlog2.f32 %v2313_v39 }
0x161c   :  { %v2316_v41 = vpop.xlane.xlu1 %2315 }
0x161d   :  { %3427 = vlog2.f32 %v2316_v41 }
0x1621   :  { %v3426_v40 = vpop.eup %3425 }
0x1622   :  { %v2318_v42 = vmul.f32 0.6931472, %v3426_v40 }
0x1623   :  { %v3428_v46 = vpop.eup %3427 }
0x1624   :  { %v2321_v43 = vadd.f32 %v2318_v42, %v2301_v5  ;;  %v2320_v55 = vmul.f32 0.6931472, %v3428_v46  ;;  %v1155_v5 = vpop.permute.xlu2 %1154 }
0x1625   :  { %v1157_v6 = vmul.f32 %v1155_v5, %v3868_v18 }
0x1626   :  { %v2340_v44 = vadd.f32 %v4116_v3, %v2321_v43  ;;  %v2322_v57 = vadd.f32 %v2320_v55, %v2304_v17  ;;  %v1720_v55 = vmul.f32 %v3946_v22, %v3927_v63  ;;  %v3243_v22 = vld [vmem:[%s5149_s1 + $0x6] sm:$0x3] }
0x1628   :  { %2401 = vperm.xlu1 %3265, %v2340_v44  }
0x162c   :  { %v1724_v17 = vpop.permute.xlu2 %1723 }
0x162d   :  { %v1653_v47 = vpop.permute.xlu0 %1652 }
0x162e   :  { %v1655_v49 = vmul.f32 %v1653_v47, %v4109_v60  ;;  %v2430_v47 = vld [vmem:[#allocation5 + $0x6] sm:$0x3] }
0x1630   :  { %v4132_v56 = vadd.f32 %v1663_v50, %v1655_v49  ;;  %2395 = vperm.xlu1 %3265, %v2393_v48   ;;  %v2465_v48 = vperm.slane %v2430_v47, 0  ;;  %v2472_v49 = vperm.slane %v2430_v47, 1 }
0x1632   :  { %3429 = vtanh.f32 %v4132_v56 }
0x1634   :  { %v4135_v58 = vpop.permute.xlu1 %2336 }
0x1635   :  { %v2341_v59 = vadd.f32 %v4135_v58, %v2322_v57 }
0x1637   :  { %2404 = vperm.xlu2 %3266, %v2341_v59  }
0x1638   :  { %v3430_v0 = vpop.eup %3429  ;;  %1344 = vperm.xlu1 %3265, %v3212_v61  }
0x1639   :  { %1668 = vrot.lane.b32.xlu0 %v3430_v0, %s3478_s23 }
0x163f   :  { %3268 = vset.pattern.permute.xlu2 %v4002_v37 }
0x1641   :  { %1534 = vperm.xlu0 %3267, %v3218_v1  }
0x1649   :  { %390 = vrot.lane.b32.xlu0 %v3662_v54, %s3478_s23 }
0x1651   :  { %585 = vrot.lane.b32.xlu0 %v3721_v14, %s3478_s23 }
0x1659   :  { %779 = vrot.lane.b32.xlu0 %v3758_v9, %s3478_s23 }
0x1661   :  { %973 = vrot.lane.b32.xlu0 %v3781_v8, %s3478_s23 }
0x1669   :  { %1159 = vrot.lane.b32.xlu0 %v1157_v6, %s3479_s8 }
0x1691   :  { %v2405_v25 = vpop.permute.xlu2 %2404 }
0x1692   :  { %v2407_v54 = vperm.slane %v2405_v25, %v4092_v51 }
0x169a   :  { %v2402_v19 = vpop.permute.xlu1 %2401 }
0x169b   :  { %v2406_v10 = vperm.slane %v2402_v19, %v4092_v51 }
0x169d   :  { %v2408_v14 = vsel %vm2266_vm1, %v2407_v54, %v2406_v10 }
0x16a2   :  { %v4158_v27 = vpop.permute.xlu1 %2395 }
0x16a3   :  { %vm2397_vm4 = vcmp.eq.s32.totalorder %v4158_v27, 1 }
0x16a4   :  { %v4165_v9 = vsel %vm2397_vm4, %v2408_v14, %v4101_v30 }
0x16a5   :  { %v2434_v8 = vperm.slane %v4165_v9, 0  ;;  %v2433_v41 = vrot.slane %v4165_v9, 1 }
0x16a7   :  { %v2438_v18 = vadd.f32 %v2434_v8, %v4026_v23 }
0x16a9   :  { %v2440_v36 = vsel %vm1983_vm9, %v2438_v18, -inf }
0x16aa   :  { %2441 = vmax.xlane.f32.xlu1 %v2440_v36  ;;  %v1345_v39 = vpop.permute.xlu1 %1344 }
0x16ab   :  { %v1669_v28 = vpop.permute.xlu0 %1668  ;;  %v1347_v40 = vmul.f32 %v1345_v39, %v3914_v16  ;;  %v1866_v39 = vld [vmem:[%s5157_s2 + $0x4] sm:$0x3] }
0x16ac   :  { %v1671_v29 = vmul.f32 %v1669_v28, %v4109_v60 }
0x16ae   :  { %v1726_v35 = vmul.f32 %v1724_v17, %v1671_v29 }
0x16b0   :  { %1728 = vrot.lane.b32.xlu0 %v1726_v35, %s3479_s8 }
0x16b3   :  { %v1535_v7 = vpop.permute.xlu0 %1534 }
0x16b4   :  { %v1537_v12 = vmul.f32 %v1535_v7, %v4053_v31  ;;  %v2435_v31 = vperm.slane %v2433_v41, 0 }
0x16b6   :  { %1539 = vrot.lane.b32.xlu2 %v1537_v12, %s3479_s8  ;;  %v2439_v44 = vadd.f32 %v2435_v31, %v4026_v23  ;;  %v1864_v12 = vld [vmem:[%s5157_s2] sm:$0x3] }
0x16b8   :  { %v2443_v16 = vsel %vm1983_vm9, %v2439_v44, -inf }
0x16bb   :  { %v391_v30 = vpop.permute.xlu0 %390 }
0x16bc   :  { %395 = vst.msk [vmem:[#allocation4 + $0xe] sm:$0x3] %vm394_vm2, %v391_v30  ;;  %v1865_v30 = vld [vmem:[%s5157_s2 + $0x2] sm:$0x3] }
0x16c3   :  { %1349 = vrot.lane.b32.xlu1 %v1347_v40, %s3479_s8  ;;  %v586_v42 = vpop.permute.xlu0 %585  ;;  %v1869_v40 = vld [vmem:[%s5157_s2 + $0xa] sm:$0x3] }
0x16c4   :  { %589 = vst.msk [vmem:[#allocation4 + $0xc] sm:$0x3] %vm394_vm2, %v586_v42 }
0x16cb   :  { %v780_v60 = vpop.permute.xlu0 %779 }
0x16cc   :  { %783 = vst.msk [vmem:[#allocation4 + $0xa] sm:$0x3] %vm394_vm2, %v780_v60 }
0x16d3   :  { %v974_v43 = vpop.permute.xlu0 %973 }
0x16d4   :  { %977 = vst.msk [vmem:[#allocation4 + $0x8] sm:$0x3] %vm394_vm2, %v974_v43  ;;  %vm2533_vm2 = vcmp.gt.f32.partialorder %v3243_v22, 0.0 }
0x16d5   :  { %v2534_v17 = vsel %vm2533_vm2, 1, %v5165_v32 }
0x16db   :  { %v1160_v4 = vpop.permute.xlu0 %1159 }
0x16dc   :  { %1162 = vst.msk [vmem:[#allocation4 + $0x8] sm:$0x3] %vm218_vm0, %v1160_v4 }
0x16df   :  { %2444 = vmax.xlane.f32.xlu2 %v2443_v16 }
0x16e3   :  { %v1760_v46 = vld [vmem:[#allocation4 + $0x8] sm:$0x3] }
0x16e4   :  { %1792 = vst [vmem:[#allocation1 + $0x20] ss:$4 sm:$0xff] %v1760_v46 }
0x16f7   :  { %2470 = vperm.xlu2 %3268, %v2465_v48  }
0x16ff   :  { %2477 = vperm.xlu2 %3268, %v2472_v49  }
0x1707   :  { %1738 = vrot.lane.b32.xlu2 %v1671_v29, %s3479_s8 }
0x170f   :  { %1747 = vrot.lane.b32.xlu2 %v3949_v62, %s3479_s8 }
0x1710   :  { %v1540_v50 = vpop.permute.xlu2 %1539 }
0x1711   :  { %1542 = vst.msk [vmem:[#allocation4 + $0xc] sm:$0x3] %vm218_vm0, %v1540_v50 }
0x1717   :  { %1752 = vrot.lane.b32.xlu2 %v1720_v55, %s3481_s27 }
0x1718   :  { %v1762_v57 = vld [vmem:[#allocation4 + $0xc] sm:$0x3] }
0x1719   :  { %1796 = vst [vmem:[#allocation1 + $0x22] ss:$4 sm:$0xff] %v1762_v57 }
0x171d   :  { %v4191_v59 = vpop.xlane.xlu1 %2441 }
0x171e   :  { %v2446_v61 = vsub.f32 %v2438_v18, %v4191_v59 }
0x1720   :  { %v2448_v0 = vmul.f32 1.442695, %v2446_v61 }
0x1722   :  { %3431 = vpow2.f32 %v2448_v0  ;;  %v1729_v1 = vpop.permute.xlu0 %1728  ;;  %v2249_v0 = vadd.f32 %v4067_v45, %v4061_v38 }
0x1723   :  { %1731 = vst.msk [vmem:[#allocation4 + $0xe] sm:$0x3] %vm218_vm0, %v1729_v1 }
0x1728   :  { %v3432_v62 = vpop.eup %3431 }
0x1729   :  { %v2452_v5 = vsel %vm1983_vm9, %v3432_v62, 0.0 }
0x172a   :  { %v1763_v6 = vld [vmem:[#allocation4 + $0xe] sm:$0x3]  ;;  %2453 = vadd.xlane.f32.xlu0 %v2452_v5  ;;  %v1960_v5 = vld [vmem:[%s5158_s13] sm:$0xff] }
0x172b   :  { %1798 = vst [vmem:[#allocation1 + $0x23] ss:$4 sm:$0xff] %v1763_v6  ;;  %2003 = vmatpush.msra.mxu1 %v1960_v5 }
0x1735   :  { %v1350_v63 = vpop.permute.xlu1 %1349 }
0x1736   :  { %1352 = vst.msk [vmem:[#allocation4 + $0xa] sm:$0x3] %vm218_vm0, %v1350_v63 }
0x173d   :  { %v1761_v19 = vld [vmem:[#allocation4 + $0xa] sm:$0x3] }
0x173e   :  { %1794 = vst [vmem:[#allocation1 + $0x21] ss:$4 sm:$0xff] %v1761_v19  ;;  %2536 = vperm.xlu0 %3267, %v2534_v17  }
0x1745   :  { %v1800_v25 = vld.sshfl [vmem:[#allocation1 + $0x20] sm:$0xff pattern:$0x73625140] }
0x1746   :  { %3230 = vmatmul.msk.f32.gmra.mxu0 %vm1801_vm7, %v1800_v25  ;;  %3270 = vset.pattern.permute.xlu0 %v4002_v37 }
0x1752   :  { %v2445_v10 = vpop.xlane.xlu2 %2444 }
0x1753   :  { %v2447_v54 = vsub.f32 %v2439_v44, %v2445_v10 }
0x1755   :  { %v2450_v14 = vmul.f32 1.442695, %v2447_v54 }
0x1757   :  { %3433 = vpow2.f32 %v2450_v14 }
0x175a   :  { %v4203_v8 = vpop.permute.xlu2 %2470 }
0x175d   :  { %v3434_v18 = vpop.eup %3433 }
0x175e   :  { %v2455_v36 = vsel %vm1983_vm9, %v3434_v18, 0.0 }
0x175f   :  { %2456 = vadd.xlane.f32.xlu1 %v2455_v36 }
0x1762   :  { %v4206_v28 = vpop.permute.xlu2 %2477 }
0x176a   :  { %v1739_v29 = vpop.permute.xlu2 %1738 }
0x176b   :  { %1741 = vst.msk [vmem:[#allocation7] sm:$0x3] %vm218_vm0, %v1739_v29 }
0x1772   :  { %v1748_v35 = vpop.permute.xlu2 %1747 }
0x1773   :  { %1750 = vst.msk [vmem:[#allocation9] sm:$0x3] %vm218_vm0, %v1748_v35 }
0x1778   :  { %1743 = vrot.lane.b32.xlu1 %v4132_v56, %s3481_s27  ;;  %v1867_v56 = vld [vmem:[%s5157_s2 + $0x6] sm:$0x3] }
0x177a   :  { %v1753_v7 = vpop.permute.xlu2 %1752 }
0x177b   :  { %1755 = vst.msk [vmem:[#allocation10] sm:$0x3] %vm218_vm0, %v1753_v7 }
0x1780   :  { %1873 = vperm.xlu1 %3265, %v1864_v12  }
0x1788   :  { %1876 = vperm.xlu1 %3265, %v1865_v30  }
0x1790   :  { %1879 = vperm.xlu1 %3265, %v1866_v39  }
0x1798   :  { %1882 = vperm.xlu1 %3265, %v1867_v56  }
0x179d   :  { %v2454_v42 = vpop.xlane.xlu0 %2453 }
0x179e   :  { %3435 = vlog2.f32 %v2454_v42 }
0x17a0   :  { %1888 = vperm.xlu1 %3265, %v1869_v40  }
0x17b0   :  { %v4283_v36 = vpop.permute.xlu0 %2536 }
0x17b1   :  { %vm2538_vm12 = vcmp.eq.s32.totalorder %v4283_v36, 1 }
0x17c3   :  { %v1826_v60 = vpop.f32.mrf.mxu0 }
0x17c4   :  { %v4229_v41 = vadd.f32 %v4009_v15, %v1826_v60  ;;  %v3436_v15 = vpop.eup %3435  ;;  %v1868_v60 = vld [vmem:[%s5157_s2 + $0x8] sm:$0x3] }
0x17c5   :  { %v2459_v46 = vmul.f32 0.6931472, %v3436_v15  ;;  %v3244_v15 = vld [vmem:[%s5149_s1 + $0x8] sm:$0x3] }
0x17c6   :  { %v1834_v43 = vrot.slane %v4229_v41, 2  ;;  %1848 = vst.msk [vmem:[#allocation5 + $0x8] sm:$0x3] %vm1843_vm8, %v4229_v41  ;;  %v1835_v31 = vrot.slane %v4229_v41, 4  ;;  %v1836_v44 = vrot.slane %v4229_v41, 6  ;;  %vm2674_vm13 = vcmp.gt.f32.partialorder %v3244_v15, 0.0 }
0x17c7   :  { %v2462_v48 = vadd.f32 %v2459_v46, %v4191_v59 }
0x17c8   :  { %1849 = vst.msk [vmem:[#allocation5 + $0xa] sm:$0x3] %vm1843_vm8, %v1834_v43 }
0x17c9   :  { %1850 = vst.msk [vmem:[#allocation5 + $0xc] sm:$0x3] %vm1843_vm8, %v1835_v31  ;;  %v2481_v49 = vadd.f32 %v4203_v8, %v2462_v48 }
0x17ca   :  { %1851 = vst.msk [vmem:[#allocation5 + $0xe] sm:$0x3] %vm1843_vm8, %v1836_v44 }
0x17cd   :  { %v2571_v4 = vld [vmem:[#allocation5 + $0x8] sm:$0x3] }
0x17ce   :  { %v2606_v16 = vperm.slane %v2571_v4, 0  ;;  %v2613_v42 = vperm.slane %v2571_v4, 1 }
0x17d0   :  { %2611 = vperm.xlu2 %3268, %v2606_v16   ;;  %v2675_v16 = vsel %vm2674_vm13, 1, %v5165_v32 }
0x17d2   :  { %v2457_v47 = vpop.xlane.xlu1 %2456 }
0x17d3   :  { %3437 = vlog2.f32 %v2457_v47 }
0x17d8   :  { %3269 = vset.pattern.permute.xlu2 %v5165_v32 }
0x17d9   :  { %v3438_v50 = vpop.eup %3437  ;;  %2542 = vperm.xlu2 %3269, %v2481_v49  }
0x17da   :  { %v2461_v55 = vmul.f32 0.6931472, %v3438_v50 }
0x17dc   :  { %v2463_v57 = vadd.f32 %v2461_v55, %v2445_v10 }
0x17de   :  { %v2482_v61 = vadd.f32 %v4206_v28, %v2463_v57 }
0x17e1   :  { %2545 = vperm.xlu2 %3269, %v2482_v61  }
0x17e9   :  { %2276 = vperm.xlu2 %3269, %v2249_v0  }
0x17ea   :  { %v1744_v1 = vpop.permute.xlu1 %1743 }
0x17eb   :  { %1746 = vst.msk [vmem:[#allocation8] sm:$0x3] %vm218_vm0, %v1744_v1 }
0x17f2   :  { %v1874_v59 = vpop.permute.xlu1 %1873 }
0x17f3   :  { %vm1896_vm5 = vcmp.eq.s32.totalorder %v1874_v59, %v4092_v51 }
0x17f4   :  { %v4254_v62 = vsel %vm1896_vm5, 1.0, %v3477_v2 }
0x17f5   :  { %1968 = vst [vmem:[#allocation1] ss:$4 sm:$0xff] %v4254_v62 }
0x17fa   :  { %v1877_v6 = vpop.permute.xlu1 %1876 }
0x17fb   :  { %vm1897_vm6 = vcmp.eq.s32.totalorder %v1877_v6, %v4092_v51 }
0x17fc   :  { %v4262_v45 = vsel %vm1897_vm6, 1.0, %v3477_v2  ;;  %vm2065_vm6 = vcmask 1024  }
0x17fd   :  { %1970 = vst [vmem:[#allocation1 + $0x1] ss:$4 sm:$0xff] %v4262_v45 }
0x1802   :  { %v1880_v63 = vpop.permute.xlu1 %1879 }
0x1803   :  { %vm1898_vm0 = vcmp.eq.s32.totalorder %v1880_v63, %v4092_v51 }
0x1804   :  { %v4267_v22 = vsel %vm1898_vm0, 1.0, %v3477_v2  ;;  %vm2214_vm0 = vcmp.ge.f32.partialorder %v4040_v26, %v4057_v34 }
0x1805   :  { %1972 = vst [vmem:[#allocation1 + $0x2] ss:$4 sm:$0xff] %v4267_v22 }
0x180a   :  { %v1883_v17 = vpop.permute.xlu1 %1882 }
0x180b   :  { %vm1899_vm7 = vcmp.eq.s32.totalorder %v1883_v17, %v4092_v51 }
0x180c   :  { %v4272_v19 = vsel %vm1899_vm7, 1.0, %v3477_v2  ;;  %vm2215_vm7 = vcmp.ge.f32.partialorder %v4045_v11, %v4061_v38 }
0x180d   :  { %1974 = vst [vmem:[#allocation1 + $0x3] ss:$4 sm:$0xff] %v4272_v19 }
0x1812   :  { %v1889_v25 = vpop.permute.xlu1 %1888 }
0x1813   :  { %vm1901_vm10 = vcmp.eq.s32.totalorder %v1889_v25, %v4092_v51 }
0x1814   :  { %v4277_v10 = vsel %vm1901_vm10, 1.0, %v3477_v2  ;;  %v1981_v54 = vld.sshfl [vmem:[#allocation1] sm:$0xff pattern:$0x73625140] }
0x1815   :  { %5174 = vst [vmem:[#allocation11_spill] sm:$0xff] %v4277_v10  ;;  %3239 = vmatmul.msk.f32.vlgmr.msra.gmra.mxu1 %vm1983_vm9, %v1981_v54 }
0x1816   :  { %1978 = vst [vmem:[#allocation1 + $0x21] ss:$4 sm:$0xff] %v4277_v10 }
0x182a   :  { %v4281_v14 = vpop.permute.xlu2 %2611 }
0x1833   :  { %v2543_v18 = vpop.permute.xlu2 %2542 }
0x1834   :  { %v2547_v35 = vperm.slane %v2543_v18, %v4092_v51 }
0x183b   :  { %v2546_v29 = vpop.permute.xlu2 %2545 }
0x183c   :  { %v2548_v7 = vperm.slane %v2546_v29, %v4092_v51 }
0x183e   :  { %v2549_v12 = vsel %vm2266_vm1, %v2548_v7, %v2547_v35 }
0x183f   :  { %v4292_v30 = vsel %vm2538_vm12, %v2549_v12, %v4165_v9  ;;  %v2248_v9 = vadd.f32 %v4076_v52, %v4057_v34 }
0x1840   :  { %v2575_v39 = vperm.slane %v4292_v30, 0 }
0x1842   :  { %v2579_v56 = vadd.f32 %v2575_v39, %v4026_v23  ;;  %v2574_v39 = vrot.slane %v4292_v30, 1 }
0x1843   :  { %v2277_v57 = vpop.permute.xlu2 %2276 }
0x1844   :  { %v2581_v40 = vsel %vm1983_vm9, %v2579_v56, -inf  ;;  %v2279_v0 = vperm.slane %v2277_v57, %v4092_v51 }
0x1845   :  { %2582 = vmax.xlane.f32.xlu0 %v2581_v40 }
0x1859   :  { %2618 = vperm.xlu0 %3270, %v2613_v42  }
0x1861   :  { %3271 = vset.pattern.permute.xlu0 %v5165_v32 }
0x1862   :  { %1885 = vperm.xlu0 %3271, %v1868_v60  }
0x186a   :  { %2273 = vperm.xlu0 %3271, %v2248_v9  }
0x1872   :  { %2677 = vperm.xlu0 %3271, %v2675_v16  }
0x18b8   :  { %v2583_v4 = vpop.xlane.xlu0 %2582 }
0x18b9   :  { %v2587_v46 = vsub.f32 %v2579_v56, %v2583_v4  ;;  %v2576_v56 = vperm.slane %v2574_v39, 0 }
0x18bb   :  { %v2589_v47 = vmul.f32 1.442695, %v2587_v46  ;;  %v2580_v40 = vadd.f32 %v2576_v56, %v4026_v23 }
0x18bd   :  { %3439 = vpow2.f32 %v2589_v47  ;;  %v2584_v42 = vsel %vm1983_vm9, %v2580_v40, -inf }
0x18c3   :  { %v3440_v48 = vpop.eup %3439 }
0x18c4   :  { %v2593_v49 = vsel %vm1983_vm9, %v3440_v48, 0.0 }
0x18c5   :  { %2594 = vadd.xlane.f32.xlu1 %v2593_v49 }
0x18cb   :  { %v4308_v50 = vpop.permute.xlu0 %2618 }
0x18d4   :  { %v1886_v52 = vpop.permute.xlu0 %1885 }
0x18d5   :  { %vm1900_vm14 = vcmp.eq.s32.totalorder %v1886_v52, %v4092_v51 }
0x18d6   :  { %v4312_v55 = vsel %vm1900_vm14, 1.0, %v3477_v2 }
0x18d7   :  { %1976 = vst [vmem:[#allocation1 + $0x20] ss:$4 sm:$0xff] %v4312_v55 }
0x18dc   :  { %v2274_v61 = vpop.permute.xlu0 %2273 }
0x18dd   :  { %v2278_v1 = vperm.slane %v2274_v61, %v4092_v51 }
0x18df   :  { %v2280_v59 = vsel %vm2266_vm1, %v2279_v0, %v2278_v1 }
0x18e0   :  { %v2282_v5 = vsel %vm2255_vm11, %v2280_v59, %v4021_v53 }
0x18e1   :  { %v2344_v6 = vperm.slane %v2282_v5, 0  ;;  %v2343_v63 = vrot.slane %v2282_v5, 1 }
0x18e3   :  { %v4322_v17 = vadd.f32 %v2344_v6, %v4026_v23  ;;  %v2345_v25 = vperm.slane %v2343_v63, 0 }
0x18e4   :  { %v4331_v35 = vpop.permute.xlu0 %2677 }
0x18e5   :  { %v2350_v54 = vsel %vm1983_vm9, %v4322_v17, -inf  ;;  %v4327_v18 = vadd.f32 %v2345_v25, %v4026_v23  ;;  %v1920_v25 = vmul.f32 %v4254_v62, %v4015_v20  ;;  %vm2679_vm11 = vcmp.eq.s32.totalorder %v4331_v35, 1 }
0x18e6   :  { %2351 = vmax.xlane.f32.xlu2 %v2350_v54 }
0x18e7   :  { %v2353_v29 = vsel %vm1983_vm9, %v4327_v18, -inf  ;;  %v1928_v54 = vsel %vm1843_vm8, %v1920_v25, 0.0 }
0x18e8   :  { %2354 = vmax.xlane.f32.xlu0 %v2353_v29 }
0x1938   :  { %v2595_v27 = vpop.xlane.xlu1 %2594 }
0x1959   :  { %v4333_v53 = vpop.xlane.xlu2 %2351 }
0x195a   :  { %v2390_v13 = vadd.f32 %v4333_v53, %v4116_v3 }
0x195b   :  { %v4337_v7 = vpop.xlane.xlu0 %2354 }
0x195c   :  { %v2391_v12 = vadd.f32 %v4337_v7, %v4135_v58  ;;  %2414 = vperm.xlu2 %3269, %v2390_v13   ;;  %vm2357_vm10 = vcmp.ge.f32.partialorder %v4327_v18, %v4337_v7 }
0x195d   :  { %v2359_v34 = vsel %vm2357_vm10, %v4092_v51, 8 }
0x195e   :  { %2417 = vperm.xlu0 %3271, %v2391_v12   ;;  %v4707_v11 = vsel %vm1983_vm9, %v2359_v34, 2147483647 }
0x1966   :  { %3273 = vset.pattern.permute.xlu0 %v4002_v37 }
0x1985   :  { %2585 = vmax.xlane.f32.xlu2 %v2584_v42 }
0x19b6   :  { %v2415_v60 = vpop.permute.xlu2 %2414 }
0x19b7   :  { %v2419_v3 = vperm.slane %v2415_v60, %v4092_v51 }
0x19d0   :  { %v2418_v9 = vpop.permute.xlu0 %2417 }
0x19d1   :  { %v2420_v15 = vperm.slane %v2418_v9, %v4092_v51 }
0x19d3   :  { %v2421_v58 = vsel %vm2266_vm1, %v2420_v15, %v2419_v3 }
0x19d4   :  { %v4350_v16 = vsel %vm2397_vm4, %v2421_v58, %v2282_v5 }
0x19d5   :  { %v2484_v46 = vrot.slane %v4350_v16, 1  ;;  %v2485_v29 = vperm.slane %v4350_v16, 0 }
0x19d7   :  { %v2486_v47 = vperm.slane %v2484_v46, 0  ;;  %v4366_v13 = vadd.f32 %v2485_v29, %v4026_v23 }
0x19d9   :  { %v4354_v48 = vadd.f32 %v2486_v47, %v4026_v23  ;;  %v2491_v12 = vsel %vm1983_vm9, %v4366_v13, -inf }
0x19db   :  { %v2494_v49 = vsel %vm1983_vm9, %v4354_v48, -inf }
0x19dc   :  { %2495 = vmax.xlane.f32.xlu0 %v2494_v49 }
0x19f8   :  { %v2586_v52 = vpop.xlane.xlu2 %2585 }
0x19f9   :  { %v2588_v57 = vsub.f32 %v2580_v40, %v2586_v52 }
0x19fb   :  { %v2591_v61 = vmul.f32 1.442695, %v2588_v57 }
0x19fd   :  { %3441 = vpow2.f32 %v2591_v61 }
0x19fe   :  { %3443 = vlog2.f32 %v2595_v27 }
0x1a03   :  { %v3442_v0 = vpop.eup %3441 }
0x1a04   :  { %v2596_v1 = vsel %vm1983_vm9, %v3442_v0, 0.0  ;;  %v3444_v59 = vpop.eup %3443 }
0x1a05   :  { %2597 = vadd.xlane.f32.xlu2 %v2596_v1  ;;  %v2600_v5 = vmul.f32 0.6931472, %v3444_v59 }
0x1a07   :  { %v2603_v6 = vadd.f32 %v2600_v5, %v2583_v4  ;;  %v2712_v4 = vld [vmem:[#allocation5 + $0xa] sm:$0x3] }
0x1a08   :  { %v2747_v39 = vperm.slane %v2712_v4, 0 }
0x1a09   :  { %v2622_v63 = vadd.f32 %v4281_v14, %v2603_v6 }
0x1a1d   :  { %2683 = vperm.xlu2 %3269, %v2622_v63   ;;  %v1921_v63 = vmul.f32 %v4262_v45, %v1831_v24 }
0x1a25   :  { %3272 = vset.pattern.permute.xlu2 %v4002_v37 }
0x1a46   :  { %1929 = vadd.xlane.f32.xlu2 %v1928_v54 }
0x1a4e   :  { %2492 = vmax.xlane.f32.xlu2 %v2491_v12 }
0x1a4f   :  { %v4387_v5 = vpop.xlane.xlu0 %2495 }
0x1a50   :  { %v2532_v6 = vadd.f32 %v4387_v5, %v4206_v28 }
0x1a66   :  { %2752 = vperm.xlu2 %3272, %v2747_v39  }
0x1a6e   :  { %3275 = vset.pattern.permute.xlu2 %v5165_v32 }
0x1a78   :  { %v2598_v56 = vpop.xlane.xlu2 %2597 }
0x1a79   :  { %3445 = vlog2.f32 %v2598_v56 }
0x1a7f   :  { %v3446_v40 = vpop.eup %3445 }
0x1a80   :  { %v2602_v42 = vmul.f32 0.6931472, %v3446_v40  ;;  %v2684_v3 = vpop.permute.xlu2 %2683 }
0x1a81   :  { %v2688_v58 = vperm.slane %v2684_v3, %v4092_v51 }
0x1a82   :  { %v2604_v60 = vadd.f32 %v2602_v42, %v2586_v52 }
0x1a84   :  { %v2623_v9 = vadd.f32 %v4308_v50, %v2604_v60 }
0x1a86   :  { %2686 = vperm.xlu1 %3265, %v2623_v9  }
0x1ab9   :  { %v4398_v25 = vpop.xlane.xlu2 %1929 }
0x1aba   :  { %5175 = vst [vmem:[#allocation12_spill] sm:$0xff] %v4398_v25 }
0x1ac1   :  { %v4400_v54 = vpop.xlane.xlu2 %2492 }
0x1ac9   :  { %v4402_v29 = vpop.permute.xlu2 %2752 }
0x1af8   :  { %v2687_v15 = vpop.permute.xlu1 %2686 }
0x1af9   :  { %v2689_v46 = vperm.slane %v2687_v15, %v4092_v51 }
0x1afb   :  { %v2690_v47 = vsel %vm2266_vm1, %v2689_v46, %v2688_v58  ;;  %v2754_v46 = vperm.slane %v2712_v4, 1 }
0x1afc   :  { %v4379_v49 = vsel %vm2679_vm11, %v2690_v47, %v4292_v30  ;;  %v1870_v30 = vld [vmem:[%s5157_s2 + $0xc] sm:$0x3] }
0x1afd   :  { %v2716_v52 = vperm.slane %v4379_v49, 0  ;;  %v2715_v57 = vrot.slane %v4379_v49, 1 }
0x1aff   :  { %v2720_v61 = vadd.f32 %v2716_v52, %v4026_v23  ;;  %v2717_v0 = vperm.slane %v2715_v57, 0  ;;  %v2531_v52 = vadd.f32 %v4400_v54, %v4203_v8  ;;  %v1871_v57 = vld [vmem:[%s5157_s2 + $0xe] sm:$0x3]  ;;  %v1925_v8 = vmul.f32 %v4277_v10, %v1834_v43 }
0x1b01   :  { %v2722_v1 = vsel %vm1983_vm9, %v2720_v61, -inf  ;;  %v2721_v27 = vadd.f32 %v2717_v0, %v4026_v23  ;;  %v1931_v23 = vsel %vm1843_vm8, %v1921_v63, 0.0  ;;  %v1943_v0 = vsel %vm1843_vm8, %v1925_v8, 0.0 }
0x1b02   :  { %2723 = vmax.xlane.f32.xlu1 %v2722_v1 }
0x1b03   :  { %v2725_v59 = vsel %vm1983_vm9, %v2721_v27, -inf }
0x1b04   :  { %2726 = vmax.xlane.f32.xlu2 %v2725_v59 }
0x1b1b   :  { %1891 = vperm.xlu1 %3265, %v1870_v30  }
0x1b1c   :  { %2558 = vperm.xlu2 %3275, %v2532_v6  }
0x1b45   :  { %1932 = vadd.xlane.f32.xlu1 %v1931_v23 }
0x1b75   :  { %v4404_v12 = vpop.xlane.xlu1 %2723 }
0x1b76   :  { %v2728_v39 = vsub.f32 %v2720_v61, %v4404_v12  ;;  %v3245_v61 = vld [vmem:[%s5149_s1 + $0xa] sm:$0x3] }
0x1b77   :  { %v4407_v28 = vpop.xlane.xlu2 %2726  ;;  %vm2815_vm3 = vcmp.gt.f32.partialorder %v3245_v61, 0.0 }
0x1b78   :  { %v2730_v56 = vmul.f32 1.442695, %v2728_v39  ;;  %v2729_v40 = vsub.f32 %v2721_v27, %v4407_v28  ;;  %v2816_v4 = vsel %vm2815_vm3, 1, %v5165_v32 }
0x1b7a   :  { %3447 = vpow2.f32 %v2730_v56  ;;  %v2732_v24 = vmul.f32 1.442695, %v2729_v40 }
0x1b7c   :  { %3449 = vpow2.f32 %v2732_v24  ;;  %v4447_v24 = vld [vmem:[%s5156_s14] sm:$0xff] }
0x1b7f   :  { %v2559_v59 = vpop.permute.xlu2 %2558 }
0x1b80   :  { %v3448_v42 = vpop.eup %3447  ;;  %v2561_v6 = vperm.slane %v2559_v59, %v4092_v51 }
0x1b81   :  { %v2734_v60 = vsel %vm1983_vm9, %v3448_v42, 0.0 }
0x1b82   :  { %v3450_v9 = vpop.eup %3449  ;;  %2735 = vadd.xlane.f32.xlu0 %v2734_v60 }
0x1b83   :  { %v2737_v3 = vsel %vm1983_vm9, %v3450_v9, 0.0 }
0x1b84   :  { %2738 = vadd.xlane.f32.xlu1 %v2737_v3 }
0x1b8d   :  { %v1892_v15 = vpop.permute.xlu1 %1891 }
0x1b8e   :  { %vm1902_vm15 = vcmp.eq.s32.totalorder %v1892_v15, %v4092_v51  ;;  %v1923_v15 = vmul.f32 %v4272_v19, %v1833_v21 }
0x1b8f   :  { %v4414_v58 = vsel %vm1902_vm15, 1.0, %v3477_v2 }
0x1b90   :  { %5176 = vst [vmem:[#allocation13_spill] sm:$0xff] %v4414_v58 }
0x1b91   :  { %1980 = vst [vmem:[#allocation1 + $0x22] ss:$4 sm:$0xff] %v4414_v58 }
0x1b96   :  { %2759 = vperm.xlu0 %3273, %v2754_v46   ;;  %v1922_v46 = vmul.f32 %v4267_v22, %v1832_v33 }
0x1b98   :  { %v1982_v47 = vld.sshfl [vmem:[#allocation1 + $0x20] sm:$0xff pattern:$0x73625140] }
0x1b99   :  { %3240 = vmatmul.msk.f32.gmra.mxu1 %vm1983_vm9, %v1982_v47  ;;  %v1937_v47 = vsel %vm1843_vm8, %v1923_v15, 0.0 }
0x1b9d   :  { %2555 = vperm.xlu1 %3265, %v2531_v52   ;;  %v1934_v52 = vsel %vm1843_vm8, %v1922_v46, 0.0 }
0x1b9e   :  { %3274 = vset.pattern.permute.xlu0 %v5165_v32 }
0x1b9f   :  { %1894 = vperm.xlu0 %3274, %v1871_v57   ;;  %v1926_v57 = vmul.f32 %v4414_v58, %v1835_v31 }
0x1ba1   :  { %v1946_v21 = vsel %vm1843_vm8, %v1926_v57, 0.0 }
0x1ba7   :  { %2818 = vperm.xlu0 %3274, %v2816_v4   ;;  %v1924_v4 = vmul.f32 %v4312_v55, %v4229_v41 }
0x1ba9   :  { %v1940_v20 = vsel %vm1843_vm8, %v1924_v4, 0.0 }
0x1bb8   :  { %v4432_v1 = vpop.xlane.xlu1 %1932 }
0x1bd1   :  { %1944 = vadd.xlane.f32.xlu0 %v1943_v0 }
0x1bf5   :  { %v2736_v43 = vpop.xlane.xlu0 %2735 }
0x1bf6   :  { %3451 = vlog2.f32 %v2736_v43 }
0x1bf7   :  { %v2739_v27 = vpop.xlane.xlu1 %2738 }
0x1bf8   :  { %3453 = vlog2.f32 %v2739_v27 }
0x1bfc   :  { %v3452_v0 = vpop.eup %3451 }
0x1bfd   :  { %v2741_v59 = vmul.f32 0.6931472, %v3452_v0 }
0x1c08   :  { %v4459_v3 = vpop.permute.xlu0 %2759 }
0x1c0f   :  { %v2556_v30 = vpop.permute.xlu1 %2555 }
0x1c10   :  { %v2560_v63 = vperm.slane %v2556_v30, %v4092_v51  ;;  %v2744_v30 = vadd.f32 %v2741_v59, %v4404_v12 }
0x1c11   :  { %v1895_v61 = vpop.permute.xlu0 %1894 }
0x1c12   :  { %v2562_v23 = vsel %vm2266_vm1, %v2561_v6, %v2560_v63  ;;  %vm1903_vm4 = vcmp.eq.s32.totalorder %v1895_v61, %v4092_v51  ;;  %v3454_v6 = vpop.eup %3453  ;;  %v2763_v63 = vadd.f32 %v4402_v29, %v2744_v30 }
0x1c13   :  { %v4440_v39 = vsel %vm2538_vm12, %v2562_v23, %v4350_v16  ;;  %v4478_v33 = vsel %vm1903_vm4, 1.0, %v3477_v2  ;;  %v2743_v23 = vmul.f32 0.6931472, %v3454_v6  ;;  %vm2497_vm12 = vcmp.ge.f32.partialorder %v4366_v13, %v4400_v54 }
0x1c14   :  { %v2626_v56 = vperm.slane %v4440_v39, 0  ;;  %v2625_v40 = vrot.slane %v4440_v39, 1  ;;  %5177 = vst [vmem:[#allocation14_spill] sm:$0xff] %v4478_v33  ;;  %v1927_v8 = vmul.f32 %v4478_v33, %v1836_v44  ;;  %v2853_v44 = vld [vmem:[#allocation5 + $0xc] sm:$0x3]  ;;  %v2499_v7 = vsel %vm2497_vm12, %v4092_v51, 8 }
0x1c15   :  { %v2745_v2 = vadd.f32 %v2743_v23, %v4407_v28  ;;  %v2895_v59 = vperm.slane %v2853_v44, 1 }
0x1c16   :  { %v4450_v42 = vadd.f32 %v4447_v24, %v2626_v56  ;;  %v2627_v60 = vperm.slane %v2625_v40, 0  ;;  %v1949_v31 = vsel %vm1843_vm8, %v1927_v8, 0.0  ;;  %v2888_v56 = vperm.slane %v2853_v44, 0 }
0x1c17   :  { %v2764_v41 = vadd.f32 %v4459_v3, %v2745_v2 }
0x1c18   :  { %v2632_v9 = vsel %vm1983_vm9, %v4450_v42, -inf  ;;  %v4455_v36 = vadd.f32 %v4447_v24, %v2627_v60 }
0x1c19   :  { %2633 = vmax.xlane.f32.xlu1 %v2632_v9  ;;  %v4498_v28 = vpop.permute.xlu0 %2818 }
0x1c1a   :  { %v2635_v16 = vsel %vm1983_vm9, %v4455_v36, -inf  ;;  %vm2820_vm2 = vcmp.eq.s32.totalorder %v4498_v28, 1 }
0x1c1b   :  { %2636 = vmax.xlane.f32.xlu2 %v2635_v16 }
0x1c21   :  { %1938 = vadd.xlane.f32.xlu1 %v1937_v47 }
0x1c23   :  { %1935 = vadd.xlane.f32.xlu2 %v1934_v52 }
0x1c29   :  { %1947 = vadd.xlane.f32.xlu1 %v1946_v21 }
0x1c2b   :  { %1941 = vadd.xlane.f32.xlu2 %v1940_v20 }
0x1c33   :  { %1950 = vadd.xlane.f32.xlu2 %v1949_v31 }
0x1c44   :  { %v4530_v6 = vpop.xlane.xlu0 %1944 }
0x1c4b   :  { %2824 = vperm.xlu2 %3275, %v2763_v63  }
0x1c53   :  { %2827 = vperm.xlu2 %3275, %v2764_v41  }
0x1c5b   :  { %3276 = vset.pattern.permute.xlu2 %v4002_v37 }
0x1c63   :  { %2893 = vperm.xlu2 %3276, %v2888_v56  }
0x1c6b   :  { %3278 = vset.pattern.permute.xlu2 %v5165_v32 }
0x1c8e   :  { %v4490_v27 = vpop.xlane.xlu2 %2636 }
0x1c8f   :  { %v2673_v0 = vadd.f32 %v4490_v27, %v4308_v50  ;;  %vm2639_vm14 = vcmp.ge.f32.partialorder %v4455_v36, %v4490_v27 }
0x1c96   :  { %v4492_v12 = vpop.xlane.xlu2 %1935 }
0x1c9e   :  { %v4494_v43 = vpop.xlane.xlu2 %1941 }
0x1ca6   :  { %v4496_v40 = vpop.xlane.xlu2 %1950 }
0x1cae   :  { %v2825_v60 = vpop.permute.xlu2 %2824 }
0x1caf   :  { %v2829_v16 = vperm.slane %v2825_v60, %v4092_v51 }
0x1cb6   :  { %v2828_v9 = vpop.permute.xlu2 %2827 }
0x1cb7   :  { %v2830_v15 = vperm.slane %v2828_v9, %v4092_v51  ;;  %v3246_v9 = vld [vmem:[%s5149_s1 + $0xc] sm:$0x3] }
0x1cb8   :  { %vm2956_vm5 = vcmp.gt.f32.partialorder %v3246_v9, 0.0 }
0x1cb9   :  { %v2831_v46 = vsel %vm2266_vm1, %v2830_v15, %v2829_v16 }
0x1cba   :  { %v4507_v47 = vsel %vm2820_vm2, %v2831_v46, %v4379_v49  ;;  %v4521_v49 = vpop.xlane.xlu1 %2633  ;;  %v2957_v46 = vsel %vm2956_vm5, 1, %v5165_v32  ;;  %vm2356_vm5 = vcmp.ge.f32.partialorder %v4322_v17, %v4333_v53 }
0x1cbb   :  { %v2857_v52 = vperm.slane %v4507_v47, 0  ;;  %v2856_v57 = vrot.slane %v4507_v47, 1  ;;  %v2672_v31 = vadd.f32 %v4521_v49, %v4281_v14  ;;  %2959 = vperm.xlu2 %3278, %v2957_v46   ;;  %vm2638_vm13 = vcmp.ge.f32.partialorder %v4450_v42, %v4521_v49 }
0x1cbc   :  { %v2640_v54 = vsel %vm2638_vm13, %v4092_v51, 8 }
0x1cbd   :  { %v4512_v61 = vadd.f32 %v4447_v24, %v2857_v52  ;;  %v2858_v4 = vperm.slane %v2856_v57, 0 }
0x1cbf   :  { %v2863_v21 = vsel %vm1983_vm9, %v4512_v61, -inf  ;;  %v4517_v20 = vadd.f32 %v4447_v24, %v2858_v4  ;;  %v2005_v4 = vpop.f32.mrf.mxu1 }
0x1cc0   :  { %2864 = vmax.xlane.f32.xlu0 %v2863_v21 }
0x1cc1   :  { %v2866_v8 = vsel %vm1983_vm9, %v4517_v20, -inf }
0x1cc2   :  { %2867 = vmax.xlane.f32.xlu1 %v2866_v8  ;;  %v4528_v30 = vpop.xlane.xlu1 %1938  ;;  %v2013_v8 = vrot.slane %v2005_v4, 2 }
0x1cca   :  { %v4532_v63 = vpop.xlane.xlu1 %1947 }
0x1cd4   :  { %2696 = vperm.xlu0 %3274, %v2672_v31   ;;  %v2023_v31 = vmul.f32 %v4262_v45, %v2005_v4 }
0x1cdb   :  { %2699 = vperm.xlu1 %3265, %v2673_v0   ;;  %v2024_v0 = vmul.f32 %v4267_v22, %v2013_v8  ;;  %v4588_v8 = vld [vmem:[%s5149_s1 + $0x4] sm:$0x3] }
0x1cdc   :  { %3277 = vset.pattern.permute.xlu0 %v4002_v37 }
0x1ce4   :  { %2900 = vperm.xlu0 %3277, %v2895_v59   ;;  %v2030_v59 = vsel %vm1843_vm8, %v2023_v31, 0.0 }
0x1d33   :  { %v4534_v23 = vpop.xlane.xlu0 %2864 }
0x1d35   :  { %v4536_v2 = vpop.xlane.xlu1 %2867 }
0x1d46   :  { %v2697_v14 = vpop.permute.xlu0 %2696 }
0x1d47   :  { %v2701_v56 = vperm.slane %v2697_v14, %v4092_v51  ;;  %v2033_v14 = vsel %vm1843_vm8, %v2024_v0, 0.0 }
0x1d4d   :  { %v2700_v41 = vpop.permute.xlu1 %2699 }
0x1d4e   :  { %v2702_v50 = vperm.slane %v2700_v41, %v4092_v51  ;;  %v2014_v41 = vrot.slane %v2005_v4, 4 }
0x1d50   :  { %v2703_v60 = vsel %vm2266_vm1, %v2702_v50, %v2701_v56  ;;  %v2025_v56 = vmul.f32 %v4272_v19, %v2014_v41 }
0x1d51   :  { %v4544_v44 = vsel %vm2679_vm11, %v2703_v60, %v4440_v39  ;;  %v2015_v60 = vrot.slane %v2005_v4, 6  ;;  %v4583_v4 = vld [vmem:[%s5149_s1 + $0x2] sm:$0x3] }
0x1d52   :  { %v2767_v16 = vperm.slane %v4544_v44, 0  ;;  %v2766_v15 = vrot.slane %v4544_v44, 1  ;;  %v2036_v50 = vsel %vm1843_vm8, %v2025_v56, 0.0  ;;  %v2081_v0 = vsub.f32 %v4583_v4, %v4588_v8 }
0x1d53   :  { %v2026_v9 = vmul.f32 %v4312_v55, %v2015_v60 }
0x1d54   :  { %v4553_v52 = vadd.f32 %v4447_v24, %v2767_v16  ;;  %v2768_v57 = vperm.slane %v2766_v15, 0 }
0x1d55   :  { %v2039_v16 = vsel %vm1843_vm8, %v2026_v9, 0.0 }
0x1d56   :  { %v2773_v35 = vsel %vm1983_vm9, %v4553_v52, -inf  ;;  %v4558_v39 = vadd.f32 %v4447_v24, %v2768_v57  ;;  %v4570_v15 = vpop.permute.xlu0 %2900 }
0x1d57   :  { %2774 = vmax.xlane.f32.xlu1 %v2773_v35 }
0x1d58   :  { %v2776_v21 = vsel %vm1983_vm9, %v4558_v39, -inf }
0x1d59   :  { %2777 = vmax.xlane.f32.xlu0 %v2776_v21 }
0x1d5f   :  { %2031 = vadd.xlane.f32.xlu1 %v2030_v59 }
0x1d61   :  { %2034 = vadd.xlane.f32.xlu0 %v2033_v14 }
0x1d69   :  { %2037 = vadd.xlane.f32.xlu0 %v2036_v50 }
0x1d71   :  { %2040 = vadd.xlane.f32.xlu0 %v2039_v16 }
0x1dca   :  { %v4572_v46 = vpop.xlane.xlu1 %2774 }
0x1dcb   :  { %v2813_v57 = vadd.f32 %v4572_v46, %v4402_v29  ;;  %vm2779_vm11 = vcmp.ge.f32.partialorder %v4553_v52, %v4572_v46 }
0x1dcc   :  { %v4576_v35 = vpop.xlane.xlu0 %2777 }
0x1dcd   :  { %v2814_v21 = vadd.f32 %v4576_v35, %v4459_v3  ;;  %2837 = vperm.xlu2 %3278, %v2813_v57  }
0x1dcf   :  { %2840 = vperm.xlu1 %3265, %v2814_v21  }
0x1dd2   :  { %v2032_v31 = vpop.xlane.xlu1 %2031 }
0x1dd3   :  { %v2051_v29 = vadd.f32 %v2032_v31, %v4432_v1  ;;  %v4601_v1 = vld [vmem:[%s5149_s1 + $0x6] sm:$0x3]  ;;  %v3476_v31 = vld [vmem:[%s5155_s11] ss:$0 sm:$0xff] }
0x1dd4   :  { %v2035_v59 = vpop.xlane.xlu0 %2034 }
0x1dd5   :  { %v2058_v3 = vmul.f32 %v2051_v29, %v4583_v4  ;;  %v2052_v14 = vadd.f32 %v2035_v59, %v4492_v12  ;;  %v1955_v29 = vmul.f32 %v3476_v31, %v4254_v62  ;;  %v4611_v59 = vpop.permute.xlu2 %2893  ;;  %v4628_v31 = vpop.f32.mrf.mxu1 }
0x1dd6   :  { %v2017_v38 = vrot.slane %v4628_v31, 4 }
0x1dd7   :  { %v2059_v41 = vmul.f32 %v2052_v14, %v4588_v8  ;;  %2094 = vperm.xlu1 %3265, %v2081_v0   ;;  %v2066_v56 = vsel %vm2065_vm6, %v2058_v3, 0.0  ;;  %v1956_v0 = vsel %vm1843_vm8, %v1955_v29, 0.0  ;;  %v2869_v29 = vsub.f32 %v4512_v61, %v4534_v23 }
0x1dd8   :  { %v2870_v61 = vsub.f32 %v4517_v20, %v4536_v2  ;;  %v2029_v18 = vmul.f32 %v4478_v33, %v2017_v38 }
0x1dd9   :  { %v2067_v50 = vsel %vm2065_vm6, %v2059_v41, 0.0 }
0x1dda   :  { %v2068_v60 = vadd.f32 %v2067_v50, %v2066_v56 }
0x1ddc   :  { %v2038_v9 = vpop.xlane.xlu0 %2037 }
0x1ddd   :  { %v2053_v16 = vadd.f32 %v2038_v9, %v4528_v30  ;;  %v4613_v3 = vpop.permute.xlu2 %2959 }
0x1dde   :  { %vm2961_vm3 = vcmp.eq.s32.totalorder %v4613_v3, 1 }
0x1ddf   :  { %v2060_v57 = vmul.f32 %v2053_v16, %v4601_v1 }
0x1de1   :  { %v2069_v12 = vsel %vm2065_vm6, %v2060_v57, 0.0 }
0x1de2   :  { %v2070_v21 = vadd.f32 %v2069_v12, %v2068_v60 }
0x1df6   :  { %1957 = vadd.xlane.f32.xlu2 %v1956_v0 }
0x1e27   :  { %v2838_v14 = vpop.permute.xlu2 %2837 }
0x1e28   :  { %v2842_v41 = vperm.slane %v2838_v14, %v4092_v51 }
0x1e41   :  { %v2841_v30 = vpop.permute.xlu1 %2840 }
0x1e42   :  { %v2843_v56 = vperm.slane %v2841_v30, %v4092_v51  ;;  %v2871_v30 = vmul.f32 1.442695, %v2869_v29 }
0x1e44   :  { %v2844_v50 = vsel %vm2266_vm1, %v2843_v56, %v2842_v41  ;;  %v2027_v41 = vmul.f32 %v4277_v10, %v4628_v31  ;;  %3455 = vpow2.f32 %v2871_v30  ;;  %v2041_v30 = vpop.xlane.xlu0 %2040 }
0x1e45   :  { %v4621_v60 = vsel %vm2820_vm2, %v2844_v50, %v4544_v44  ;;  %v2016_v44 = vrot.slane %v4628_v31, 2 }
0x1e46   :  { %v2908_v9 = vperm.slane %v4621_v60, 0  ;;  %v2907_v16 = vrot.slane %v4621_v60, 1  ;;  %v2042_v50 = vsel %vm1843_vm8, %v2027_v41, 0.0  ;;  %v2054_v41 = vadd.f32 %v2041_v30, %v4494_v43 }
0x1e47   :  { %v2028_v56 = vmul.f32 %v4414_v58, %v2016_v44 }
0x1e48   :  { %v4626_v57 = vadd.f32 %v4447_v24, %v2908_v9  ;;  %v2909_v12 = vperm.slane %v2907_v16, 0  ;;  %v2873_v16 = vmul.f32 1.442695, %v2870_v61 }
0x1e49   :  { %v2045_v9 = vsel %vm1843_vm8, %v2028_v56, 0.0  ;;  %v4657_v56 = vld [vmem:[%s5149_s1 + $0x8] sm:$0x3] }
0x1e4a   :  { %v2914_v0 = vsel %vm1983_vm9, %v4626_v57, -inf  ;;  %v4635_v28 = vadd.f32 %v4447_v24, %v2909_v12  ;;  %v3456_v12 = vpop.eup %3455  ;;  %3457 = vpow2.f32 %v2873_v16  ;;  %v4667_v16 = vld [vmem:[%s5149_s1 + $0xa] sm:$0x3] }
0x1e4b   :  { %2915 = vmax.xlane.f32.xlu2 %v2914_v0  ;;  %v2875_v29 = vsel %vm1983_vm9, %v3456_v12, 0.0 }
0x1e4c   :  { %v2917_v14 = vsel %vm1983_vm9, %v4635_v28, -inf }
0x1e4d   :  { %2918 = vmax.xlane.f32.xlu0 %v2917_v14 }
0x1e50   :  { %v3458_v0 = vpop.eup %3457 }
0x1e51   :  { %v2878_v14 = vsel %vm1983_vm9, %v3458_v0, 0.0 }
0x1e53   :  { %2043 = vadd.xlane.f32.xlu2 %v2042_v50 }
0x1e55   :  { %2046 = vadd.xlane.f32.xlu0 %v2045_v9  ;;  %v2061_v9 = vmul.f32 %v2054_v41, %v4657_v56 }
0x1e57   :  { %v2071_v43 = vsel %vm2065_vm6, %v2061_v9, 0.0 }
0x1e5b   :  { %2876 = vadd.xlane.f32.xlu2 %v2875_v29 }
0x1e63   :  { %2879 = vadd.xlane.f32.xlu2 %v2878_v14  ;;  %v2072_v14 = vadd.f32 %v2071_v43, %v2070_v21 }
0x1e69   :  { %v4649_v44 = vpop.xlane.xlu2 %1957 }
0x1e6a   :  { %5178 = vst [vmem:[#allocation15_spill] sm:$0xff] %v4649_v44 }
0x1ebe   :  { %v4651_v20 = vpop.xlane.xlu2 %2915 }
0x1ebf   :  { %v2954_v36 = vadd.f32 %v4651_v20, %v4611_v59  ;;  %vm2920_vm15 = vcmp.ge.f32.partialorder %v4626_v57, %v4651_v20 }
0x1ec0   :  { %v4659_v61 = vpop.xlane.xlu0 %2918  ;;  %v2922_v46 = vsel %vm2920_vm15, %v4092_v51, 8 }
0x1ec1   :  { %v2955_v50 = vadd.f32 %v4659_v61, %v4570_v15  ;;  %vm2921_vm12 = vcmp.ge.f32.partialorder %v4635_v28, %v4659_v61 }
0x1ec3   :  { %2981 = vperm.xlu1 %3265, %v2955_v50   ;;  %v4676_v50 = vld [vmem:[#allocation5 + $0xe] sm:$0x3] }
0x1ec4   :  { %v3029_v44 = vperm.slane %v4676_v50, 0 }
0x1ec6   :  { %v2044_v12 = vpop.xlane.xlu2 %2043 }
0x1ec7   :  { %v2055_v29 = vadd.f32 %v2044_v12, %v4530_v6  ;;  %v5179_v12 = vmov 0  }
0x1ec9   :  { %v2062_v0 = vmul.f32 %v2055_v29, %v4667_v16 }
0x1ecb   :  { %v2073_v30 = vsel %vm2065_vm6, %v2062_v0, 0.0  ;;  %3279 = vset.pattern.permute.xlu1 %v4002_v37 }
0x1ecc   :  { %v4674_v32 = vadd.f32 %v2073_v30, %v2072_v14  ;;  %v2377_v30 = vshra.s32 %v4707_v11, 16 }
0x1ece   :  { %v2877_v41 = vpop.xlane.xlu2 %2876 }
0x1ecf   :  { %3459 = vlog2.f32 %v2877_v41  ;;  %v4716_v41 = vcvt.s32.f32 %v2377_v30 }
0x1ed3   :  { %3034 = vperm.xlu1 %3279, %v3029_v44   ;;  %v2217_v44 = vsel %vm2215_vm7, %v4092_v51, 8  ;;  %vm2780_vm7 = vcmp.ge.f32.partialorder %v4558_v39, %v4576_v35 }
0x1ed5   :  { %v3460_v25 = vpop.eup %3459 }
0x1ed6   :  { %v2882_v9 = vmul.f32 0.6931472, %v3460_v25  ;;  %v2880_v58 = vpop.xlane.xlu2 %2879  ;;  %v2216_v25 = vsel %vm2214_vm0, %v4092_v51, 8  ;;  %vm2498_vm0 = vcmp.ge.f32.partialorder %v4354_v48, %v4387_v5 }
0x1ed7   :  { %3461 = vlog2.f32 %v2880_v58  ;;  %v4688_v58 = vsel %vm1983_vm9, %v2216_v25, 2147483647 }
0x1ed8   :  { %v2885_v6 = vadd.f32 %v2882_v9, %v4534_v23  ;;  %v2220_v23 = vshra.s32 %v4688_v58, 16  ;;  %v4719_v9 = vsel %vm1983_vm9, %v2499_v7, 2147483647 }
0x1ed9   :  { %v2503_v13 = vshra.s32 %v4719_v9, 16 }
0x1eda   :  { %v2904_v21 = vadd.f32 %v4611_v59, %v2885_v6  ;;  %v4694_v14 = vcvt.s32.f32 %v2220_v23  ;;  %v2048_v6 = vsel %vm1843_vm8, %v2029_v18, 0.0 }
0x1edb   :  { %3281 = vset.pattern.permute.xlu1 %v5179_v12  ;;  %v4727_v31 = vcvt.s32.f32 %v2503_v13 }
0x1edc   :  { %2965 = vperm.xlu2 %3278, %v2904_v21   ;;  %v4730_v21 = vsel %vm1983_vm9, %v2640_v54, 2147483647 }
0x1edd   :  { %v3462_v37 = vpop.eup %3461 }
0x1ede   :  { %v2884_v43 = vmul.f32 0.6931472, %v3462_v37  ;;  %v2644_v37 = vshra.s32 %v4730_v21, 16 }
0x1ee0   :  { %v2886_v29 = vadd.f32 %v2884_v43, %v4536_v2  ;;  %v4697_v2 = vsel %vm1983_vm9, %v2217_v44, 2147483647  ;;  %v2641_v43 = vsel %vm2639_vm14, %v4092_v51, 8  ;;  %v4762_v44 = vsel %vm1983_vm9, %v2922_v46, 2147483647 }
0x1ee1   :  { %v2235_v26 = vshra.s32 %v4697_v2, 16  ;;  %v4740_v42 = vsel %vm1983_vm9, %v2641_v43, 2147483647  ;;  %v2926_v59 = vshra.s32 %v4762_v44, 16 }
0x1ee2   :  { %v2905_v0 = vadd.f32 %v4570_v15, %v2886_v29  ;;  %v4737_v29 = vcvt.s32.f32 %v2644_v37  ;;  %v2659_v49 = vshra.s32 %v4740_v42, 16 }
0x1ee3   :  { %v4704_v15 = vcvt.s32.f32 %v2235_v26  ;;  %v4766_v26 = vcvt.s32.f32 %v2926_v59  ;;  %v2234_v59 = vand.u32 65535, %v4697_v2  ;;  %v4817_v2 = vld [vmem:[%s5149_s1 + $0xe] sm:$0x3] }
0x1ee4   :  { %2968 = vperm.xlu2 %3278, %v2905_v0   ;;  %v2781_v0 = vsel %vm2779_vm11, %v4092_v51, 8  ;;  %v4749_v27 = vcvt.s32.f32 %v2659_v49 }
0x1ee5   :  { %v4752_v25 = vsel %vm1983_vm9, %v2781_v0, 2147483647 }
0x1ee6   :  { %v2785_v52 = vshra.s32 %v4752_v25, 16 }
0x1ee8   :  { %v4759_v23 = vcvt.s32.f32 %v2785_v52 }
0x1efd   :  { %2223 = vmin.xlane.f32.xlu1 %v4694_v14 }
0x1f05   :  { %2238 = vmin.xlane.f32.xlu1 %v4704_v15 }
0x1f0d   :  { %2380 = vmin.xlane.f32.xlu1 %v4716_v41  ;;  %2049 = vadd.xlane.f32.xlu2 %v2048_v6 }
0x1f15   :  { %2506 = vmin.xlane.f32.xlu1 %v4727_v31 }
0x1f1d   :  { %2647 = vmin.xlane.f32.xlu1 %v4737_v29 }
0x1f25   :  { %2662 = vmin.xlane.f32.xlu1 %v4749_v27  ;;  %2978 = vperm.xlu2 %3278, %v2954_v36   ;;  %v3036_v36 = vperm.slane %v4676_v50, 1  ;;  %v4807_v50 = vld [vmem:[%s5149_s1 + $0xc] sm:$0x3] }
0x1f2d   :  { %2788 = vmin.xlane.f32.xlu1 %v4759_v23 }
0x1f35   :  { %2929 = vmin.xlane.f32.xlu1 %v4766_v26 }
0x1f36   :  { %v2966_v34 = vpop.permute.xlu2 %2965 }
0x1f37   :  { %v2970_v57 = vperm.slane %v2966_v34, %v4092_v51  ;;  %v2047_v34 = vpop.xlane.xlu0 %2046 }
0x1f3e   :  { %v2969_v38 = vpop.permute.xlu2 %2968 }
0x1f3f   :  { %v2971_v20 = vperm.slane %v2969_v38, %v4092_v51 }
0x1f41   :  { %v2972_v30 = vsel %vm2266_vm1, %v2971_v20, %v2970_v57  ;;  %v2236_v57 = vcvt.s32.f32 %v2234_v59  ;;  %v2056_v20 = vadd.f32 %v2047_v34, %v4532_v63 }
0x1f42   :  { %v4776_v18 = vsel %vm2961_vm3, %v2972_v30, %v4507_v47  ;;  %v4790_v47 = vpop.permute.xlu1 %2094 }
0x1f43   :  { %v2998_v7 = vperm.slane %v4776_v18, 0  ;;  %v2997_v6 = vrot.slane %v4776_v18, 1 }
0x1f45   :  { %v4781_v13 = vadd.f32 %v4447_v24, %v2998_v7  ;;  %v2999_v37 = vperm.slane %v2997_v6, 0  ;;  %v2063_v7 = vmul.f32 %v2056_v20, %v4807_v50 }
0x1f47   :  { %v3004_v54 = vsel %vm1983_vm9, %v4781_v13, -inf  ;;  %v4786_v43 = vadd.f32 %v4447_v24, %v2999_v37 }
0x1f48   :  { %3005 = vmax.xlane.f32.xlu0 %v3004_v54  ;;  %v2075_v54 = vsel %vm2065_vm6, %v2063_v7, 0.0 }
0x1f49   :  { %v3007_v49 = vsel %vm1983_vm9, %v4786_v43, -inf }
0x1f4a   :  { %v2982_v0 = vpop.permute.xlu1 %2981 }
0x1f4b   :  { %v2984_v10 = vperm.slane %v2982_v0, %v4092_v51 }
0x1f50   :  { %3008 = vmax.xlane.f32.xlu0 %v3007_v49  ;;  %v2076_v49 = vadd.f32 %v2075_v54, %v4674_v32 }
0x1f52   :  { %v4793_v52 = vpop.permute.xlu1 %3034 }
0x1f64   :  { %3041 = vperm.xlu0 %3277, %v3036_v36   ;;  %v2502_v36 = vand.u32 65535, %v4719_v9 }
0x1f66   :  { %v2504_v33 = vcvt.s32.f32 %v2502_v36 }
0x1f6c   :  { %3280 = vset.pattern.permute.xlu0 %v5179_v12 }
0x1f70   :  { %v4796_v46 = vpop.xlane.xlu1 %2223 }
0x1f71   :  { %vm2225_vm14 = vcmp.eq.f32.partialorder %v4694_v14, %v4796_v46 }
0x1f78   :  { %v4799_v38 = vpop.xlane.xlu1 %2238 }
0x1f79   :  { %vm2240_vm4 = vcmp.eq.f32.partialorder %v4704_v15, %v4799_v38 }
0x1f7a   :  { %v4809_v30 = vsel %vm2240_vm4, %v2236_v57, inf }
0x1f80   :  { %v4812_v6 = vpop.xlane.xlu1 %2380  ;;  %v2050_v63 = vpop.xlane.xlu2 %2049 }
0x1f81   :  { %v2057_v15 = vadd.f32 %v2050_v63, %v4496_v40  ;;  %vm2382_vm11 = vcmp.eq.f32.partialorder %v4716_v41, %v4812_v6 }
0x1f83   :  { %v2064_v37 = vmul.f32 %v2057_v15, %v4817_v2 }
0x1f85   :  { %v2077_v59 = vsel %vm2065_vm6, %v2064_v37, 0.0  ;;  %v2658_v37 = vand.u32 65535, %v4740_v42 }
0x1f86   :  { %v4825_v34 = vadd.f32 %v2077_v59, %v2076_v49  ;;  %v2782_v49 = vsel %vm2780_vm7, %v4092_v51, 8 }
0x1f88   :  { %v4827_v57 = vpop.xlane.xlu1 %2506  ;;  %v2979_v20 = vpop.permute.xlu2 %2978 }
0x1f89   :  { %vm2508_vm2 = vcmp.eq.f32.partialorder %v4727_v31, %v4827_v57  ;;  %v2983_v40 = vperm.slane %v2979_v20, %v4092_v51  ;;  %v2660_v20 = vcvt.s32.f32 %v2658_v37 }
0x1f8a   :  { %v4833_v7 = vsel %vm2508_vm2, %v2504_v33, inf  ;;  %v2358_v33 = vsel %vm2356_vm5, %v4092_v51, 8 }
0x1f8b   :  { %v2985_v32 = vsel %vm2266_vm1, %v2984_v10, %v2983_v40  ;;  %v2500_v10 = vsel %vm2498_vm0, %v4092_v51, 8  ;;  %v4855_v3 = vsel %vm1983_vm9, %v2358_v33, 2147483647  ;;  %v4878_v40 = vsel %vm1983_vm9, %v2782_v49, 2147483647 }
0x1f8c   :  { %v4841_v9 = vsel %vm2961_vm3, %v2985_v32, %v4621_v60  ;;  %v4863_v60 = vsel %vm1983_vm9, %v2500_v10, 2147483647  ;;  %v2362_v15 = vshra.s32 %v4855_v3, 16  ;;  %v2800_v42 = vshra.s32 %v4878_v40, 16 }
0x1f8d   :  { %v3049_v0 = vperm.slane %v4841_v9, 0  ;;  %v3048_v31 = vrot.slane %v4841_v9, 1  ;;  %v2784_v32 = vand.u32 65535, %v4752_v25  ;;  %v1854_v25 = vld [vmem:[%s5149_s1] sm:$0x3] }
0x1f8e   :  { %v4875_v59 = vcvt.s32.f32 %v2362_v15 }
0x1f8f   :  { %v4849_v63 = vadd.f32 %v4447_v24, %v3049_v0  ;;  %v3050_v17 = vperm.slane %v3048_v31, 0  ;;  %v2923_v0 = vsel %vm2921_vm12, %v4092_v51, 8  ;;  %v2786_v33 = vcvt.s32.f32 %v2784_v32 }
0x1f90   :  { %v4852_v53 = vpop.xlane.xlu1 %2647 }
0x1f91   :  { %v3055_v48 = vsel %vm1983_vm9, %v4849_v63, -inf  ;;  %v4860_v5 = vadd.f32 %v4447_v24, %v3050_v17  ;;  %v2518_v24 = vshra.s32 %v4863_v60, 16  ;;  %v4896_v17 = vsel %vm1983_vm9, %v2923_v0, 2147483647 }
0x1f92   :  { %3056 = vmax.xlane.f32.xlu2 %v3055_v48  ;;  %v2941_v61 = vshra.s32 %v4896_v17, 16  ;;  %v2080_v48 = vsub.f32 %v1854_v25, %v4583_v4  ;;  %vm2649_vm15 = vcmp.eq.f32.partialorder %v4737_v29, %v4852_v53 }
0x1f93   :  { %v3058_v54 = vsel %vm1983_vm9, %v4860_v5, -inf  ;;  %v4883_v39 = vcvt.s32.f32 %v2518_v24 }
0x1f94   :  { %3059 = vmax.xlane.f32.xlu0 %v3058_v54  ;;  %v2943_v10 = vcvt.s32.f32 %v2941_v61  ;;  %v2084_v54 = vsub.f32 %v4657_v56, %v4667_v16 }
0x1f98   :  { %v4873_v36 = vpop.xlane.xlu1 %2662 }
0x1f99   :  { %vm2664_vm10 = vcmp.eq.f32.partialorder %v4749_v27, %v4873_v36  ;;  %v2802_v27 = vcvt.s32.f32 %v2800_v42 }
0x1f9a   :  { %2365 = vmin.xlane.f32.xlu2 %v4875_v59  ;;  %v4885_v35 = vsel %vm2664_vm10, %v2660_v20, inf }
0x1f9c   :  { %2521 = vmin.xlane.f32.xlu0 %v4883_v39 }
0x1fa0   :  { %v4893_v31 = vpop.xlane.xlu1 %2788 }
0x1fa1   :  { %vm2790_vm13 = vcmp.eq.f32.partialorder %v4759_v23, %v4893_v31  ;;  %v2085_v23 = vsub.f32 %v4667_v16, %v4807_v50 }
0x1fa2   :  { %2803 = vmin.xlane.f32.xlu2 %v2802_v27  ;;  %v4900_v28 = vsel %vm2790_vm13, %v2786_v33, inf }
0x1faa   :  { %2944 = vmin.xlane.f32.xlu2 %v2943_v10 }
0x1fb0   :  { %2089 = vperm.xlu0 %3280, %v2080_v48  }
0x1fb8   :  { %2109 = vperm.xlu0 %3280, %v2084_v54   ;;  %v2643_v54 = vand.u32 65535, %v4730_v21 }
0x1fbb   :  { %v4909_v15 = vpop.xlane.xlu0 %3005 }
0x1fbc   :  { %v3010_v37 = vsub.f32 %v4781_v13, %v4909_v15  ;;  %v2219_v13 = vand.u32 65535, %v4688_v58  ;;  %v2645_v58 = vcvt.s32.f32 %v2643_v54 }
0x1fbe   :  { %v3012_v49 = vmul.f32 1.442695, %v3010_v37  ;;  %v2221_v33 = vcvt.s32.f32 %v2219_v13  ;;  %v3247_v13 = vld [vmem:[%s5149_s1 + $0xe] sm:$0x3] }
0x1fbf   :  { %vm3097_vm0 = vcmp.gt.f32.partialorder %v3247_v13, 0.0 }
0x1fc0   :  { %3463 = vpow2.f32 %v3012_v49  ;;  %2114 = vperm.xlu0 %3280, %v2085_v23   ;;  %v2226_v61 = vsel %vm2225_vm14, %v2221_v33, inf  ;;  %v2650_v23 = vsel %vm2649_vm15, %v2645_v58, inf  ;;  %v2361_v49 = vand.u32 65535, %v4855_v3 }
0x1fc1   :  { %v2940_v3 = vand.u32 65535, %v4896_v17 }
0x1fc2   :  { %v2363_v29 = vcvt.s32.f32 %v2361_v49 }
0x1fc3   :  { %v4915_v24 = vpop.xlane.xlu0 %3008 }
0x1fc4   :  { %v3011_v4 = vsub.f32 %v4786_v43, %v4915_v24  ;;  %v2376_v43 = vand.u32 65535, %v4707_v11 }
0x1fc6   :  { %v3464_v20 = vpop.eup %3463  ;;  %v3014_v42 = vmul.f32 1.442695, %v3011_v4  ;;  %v2378_v25 = vcvt.s32.f32 %v2376_v43 }
0x1fc7   :  { %v3016_v32 = vsel %vm1983_vm9, %v3464_v20, 0.0 }
0x1fc8   :  { %3465 = vpow2.f32 %v3014_v42  ;;  %3017 = vadd.xlane.f32.xlu2 %v3016_v32  ;;  %v2383_v48 = vsel %vm2382_vm11, %v2378_v25, inf  ;;  %v2799_v42 = vand.u32 65535, %v4878_v40  ;;  %v3098_v40 = vsel %vm3097_vm0, 1, %v5179_v12 }
0x1fc9   :  { %v2086_v12 = vsub.f32 %v4807_v50, %v4817_v2 }
0x1fca   :  { %v2801_v32 = vcvt.s32.f32 %v2799_v42 }
0x1fce   :  { %v3466_v0 = vpop.eup %3465 }
0x1fcf   :  { %v3019_v16 = vsel %vm1983_vm9, %v3466_v0, 0.0 }
0x1fd0   :  { %3020 = vadd.xlane.f32.xlu2 %v3019_v16 }
0x1fea   :  { %2227 = vmin.xlane.f32.xlu0 %v2226_v61 }
0x1ff2   :  { %2384 = vmin.xlane.f32.xlu0 %v2383_v48 }
0x1ffa   :  { %2651 = vmin.xlane.f32.xlu0 %v2650_v23 }
0x2005   :  { %v4930_v14 = vpop.xlane.xlu2 %3056 }
0x2006   :  { %vm3061_vm3 = vcmp.ge.f32.partialorder %v4849_v63, %v4930_v14 }
0x2007   :  { %v3063_v11 = vsel %vm3061_vm3, %v4092_v51, 8 }
0x2008   :  { %v3065_v41 = vsel %vm1983_vm9, %v3063_v11, 2147483647 }
0x2009   :  { %v3067_v37 = vshra.s32 %v3065_v41, 16  ;;  %v3066_v42 = vand.u32 65535, %v3065_v41 }
0x200b   :  { %v3069_v4 = vcvt.s32.f32 %v3067_v37 }
0x200d   :  { %3070 = vmin.xlane.f32.xlu1 %v3069_v4  ;;  %v4937_v21 = vpop.xlane.xlu2 %2365 }
0x200e   :  { %vm2367_vm4 = vcmp.eq.f32.partialorder %v4875_v59, %v4937_v21  ;;  %v2942_v59 = vcvt.s32.f32 %v2940_v3  ;;  %v2083_v3 = vsub.f32 %v4601_v1, %v4657_v56 }
0x200f   :  { %v4941_v20 = vsel %vm2367_vm4, %v2363_v29, inf  ;;  %v4976_v29 = vpop.xlane.xlu1 %2929 }
0x2010   :  { %vm2931_vm13 = vcmp.eq.f32.partialorder %v4766_v26, %v4976_v29 }
0x2015   :  { %v4944_v63 = vpop.xlane.xlu2 %2803 }
0x2016   :  { %vm2805_vm2 = vcmp.eq.f32.partialorder %v2802_v27, %v4944_v63  ;;  %v2082_v27 = vsub.f32 %v4588_v8, %v4601_v1  ;;  %v4964_v8 = vpop.permute.xlu0 %3041 }
0x2017   :  { %v2806_v0 = vsel %vm2805_vm2, %v2801_v32, inf }
0x2018   :  { %2807 = vmin.xlane.f32.xlu0 %v2806_v0  ;;  %v3068_v0 = vcvt.s32.f32 %v3066_v42 }
0x201d   :  { %v4948_v16 = vpop.xlane.xlu2 %2944 }
0x201e   :  { %vm2946_vm5 = vcmp.eq.f32.partialorder %v2943_v10, %v4948_v16  ;;  %v4967_v37 = vpop.xlane.xlu0 %3059 }
0x201f   :  { %v4954_v33 = vsel %vm2946_vm5, %v2942_v59, inf  ;;  %vm3062_vm7 = vcmp.ge.f32.partialorder %v4860_v5, %v4967_v37  ;;  %v3095_v59 = vadd.f32 %v4930_v14, %v4793_v52 }
0x2026   :  { %3100 = vperm.xlu1 %3281, %v3098_v40   ;;  %v4988_v13 = vpop.xlane.xlu0 %2521 }
0x2027   :  { %vm2523_vm12 = vcmp.eq.f32.partialorder %v4883_v39, %v4988_v13 }
0x202e   :  { %2099 = vperm.xlu1 %3281, %v2082_v27  }
0x203b   :  { %v3018_v17 = vpop.xlane.xlu2 %3017 }
0x203c   :  { %3467 = vlog2.f32 %v3018_v17 }
0x2042   :  { %v3468_v61 = vpop.eup %3467 }
0x2043   :  { %v3023_v43 = vmul.f32 0.6931472, %v3468_v61  ;;  %v3021_v25 = vpop.xlane.xlu2 %3020 }
0x2044   :  { %3469 = vlog2.f32 %v3021_v25 }
0x2045   :  { %v3026_v48 = vadd.f32 %v3023_v43, %v4909_v15  ;;  %v3064_v15 = vsel %vm3062_vm7, %v4092_v51, 8 }
0x2046   :  { %v4973_v49 = vsel %vm1983_vm9, %v3064_v15, 2147483647  ;;  %v2245_v15 = vcvt.f32.s32 %v4799_v38 }
0x2047   :  { %v3045_v10 = vadd.f32 %v4793_v52, %v3026_v48  ;;  %v3082_v50 = vshra.s32 %v4973_v49, 16  ;;  %v3081_v26 = vand.u32 65535, %v4973_v49 }
0x2049   :  { %3106 = vperm.xlu1 %3281, %v3045_v10   ;;  %v2517_v10 = vand.u32 65535, %v4863_v60 }
0x204a   :  { %v3470_v54 = vpop.eup %3469 }
0x204b   :  { %v3025_v58 = vmul.f32 0.6931472, %v3470_v54  ;;  %v2519_v54 = vcvt.s32.f32 %v2517_v10 }
0x204d   :  { %v3027_v23 = vadd.f32 %v3025_v58, %v4915_v24  ;;  %v4978_v24 = vcvt.s32.f32 %v3082_v50  ;;  %v2524_v58 = vsel %vm2523_vm12, %v2519_v54, inf }
0x204f   :  { %v3046_v11 = vadd.f32 %v4964_v8, %v3027_v23  ;;  %v3151_v23 = vld [vmem:[#allocation6] sm:$0x3] }
0x2050   :  { %3159 = vst.msk [vmem:[%s5160_s17] sm:$0x3] %vm1843_vm8, %v3151_v23 }
0x2051   :  { %2119 = vperm.xlu1 %3281, %v2086_v12   ;;  %3109 = vperm.xlu2 %3278, %v3046_v11   ;;  %v2230_v11 = vcvt.f32.s32 %v4796_v46 }
0x2053   :  { %v2231_v42 = vshll.u32 %v2230_v11, 16 }
0x207a   :  { %3085 = vmin.xlane.f32.xlu2 %v4978_v24 }
0x207b   :  { %2242 = vmin.xlane.f32.xlu1 %v4809_v30  ;;  %v2090_v30 = vpop.permute.xlu0 %2089 }
0x2080   :  { %v4982_v32 = vpop.xlane.xlu1 %3070 }
0x2081   :  { %vm3072_vm10 = vcmp.eq.f32.partialorder %v3069_v4, %v4982_v32  ;;  %v2122_v4 = vmul.f32 %v4254_v62, %v2090_v30 }
0x2082   :  { %v3073_v5 = vsel %vm3072_vm10, %v3068_v0, inf }
0x2083   :  { %2510 = vmin.xlane.f32.xlu1 %v4833_v7  ;;  %3074 = vmin.xlane.f32.xlu0 %v3073_v5  ;;  %v2123_v7 = vmul.f32 %v4262_v45, %v4790_v47  ;;  %v2129_v40 = vsel %vm1843_vm8, %v2122_v4, 0.0  ;;  %v5007_v45 = vld [vmem:[%s5159_s12] ss:$0 sm:$0xff]  ;;  %v2110_v39 = vpop.permute.xlu0 %2109  ;;  %v3083_v5 = vcvt.s32.f32 %v3081_v26  ;;  %v2513_v26 = vcvt.f32.s32 %v4827_v57  ;;  %v5182_v57 = vld [vmem:[#allocation14_spill] sm:$0xff] }
0x2085   :  { %v2130_v56 = vsel %vm1843_vm8, %v2123_v7, 0.0 }
0x2086   :  { %v2131_v17 = vadd.f32 %v2130_v56, %v2129_v40  ;;  %v2126_v40 = vmul.f32 %v4312_v55, %v2110_v39 }
0x2092   :  { %2104 = vperm.xlu2 %3278, %v2083_v3   ;;  %v2246_v3 = vshll.u32 %v2245_v15, 16 }
0x2097   :  { %3119 = vperm.xlu0 %3280, %v3095_v59  }
0x2098   :  { %v4992_v41 = vpop.permute.xlu1 %3100 }
0x2099   :  { %vm3102_vm9 = vcmp.eq.s32.totalorder %v4992_v41, 1 }
0x209a   :  { %2144 = vperm.xlu2 %3278, %v4817_v2  }
0x20a0   :  { %v2100_v1 = vpop.permute.xlu1 %2099 }
0x20a1   :  { %v2124_v27 = vmul.f32 %v4267_v22, %v2100_v1  ;;  %v5180_v1 = vld [vmem:[#allocation11_spill] sm:$0xff] }
0x20a3   :  { %v2132_v52 = vsel %vm1843_vm8, %v2124_v27, 0.0 }
0x20a4   :  { %v2133_v14 = vadd.f32 %v2132_v52, %v2131_v17  ;;  %v2136_v52 = vsel %vm1843_vm8, %v2126_v40, 0.0 }
0x20ab   :  { %v3110_v61 = vpop.permute.xlu2 %3109 }
0x20ac   :  { %v3112_v2 = vperm.slane %v3110_v61, %v4092_v51  ;;  %v5181_v61 = vld [vmem:[#allocation13_spill] sm:$0xff] }
0x20bb   :  { %v3107_v43 = vpop.permute.xlu1 %3106 }
0x20bc   :  { %v3111_v62 = vperm.slane %v3107_v43, %v4092_v51 }
0x20be   :  { %v3113_v47 = vsel %vm2266_vm1, %v3112_v2, %v3111_v62 }
0x20bf   :  { %v3115_v22 = vsel %vm3102_vm9, %v3113_v47, %v4776_v18  ;;  %v2925_v18 = vand.u32 65535, %v4762_v44 }
0x20c0   :  { %v5015_v25 = vadd.f32 %v5007_v45, %v3115_v22 }
0x20c1   :  { %v2927_v12 = vcvt.s32.f32 %v2925_v18  ;;  %v2372_v18 = vcvt.f32.s32 %v4937_v21  ;;  %v2669_v21 = vcvt.f32.s32 %v4873_v36 }
0x20c2   :  { %v3135_v48 = vsel %vm1843_vm8, %v5015_v25, -inf }
0x20c3   :  { %3136 = vmax.xlane.f32.xlu1 %v3135_v48  ;;  %2369 = vmin.xlane.f32.xlu2 %v4941_v20  ;;  %v2932_v60 = vsel %vm2931_vm13, %v2927_v12, inf  ;;  %v2120_v20 = vpop.permute.xlu1 %2119 }
0x20c4   :  { %v2128_v43 = vmul.f32 %v5181_v61, %v2120_v20 }
0x20c6   :  { %v2140_v55 = vsel %vm1843_vm8, %v2128_v43, 0.0 }
0x20cb   :  { %2666 = vmin.xlane.f32.xlu1 %v4885_v35  ;;  %2525 = vmin.xlane.f32.xlu2 %v2524_v58  ;;  %v2115_v35 = vpop.permute.xlu0 %2114  ;;  %v2387_v58 = vcvt.f32.s32 %v4812_v6 }
0x20cc   :  { %v2127_v56 = vmul.f32 %v5180_v1, %v2115_v35  ;;  %v2373_v35 = vshll.u32 %v2372_v18, 16  ;;  %v2810_v1 = vcvt.f32.s32 %v4944_v63 }
0x20cd   :  { %v2388_v23 = vshll.u32 %v2387_v58, 16 }
0x20ce   :  { %v2138_v62 = vsel %vm1843_vm8, %v2127_v56, 0.0 }
0x20d3   :  { %2933 = vmin.xlane.f32.xlu1 %v2932_v60  ;;  %2792 = vmin.xlane.f32.xlu2 %v4900_v28  ;;  %v2228_v44 = vpop.xlane.xlu0 %2227 }
0x20d4   :  { %v2229_v50 = vcvt.f32.s32 %v2228_v44 }
0x20db   :  { %2948 = vmin.xlane.f32.xlu2 %v4954_v33  ;;  %v2232_v33 = vadd.s32 %v2231_v42, %v2229_v50  ;;  %v2385_v48 = vpop.xlane.xlu0 %2384  ;;  %v2528_v50 = vcvt.f32.s32 %v4988_v13 }
0x20dc   :  { %v2386_v12 = vcvt.f32.s32 %v2385_v48 }
0x20dd   :  { %v2283_v46 = vperm.slane %v2232_v33, %v4092_v51  ;;  %v2529_v13 = vshll.u32 %v2528_v50, 16 }
0x20de   :  { %v2389_v20 = vadd.s32 %v2388_v23, %v2386_v12  ;;  %v2936_v12 = vcvt.f32.s32 %v4976_v29 }
0x20e3   :  { %v2652_v44 = vpop.xlane.xlu0 %2651 }
0x20e4   :  { %v2653_v42 = vcvt.f32.s32 %v2652_v44 }
0x20eb   :  { %v2808_v40 = vpop.xlane.xlu0 %2807 }
0x20ed   :  { %v5036_v0 = vpop.xlane.xlu2 %3085 }
0x20ee   :  { %vm3087_vm14 = vcmp.eq.f32.partialorder %v4978_v24, %v5036_v0  ;;  %v2243_v28 = vpop.xlane.xlu1 %2242 }
0x20ef   :  { %v2244_v59 = vcvt.f32.s32 %v2243_v28  ;;  %v3088_v30 = vsel %vm3087_vm14, %v3083_v5, inf  ;;  %v2425_v5 = vperm.slane %v2389_v20, %v4092_v51 }
0x20f0   :  { %3089 = vmin.xlane.f32.xlu1 %v3088_v30 }
0x20f1   :  { %v2247_v4 = vadd.s32 %v2246_v3, %v2244_v59 }
0x20f3   :  { %v2284_v49 = vperm.slane %v2247_v4, %v4092_v51 }
0x20f5   :  { %v2285_v38 = vsel %vm2266_vm1, %v2284_v49, %v2283_v46  ;;  %v2105_v7 = vpop.permute.xlu2 %2104 }
0x20f6   :  { %2287 = vst.msk [vmem:[#allocation6 + $0x2] sm:$0x3] %vm1843_vm8, %v2285_v38  ;;  %v2125_v24 = vmul.f32 %v4272_v19, %v2105_v7  ;;  %v2511_v10 = vpop.xlane.xlu1 %2510 }
0x20f7   :  { %v2512_v28 = vcvt.f32.s32 %v2511_v10 }
0x20f8   :  { %v2134_v27 = vsel %vm1843_vm8, %v2125_v24, 0.0 }
0x20f9   :  { %v2135_v17 = vadd.f32 %v2134_v27, %v2133_v14  ;;  %v3096_v14 = vadd.f32 %v4967_v37, %v4964_v8  ;;  %v2654_v37 = vcvt.f32.s32 %v4852_v53  ;;  %v2670_v53 = vshll.u32 %v2669_v21, 16 }
0x20fb   :  { %v2137_v2 = vadd.f32 %v2136_v52, %v2135_v17  ;;  %v2655_v33 = vshll.u32 %v2654_v37, 16  ;;  %v2795_v17 = vcvt.f32.s32 %v4893_v31 }
0x20fd   :  { %v3152_v47 = vld [vmem:[#allocation6 + $0x2] sm:$0x3]  ;;  %v2139_v22 = vadd.f32 %v2138_v62, %v2137_v2  ;;  %v2145_v54 = vpop.permute.xlu2 %2144  ;;  %v2656_v30 = vadd.s32 %v2655_v33, %v2653_v42  ;;  %v2809_v2 = vcvt.f32.s32 %v2808_v40  ;;  %v2796_v10 = vshll.u32 %v2795_v17, 16  ;;  %v3075_v33 = vpop.xlane.xlu0 %3074 }
0x20fe   :  { %3160 = vst.msk [vmem:[%s5160_s17 + $0x2] sm:$0x3] %vm1843_vm8, %v3152_v47  ;;  %v2147_v4 = vmul.f32 %v5182_v57, %v2145_v54 }
0x20ff   :  { %v2141_v19 = vadd.f32 %v2140_v55, %v2139_v22  ;;  %v2706_v52 = vperm.slane %v2656_v30, %v4092_v51  ;;  %v2811_v55 = vshll.u32 %v2810_v1, 16  ;;  %v3076_v30 = vcvt.f32.s32 %v3075_v33 }
0x2101   :  { %v2148_v61 = vadd.f32 %v2147_v4, %v2141_v19  ;;  %v2812_v54 = vadd.s32 %v2811_v55, %v2809_v2  ;;  %v5184_v2 = vld [vmem:[#allocation15_spill] sm:$0xff] }
0x2103   :  { %v2152_v19 = vmul.f32 %v5007_v45, %v2148_v61  ;;  %v2848_v20 = vperm.slane %v2812_v54, %v4092_v51 }
0x2109   :  { %3122 = vperm.xlu1 %3281, %v3096_v14  }
0x2136   :  { %v5060_v60 = vpop.xlane.xlu1 %3136  ;;  %v2370_v39 = vpop.xlane.xlu2 %2369 }
0x2137   :  { %v3138_v11 = vsub.f32 %v5015_v25, %v5060_v60  ;;  %v2371_v8 = vcvt.f32.s32 %v2370_v39  ;;  %v2514_v25 = vshll.u32 %v2513_v26, 16  ;;  %v2153_v39 = vsel %vm1843_vm8, %v2152_v19, 0.0 }
0x2139   :  { %v3139_v15 = vmul.f32 1.442695, %v3138_v11  ;;  %v2374_v6 = vadd.s32 %v2373_v35, %v2371_v8  ;;  %v2515_v49 = vadd.s32 %v2514_v25, %v2512_v28  ;;  %v2951_v35 = vcvt.f32.s32 %v4948_v16 }
0x213a   :  { %v2937_v8 = vshll.u32 %v2936_v12, 16  ;;  %v3077_v25 = vcvt.f32.s32 %v4982_v32 }
0x213b   :  { %3471 = vpow2.f32 %v3139_v15  ;;  %v2424_v3 = vperm.slane %v2374_v6, %v4092_v51  ;;  %v2565_v62 = vperm.slane %v2515_v49, %v4092_v51  ;;  %v2952_v6 = vshll.u32 %v2951_v35, 16 }
0x213c   :  { %v3078_v57 = vshll.u32 %v3077_v25, 16 }
0x213d   :  { %v2426_v59 = vsel %vm2266_vm1, %v2425_v5, %v2424_v3 }
0x213e   :  { %2428 = vst.msk [vmem:[#allocation6 + $0x4] sm:$0x3] %vm1843_vm8, %v2426_v59  ;;  %v2667_v36 = vpop.xlane.xlu1 %2666  ;;  %v2526_v46 = vpop.xlane.xlu2 %2525 }
0x213f   :  { %v2668_v38 = vcvt.f32.s32 %v2667_v36  ;;  %v2527_v7 = vcvt.f32.s32 %v2526_v46  ;;  %v3079_v46 = vadd.s32 %v3078_v57, %v3076_v30 }
0x2141   :  { %v3472_v24 = vpop.eup %3471  ;;  %v2671_v56 = vadd.s32 %v2670_v53, %v2668_v38  ;;  %v2530_v27 = vadd.s32 %v2529_v13, %v2527_v7  ;;  %v3092_v53 = vcvt.f32.s32 %v5036_v0  ;;  %v3129_v38 = vperm.slane %v3079_v46, %v4092_v51  ;;  %v3120_v0 = vpop.permute.xlu0 %3119 }
0x2142   :  { %v3141_v43 = vsel %vm1843_vm8, %v3472_v24, 0.0  ;;  %v3124_v1 = vperm.slane %v3120_v0, %v4092_v51 }
0x2143   :  { %v2707_v47 = vperm.slane %v2671_v56, %v4092_v51  ;;  %v2566_v22 = vperm.slane %v2530_v27, %v4092_v51  ;;  %3142 = vadd.xlane.f32.xlu2 %v3141_v43  ;;  %v3093_v36 = vshll.u32 %v3092_v53, 16  ;;  %v5183_v43 = vld [vmem:[#allocation12_spill] sm:$0xff] }
0x2145   :  { %v3153_v14 = vld [vmem:[#allocation6 + $0x4] sm:$0x3]  ;;  %v2708_v63 = vsel %vm2266_vm1, %v2707_v47, %v2706_v52  ;;  %v2567_v48 = vsel %vm2266_vm1, %v2566_v22, %v2565_v62  ;;  %v1959_v62 = vadd.f32 %v5184_v2, %v5183_v43 }
0x2146   :  { %3161 = vst.msk [vmem:[%s5160_s17 + $0x4] sm:$0x3] %vm1843_vm8, %v3153_v14  ;;  %v2793_v31 = vpop.xlane.xlu2 %2792  ;;  %v2934_v18 = vpop.xlane.xlu1 %2933 }
0x2147   :  { %2710 = vst.msk [vmem:[#allocation6 + $0x8] sm:$0x3] %vm1843_vm8, %v2708_v63  ;;  %v2794_v58 = vcvt.f32.s32 %v2793_v31  ;;  %v2935_v44 = vcvt.f32.s32 %v2934_v18 }
0x2148   :  { %2569 = vst.msk [vmem:[#allocation6 + $0x6] sm:$0x3] %vm1843_vm8, %v2567_v48 }
0x2149   :  { %v2797_v23 = vadd.s32 %v2796_v10, %v2794_v58  ;;  %v2938_v29 = vadd.s32 %v2937_v8, %v2935_v44 }
0x214b   :  { %v2847_v11 = vperm.slane %v2797_v23, %v4092_v51  ;;  %2154 = vadd.xlane.f32.xlu2 %v2153_v39  ;;  %v2988_v42 = vperm.slane %v2938_v29, %v4092_v51 }
0x214d   :  { %v2849_v37 = vsel %vm2266_vm1, %v2848_v20, %v2847_v11 }
0x214e   :  { %v3155_v26 = vld [vmem:[#allocation6 + $0x8] sm:$0x3]  ;;  %2851 = vst.msk [vmem:[#allocation6 + $0xa] sm:$0x3] %vm1843_vm8, %v2849_v37  ;;  %v2949_v15 = vpop.xlane.xlu2 %2948 }
0x214f   :  { %3163 = vst.msk [vmem:[%s5160_s17 + $0x8] sm:$0x3] %vm1843_vm8, %v3155_v26  ;;  %v3154_v16 = vld [vmem:[#allocation6 + $0x6] sm:$0x3]  ;;  %v2950_v21 = vcvt.f32.s32 %v2949_v15 }
0x2150   :  { %3162 = vst.msk [vmem:[%s5160_s17 + $0x6] sm:$0x3] %vm1843_vm8, %v3154_v16 }
0x2151   :  { %v2953_v50 = vadd.s32 %v2952_v6, %v2950_v21 }
0x2153   :  { %v2989_v5 = vperm.slane %v2953_v50, %v4092_v51 }
0x2155   :  { %v3156_v28 = vld [vmem:[#allocation6 + $0xa] sm:$0x3]  ;;  %v2990_v3 = vsel %vm2266_vm1, %v2989_v5, %v2988_v42 }
0x2156   :  { %3164 = vst.msk [vmem:[%s5160_s17 + $0xa] sm:$0x3] %vm1843_vm8, %v3156_v28 }
0x2157   :  { %2992 = vst.msk [vmem:[#allocation6 + $0xc] sm:$0x3] %vm1843_vm8, %v2990_v3 }
0x215e   :  { %v3157_v59 = vld [vmem:[#allocation6 + $0xc] sm:$0x3] }
0x215f   :  { %3165 = vst.msk [vmem:[%s5160_s17 + $0xc] sm:$0x3] %vm1843_vm8, %v3157_v59 }
0x2163   :  { %v3090_v4 = vpop.xlane.xlu1 %3089 }
0x2164   :  { %v3091_v13 = vcvt.f32.s32 %v3090_v4 }
0x2166   :  { %v3094_v49 = vadd.s32 %v3093_v36, %v3091_v13 }
0x2168   :  { %v3130_v7 = vperm.slane %v3094_v49, %v4092_v51 }
0x216a   :  { %v3131_v32 = vsel %vm2266_vm1, %v3130_v7, %v3129_v38 }
0x216b   :  { %3133 = vst.msk [vmem:[#allocation6 + $0xe] sm:$0x3] %vm1843_vm8, %v3131_v32 }
0x2172   :  { %v3158_v40 = vld [vmem:[#allocation6 + $0xe] sm:$0x3] }
0x2173   :  { %3166 = vst.msk [vmem:[%s5160_s17 + $0xe] sm:$0x3] %vm1843_vm8, %v3158_v40 }
0x217b   :  { %v3123_v24 = vpop.permute.xlu1 %3122 }
0x217c   :  { %v3125_v56 = vperm.slane %v3123_v24, %v4092_v51  ;;  %v2079_v51 = vadd.f32 %v4825_v34, %v1959_v62 }
0x217e   :  { %v3126_v27 = vsel %vm2266_vm1, %v3125_v56, %v3124_v1 }
0x217f   :  { %v3128_v17 = vsel %vm3102_vm9, %v3126_v27, %v4841_v9 }
0x2180   :  { %v3149_v52 = vadd.f32 %v5007_v45, %v3128_v17 }
0x2182   :  { %3150 = vst.msk [vmem:[%s5161_s16] sm:$0x3] %vm1843_vm8, %v3149_v52 }
0x21b6   :  { %v3143_v61 = vpop.xlane.xlu2 %3142 }
0x21b7   :  { %3473 = vlog2.f32 %v3143_v61 }
0x21bd   :  { %v3474_v47 = vpop.eup %3473 }
0x21be   :  { %v3145_v22 = vmul.f32 0.6931472, %v3474_v47  ;;  %v2155_v55 = vpop.xlane.xlu2 %2154 }
0x21bf   :  { %v2156_v14 = vadd.f32 %v2155_v55, %v2079_v51 }
0x21c0   :  { %v3146_v9 = vadd.f32 %v3145_v22, %v5060_v60 }
0x21c2   :  { %v3147_v41 = vsub.f32 %v2156_v14, %v3146_v9 }
0x21c4   :  { %3148 = vst.msk [vmem:[%s5162_s15] sm:$0x3] %vm2065_vm6, %v3147_v41 }

</bundles_post_ra>
